<compile_context>
chip_gen: v5e
topology: v5e:2x2
jax: 0.10.0
libtpu: 0.0.40
codegen_flags: <defaults>
</compile_context>

<pallas_src>
import functools

import jax
import jax.numpy as jnp
from jax.experimental import pallas as pl
from jax.experimental.pallas import tpu as pltpu

NEG_INF = -1e30


def _km_fused_kernel(tm,
                     q_ref, mem_ref, memn_ref, selr_ref, selc_ref, bias_ref,
                     wq_ref, bq_ref, wm_ref, wv_ref,
                     ok_ref, attn_ref,
                     q_sc, qp_sc, m_sc, l_sc, acc_sc):
    h = pl.program_id(1)
    m = pl.program_id(2)
    nh = pl.num_programs(1)
    nm = pl.num_programs(2)

    # ---- hop init (first memory tile of each hop) ----
    @pl.when(m == 0)
    def _init():
        @pl.when(h == 0)
        def _load_q():
            q_sc[...] = q_ref[0]                      # fresh query for this batch row
        # linear_query[h](q_k)  (bias=True); weights are pre-transposed -> plain x @ W
        qp_sc[...] = (jnp.dot(q_sc[...], wq_ref[0],
                              preferred_element_type=jnp.float32) + bq_ref[0])
        m_sc[...] = jnp.full_like(m_sc, NEG_INF)
        l_sc[...] = jnp.zeros_like(l_sc)
        acc_sc[...] = jnp.zeros_like(acc_sc)

    # ---- per-(hop, memory-tile) work ----
    mem = mem_ref[0, 0]                               # (TM, D)
    sel_col = selc_ref[0]                             # (TM, 1)
    # linear_memory[h](mem * sel) == (mem @ Wm^T) * sel   (row scaling commutes)
    mp = jnp.dot(mem, wm_ref[0], preferred_element_type=jnp.float32) * sel_col

    # MLP attention scores: v^T tanh(qp + mp)   — tanh on the EUP is the binding unit.
    key = jnp.tanh(qp_sc[...][:, None, :] + mp[None, :, :])     # (Lq, TM, D)
    v = wv_ref[0]                                               # (1, D)
    # NOTE: D-contraction kept as VPU mul + lane reduce: an MXU version is an N=1 matmul
    # whose (Lq*TM, 1) result needs a lane relayout; the kernel is EUP(tanh)-bound so
    # this work is hidden under the tanh anyway.
    s = jnp.sum(key * v[None, :, :], axis=-1)                   # (Lq, TM)
    s = s + bias_ref[0]          # additive mask: user mask + M-padding (-1e30)

    # stash raw logits of the final hop (normalized once at the end of the hop)
    @pl.when(h == nh - 1)
    def _stash():
        start = pl.multiple_of(m * tm, tm)
        attn_ref[0, :, pl.ds(start, tm)] = s

    # online softmax update
    m_new = jnp.maximum(m_sc[...], jnp.max(s, axis=-1, keepdims=True))   # (Lq, 1)
    alpha = jnp.exp(m_sc[...] - m_new)
    p = jnp.exp(s - m_new)                                               # (Lq, TM)
    l_sc[...] = alpha * l_sc[...] + jnp.sum(p, axis=-1, keepdims=True)
    # selector applied to the weights instead of kb_memory_next (identical math)
    pw = p * selr_ref[0]                                                 # (Lq, TM)
    acc_sc[...] = alpha * acc_sc[...] + jnp.dot(
        pw, memn_ref[0, 0], preferred_element_type=jnp.float32)          # (Lq, D)
    m_sc[...] = m_new

    # ---- hop finalize (last memory tile) ----
    @pl.when(m == nm - 1)
    def _finalize():
        # 1/l via EUP approximate reciprocal + one Newton step (≈ exact f32)
        r = pl.reciprocal(l_sc[...], approx=True)
        r = r * (2.0 - l_sc[...] * r)
        o = acc_sc[...] * r                                   # (Lq, D)
        q_sc[...] = q_sc[...] + o                             # residual q_k = q + o_k

        @pl.when(h == nh - 1)                                 # write outputs only once
        def _write_out():
            ok_ref[0] = o.astype(ok_ref.dtype)
            w = jnp.exp(attn_ref[0] - m_sc[...]) * r          # normalized softmax weights
            attn_ref[0] = w.astype(attn_ref.dtype)


def knowledge_memory_v3_forward(query, kb_memory_db, params, selector=None,
                                mask=None, max_hop=1, tm=128,
                                vmem_limit_bytes=32 * 1024 * 1024):
    """Fused Pallas implementation of KnowledgeMemoryv3.forward (mode='mlp')."""
    # TODO(synk): mode='general' (bmm attention) branch not implemented; mlp mode only.
    B, Lq, Q = query.shape
    Bk, H1, M, D = kb_memory_db.shape
    assert Bk == B and H1 == max_hop + 1 and max_hop >= 1
    assert Q == D, "residual q_k = q + o_k requires query_size == memory_size"

    f32 = jnp.float32
    tm = max(128, tm)                          # lane-dense attn stores & (8,128) tiles
    m_pad = ((M + tm - 1) // tm) * tm
    nm = m_pad // tm
    pad = m_pad - M

    q = query.astype(f32)
    kb = kb_memory_db.astype(f32)
    sel = jnp.ones((B, M), f32) if selector is None else selector.astype(f32)
    bias = (jnp.zeros((B, M), f32) if mask is None
            else jnp.where(mask, NEG_INF, 0.0).astype(f32))
    if pad:
        kb = jnp.pad(kb, ((0, 0), (0, 0), (0, pad), (0, 0)))
        sel = jnp.pad(sel, ((0, 0), (0, pad)))
        bias = jnp.pad(bias, ((0, 0), (0, pad)), constant_values=NEG_INF)
    sel_row = sel.reshape(B, 1, m_pad)
    sel_col = sel.reshape(B, m_pad, 1)
    bias = bias.reshape(B, 1, m_pad)

    H = max_hop
    wq_all = jnp.stack([params['wq'][h].T for h in range(H)]).astype(f32)              # (H, Q, D)
    bq_all = jnp.stack([params['bq'][h].reshape(1, D) for h in range(H)]).astype(f32)  # (H, 1, D)
    wm_all = jnp.stack([params['wm'][h].T for h in range(H)]).astype(f32)              # (H, D, D)
    wv_all = jnp.stack([params['wv'][h].reshape(1, D) for h in range(H)]).astype(f32)  # (H, 1, D)

    kernel = functools.partial(_km_fused_kernel, tm)

    o_k, attn = pl.pallas_call(
        kernel,
        out_shape=(jax.ShapeDtypeStruct((B, Lq, D), f32),
                   jax.ShapeDtypeStruct((B, Lq, m_pad), f32)),
        grid_spec=pltpu.PrefetchScalarGridSpec(
            num_scalar_prefetch=0,
            grid=(B, H, nm),
            in_specs=[
                pl.BlockSpec((1, Lq, Q), lambda b, h, m: (b, 0, 0)),            # query
                pl.BlockSpec((1, 1, tm, D), lambda b, h, m: (b, h, m, 0)),      # kb[:, h]
                pl.BlockSpec((1, 1, tm, D), lambda b, h, m: (b, h + 1, m, 0)),  # kb[:, h+1]
                pl.BlockSpec((1, 1, tm), lambda b, h, m: (b, 0, m)),            # selector (row)
                pl.BlockSpec((1, tm, 1), lambda b, h, m: (b, m, 0)),            # selector (col)
                pl.BlockSpec((1, 1, tm), lambda b, h, m: (b, 0, m)),            # mask/pad bias
                pl.BlockSpec((1, Q, D), lambda b, h, m: (h, 0, 0)),             # Wq^T
                pl.BlockSpec((1, 1, D), lambda b, h, m: (h, 0, 0)),             # bq
                pl.BlockSpec((1, D, D), lambda b, h, m: (h, 0, 0)),             # Wm^T
                pl.BlockSpec((1, 1, D), lambda b, h, m: (h, 0, 0)),             # v
            ],
            out_specs=[
                pl.BlockSpec((1, Lq, D), lambda b, h, m: (b, 0, 0)),
                pl.BlockSpec((1, Lq, m_pad), lambda b, h, m: (b, 0, 0)),
            ],
            scratch_shapes=[
                pltpu.VMEM((Lq, D), f32),   # q_k carry across hops
                pltpu.VMEM((Lq, D), f32),   # per-hop query projection
                pltpu.VMEM((Lq, 1), f32),   # running max
                pltpu.VMEM((Lq, 1), f32),   # running sum
                pltpu.VMEM((Lq, D), f32),   # o_k accumulator
            ],
        ),
        compiler_params=pltpu.CompilerParams(
            dimension_semantics=("parallel", "arbitrary", "arbitrary"),
            vmem_limit_bytes=vmem_limit_bytes),
    )(q, kb, kb, sel_row, sel_col, bias, wq_all, bq_all, wm_all, wv_all)

    return o_k, attn[:, :, :M]


def reference_forward(query, kb_memory_db, params, selector=None, mask=None, max_hop=1):
    """Plain-JAX reference, mirrors the PyTorch forward exactly."""
    q = query
    for hop in range(max_hop):
        mem = kb_memory_db[:, hop]
        memn = kb_memory_db[:, hop + 1]
        if selector is not None:
            mem = mem * selector[:, :, None]
            memn = memn * selector[:, :, None]
        qp = q @ params['wq'][hop].T + params['bq'][hop]
        mp = mem @ params['wm'][hop].T
        key = jnp.tanh(qp[:, :, None, :] + mp[:, None, :, :])
        logits = jnp.einsum('bqmd,d->bqm', key, params['wv'][hop][0])
        if mask is not None:
            logits = jnp.where(mask[:, None, :], -jnp.inf, logits)
        w = jax.nn.softmax(logits, axis=-1)
        o = jnp.einsum('bqm,bmd->bqd', w, memn)
        q = q + o
    return o, w


if __name__ == "__main__":
    B, Lq, M = 2, 8, 16
    Q = D = 32                  # query_size == memory_size (required by q_k = q + o_k)
    max_hop = 2

    root = jax.random.PRNGKey(0)
    ks = jax.random.split(root, 12)
    query = jax.random.normal(ks[0], (B, Lq, Q), jnp.float32)
    kb_memory_db = 0.1 * jax.random.normal(ks[1], (B, max_hop + 1, M, D), jnp.float32)
    selector = jax.nn.sigmoid(jax.random.normal(ks[2], (B, M), jnp.float32))

    # deterministic synthetic parameters (PyTorch Linear: W is (out, in))
    params = {
        'wq': [0.1 * jax.random.normal(ks[3 + h], (D, Q), jnp.float32) for h in range(max_hop)],
        'bq': [0.1 * jax.random.normal(ks[5 + h], (D,), jnp.float32) for h in range(max_hop)],
        'wm': [0.1 * jax.random.normal(ks[7 + h], (D, D), jnp.float32) for h in range(max_hop)],
        'wv': [0.1 * jax.random.normal(ks[9 + h], (1, D), jnp.float32) for h in range(max_hop)],
    }

    # --- run 1: selector, no mask ---
    o_k, attn = knowledge_memory_v3_forward(
        query, kb_memory_db, params, selector=selector, max_hop=max_hop)
    jax.block_until_ready((o_k, attn))
    o_ref, w_ref = reference_forward(
        query, kb_memory_db, params, selector=selector, max_hop=max_hop)
    assert o_k.shape == (B, Lq, D) and attn.shape == (B, Lq, M)
    assert jnp.allclose(o_k, o_ref, atol=2e-4, rtol=2e-4)
    assert jnp.allclose(attn, w_ref, atol=2e-4, rtol=2e-4)

    # --- run 2: selector + mask (last 4 memory slots masked out) ---
    mask = jnp.broadcast_to(jnp.arange(M)[None, :] >= M - 4, (B, M))
    o_k2, attn2 = knowledge_memory_v3_forward(
        query, kb_memory_db, params, selector=selector, mask=mask, max_hop=max_hop)
    jax.block_until_ready((o_k2, attn2))
    o_ref2, w_ref2 = reference_forward(
        query, kb_memory_db, params, selector=selector, mask=mask, max_hop=max_hop)
    assert jnp.allclose(o_k2, o_ref2, atol=2e-4, rtol=2e-4)
    assert jnp.allclose(attn2, w_ref2, atol=2e-4, rtol=2e-4)
    assert jnp.allclose(attn2[:, :, M - 4:], 0.0)

    print("KERNEL_OK")
</pallas_src>

<mosaic_0001>
module attributes {stable_mosaic.version = 11 : i64} {
  func.func @_km_fused_kernel(%arg0: i32, %arg1: i32, %arg2: i32, %arg3: memref<1x8x32xf32, #tpu.memory_space<vmem>>, %arg4: memref<1x1x128x32xf32, #tpu.memory_space<vmem>>, %arg5: memref<1x1x128x32xf32, #tpu.memory_space<vmem>>, %arg6: memref<1x1x128xf32, #tpu.memory_space<vmem>>, %arg7: memref<1x128x1xf32, #tpu.memory_space<vmem>>, %arg8: memref<1x1x128xf32, #tpu.memory_space<vmem>>, %arg9: memref<1x32x32xf32, #tpu.memory_space<vmem>>, %arg10: memref<1x1x32xf32, #tpu.memory_space<vmem>>, %arg11: memref<1x32x32xf32, #tpu.memory_space<vmem>>, %arg12: memref<1x1x32xf32, #tpu.memory_space<vmem>>, %arg13: memref<1x8x32xf32, #tpu.memory_space<vmem>>, %arg14: memref<1x8x128xf32, #tpu.memory_space<vmem>>, %arg15: memref<8x32xf32, #tpu.memory_space<vmem>>, %arg16: memref<8x32xf32, #tpu.memory_space<vmem>>, %arg17: memref<8x1xf32, #tpu.memory_space<vmem>>, %arg18: memref<8x1xf32, #tpu.memory_space<vmem>>, %arg19: memref<8x32xf32, #tpu.memory_space<vmem>>) attributes {dimension_semantics = [#tpu.dimension_semantics<parallel>, #tpu.dimension_semantics<arbitrary>, #tpu.dimension_semantics<arbitrary>], iteration_bounds = array<i64: 2, 2, 1>, scalar_prefetch = 0 : i64, scratch_operands = 5 : i64, tpu.core_type = #tpu.core_type<tc>, window_params = [{transform_indices = @transform_0, window_bounds = array<i64: 1, 8, 32>}, {transform_indices = @transform_1, window_bounds = array<i64: 1, 1, 128, 32>}, {transform_indices = @transform_2, window_bounds = array<i64: 1, 1, 128, 32>}, {transform_indices = @transform_3, window_bounds = array<i64: 1, 1, 128>}, {transform_indices = @transform_4, window_bounds = array<i64: 1, 128, 1>}, {transform_indices = @transform_5, window_bounds = array<i64: 1, 1, 128>}, {transform_indices = @transform_6, window_bounds = array<i64: 1, 32, 32>}, {transform_indices = @transform_7, window_bounds = array<i64: 1, 1, 32>}, {transform_indices = @transform_8, window_bounds = array<i64: 1, 32, 32>}, {transform_indices = @transform_9, window_bounds = array<i64: 1, 1, 32>}, {transform_indices = @transform_10, window_bounds = array<i64: 1, 8, 32>}, {transform_indices = @transform_11, window_bounds = array<i64: 1, 8, 128>}]} {
    %c0_i32 = arith.constant 0 : i32
    %0 = arith.cmpi eq, %arg2, %c0_i32 : i32
    %1 = arith.extui %0 : i1 to i32
    %c0_i32_0 = arith.constant 0 : i32
    %2 = arith.cmpi ne, %1, %c0_i32_0 : i32
    scf.if %2 {
      %c0_i32_46 = arith.constant 0 : i32
      %64 = arith.cmpi eq, %arg1, %c0_i32_46 : i32
      %65 = arith.extui %64 : i1 to i32
      %c0_i32_47 = arith.constant 0 : i32
      %66 = arith.cmpi ne, %65, %c0_i32_47 : i32
      scf.if %66 {
        %c0_68 = arith.constant 0 : index
        %c0_69 = arith.constant 0 : index
        %c0_70 = arith.constant 0 : index
        %82 = vector.load %arg3[%c0_68, %c0_69, %c0_70] : memref<1x8x32xf32, #tpu.memory_space<vmem>>, vector<1x8x32xf32>
        %83 = vector.shape_cast %82 : vector<1x8x32xf32> to vector<8x32xf32>
        %c0_71 = arith.constant 0 : index
        %c0_72 = arith.constant 0 : index
        %84 = vector.load %arg15[%c0_71, %c0_72] : memref<8x32xf32, #tpu.memory_space<vmem>>, vector<8x32xf32>
        tpu.vector_store %arg15[%c0_71, %c0_72], %83 {strides = array<i32>} : memref<8x32xf32, #tpu.memory_space<vmem>>, vector<8x32xf32>,
      } else {
      }
      %c0_48 = arith.constant 0 : index
      %c0_49 = arith.constant 0 : index
      %67 = vector.load %arg15[%c0_48, %c0_49] : memref<8x32xf32, #tpu.memory_space<vmem>>, vector<8x32xf32>
      %c0_50 = arith.constant 0 : index
      %c0_51 = arith.constant 0 : index
      %c0_52 = arith.constant 0 : index
      %68 = vector.load %arg9[%c0_50, %c0_51, %c0_52] : memref<1x32x32xf32, #tpu.memory_space<vmem>>, vector<1x32x32xf32>
      %69 = vector.shape_cast %68 : vector<1x32x32xf32> to vector<32x32xf32>
      %cst_53 = arith.constant dense<0.000000e+00> : vector<8x32xf32>
      %70 = tpu.matmul %67, %69, %cst_53 {dimension_numbers = #tpu.dot_dimension_numbers<[1], [0], [0], [1], [0, 0, 1, 1], [], []>} : vector<8x32xf32>, vector<32x32xf32>, vector<8x32xf32> -> vector<8x32xf32>
      %c0_54 = arith.constant 0 : index
      %c0_55 = arith.constant 0 : index
      %c0_56 = arith.constant 0 : index
      %71 = vector.load %arg10[%c0_54, %c0_55, %c0_56] : memref<1x1x32xf32, #tpu.memory_space<vmem>>, vector<1x1x32xf32>
      %72 = vector.shape_cast %71 : vector<1x1x32xf32> to vector<1x32xf32>
      %73 = vector.broadcast %72 : vector<1x32xf32> to vector<8x32xf32>
      %74 = arith.addf %70, %73 : vector<8x32xf32>
      %c0_57 = arith.constant 0 : index
      %c0_58 = arith.constant 0 : index
      %75 = vector.load %arg16[%c0_57, %c0_58] : memref<8x32xf32, #tpu.memory_space<vmem>>, vector<8x32xf32>
      tpu.vector_store %arg16[%c0_57, %c0_58], %74 {strides = array<i32>} : memref<8x32xf32, #tpu.memory_space<vmem>>, vector<8x32xf32>,
      %cst_59 = arith.constant -1.000000e+30 : f32
      %76 = vector.broadcast %cst_59 : f32 to vector<8x1xf32>
      %c0_60 = arith.constant 0 : index
      %c0_61 = arith.constant 0 : index
      %77 = vector.load %arg17[%c0_60, %c0_61] : memref<8x1xf32, #tpu.memory_space<vmem>>, vector<8x1xf32>
      tpu.vector_store %arg17[%c0_60, %c0_61], %76 {strides = array<i32>} : memref<8x1xf32, #tpu.memory_space<vmem>>, vector<8x1xf32>,
      %cst_62 = arith.constant 0.000000e+00 : f32
      %78 = vector.broadcast %cst_62 : f32 to vector<8x1xf32>
      %c0_63 = arith.constant 0 : index
      %c0_64 = arith.constant 0 : index
      %79 = vector.load %arg18[%c0_63, %c0_64] : memref<8x1xf32, #tpu.memory_space<vmem>>, vector<8x1xf32>
      tpu.vector_store %arg18[%c0_63, %c0_64], %78 {strides = array<i32>} : memref<8x1xf32, #tpu.memory_space<vmem>>, vector<8x1xf32>,
      %cst_65 = arith.constant 0.000000e+00 : f32
      %80 = vector.broadcast %cst_65 : f32 to vector<8x32xf32>
      %c0_66 = arith.constant 0 : index
      %c0_67 = arith.constant 0 : index
      %81 = vector.load %arg19[%c0_66, %c0_67] : memref<8x32xf32, #tpu.memory_space<vmem>>, vector<8x32xf32>
      tpu.vector_store %arg19[%c0_66, %c0_67], %80 {strides = array<i32>} : memref<8x32xf32, #tpu.memory_space<vmem>>, vector<8x32xf32>,
    } else {
    }
    %c0 = arith.constant 0 : index
    %c0_1 = arith.constant 0 : index
    %c0_2 = arith.constant 0 : index
    %c0_3 = arith.constant 0 : index
    %3 = vector.load %arg4[%c0, %c0_1, %c0_2, %c0_3] : memref<1x1x128x32xf32, #tpu.memory_space<vmem>>, vector<1x1x128x32xf32>
    %4 = vector.shape_cast %3 : vector<1x1x128x32xf32> to vector<128x32xf32>
    %c0_4 = arith.constant 0 : index
    %c0_5 = arith.constant 0 : index
    %c0_6 = arith.constant 0 : index
    %5 = vector.load %arg7[%c0_4, %c0_5, %c0_6] : memref<1x128x1xf32, #tpu.memory_space<vmem>>, vector<1x128x1xf32>
    %6 = vector.shape_cast %5 : vector<1x128x1xf32> to vector<128x1xf32>
    %c0_7 = arith.constant 0 : index
    %c0_8 = arith.constant 0 : index
    %c0_9 = arith.constant 0 : index
    %7 = vector.load %arg11[%c0_7, %c0_8, %c0_9] : memref<1x32x32xf32, #tpu.memory_space<vmem>>, vector<1x32x32xf32>
    %8 = vector.shape_cast %7 : vector<1x32x32xf32> to vector<32x32xf32>
    %cst = arith.constant dense<0.000000e+00> : vector<128x32xf32>
    %9 = tpu.matmul %4, %8, %cst {dimension_numbers = #tpu.dot_dimension_numbers<[1], [0], [0], [1], [0, 0, 1, 1], [], []>} : vector<128x32xf32>, vector<32x32xf32>, vector<128x32xf32> -> vector<128x32xf32>
    %10 = vector.broadcast %6 : vector<128x1xf32> to vector<128x32xf32>
    %11 = arith.mulf %9, %10 : vector<128x32xf32>
    %c0_10 = arith.constant 0 : index
    %c0_11 = arith.constant 0 : index
    %12 = vector.load %arg16[%c0_10, %c0_11] : memref<8x32xf32, #tpu.memory_space<vmem>>, vector<8x32xf32>
    %13 = vector.shape_cast %12 : vector<8x32xf32> to vector<8x1x32xf32>
    %14 = vector.shape_cast %11 : vector<128x32xf32> to vector<1x128x32xf32>
    %15 = vector.broadcast %13 : vector<8x1x32xf32> to vector<8x128x32xf32>
    %16 = vector.broadcast %14 : vector<1x128x32xf32> to vector<8x128x32xf32>
    %17 = arith.addf %15, %16 : vector<8x128x32xf32>
    %18 = math.tanh %17 : vector<8x128x32xf32>
    %c0_12 = arith.constant 0 : index
    %c0_13 = arith.constant 0 : index
    %c0_14 = arith.constant 0 : index
    %19 = vector.load %arg12[%c0_12, %c0_13, %c0_14] : memref<1x1x32xf32, #tpu.memory_space<vmem>>, vector<1x1x32xf32>
    %20 = vector.shape_cast %19 : vector<1x1x32xf32> to vector<1x32xf32>
    %21 = vector.shape_cast %20 : vector<1x32xf32> to vector<1x1x32xf32>
    %22 = vector.broadcast %21 : vector<1x1x32xf32> to vector<8x128x32xf32>
    %23 = arith.mulf %18, %22 : vector<8x128x32xf32>
    %cst_15 = arith.constant dense<0.000000e+00> : vector<8x128xf32>
    %24 = vector.multi_reduction <add>, %23, %cst_15 [2] : vector<8x128x32xf32> to vector<8x128xf32>
    %c0_16 = arith.constant 0 : index
    %c0_17 = arith.constant 0 : index
    %c0_18 = arith.constant 0 : index
    %25 = vector.load %arg8[%c0_16, %c0_17, %c0_18] : memref<1x1x128xf32, #tpu.memory_space<vmem>>, vector<1x1x128xf32>
    %26 = vector.shape_cast %25 : vector<1x1x128xf32> to vector<1x128xf32>
    %27 = vector.broadcast %26 : vector<1x128xf32> to vector<8x128xf32>
    %28 = arith.addf %24, %27 : vector<8x128xf32>
    %c1_i32 = arith.constant 1 : i32
    %29 = arith.cmpi eq, %arg1, %c1_i32 : i32
    %30 = arith.extui %29 : i1 to i32
    %c0_i32_19 = arith.constant 0 : i32
    %31 = arith.cmpi ne, %30, %c0_i32_19 : i32
    scf.if %31 {
      %c128_i32 = arith.constant 128 : i32
      %64 = arith.muli %arg2, %c128_i32 : i32
      %65 = tpu.assume_multiple %64, 128 : i32
      %c0_46 = arith.constant 0 : index
      %c0_47 = arith.constant 0 : index
      %66 = arith.index_cast %65 : i32 to index
      %67 = vector.load %arg14[%c0_46, %c0_47, %66] : memref<1x8x128xf32, #tpu.memory_space<vmem>>, vector<1x8x128xf32>
      %68 = vector.shape_cast %67 : vector<1x8x128xf32> to vector<8x128xf32>
      %69 = vector.shape_cast %28 : vector<8x128xf32> to vector<1x8x128xf32>
      tpu.vector_store %arg14[%c0_46, %c0_47, %66], %69 {strides = array<i32>} : memref<1x8x128xf32, #tpu.memory_space<vmem>>, vector<1x8x128xf32>,
    } else {
    }
    %c0_20 = arith.constant 0 : index
    %c0_21 = arith.constant 0 : index
    %32 = vector.load %arg17[%c0_20, %c0_21] : memref<8x1xf32, #tpu.memory_space<vmem>>, vector<8x1xf32>
    %cst_22 = arith.constant dense<0xFF800000> : vector<8xf32>
    %33 = vector.multi_reduction <maximumf>, %28, %cst_22 [1] : vector<8x128xf32> to vector<8xf32>
    %34 = vector.shape_cast %33 : vector<8xf32> to vector<8x1xf32>
    %35 = arith.maximumf %32, %34 : vector<8x1xf32>
    %c0_23 = arith.constant 0 : index
    %c0_24 = arith.constant 0 : index
    %36 = vector.load %arg17[%c0_23, %c0_24] : memref<8x1xf32, #tpu.memory_space<vmem>>, vector<8x1xf32>
    %37 = arith.subf %36, %35 : vector<8x1xf32>
    %38 = math.exp %37 : vector<8x1xf32>
    %39 = vector.broadcast %35 : vector<8x1xf32> to vector<8x128xf32>
    %40 = arith.subf %28, %39 : vector<8x128xf32>
    %41 = math.exp %40 : vector<8x128xf32>
    %c0_25 = arith.constant 0 : index
    %c0_26 = arith.constant 0 : index
    %42 = vector.load %arg18[%c0_25, %c0_26] : memref<8x1xf32, #tpu.memory_space<vmem>>, vector<8x1xf32>
    %43 = arith.mulf %38, %42 : vector<8x1xf32>
    %cst_27 = arith.constant dense<0.000000e+00> : vector<8xf32>
    %44 = vector.multi_reduction <add>, %41, %cst_27 [1] : vector<8x128xf32> to vector<8xf32>
    %45 = vector.shape_cast %44 : vector<8xf32> to vector<8x1xf32>
    %46 = arith.addf %43, %45 : vector<8x1xf32>
    %c0_28 = arith.constant 0 : index
    %c0_29 = arith.constant 0 : index
    %47 = vector.load %arg18[%c0_28, %c0_29] : memref<8x1xf32, #tpu.memory_space<vmem>>, vector<8x1xf32>
    tpu.vector_store %arg18[%c0_28, %c0_29], %46 {strides = array<i32>} : memref<8x1xf32, #tpu.memory_space<vmem>>, vector<8x1xf32>,
    %c0_30 = arith.constant 0 : index
    %c0_31 = arith.constant 0 : index
    %c0_32 = arith.constant 0 : index
    %48 = vector.load %arg6[%c0_30, %c0_31, %c0_32] : memref<1x1x128xf32, #tpu.memory_space<vmem>>, vector<1x1x128xf32>
    %49 = vector.shape_cast %48 : vector<1x1x128xf32> to vector<1x128xf32>
    %50 = vector.broadcast %49 : vector<1x128xf32> to vector<8x128xf32>
    %51 = arith.mulf %41, %50 : vector<8x128xf32>
    %c0_33 = arith.constant 0 : index
    %c0_34 = arith.constant 0 : index
    %52 = vector.load %arg19[%c0_33, %c0_34] : memref<8x32xf32, #tpu.memory_space<vmem>>, vector<8x32xf32>
    %53 = vector.broadcast %38 : vector<8x1xf32> to vector<8x32xf32>
    %54 = arith.mulf %53, %52 : vector<8x32xf32>
    %c0_35 = arith.constant 0 : index
    %c0_36 = arith.constant 0 : index
    %c0_37 = arith.constant 0 : index
    %c0_38 = arith.constant 0 : index
    %55 = vector.load %arg5[%c0_35, %c0_36, %c0_37, %c0_38] : memref<1x1x128x32xf32, #tpu.memory_space<vmem>>, vector<1x1x128x32xf32>
    %56 = vector.shape_cast %55 : vector<1x1x128x32xf32> to vector<128x32xf32>
    %cst_39 = arith.constant dense<0.000000e+00> : vector<8x32xf32>
    %57 = tpu.matmul %51, %56, %cst_39 {dimension_numbers = #tpu.dot_dimension_numbers<[1], [0], [0], [1], [0, 0, 1, 1], [], []>} : vector<8x128xf32>, vector<128x32xf32>, vector<8x32xf32> -> vector<8x32xf32>
    %58 = arith.addf %54, %57 : vector<8x32xf32>
    %c0_40 = arith.constant 0 : index
    %c0_41 = arith.constant 0 : index
    %59 = vector.load %arg19[%c0_40, %c0_41] : memref<8x32xf32, #tpu.memory_space<vmem>>, vector<8x32xf32>
    tpu.vector_store %arg19[%c0_40, %c0_41], %58 {strides = array<i32>} : memref<8x32xf32, #tpu.memory_space<vmem>>, vector<8x32xf32>,
    %c0_42 = arith.constant 0 : index
    %c0_43 = arith.constant 0 : index
    %60 = vector.load %arg17[%c0_42, %c0_43] : memref<8x1xf32, #tpu.memory_space<vmem>>, vector<8x1xf32>
    tpu.vector_store %arg17[%c0_42, %c0_43], %35 {strides = array<i32>} : memref<8x1xf32, #tpu.memory_space<vmem>>, vector<8x1xf32>,
    %c0_i32_44 = arith.constant 0 : i32
    %61 = arith.cmpi eq, %arg2, %c0_i32_44 : i32
    %62 = arith.extui %61 : i1 to i32
    %c0_i32_45 = arith.constant 0 : i32
    %63 = arith.cmpi ne, %62, %c0_i32_45 : i32
    scf.if %63 {
      %c0_46 = arith.constant 0 : index
      %c0_47 = arith.constant 0 : index
      %64 = vector.load %arg18[%c0_46, %c0_47] : memref<8x1xf32, #tpu.memory_space<vmem>>, vector<8x1xf32>
      %65 = tpu.reciprocal %64 {approx = true} : vector<8x1xf32> -> vector<8x1xf32>
      %c0_48 = arith.constant 0 : index
      %c0_49 = arith.constant 0 : index
      %66 = vector.load %arg18[%c0_48, %c0_49] : memref<8x1xf32, #tpu.memory_space<vmem>>, vector<8x1xf32>
      %67 = arith.mulf %66, %65 : vector<8x1xf32>
      %cst_50 = arith.constant 2.000000e+00 : f32
      %68 = vector.broadcast %cst_50 : f32 to vector<8x1xf32>
      %69 = arith.subf %68, %67 : vector<8x1xf32>
      %70 = arith.mulf %65, %69 : vector<8x1xf32>
      %c0_51 = arith.constant 0 : index
      %c0_52 = arith.constant 0 : index
      %71 = vector.load %arg19[%c0_51, %c0_52] : memref<8x32xf32, #tpu.memory_space<vmem>>, vector<8x32xf32>
      %72 = vector.broadcast %70 : vector<8x1xf32> to vector<8x32xf32>
      %73 = arith.mulf %71, %72 : vector<8x32xf32>
      %c0_53 = arith.constant 0 : index
      %c0_54 = arith.constant 0 : index
      %74 = vector.load %arg15[%c0_53, %c0_54] : memref<8x32xf32, #tpu.memory_space<vmem>>, vector<8x32xf32>
      %75 = arith.addf %74, %73 : vector<8x32xf32>
      %c0_55 = arith.constant 0 : index
      %c0_56 = arith.constant 0 : index
      %76 = vector.load %arg15[%c0_55, %c0_56] : memref<8x32xf32, #tpu.memory_space<vmem>>, vector<8x32xf32>
      tpu.vector_store %arg15[%c0_55, %c0_56], %75 {strides = array<i32>} : memref<8x32xf32, #tpu.memory_space<vmem>>, vector<8x32xf32>,
      %c1_i32_57 = arith.constant 1 : i32
      %77 = arith.cmpi eq, %arg1, %c1_i32_57 : i32
      %78 = arith.extui %77 : i1 to i32
      %c0_i32_58 = arith.constant 0 : i32
      %79 = arith.cmpi ne, %78, %c0_i32_58 : i32
      scf.if %79 {
        %c0_59 = arith.constant 0 : index
        %c0_60 = arith.constant 0 : index
        %c0_61 = arith.constant 0 : index
        %80 = vector.load %arg13[%c0_59, %c0_60, %c0_61] : memref<1x8x32xf32, #tpu.memory_space<vmem>>, vector<1x8x32xf32>
        %81 = vector.shape_cast %80 : vector<1x8x32xf32> to vector<8x32xf32>
        %82 = vector.shape_cast %73 : vector<8x32xf32> to vector<1x8x32xf32>
        tpu.vector_store %arg13[%c0_59, %c0_60, %c0_61], %82 {strides = array<i32>} : memref<1x8x32xf32, #tpu.memory_space<vmem>>, vector<1x8x32xf32>,
        %c0_62 = arith.constant 0 : index
        %c0_63 = arith.constant 0 : index
        %c0_64 = arith.constant 0 : index
        %83 = vector.load %arg14[%c0_62, %c0_63, %c0_64] : memref<1x8x128xf32, #tpu.memory_space<vmem>>, vector<1x8x128xf32>
        %84 = vector.shape_cast %83 : vector<1x8x128xf32> to vector<8x128xf32>
        %c0_65 = arith.constant 0 : index
        %c0_66 = arith.constant 0 : index
        %85 = vector.load %arg17[%c0_65, %c0_66] : memref<8x1xf32, #tpu.memory_space<vmem>>, vector<8x1xf32>
        %86 = vector.broadcast %85 : vector<8x1xf32> to vector<8x128xf32>
        %87 = arith.subf %84, %86 : vector<8x128xf32>
        %88 = math.exp %87 : vector<8x128xf32>
        %89 = vector.broadcast %70 : vector<8x1xf32> to vector<8x128xf32>
        %90 = arith.mulf %88, %89 : vector<8x128xf32>
        %c0_67 = arith.constant 0 : index
        %c0_68 = arith.constant 0 : index
        %c0_69 = arith.constant 0 : index
        %91 = vector.load %arg14[%c0_67, %c0_68, %c0_69] : memref<1x8x128xf32, #tpu.memory_space<vmem>>, vector<1x8x128xf32>
        %92 = vector.shape_cast %91 : vector<1x8x128xf32> to vector<8x128xf32>
        %93 = vector.shape_cast %90 : vector<8x128xf32> to vector<1x8x128xf32>
        tpu.vector_store %arg14[%c0_67, %c0_68, %c0_69], %93 {strides = array<i32>} : memref<1x8x128xf32, #tpu.memory_space<vmem>>, vector<1x8x128xf32>,
      } else {
      }
    } else {
    }
    return
  }
  func.func @transform_0(%arg0: i32, %arg1: i32, %arg2: i32) -> (i32, i32, i32) {
    %c0_i32 = arith.constant 0 : i32
    %c0_i32_0 = arith.constant 0 : i32
    %c0_i32_1 = arith.constant 0 : i32
    return %arg0, %c0_i32, %c0_i32_0 : i32, i32, i32
  }
  func.func @transform_1(%arg0: i32, %arg1: i32, %arg2: i32) -> (i32, i32, i32, i32) {
    %c0_i32 = arith.constant 0 : i32
    %c0_i32_0 = arith.constant 0 : i32
    return %arg0, %arg1, %arg2, %c0_i32 : i32, i32, i32, i32
  }
  func.func @transform_2(%arg0: i32, %arg1: i32, %arg2: i32) -> (i32, i32, i32, i32) {
    %c1_i32 = arith.constant 1 : i32
    %0 = arith.addi %arg1, %c1_i32 : i32
    %c0_i32 = arith.constant 0 : i32
    %c0_i32_0 = arith.constant 0 : i32
    return %arg0, %0, %arg2, %c0_i32 : i32, i32, i32, i32
  }
  func.func @transform_3(%arg0: i32, %arg1: i32, %arg2: i32) -> (i32, i32, i32) {
    %c0_i32 = arith.constant 0 : i32
    %c0_i32_0 = arith.constant 0 : i32
    return %arg0, %c0_i32, %arg2 : i32, i32, i32
  }
  func.func @transform_4(%arg0: i32, %arg1: i32, %arg2: i32) -> (i32, i32, i32) {
    %c0_i32 = arith.constant 0 : i32
    %c0_i32_0 = arith.constant 0 : i32
    return %arg0, %arg2, %c0_i32 : i32, i32, i32
  }
  func.func @transform_5(%arg0: i32, %arg1: i32, %arg2: i32) -> (i32, i32, i32) {
    %c0_i32 = arith.constant 0 : i32
    %c0_i32_0 = arith.constant 0 : i32
    return %arg0, %c0_i32, %arg2 : i32, i32, i32
  }
  func.func @transform_6(%arg0: i32, %arg1: i32, %arg2: i32) -> (i32, i32, i32) {
    %c0_i32 = arith.constant 0 : i32
    %c0_i32_0 = arith.constant 0 : i32
    %c0_i32_1 = arith.constant 0 : i32
    return %arg1, %c0_i32, %c0_i32_0 : i32, i32, i32
  }
  func.func @transform_7(%arg0: i32, %arg1: i32, %arg2: i32) -> (i32, i32, i32) {
    %c0_i32 = arith.constant 0 : i32
    %c0_i32_0 = arith.constant 0 : i32
    %c0_i32_1 = arith.constant 0 : i32
    return %arg1, %c0_i32, %c0_i32_0 : i32, i32, i32
  }
  func.func @transform_8(%arg0: i32, %arg1: i32, %arg2: i32) -> (i32, i32, i32) {
    %c0_i32 = arith.constant 0 : i32
    %c0_i32_0 = arith.constant 0 : i32
    %c0_i32_1 = arith.constant 0 : i32
    return %arg1, %c0_i32, %c0_i32_0 : i32, i32, i32
  }
  func.func @transform_9(%arg0: i32, %arg1: i32, %arg2: i32) -> (i32, i32, i32) {
    %c0_i32 = arith.constant 0 : i32
    %c0_i32_0 = arith.constant 0 : i32
    %c0_i32_1 = arith.constant 0 : i32
    return %arg1, %c0_i32, %c0_i32_0 : i32, i32, i32
  }
  func.func @transform_10(%arg0: i32, %arg1: i32, %arg2: i32) -> (i32, i32, i32) {
    %c0_i32 = arith.constant 0 : i32
    %c0_i32_0 = arith.constant 0 : i32
    %c0_i32_1 = arith.constant 0 : i32
    return %arg0, %c0_i32, %c0_i32_0 : i32, i32, i32
  }
  func.func @transform_11(%arg0: i32, %arg1: i32, %arg2: i32) -> (i32, i32, i32) {
    %c0_i32 = arith.constant 0 : i32
    %c0_i32_0 = arith.constant 0 : i32
    %c0_i32_1 = arith.constant 0 : i32
    return %arg0, %c0_i32, %c0_i32_0 : i32, i32, i32
  }
}

</mosaic_0001>

<bundles_post_ra>
// kernel: tpu_custom_call.1
= control target key start
LH: loop header
LB: loop body
LE: loop exit
PB: predicated region body
PF: predicated region fallthrough
CT: control target
= control target key end

     0   :  { %s12033_s0 = inlined_call_operand.vmem [shape: f32[2,8,32], index: 0, kind: input, shape index: {}]   ;;  %s12034_s1 = inlined_call_operand.vmem [shape: f32[2,3,128,32], index: 1, kind: input, shape index: {}]   ;;  %s12035_s2 = inlined_call_operand.vmem [shape: f32[2,3,128,32], index: 2, kind: input, shape index: {}]   ;;  %s12036_s3 = inlined_call_operand.vmem [shape: f32[2,1,128], index: 3, kind: input, shape index: {}]   ;;  %s12037_s4 = inlined_call_operand.vmem [shape: f32[2,128,1], index: 4, kind: input, shape index: {}]   ;;  %s12038_s5 = inlined_call_operand.vmem [shape: f32[2,1,128], index: 5, kind: input, shape index: {}]   ;;  %s12039_s6 = inlined_call_operand.vmem [shape: f32[2,32,32], index: 6, kind: input, shape index: {}]   ;;  %s12040_s7 = inlined_call_operand.vmem [shape: f32[2,1,32], index: 7, kind: input, shape index: {}]   ;;  %s12041_s8 = inlined_call_operand.vmem [shape: f32[2,32,32], index: 8, kind: input, shape index: {}]   ;;  %s12042_s9 = inlined_call_operand.vmem [shape: f32[2,1,32], index: 9, kind: input, shape index: {}]   ;;  %s12043_s10 = inlined_call_operand.hbm [shape: f32[2,8,32], index: 10, kind: output, shape index: {0}]   ;;  %s12044_s11 = inlined_call_operand.hbm [shape: f32[2,8,128], index: 11, kind: output, shape index: {1}]  }
   0x1   :  { %12371 = sst [smem:[#allocation227_spill]] %s12033_s0 }
   0x2   :  { %12372 = sst [smem:[#allocation228_spill]] %s12034_s1 }
   0x3   :  { %12373 = sst [smem:[#allocation229_spill]] %s12035_s2 }
   0x4   :  { %12374 = sst [smem:[#allocation230_spill]] %s12043_s10 }
   0x5   :  { %12375 = sst [smem:[#allocation231_spill]] %s12044_s11 }
   0x6   :  { %17 = vsyncpa [#allocation8], 0 }
   0x7   :  { %19 = vsyncpa [#allocation8 + $0x1], 0 }
   0x8   :  { %20 = vsyncpa [#allocation10], 0 }
   0x9   :  { %22 = vsyncpa [#allocation10 + $0x1], 0  ;;  %s7402_s17 = smov 0   ;;  %s7404_s18 = smov 0  }
   0xa   :  { %s7406_s19 = smov 0   ;;  %s7408_s20 = smov 0  }
   0xb   :  { %s7410_s21 = smov 0   ;;  %s7412_s22 = smov 0  }
   0xc   :  { %s7414_s23 = smov 0   ;;  %s7416_s24 = smov 0  }
   0xd LB: > { %12376 = sst [smem:[#allocation13_spill]] %s7307_s17  ;;  %s6182_s25 = sadd.s32 4294967295, %s7335_s24   ;;  %s7335_s24 = sphi %s7416_s24, %s28_s24   ;;  %s7331_s23 = sphi %s7414_s23, %s13441_s23   ;;  %s7327_s22 = sphi %s7412_s22, %s13440_s22   ;;  %s7323_s21 = sphi %s7410_s21, %s13439_s21   ;;  %s7319_s20 = sphi %s7408_s20, %s13438_s20   ;;  %s7315_s19 = sphi %s7406_s19, %s13437_s19   ;;  %s7311_s18 = sphi %s7404_s18, %s13436_s18   ;;  %s7307_s17 = sphi %s7402_s17, %s13435_s17  }
   0xe   : > { %12377 = sst [smem:[#allocation14_spill]] %s7311_s18  ;;  %s6183_s26 = sadd.s32 4294967294, %s7335_s24  }
   0xf   : > { %12378 = sst [smem:[#allocation15_spill]] %s7315_s19  ;;  %s43_s27 = sadd.s32 1, %s7327_s22 }
  0x10   : > { %12379 = sst [smem:[#allocation16_spill]] %s7327_s22  ;;  %p45_p0 = scmp.ge.s32.totalorder %s43_s27, 2 }
  0x11   : > { %12380 = sst [smem:[#allocation17_spill]] %s7331_s23  ;;  %s47_s28 = sadd.s32 1, %s7331_s23 }
  0x12   : > { %12381 = sst [smem:[#allocation18_spill]] %s7335_s24  ;;  %p340_p1 = scmp.ne.s32.totalorder %s7315_s19, %s7311_s18 }
  0x13   : > { %p341_p2 = scmp.eq.s32.totalorder %s6182_s25, 3  ;;  %s13443_s27 = smov (%p45_p0, %s43_s27), 0 }
  0x14   : > { %12382 = sst [smem:[#allocation19_spill]] %s13443_s27  ;;  %s13445_s28 = smov (!%p45_p0, %s47_s28), %s7331_s23 }
  0x15   : > { %p7451_p3 = por %p341_p2, %p340_p1  ;;  %p346_p4 = scmp.ne.s32.totalorder %s7311_s18, %s7307_s17 }
  0x16   : > { %p49_p5 = scmp.ge.s32.totalorder %s13445_s28, 2  ;;  %p347_p6 = scmp.eq.s32.totalorder %s6183_s26, 3 }
  0x17   : > { %s12383_s29 = scalar_select %p7451_p3, 1, 0 }
  0x18   : > { %p6186_p7 = scmp.ge.s32.totalorder %s7335_s24, 1  ;;  %p493_p8 = scmp.lt.s32.totalorder %s7335_s24, 5 }
  0x19   : > { %12384 = sst [smem:[#allocation20_spill]] %s12383_s29  ;;  %s13447_s28 = smov (%p49_p5, %s13445_s28), 0 }
  0x1a   : > { %12385 = sst [smem:[#allocation21_spill]] %s13447_s28  ;;  %p7461_p9 = por %p347_p6, %p346_p4 }
  0x1b   : > { %p494_p10 = pnand %p6186_p7, %p493_p8  ;;  %s327_s12 = ssub.s32 %s7331_s23, %s13447_s28 }
  0x1c   : > { %s12386_s30 = scalar_select %p7461_p9, 1, 0 }
  0x1d   : > { %s330_s13 = sadd.s32 1, %s7315_s19  ;;  %p328_p11 = scmp.eq.s32.totalorder %s327_s12, 0 }
  0x1e   : > { %12387 = sst [smem:[#allocation22_spill]] %s12386_s30  ;;  %497 = sbr.rel (%p494_p10) target bundleno = 3173 (0xc65), region = 60 }
  0x1f   : > { %s7469_s14 = scalar_select %p328_p11, %s7315_s19, %s330_s13  }
  0x21   : > { %12388 = sst [smem:[#allocation23_spill]] %s7469_s14 }
  0x23   : > { %s7472_s15 = sand.u32 1, %s7311_s18   ;;  %p601_p12 = scmp.lt.s32.totalorder %s7323_s21, 1 }
  0x24   : > { %p608_p13 = scmp.lt.s32.totalorder %s7319_s20, 2  ;;  %s12389_s0 = sld [smem:[#allocation227_spill]] }
  0x25   : > { %s7478_s25 = scalar_select %p601_p12, %s7323_s21, 1 }
  0x26   : > { %s609_s26 = scalar_select %p608_p13, %s7319_s20, 2 }
  0x27   : > { %s6189_s12 = sshll.u32 %s7478_s25, 3  ;;  %s6237_s13 = smul.u32 48, %s7478_s25 }
  0x28   : > { %s6190_s22 = sshll.u32 %s609_s26, 4  ;;  %s619_s16 = sadd.s32 1, %s7319_s20 }
  0x29   : > { %s615_s14 = sadd.s32 %s6237_s13, %s6190_s22  ;;  %p623_p0 = scmp.lt.s32.totalorder %s619_s16, 2 }
  0x2a   : > { %s604_s23 = scalar_lea.vmem %s12389_s0, %s6189_s12  ;;  %s6191_s19 = sshll.u32 %s615_s14, 3 }
  0x2b   : > { %s12390_s1 = sld [smem:[#allocation228_spill]]  ;;  %s13449_s16 = smov (!%p623_p0, %s619_s16), 2 }
  0x2c   : > { %s6226_s27 = sshll.u32 %s7478_s25, 7  ;;  %s6192_s12 = sshll.u32 %s13449_s16, 4 }
  0x2d   : > { %s7504_s29 = scalar_lea.vmem %s12037_s4, %s6226_s27  ;;  %s630_s18 = sadd.s32 %s6237_s13, %s6192_s12 }
  0x2e   : > { %p657_p1 = scmp.lt.s32.totalorder %s7319_s20, 1  ;;  %s12391_s2 = sld [smem:[#allocation229_spill]] }
  0x2f   : > { %p6200_p2 = scmp.ne.s32.totalorder %s7319_s20, 0 }
  0x30   : > { %s7513_s10 = scalar_select %p657_p1, %s7319_s20, 1 }
  0x31   : > { %s7490_s17 = scalar_lea.vmem %s12390_s1, %s6191_s19  ;;  %s6193_s19 = sshll.u32 %s630_s18, 3 }
  0x32   : > { %s6227_s28 = sshll.u32 %s7513_s10, 5  ;;  %s664_s0 = scalar_lea.vmem %s12040_s7, %s7513_s10 }
  0x33   : > { %s7523_s13 = scalar_lea.vmem %s12039_s6, %s6227_s28  ;;  %s7534_s22 = scalar_lea.vmem %s12042_s9, %s7513_s10 }
  0x34   : > { %s7510_s24 = scalar_lea.vmem %s12391_s2, %s6193_s19  ;;  %s7528_s19 = scalar_lea.vmem %s12041_s8, %s6227_s28 }
  0x35   : > { %s12392_s1 = sshll.u32 %s7472_s15, 3  ;;  %680 = sbr.rel (%p6200_p2) target bundleno = 60 (0x3c), region = 68 }
  0x36   : > { %s7538_s2 = scalar_lea.vmem [#allocation7], %s12392_s1  ;;  %s12393_s16 = smov %s12392_s1 }
  0x37   : > { %s7542_s26 = scalar_lea.vmem [#allocation9], %s12393_s16 }
  0x3a   : > { %v681_v0 = vld [vmem:[%s604_s23] sm:$0xff]  ;;  %vm682_vm0 = vcmask 261120  }
  0x3b   : > { %683 = vst.msk [vmem:[#allocation2] sm:$0xff] %vm682_vm0, %v681_v0 }
  0x3c PF: > { %v688_v1 = vld [vmem:[%s7523_s13 + $0x18] sm:$0xff]  ;;  %v740_v3 = vld [vmem:[%s7504_s29 + $0x10] sm:$0xff]  ;;  %vm12206_vm1 = vcmask 7168   ;;  %v12058_v4 = vmov 0   ;;  %v738_v5 = vld [vmem:[%s7504_s29] sm:$0xff]  ;;  %vm12197_vm2 = vcmask 261120  }
  0x3d   : > { %v757_v2 = vld [vmem:[%s7528_s19 + $0x18] sm:$0xff]  ;;  %6320 = vset.pattern.permute.xlu1 %v12058_v4  ;;  %6319 = vset.pattern.permute.xlu0 %v12058_v4  ;;  %v687_v6 = vld [vmem:[%s7523_s13 + $0x10] sm:$0xff]  ;;  %v7338_v8 = vmov -1e+30   ;;  %v686_v9 = vld [vmem:[%s7523_s13 + $0x8] sm:$0xff]  ;;  %v7339_v10 = vmov 0.0  }
  0x3e   : > { %709 = vmatpush.msra.mxu0 %v688_v1  ;;  %6229 = vmatpush.msra.mxu1 %v757_v2  ;;  %v756_v7 = vld [vmem:[%s7528_s19 + $0x10] sm:$0xff]  ;;  %719 = vst.msk [vmem:[#allocation4] sm:$0xff] %vm12206_vm1, %v7338_v8  ;;  %v755_v11 = vld [vmem:[%s7528_s19 + $0x8] sm:$0xff]  ;;  %v685_v12 = vld [vmem:[%s7523_s13] sm:$0xff]  ;;  %p6218_p4 = scmp.ne.s32.totalorder %s7319_s20, 1 }
  0x3f   : > { %6230 = vmatpush.msra.mxu3 %v757_v2  ;;  %884 = vperm.xlu1 %6320, %v740_v3   ;;  %720 = vst.msk [vmem:[#allocation5] sm:$0xff] %vm12206_vm1, %v7339_v10  ;;  %v754_v13 = vld [vmem:[%s7528_s19] sm:$0xff]  ;;  %v732_v17 = vld [vmem:[%s7490_s17 + $0x50] sm:$0xff]  ;;  %v741_v18 = vld [vmem:[%s7504_s29 + $0x18] sm:$0xff] }
  0x40   : > { %874 = vperm.xlu0 %6319, %v738_v5   ;;  %710 = vmatpush.msra.mxu0 %v687_v6  ;;  %721 = vst.msk [vmem:[#allocation6] sm:$0xff] %vm12197_vm2, %v7339_v10  ;;  %v742_v14 = vld [vmem:[%s7504_s29 + $0x20] sm:$0xff]  ;;  %v739_v19 = vld [vmem:[%s7504_s29 + $0x8] sm:$0xff]  ;;  %v733_v23 = vld [vmem:[%s7490_s17 + $0x58] sm:$0xff] }
  0x41   : > { %6231 = vmatpush.msra.mxu1 %v756_v7  ;;  %6232 = vmatpush.msra.mxu3 %v756_v7  ;;  %v726_v16 = vld [vmem:[%s7490_s17 + $0x20] sm:$0xff]  ;;  %v743_v20 = vld [vmem:[%s7504_s29 + $0x28] sm:$0xff]  ;;  %v745_v24 = vld [vmem:[%s7504_s29 + $0x38] sm:$0xff] }
  0x42   : > { %711 = vmatpush.msra.mxu0 %v686_v9  ;;  %6321 = vset.pattern.permute.xlu2 %v12058_v4  ;;  %v684_v15 = vld [vmem:[#allocation2] sm:$0xff]  ;;  %v727_v22 = vld [vmem:[%s7490_s17 + $0x28] sm:$0xff]  ;;  %v744_v25 = vld [vmem:[%s7504_s29 + $0x30] sm:$0xff] }
  0x43   : > { %6233 = vmatpush.msra.mxu1 %v755_v11  ;;  %6234 = vmatpush.msra.mxu3 %v755_v11  ;;  %v722_v21 = vld [vmem:[%s7490_s17] sm:$0xff]  ;;  %v723_v27 = vld [vmem:[%s7490_s17 + $0x8] sm:$0xff]  ;;  %v728_v28 = vld [vmem:[%s7490_s17 + $0x30] sm:$0xff] }
  0x44   : > { %712 = vmatpush.msra.mxu0 %v685_v12  ;;  %894 = vperm.xlu2 %6321, %v742_v14   ;;  %v746_v26 = vld [vmem:[%s7504_s29 + $0x40] sm:$0xff]  ;;  %v748_v30 = vld [vmem:[%s7504_s29 + $0x50] sm:$0xff]  ;;  %v747_v31 = vld [vmem:[%s7504_s29 + $0x48] sm:$0xff] }
  0x45   : > { %6235 = vmatpush.msra.mxu1 %v754_v13  ;;  %6236 = vmatpush.msra.mxu3 %v754_v13  ;;  %v734_v29 = vld [vmem:[%s7490_s17 + $0x60] sm:$0xff]  ;;  %v749_v32 = vld [vmem:[%s7504_s29 + $0x58] sm:$0xff]  ;;  %v724_v33 = vld [vmem:[%s7490_s17 + $0x10] sm:$0xff] }
  0x46   : > { %6201 = vmatmul.msk.f32.vlgmr.msra.gmra.mxu0 %vm12197_vm2, %v684_v15  ;;  %6206 = vmatmul.msk.f32.vlgmr.msra.gmra.mxu1 %vm12197_vm2, %v726_v16  ;;  %v729_v34 = vld [vmem:[%s7490_s17 + $0x38] sm:$0xff]  ;;  %v735_v35 = vld [vmem:[%s7490_s17 + $0x68] sm:$0xff]  ;;  %v750_v37 = vld [vmem:[%s7504_s29 + $0x60] sm:$0xff] }
  0x47   : > { %6212 = vmatmul.msk.f32.vlgmr.msra.gmra.mxu3 %vm12197_vm2, %v732_v17  ;;  %819 = vmatpush.msrb.mxu0 %v757_v2  ;;  %v751_v36 = vld [vmem:[%s7504_s29 + $0x68] sm:$0xff]  ;;  %v752_v38 = vld [vmem:[%s7504_s29 + $0x70] sm:$0xff]  ;;  %v725_v39 = vld [vmem:[%s7490_s17 + $0x18] sm:$0xff] }
  0x48   : > { %889 = vperm.xlu1 %6320, %v741_v18   ;;  %879 = vperm.xlu0 %6319, %v739_v19   ;;  %v730_v40 = vld [vmem:[%s7490_s17 + $0x40] sm:$0xff]  ;;  %v736_v41 = vld [vmem:[%s7490_s17 + $0x70] sm:$0xff]  ;;  %v753_v42 = vld [vmem:[%s7504_s29 + $0x78] sm:$0xff]  ;;  %s12443_s29 = scalar_lea.vmem %s12038_s5, %s7478_s25 }
  0x49   : > { %820 = vmatpush.msrb.mxu0 %v756_v7  ;;  %v731_v43 = vld [vmem:[%s7490_s17 + $0x48] sm:$0xff]  ;;  %v737_v44 = vld [vmem:[%s7490_s17 + $0x78] sm:$0xff]  ;;  %v6339_v46 = vld [vmem:[%s664_s0] ss:$0 sm:$0xff] }
  0x4a   : > { %v7652_v12 = vld [vmem:[%s7534_s22] ss:$0 sm:$0xff] }
  0x4b   : > { %821 = vmatpush.msrb.mxu0 %v755_v11 }
  0x4c   : > { %899 = vperm.xlu2 %6321, %v743_v20  }
  0x4d   : > { %822 = vmatpush.msrb.mxu0 %v754_v13 }
  0x4e   : > { %6202 = vmatmul.msk.f32.vlgmr.msrb.gmra.mxu0 %vm12197_vm2, %v722_v21  ;;  %6207 = vmatmul.msk.f32.gmra.mxu1 %vm12197_vm2, %v727_v22 }
  0x4f   : > { %6213 = vmatmul.msk.f32.gmra.mxu3 %vm12197_vm2, %v733_v23 }
  0x50   : > { %909 = vperm.xlu1 %6320, %v745_v24   ;;  %904 = vperm.xlu0 %6319, %v744_v25  }
  0x54   : > { %914 = vperm.xlu2 %6321, %v746_v26  }
  0x56   : > { %6203 = vmatmul.msk.f32.gmra.mxu0 %vm12197_vm2, %v723_v27  ;;  %6208 = vmatmul.msk.f32.gmra.mxu1 %vm12197_vm2, %v728_v28 }
  0x57   : > { %6214 = vmatmul.msk.f32.gmra.mxu3 %vm12197_vm2, %v734_v29 }
  0x58   : > { %924 = vperm.xlu1 %6320, %v748_v30   ;;  %919 = vperm.xlu0 %6319, %v747_v31  }
  0x5c   : > { %929 = vperm.xlu2 %6321, %v749_v32  }
  0x5e   : > { %6204 = vmatmul.msk.f32.gmra.mxu0 %vm12197_vm2, %v724_v33  ;;  %6209 = vmatmul.msk.f32.gmra.mxu1 %vm12197_vm2, %v729_v34 }
  0x5f   : > { %6215 = vmatmul.msk.f32.gmra.mxu3 %vm12197_vm2, %v735_v35 }
  0x60   : > { %939 = vperm.xlu1 %6320, %v751_v36   ;;  %934 = vperm.xlu0 %6319, %v750_v37  }
  0x64   : > { %944 = vperm.xlu2 %6321, %v752_v38  }
  0x66   : > { %6205 = vmatmul.msk.f32.gmra.mxu0 %vm12197_vm2, %v725_v39  ;;  %6210 = vmatmul.msk.f32.gmra.mxu1 %vm12197_vm2, %v730_v40 }
  0x67   : > { %6216 = vmatmul.msk.f32.gmra.mxu3 %vm12197_vm2, %v736_v41 }
  0x68   : > { %949 = vperm.xlu0 %6319, %v753_v42  }
  0x6e   : > { %6211 = vmatmul.msk.f32.gmra.mxu1 %vm12197_vm2, %v731_v43 }
  0x6f   : > { %6217 = vmatmul.msk.f32.gmra.mxu3 %vm12197_vm2, %v737_v44 }
  0x9e   : > { %v895_v47 = vpop.permute.xlu2 %894 }
  0xa6   : > { %v900_v52 = vpop.permute.xlu2 %899 }
  0xae   : > { %v7649_v10 = vpop.permute.xlu2 %914 }
  0xb1   : > { %v7608_v45 = vpop.permute.xlu1 %884 }
  0xb2   : > { %v875_v55 = vpop.permute.xlu0 %874 }
  0xb6   : > { %v930_v31 = vpop.permute.xlu2 %929 }
  0xba   : > { %v7615_v48 = vpop.permute.xlu1 %889  ;;  %v880_v16 = vpop.permute.xlu0 %879 }
  0xc2   : > { %v7618_v53 = vpop.permute.xlu1 %909  ;;  %v905_v37 = vpop.permute.xlu0 %904 }
  0xc3   : > { %v714_v49 = vpop.f32.mrf.mxu0  ;;  %v836_v50 = vpop.f32.mrf.mxu1 }
  0xc4   : > { %v715_v51 = vadd.f32 %v6339_v46, %v714_v49  ;;  %v7633_v0 = vmul.f32 %v895_v47, %v836_v50 }
  0xc6   : > { %717 = vst.msk [vmem:[#allocation3] sm:$0xff] %vm12197_vm2, %v715_v51 }
  0xca   : > { %v854_v7 = vpop.f32.mrf.mxu3  ;;  %v925_v11 = vpop.permute.xlu1 %924 }
  0xcb   : > { %v839_v54 = vpop.f32.mrf.mxu1  ;;  %v824_v57 = vpop.f32.mrf.mxu0  ;;  %v7654_v14 = vmul.f32 %v925_v11, %v854_v7 }
  0xcc   : > { %v7622_v58 = vmul.f32 %v900_v52, %v839_v54  ;;  %v7626_v61 = vmul.f32 %v875_v55, %v824_v57 }
  0xcd   : > { %v7620_v56 = vld [vmem:[#allocation3] sm:$0xff] }
  0xce   : > { %v970_v59 = vrot.slane %v7620_v56, 1  ;;  %v971_v60 = vrot.slane %v7620_v56, 2  ;;  %v7629_v62 = vperm.slane %v7620_v56, 0 }
  0xd0   : > { %v7631_v63 = vperm.slane %v970_v59, 0  ;;  %v7635_v1 = vperm.slane %v971_v60, 0  ;;  %v998_v2 = vadd.f32 %v7629_v62, %v7622_v58  ;;  %v993_v3 = vadd.f32 %v7629_v62, %v7626_v61 }
  0xd1   : > { %v997_v8 = vadd.f32 %v7629_v62, %v7633_v0  ;;  %v1003_v23 = vadd.f32 %v7629_v62, %v7654_v14 }
  0xd2   : > { %v1014_v5 = vadd.f32 %v7631_v63, %v7622_v58  ;;  %6342 = vtanh.f32 %v998_v2  ;;  %v1013_v6 = vadd.f32 %v7631_v63, %v7633_v0  ;;  %v1029_v9 = vadd.f32 %v7635_v1, %v7633_v0  ;;  %v857_v28 = vpop.f32.mrf.mxu3 }
  0xd3   : > { %6344 = vtanh.f32 %v993_v3  ;;  %v1019_v20 = vadd.f32 %v7631_v63, %v7654_v14  ;;  %v1035_v26 = vadd.f32 %v7635_v1, %v7654_v14  ;;  %v7669_v33 = vmul.f32 %v930_v31, %v857_v28  ;;  %v842_v44 = vpop.f32.mrf.mxu1  ;;  %v827_v55 = vpop.f32.mrf.mxu0 }
  0xd4   : > { %6346 = vtanh.f32 %v1014_v5  ;;  %v1025_v36 = vadd.f32 %v7635_v1, %v7626_v61  ;;  %v1009_v39 = vadd.f32 %v7631_v63, %v7626_v61  ;;  %v7683_v50 = vmul.f32 %v905_v37, %v842_v44 }
  0xd5   : > { %6348 = vtanh.f32 %v1013_v6  ;;  %v1020_v42 = vadd.f32 %v7631_v63, %v7669_v33  ;;  %v1004_v54 = vadd.f32 %v7629_v62, %v7669_v33  ;;  %v1030_v59 = vadd.f32 %v7635_v1, %v7622_v58  ;;  %v7695_v6 = vpop.permute.xlu0 %919 }
  0xd6   : > { %6350 = vtanh.f32 %v997_v8  ;;  %v999_v3 = vadd.f32 %v7629_v62, %v7683_v50 }
  0xd7   : > { %6352 = vtanh.f32 %v1029_v9  ;;  %v7698_v9 = vmul.f32 %v880_v16, %v827_v55 }
  0xd8   : > { %v6343_v13 = vpop.eup %6342  ;;  %6354 = vtanh.f32 %v1019_v20 }
  0xd9   : > { %v6345_v15 = vpop.eup %6344  ;;  %v1258_v17 = vmul.f32 %v6343_v13, %v7652_v12  ;;  %6356 = vtanh.f32 %v1003_v23  ;;  %v1010_v31 = vadd.f32 %v7631_v63, %v7698_v9 }
  0xda   : > { %v6347_v18 = vpop.eup %6346  ;;  %v1253_v19 = vmul.f32 %v6345_v15, %v7652_v12  ;;  %6358 = vtanh.f32 %v1035_v26  ;;  %v860_v23 = vpop.f32.mrf.mxu3 }
  0xdb   : > { %v1396_v21 = vsel %vm12197_vm2, %v1258_v17, 0.0  ;;  %v1274_v22 = vmul.f32 %v6347_v18, %v7652_v12  ;;  %v6349_v24 = vpop.eup %6348  ;;  %6360 = vtanh.f32 %v1025_v36  ;;  %v994_v17 = vadd.f32 %v7629_v62, %v7698_v9 }
  0xdc   : > { %1397 = vadd.xlane.f32.xlu2 %v1396_v21  ;;  %v1381_v25 = vsel %vm12197_vm2, %v1253_v19, 0.0  ;;  %v6351_v27 = vpop.eup %6350  ;;  %v1273_v32 = vmul.f32 %v6349_v24, %v7652_v12  ;;  %6362 = vtanh.f32 %v1009_v39  ;;  %v1036_v19 = vadd.f32 %v7635_v1, %v7669_v33  ;;  %v830_v39 = vpop.f32.mrf.mxu0 }
  0xdd   : > { %1382 = vadd.xlane.f32.xlu1 %v1381_v25  ;;  %v1444_v29 = vsel %vm12197_vm2, %v1274_v22, 0.0  ;;  %v6353_v30 = vpop.eup %6352  ;;  %v1257_v34 = vmul.f32 %v6351_v27, %v7652_v12  ;;  %6364 = vtanh.f32 %v1020_v42  ;;  %v1026_v21 = vadd.f32 %v7635_v1, %v7698_v9  ;;  %v935_v26 = vpop.permute.xlu0 %934 }
  0xde   : > { %1445 = vadd.xlane.f32.xlu0 %v1444_v29  ;;  %v1289_v35 = vmul.f32 %v6353_v30, %v7652_v12  ;;  %v1441_v38 = vsel %vm12197_vm2, %v1273_v32, 0.0  ;;  %v6355_v40 = vpop.eup %6354  ;;  %6366 = vtanh.f32 %v1004_v54  ;;  %v7713_v28 = vmul.f32 %v935_v26, %v860_v23 }
  0xdf   : > { %v1393_v41 = vsel %vm12197_vm2, %v1257_v34, 0.0  ;;  %v6357_v43 = vpop.eup %6356  ;;  %v1279_v49 = vmul.f32 %v6355_v40, %v7652_v12  ;;  %6368 = vtanh.f32 %v1030_v59  ;;  %v1015_v34 = vadd.f32 %v7631_v63, %v7683_v50 }
  0xe0   : > { %v1489_v46 = vsel %vm12197_vm2, %v1289_v35, 0.0  ;;  %v6359_v47 = vpop.eup %6358  ;;  %v1263_v51 = vmul.f32 %v6357_v43, %v7652_v12  ;;  %6370 = vtanh.f32 %v999_v3  ;;  %v1005_v37 = vadd.f32 %v7629_v62, %v7713_v28 }
  0xe1   : > { %v1295_v52 = vmul.f32 %v6359_v47, %v7652_v12  ;;  %v1459_v57 = vsel %vm12197_vm2, %v1279_v49, 0.0  ;;  %v6361_v60 = vpop.eup %6360  ;;  %6372 = vtanh.f32 %v994_v17  ;;  %v7728_v43 = vmul.f32 %v7608_v45, %v830_v39  ;;  %v845_v49 = vpop.f32.mrf.mxu1 }
  0xe2   : > { %v1411_v2 = vsel %vm12197_vm2, %v1263_v51, 0.0  ;;  %v6363_v5 = vpop.eup %6362  ;;  %v1285_v11 = vmul.f32 %v6361_v60, %v7652_v12  ;;  %6374 = vtanh.f32 %v1036_v19  ;;  %v1031_v47 = vadd.f32 %v7635_v1, %v7683_v50 }
  0xe3   : > { %v1507_v7 = vsel %vm12197_vm2, %v1295_v52, 0.0  ;;  %v6365_v8 = vpop.eup %6364  ;;  %v1269_v13 = vmul.f32 %v6363_v5, %v7652_v12  ;;  %6376 = vtanh.f32 %v1026_v21  ;;  %v1021_v52 = vadd.f32 %v7631_v63, %v7713_v28 }
  0xe4   : > { %1442 = vadd.xlane.f32.xlu2 %v1441_v38  ;;  %v1280_v15 = vmul.f32 %v6365_v8, %v7652_v12  ;;  %v1477_v18 = vsel %vm12197_vm2, %v1285_v11, 0.0  ;;  %v6367_v16 = vpop.eup %6366  ;;  %6378 = vtanh.f32 %v1010_v31  ;;  %v995_v45 = vadd.f32 %v7629_v62, %v7728_v43  ;;  %v863_v11 = vpop.f32.mrf.mxu3 }
  0xe5   : > { %1394 = vadd.xlane.f32.xlu1 %v1393_v41  ;;  %v1429_v20 = vsel %vm12197_vm2, %v1269_v13, 0.0  ;;  %v6369_v22 = vpop.eup %6368  ;;  %v1264_v27 = vmul.f32 %v6367_v16, %v7652_v12  ;;  %6380 = vtanh.f32 %v1015_v34  ;;  %v940_v16 = vpop.permute.xlu1 %939 }
  0xe6   : > { %1490 = vadd.xlane.f32.xlu0 %v1489_v46  ;;  %v1462_v24 = vsel %vm12197_vm2, %v1280_v15, 0.0  ;;  %v6371_v25 = vpop.eup %6370  ;;  %v1290_v29 = vmul.f32 %v6369_v22, %v7652_v12  ;;  %6382 = vtanh.f32 %v1005_v37  ;;  %v7756_v22 = vmul.f32 %v940_v16, %v863_v11 }
  0xe7   : > { %v1259_v30 = vmul.f32 %v6371_v25, %v7652_v12  ;;  %v1414_v32 = vsel %vm12197_vm2, %v1264_v27, 0.0  ;;  %v6373_v35 = vpop.eup %6372  ;;  %6384 = vtanh.f32 %v1031_v47  ;;  %v833_v27 = vpop.f32.mrf.mxu0 }
  0xe8   : > { %v1492_v36 = vsel %vm12197_vm2, %v1290_v29, 0.0  ;;  %v6375_v38 = vpop.eup %6374  ;;  %v1254_v42 = vmul.f32 %v6373_v35, %v7652_v12  ;;  %6386 = vtanh.f32 %v1021_v52  ;;  %v1022_v26 = vadd.f32 %v7631_v63, %v7756_v22 }
  0xe9   : > { %v1399_v40 = vsel %vm12197_vm2, %v1259_v30, 0.0  ;;  %v6377_v41 = vpop.eup %6376  ;;  %v1296_v44 = vmul.f32 %v6375_v38, %v7652_v12  ;;  %6388 = vtanh.f32 %v995_v45  ;;  %v1027_v30 = vadd.f32 %v7635_v1, %v7728_v43 }
  0xea   : > { %v1286_v46 = vmul.f32 %v6377_v41, %v7652_v12  ;;  %v1384_v51 = vsel %vm12197_vm2, %v1254_v42, 0.0  ;;  %v6379_v54 = vpop.eup %6378  ;;  %v7771_v39 = vmul.f32 %v7615_v48, %v833_v27  ;;  %v1006_v48 = vadd.f32 %v7629_v62, %v7756_v22 }
  0xeb   : > { %v1510_v55 = vsel %vm12197_vm2, %v1296_v44, 0.0  ;;  %v1270_v3 = vmul.f32 %v6379_v54, %v7652_v12 }
  0xec   : > { %1460 = vadd.xlane.f32.xlu2 %v1459_v57  ;;  %v6381_v57 = vpop.eup %6380  ;;  %v1480_v59 = vsel %vm12197_vm2, %v1286_v46, 0.0  ;;  %v996_v46 = vadd.f32 %v7629_v62, %v7771_v39  ;;  %v866_v54 = vpop.f32.mrf.mxu3  ;;  %v1012_v11 = vadd.f32 %v7631_v63, %v7771_v39 }
  0xed   : > { %1412 = vadd.xlane.f32.xlu1 %v1411_v2  ;;  %v6383_v60 = vpop.eup %6382  ;;  %v7742_v2 = vmul.f32 %v7618_v53, %v845_v49  ;;  %v1275_v5 = vmul.f32 %v6381_v57, %v7652_v12  ;;  %v1432_v13 = vsel %vm12197_vm2, %v1270_v3, 0.0  ;;  %v945_v57 = vpop.permute.xlu2 %944 }
  0xee   : > { %1508 = vadd.xlane.f32.xlu0 %v1507_v7  ;;  %v1265_v7 = vmul.f32 %v6383_v60, %v7652_v12  ;;  %v6385_v15 = vpop.eup %6384  ;;  %v7789_v60 = vmul.f32 %v945_v57, %v866_v54 }
  0xef   : > { %v1016_v8 = vadd.f32 %v7631_v63, %v7742_v2  ;;  %v1000_v53 = vadd.f32 %v7629_v62, %v7742_v2  ;;  %v1447_v17 = vsel %vm12197_vm2, %v1275_v5, 0.0  ;;  %v6387_v19 = vpop.eup %6386  ;;  %v1291_v23 = vmul.f32 %v6385_v15, %v7652_v12 }
  0xf0   : > { %v6389_v21 = vpop.eup %6388  ;;  %v1032_v34 = vadd.f32 %v7635_v1, %v7742_v2  ;;  %v1023_v15 = vadd.f32 %v7631_v63, %v7789_v60 }
  0xf1   : > { %6390 = vtanh.f32 %v1016_v8  ;;  %v1255_v25 = vmul.f32 %v6389_v21, %v7652_v12  ;;  %v1495_v29 = vsel %vm12197_vm2, %v1291_v23, 0.0 }
  0xf2   : > { %6392 = vtanh.f32 %v1000_v53 }
  0xf3   : > { %v1387_v37 = vsel %vm12197_vm2, %v1255_v25, 0.0  ;;  %v1028_v25 = vadd.f32 %v7635_v1, %v7771_v39 }
  0xf4   : > { %1478 = vadd.xlane.f32.xlu2 %v1477_v18  ;;  %v1011_v18 = vadd.f32 %v7631_v63, %v7728_v43 }
  0xf5   : > { %1430 = vadd.xlane.f32.xlu1 %v1429_v20  ;;  %v1417_v20 = vsel %vm12197_vm2, %v1265_v7, 0.0 }
  0xf6   : > { %1463 = vadd.xlane.f32.xlu0 %v1462_v24  ;;  %v1281_v24 = vmul.f32 %v6387_v19, %v7652_v12  ;;  %6394 = vtanh.f32 %v1011_v18 }
  0xf7   : > { %v6391_v31 = vpop.eup %6390  ;;  %6396 = vtanh.f32 %v1022_v26 }
  0xf8   : > { %v6393_v35 = vpop.eup %6392  ;;  %6398 = vtanh.f32 %v1027_v30 }
  0xf9   : > { %v1260_v42 = vmul.f32 %v6393_v35, %v7652_v12  ;;  %6400 = vtanh.f32 %v1032_v34 }
  0xfa   : > { %6402 = vtanh.f32 %v996_v46 }
  0xfb   : > { %6404 = vtanh.f32 %v1006_v48 }
  0xfc   : > { %1415 = vadd.xlane.f32.xlu2 %v1414_v32  ;;  %v1465_v32 = vsel %vm12197_vm2, %v1281_v24, 0.0  ;;  %v6395_v38 = vpop.eup %6394 }
  0xfd   : > { %1493 = vadd.xlane.f32.xlu1 %v1492_v36  ;;  %v848_v36 = vpop.f32.mrf.mxu1  ;;  %v1271_v44 = vmul.f32 %v6395_v38, %v7652_v12  ;;  %v6397_v49 = vpop.eup %6396  ;;  %v1007_v38 = vadd.f32 %v7629_v62, %v7789_v60 }
  0xfe   : > { %1400 = vadd.xlane.f32.xlu0 %v1399_v40  ;;  %v1276_v40 = vmul.f32 %v6391_v31, %v7652_v12  ;;  %v7775_v41 = vmul.f32 %v7649_v10, %v848_v36  ;;  %v6399_v52 = vpop.eup %6398 }
  0xff   : > { %v6401_v45 = vpop.eup %6400  ;;  %v1287_v3 = vmul.f32 %v6399_v52, %v7652_v12  ;;  %v950_v52 = vpop.permute.xlu0 %949 }
 0x100   : > { %v1450_v47 = vsel %vm12197_vm2, %v1276_v40, 0.0  ;;  %v1017_v10 = vadd.f32 %v7631_v63, %v7775_v41  ;;  %v1292_v5 = vmul.f32 %v6401_v45, %v7652_v12  ;;  %v1001_v7 = vadd.f32 %v7629_v62, %v7775_v41 }
 0x101   : > { %v1483_v53 = vsel %vm12197_vm2, %v1287_v3, 0.0  ;;  %v1033_v27 = vadd.f32 %v7635_v1, %v7775_v41 }
 0x102   : > { %6406 = vtanh.f32 %v1017_v10  ;;  %v1498_v19 = vsel %vm12197_vm2, %v1292_v5, 0.0  ;;  %v1039_v5 = vadd.f32 %v7635_v1, %v7789_v60 }
 0x103   : > { %6408 = vtanh.f32 %v1001_v7 }
 0x104   : > { %1385 = vadd.xlane.f32.xlu2 %v1384_v51  ;;  %v1402_v51 = vsel %vm12197_vm2, %v1260_v42, 0.0  ;;  %6410 = vtanh.f32 %v1012_v11 }
 0x105   : > { %1511 = vadd.xlane.f32.xlu1 %v1510_v55  ;;  %v1435_v55 = vsel %vm12197_vm2, %v1271_v44, 0.0  ;;  %v851_v18 = vpop.f32.mrf.mxu1  ;;  %6412 = vtanh.f32 %v1023_v15 }
 0x106   : > { %1481 = vadd.xlane.f32.xlu0 %v1480_v59  ;;  %v1282_v59 = vmul.f32 %v6397_v49, %v7652_v12  ;;  %v7804_v21 = vmul.f32 %v7695_v6, %v851_v18  ;;  %6414 = vtanh.f32 %v1028_v25  ;;  %v869_v49 = vpop.f32.mrf.mxu3 }
 0x107   : > { %6416 = vtanh.f32 %v1033_v27 }
 0x108   : > { %v1468_v8 = vsel %vm12197_vm2, %v1282_v59, 0.0  ;;  %v1002_v6 = vadd.f32 %v7629_v62, %v7804_v21  ;;  %v1018_v42 = vadd.f32 %v7631_v63, %v7804_v21  ;;  %v1034_v59 = vadd.f32 %v7635_v1, %v7804_v21 }
 0x10a   : > { %6418 = vtanh.f32 %v1002_v6 }
 0x10b   : > { %6420 = vtanh.f32 %v1007_v38 }
 0x10c   : > { %1433 = vadd.xlane.f32.xlu2 %v1432_v13  ;;  %v6403_v13 = vpop.eup %6402  ;;  %6422 = vtanh.f32 %v1018_v42 }
 0x10d   : > { %1448 = vadd.xlane.f32.xlu1 %v1447_v17  ;;  %v6405_v17 = vpop.eup %6404 }
 0x10e   : > { %1418 = vadd.xlane.f32.xlu0 %v1417_v20  ;;  %v6407_v16 = vpop.eup %6406  ;;  %v1256_v20 = vmul.f32 %v6403_v13, %v7652_v12  ;;  %v1266_v23 = vmul.f32 %v6405_v17, %v7652_v12 }
 0x10f   : > { %v1277_v24 = vmul.f32 %v6407_v16, %v7652_v12 }
 0x110   : > { %v1390_v26 = vsel %vm12197_vm2, %v1256_v20, 0.0  ;;  %v1420_v30 = vsel %vm12197_vm2, %v1266_v23, 0.0 }
 0x114   : > { %1496 = vadd.xlane.f32.xlu2 %v1495_v29  ;;  %v6409_v29 = vpop.eup %6408 }
 0x115   : > { %1466 = vadd.xlane.f32.xlu1 %v1465_v32  ;;  %v6411_v31 = vpop.eup %6410  ;;  %v1453_v32 = vsel %vm12197_vm2, %v1277_v24, 0.0  ;;  %v1261_v35 = vmul.f32 %v6409_v29, %v7652_v12 }
 0x116   : > { %1388 = vadd.xlane.f32.xlu0 %v1387_v37  ;;  %v6413_v34 = vpop.eup %6412  ;;  %v1272_v36 = vmul.f32 %v6411_v31, %v7652_v12 }
 0x117   : > { %v1283_v37 = vmul.f32 %v6413_v34, %v7652_v12  ;;  %v1405_v40 = vsel %vm12197_vm2, %v1261_v35, 0.0  ;;  %v6415_v44 = vpop.eup %6414 }
 0x118   : > { %v1438_v46 = vsel %vm12197_vm2, %v1272_v36, 0.0  ;;  %v6417_v48 = vpop.eup %6416  ;;  %v1288_v54 = vmul.f32 %v6415_v44, %v7652_v12 }
 0x119   : > { %v6419_v10 = vpop.eup %6418  ;;  %v1293_v45 = vmul.f32 %v6417_v48, %v7652_v12 }
 0x11a   : > { %v1262_v57 = vmul.f32 %v6419_v10, %v7652_v12  ;;  %v1486_v3 = vsel %vm12197_vm2, %v1288_v54, 0.0  ;;  %v6421_v7 = vpop.eup %6420 }
 0x11b   : > { %v1501_v11 = vsel %vm12197_vm2, %v1293_v45, 0.0  ;;  %v1267_v18 = vmul.f32 %v6421_v7, %v7652_v12 }
 0x11c   : > { %1451 = vadd.xlane.f32.xlu2 %v1450_v47  ;;  %v1038_v47 = vadd.f32 %v7635_v1, %v7756_v22  ;;  %v1408_v15 = vsel %vm12197_vm2, %v1262_v57, 0.0 }
 0x11d   : > { %1403 = vadd.xlane.f32.xlu1 %v1402_v51  ;;  %v1471_v51 = vsel %vm12197_vm2, %v1283_v37, 0.0  ;;  %v1423_v23 = vsel %vm12197_vm2, %v1267_v18, 0.0 }
 0x11e   : > { %1436 = vadd.xlane.f32.xlu0 %v1435_v55  ;;  %v7830_v55 = vmul.f32 %v950_v52, %v869_v49  ;;  %6424 = vtanh.f32 %v1038_v47 }
 0x11f   : > { %6426 = vtanh.f32 %v1034_v59 }
 0x120   : > { %v1008_v13 = vadd.f32 %v7629_v62, %v7830_v55  ;;  %6428 = vtanh.f32 %v1039_v5  ;;  %v1037_v62 = vadd.f32 %v7635_v1, %v7713_v28  ;;  %v1024_v24 = vadd.f32 %v7631_v63, %v7830_v55 }
 0x121   : > { %v1040_v34 = vadd.f32 %v7635_v1, %v7830_v55 }
 0x122   : > { %6430 = vtanh.f32 %v1008_v13 }
 0x123   : > { %6432 = vtanh.f32 %v1037_v62 }
 0x124   : > { %1469 = vadd.xlane.f32.xlu2 %v1468_v8  ;;  %v972_v8 = vrot.slane %v7620_v56, 3  ;;  %6434 = vtanh.f32 %v1024_v24 }
 0x125   : > { %1484 = vadd.xlane.f32.xlu1 %v1483_v53  ;;  %v6423_v53 = vpop.eup %6422 }
 0x126   : > { %1499 = vadd.xlane.f32.xlu0 %v1498_v19  ;;  %v6425_v17 = vpop.eup %6424  ;;  %v7845_v19 = vperm.slane %v972_v8, 0  ;;  %v1278_v16 = vmul.f32 %v6423_v53, %v7652_v12 }
 0x127   : > { %v1298_v20 = vmul.f32 %v6425_v17, %v7652_v12  ;;  %v6427_v25 = vpop.eup %6426 }
 0x128   : > { %v1041_v27 = vadd.f32 %v7845_v19, %v7626_v61  ;;  %v6429_v29 = vpop.eup %6428  ;;  %v1294_v31 = vmul.f32 %v6427_v25, %v7652_v12  ;;  %v1042_v36 = vadd.f32 %v7845_v19, %v7698_v9  ;;  %v1043_v52 = vadd.f32 %v7845_v19, %v7728_v43 }
 0x129   : > { %v6431_v6 = vpop.eup %6430  ;;  %v1045_v45 = vadd.f32 %v7845_v19, %v7633_v0  ;;  %v1048_v62 = vadd.f32 %v7845_v19, %v7742_v2  ;;  %v1050_v25 = vadd.f32 %v7845_v19, %v7804_v21 }
 0x12a   : > { %6436 = vtanh.f32 %v1041_v27  ;;  %v1268_v63 = vmul.f32 %v6431_v6, %v7652_v12  ;;  %v1504_v35 = vsel %vm12197_vm2, %v1294_v31, 0.0  ;;  %v6433_v37 = vpop.eup %6432 }
 0x12b   : > { %v6435_v42 = vpop.eup %6434  ;;  %6438 = vtanh.f32 %v1040_v34  ;;  %v1297_v47 = vmul.f32 %v6433_v37, %v7652_v12  ;;  %v1051_v37 = vadd.f32 %v7845_v19, %v7654_v14 }
 0x12c   : > { %1391 = vadd.xlane.f32.xlu2 %v1390_v26  ;;  %v1456_v26 = vsel %vm12197_vm2, %v1278_v16, 0.0  ;;  %v1426_v44 = vsel %vm12197_vm2, %v1268_v63, 0.0  ;;  %6440 = vtanh.f32 %v1042_v36  ;;  %v1284_v49 = vmul.f32 %v6435_v42, %v7652_v12 }
 0x12d   : > { %1421 = vadd.xlane.f32.xlu1 %v1420_v30  ;;  %v1516_v30 = vsel %vm12197_vm2, %v1298_v20, 0.0  ;;  %v1513_v54 = vsel %vm12197_vm2, %v1297_v47, 0.0  ;;  %v1046_v16 = vadd.f32 %v7845_v19, %v7622_v58  ;;  %v1053_v42 = vadd.f32 %v7845_v19, %v7713_v28 }
 0x12e   : > { %1454 = vadd.xlane.f32.xlu0 %v1453_v32  ;;  %v1299_v32 = vmul.f32 %v6429_v29, %v7652_v12  ;;  %v1474_v59 = vsel %vm12197_vm2, %v1284_v49, 0.0 }
 0x130   : > { %v1519_v38 = vsel %vm12197_vm2, %v1299_v32, 0.0 }
 0x134   : > { %1406 = vadd.xlane.f32.xlu2 %v1405_v40  ;;  %v1044_v40 = vadd.f32 %v7845_v19, %v7771_v39 }
 0x135   : > { %1439 = vadd.xlane.f32.xlu1 %v1438_v46  ;;  %v6437_v46 = vpop.eup %6436 }
 0x136   : > { %1472 = vadd.xlane.f32.xlu0 %v1471_v51  ;;  %6442 = vtanh.f32 %v1044_v40  ;;  %v1301_v10 = vmul.f32 %v6437_v46, %v7652_v12  ;;  %v6439_v57 = vpop.eup %6438 }
 0x137   : > { %v6441_v5 = vpop.eup %6440  ;;  %6444 = vtanh.f32 %v1043_v52  ;;  %v1300_v13 = vmul.f32 %v6439_v57, %v7652_v12 }
 0x138   : > { %v1525_v7 = vsel %vm12197_vm2, %v1301_v10, 0.0  ;;  %6446 = vtanh.f32 %v1045_v45 }
 0x139   : > { %v1522_v20 = vsel %vm12197_vm2, %v1300_v13, 0.0 }
 0x13c   : > { %1487 = vadd.xlane.f32.xlu2 %v1486_v3  ;;  %v1047_v3 = vadd.f32 %v7845_v19, %v7683_v50  ;;  %v6443_v8 = vpop.eup %6442 }
 0x13d   : > { %1502 = vadd.xlane.f32.xlu1 %v1501_v11  ;;  %v1304_v18 = vmul.f32 %v6443_v8, %v7652_v12 }
 0x13e   : > { %1409 = vadd.xlane.f32.xlu0 %v1408_v15  ;;  %v1302_v15 = vmul.f32 %v6441_v5, %v7652_v12  ;;  %6448 = vtanh.f32 %v1047_v3  ;;  %v973_v3 = vrot.slane %v7620_v56, 4 }
 0x13f   : > { %v1534_v27 = vsel %vm12197_vm2, %v1304_v18, 0.0  ;;  %6450 = vtanh.f32 %v1046_v16 }
 0x140   : > { %v1528_v24 = vsel %vm12197_vm2, %v1302_v15, 0.0  ;;  %6452 = vtanh.f32 %v1048_v62  ;;  %v1056_v15 = vadd.f32 %v7845_v19, %v7830_v55  ;;  %v7943_v56 = vperm.slane %v973_v3, 0 }
 0x141   : > { %6454 = vtanh.f32 %v1050_v25 }
 0x144   : > { %1424 = vadd.xlane.f32.xlu2 %v1423_v23  ;;  %v6445_v23 = vpop.eup %6444 }
 0x145   : > { %1457 = vadd.xlane.f32.xlu1 %v1456_v26  ;;  %v6447_v26 = vpop.eup %6446  ;;  %v1303_v6 = vmul.f32 %v6445_v23, %v7652_v12 }
 0x146   : > { %1517 = vadd.xlane.f32.xlu0 %v1516_v30  ;;  %v6449_v29 = vpop.eup %6448  ;;  %v1305_v32 = vmul.f32 %v6447_v26, %v7652_v12 }
 0x147   : > { %v1307_v34 = vmul.f32 %v6449_v29, %v7652_v12  ;;  %v1531_v36 = vsel %vm12197_vm2, %v1303_v6, 0.0  ;;  %v1055_v29 = vadd.f32 %v7845_v19, %v7789_v60 }
 0x148   : > { %v1537_v40 = vsel %vm12197_vm2, %v1305_v32, 0.0  ;;  %v1057_v32 = vadd.f32 %v7943_v56, %v7626_v61 }
 0x149   : > { %v1543_v46 = vsel %vm12197_vm2, %v1307_v34, 0.0 }
 0x14c   : > { %1505 = vadd.xlane.f32.xlu2 %v1504_v35  ;;  %v1049_v35 = vadd.f32 %v7845_v19, %v7775_v41 }
 0x14d   : > { %1520 = vadd.xlane.f32.xlu1 %v1519_v38  ;;  %v6451_v38 = vpop.eup %6450 }
 0x14e   : > { %1427 = vadd.xlane.f32.xlu0 %v1426_v44  ;;  %v6453_v44 = vpop.eup %6452  ;;  %6456 = vtanh.f32 %v1049_v35  ;;  %v1306_v10 = vmul.f32 %v6451_v38, %v7652_v12 }
 0x14f   : > { %v7870_v1 = vpop.xlane.xlu2 %1397  ;;  %v6455_v47 = vpop.eup %6454  ;;  %6458 = vtanh.f32 %v1051_v37 }
 0x150   : > { %v7873_v48 = vpop.xlane.xlu1 %1382  ;;  %6460 = vtanh.f32 %v1053_v42  ;;  %v1310_v57 = vmul.f32 %v6455_v47, %v7652_v12  ;;  %v1540_v5 = vsel %vm12197_vm2, %v1306_v10, 0.0 }
 0x151   : > { %v7876_v51 = vpop.xlane.xlu0 %1445 }
 0x152   : > { %v1552_v16 = vsel %vm12197_vm2, %v1310_v57, 0.0 }
 0x154   : > { %1514 = vadd.xlane.f32.xlu2 %v1513_v54  ;;  %v1308_v54 = vmul.f32 %v6453_v44, %v7652_v12  ;;  %v6457_v8 = vpop.eup %6456 }
 0x155   : > { %1475 = vadd.xlane.f32.xlu1 %v1474_v59  ;;  %v1052_v59 = vadd.f32 %v7845_v19, %v7669_v33  ;;  %v6459_v18 = vpop.eup %6458  ;;  %v1309_v23 = vmul.f32 %v6457_v8, %v7652_v12 }
 0x156   : > { %1526 = vadd.xlane.f32.xlu0 %v1525_v7  ;;  %v1054_v7 = vadd.f32 %v7845_v19, %v7756_v22  ;;  %v1546_v13 = vsel %vm12197_vm2, %v1308_v54, 0.0  ;;  %v1311_v25 = vmul.f32 %v6459_v18, %v7652_v12  ;;  %v1058_v54 = vadd.f32 %v7943_v56, %v7698_v9 }
 0x157   : > { %v7888_v11 = vpop.xlane.xlu2 %1442  ;;  %6462 = vtanh.f32 %v1052_v59  ;;  %v1549_v6 = vsel %vm12197_vm2, %v1309_v23, 0.0  ;;  %v1060_v59 = vadd.f32 %v7943_v56, %v7771_v39 }
 0x158   : > { %v7891_v53 = vpop.xlane.xlu1 %1394  ;;  %6464 = vtanh.f32 %v1054_v7  ;;  %v1555_v35 = vsel %vm12197_vm2, %v1311_v25, 0.0  ;;  %v1062_v7 = vadd.f32 %v7943_v56, %v7622_v58 }
 0x159   : > { %v7894_v17 = vpop.xlane.xlu0 %1490  ;;  %6466 = vtanh.f32 %v1056_v15 }
 0x15a   : > { %6468 = vtanh.f32 %v1055_v29  ;;  %v1061_v29 = vadd.f32 %v7943_v56, %v7633_v0 }
 0x15b   : > { %6470 = vtanh.f32 %v1057_v32  ;;  %v1063_v32 = vadd.f32 %v7943_v56, %v7683_v50 }
 0x15c   : > { %1523 = vadd.xlane.f32.xlu2 %v1522_v20  ;;  %v6461_v20 = vpop.eup %6460 }
 0x15d   : > { %1529 = vadd.xlane.f32.xlu1 %v1528_v24  ;;  %v6463_v34 = vpop.eup %6462 }
 0x15e   : > { %1535 = vadd.xlane.f32.xlu0 %v1534_v27  ;;  %v1313_v27 = vmul.f32 %v6461_v20, %v7652_v12  ;;  %v6465_v37 = vpop.eup %6464  ;;  %v1312_v42 = vmul.f32 %v6463_v34, %v7652_v12 }
 0x15f   : > { %v7906_v30 = vpop.xlane.xlu2 %1460 }
 0x160   : > { %12394 = vst [vmem:[#allocation24_spill] sm:$0xff] %v7906_v30  ;;  %v7909_v31 = vpop.xlane.xlu1 %1412  ;;  %v1561_v38 = vsel %vm12197_vm2, %v1313_v27, 0.0  ;;  %v1558_v57 = vsel %vm12197_vm2, %v1312_v42, 0.0 }
 0x161   : > { %12395 = vst [vmem:[#allocation25_spill] sm:$0xff] %v7909_v31  ;;  %v7912_v63 = vpop.xlane.xlu0 %1508 }
 0x162   : > { %12396 = vst [vmem:[#allocation26_spill] sm:$0xff] %v7912_v63 }
 0x164   : > { %1532 = vadd.xlane.f32.xlu2 %v1531_v36  ;;  %v1059_v36 = vadd.f32 %v7943_v56, %v7728_v43 }
 0x165   : > { %1538 = vadd.xlane.f32.xlu1 %v1537_v40  ;;  %v6467_v40 = vpop.eup %6466 }
 0x166   : > { %1544 = vadd.xlane.f32.xlu0 %v1543_v46  ;;  %v1314_v46 = vmul.f32 %v6465_v37, %v7652_v12  ;;  %6472 = vtanh.f32 %v1059_v36  ;;  %v1316_v10 = vmul.f32 %v6467_v40, %v7652_v12  ;;  %v6469_v3 = vpop.eup %6468  ;;  %v1065_v36 = vadd.f32 %v7943_v56, %v7775_v41 }
 0x167   : > { %v7924_v49 = vpop.xlane.xlu2 %1478  ;;  %v6471_v8 = vpop.eup %6470  ;;  %6474 = vtanh.f32 %v1058_v54 }
 0x168   : > { %v7927_v52 = vpop.xlane.xlu1 %1430  ;;  %6476 = vtanh.f32 %v1060_v59  ;;  %v1317_v23 = vmul.f32 %v6471_v8, %v7652_v12 }
 0x169   : > { %v7930_v45 = vpop.xlane.xlu0 %1463  ;;  %6478 = vtanh.f32 %v1062_v7  ;;  %v1066_v7 = vadd.f32 %v7943_v56, %v7804_v21 }
 0x16a   : > { %12397 = vst [vmem:[#allocation27_spill] sm:$0xff] %v7930_v45  ;;  %6480 = vtanh.f32 %v1061_v29 }
 0x16b   : > { %6482 = vtanh.f32 %v1063_v32 }
 0x16c   : > { %1541 = vadd.xlane.f32.xlu2 %v1540_v5  ;;  %v1564_v5 = vsel %vm12197_vm2, %v1314_v46, 0.0  ;;  %v6473_v15 = vpop.eup %6472  ;;  %6484 = vtanh.f32 %v1065_v36 }
 0x16d   : > { %1547 = vadd.xlane.f32.xlu1 %v1546_v13  ;;  %v1570_v13 = vsel %vm12197_vm2, %v1316_v10, 0.0  ;;  %v1319_v27 = vmul.f32 %v6473_v15, %v7652_v12  ;;  %v6475_v34 = vpop.eup %6474  ;;  %v1068_v15 = vadd.f32 %v7943_v56, %v7669_v33 }
 0x16e   : > { %1553 = vadd.xlane.f32.xlu0 %v1552_v16  ;;  %v1315_v16 = vmul.f32 %v6469_v3, %v7652_v12  ;;  %v6477_v37 = vpop.eup %6476  ;;  %v1318_v46 = vmul.f32 %v6475_v34, %v7652_v12  ;;  %v1064_v3 = vadd.f32 %v7943_v56, %v7742_v2 }
 0x16f   : > { %v7945_v62 = vpop.xlane.xlu2 %1415  ;;  %v6479_v40 = vpop.eup %6478  ;;  %v1320_v54 = vmul.f32 %v6477_v37, %v7652_v12  ;;  %v1067_v37 = vadd.f32 %v7943_v56, %v7654_v14 }
 0x170   : > { %12398 = vst [vmem:[#allocation28_spill] sm:$0xff] %v7945_v62  ;;  %v7948_v24 = vpop.xlane.xlu1 %1493  ;;  %v1322_v59 = vmul.f32 %v6479_v40, %v7652_v12  ;;  %v6481_v8 = vpop.eup %6480  ;;  %6486 = vtanh.f32 %v1064_v3  ;;  %v1069_v40 = vadd.f32 %v7943_v56, %v7713_v28 }
 0x171   : > { %v7951_v26 = vpop.xlane.xlu0 %1400  ;;  %6488 = vtanh.f32 %v1066_v7 }
 0x172   : > { %12399 = vst [vmem:[#allocation29_spill] sm:$0xff] %v7951_v26  ;;  %6490 = vtanh.f32 %v1068_v15 }
 0x173   : > { %6492 = vtanh.f32 %v1067_v37  ;;  %v1070_v37 = vadd.f32 %v7943_v56, %v7756_v22 }
 0x174   : > { %1550 = vadd.xlane.f32.xlu2 %v1549_v6  ;;  %v1567_v6 = vsel %vm12197_vm2, %v1315_v16, 0.0  ;;  %v6483_v16 = vpop.eup %6482  ;;  %6494 = vtanh.f32 %v1069_v40  ;;  %v1072_v40 = vadd.f32 %v7943_v56, %v7830_v55 }
 0x175   : > { %1556 = vadd.xlane.f32.xlu1 %v1555_v35  ;;  %v1573_v35 = vsel %vm12197_vm2, %v1317_v23, 0.0  ;;  %v1588_v23 = vsel %vm12197_vm2, %v1322_v59, 0.0  ;;  %v1323_v34 = vmul.f32 %v6483_v16, %v7652_v12  ;;  %v1071_v59 = vadd.f32 %v7943_v56, %v7789_v60 }
 0x176   : > { %1562 = vadd.xlane.f32.xlu0 %v1561_v38  ;;  %v1579_v38 = vsel %vm12197_vm2, %v1319_v27, 0.0  ;;  %v6485_v27 = vpop.eup %6484 }
 0x177   : > { %v7963_v19 = vpop.xlane.xlu2 %1385  ;;  %v1325_v36 = vmul.f32 %v6485_v27, %v7652_v12  ;;  %6496 = vtanh.f32 %v1071_v59 }
 0x178   : > { %v7966_v44 = vpop.xlane.xlu1 %1511  ;;  %6498 = vtanh.f32 %v1070_v37 }
 0x179   : > { %12400 = vst [vmem:[#allocation30_spill] sm:$0xff] %v7966_v44  ;;  %v7969_v47 = vpop.xlane.xlu0 %1481  ;;  %6500 = vtanh.f32 %v1072_v40 }
 0x17c   : > { %1559 = vadd.xlane.f32.xlu2 %v1558_v57 }
 0x17d   : > { %1565 = vadd.xlane.f32.xlu1 %v1564_v5  ;;  %v1576_v5 = vsel %vm12197_vm2, %v1318_v46, 0.0  ;;  %v6487_v46 = vpop.eup %6486 }
 0x17e   : > { %1571 = vadd.xlane.f32.xlu0 %v1570_v13  ;;  %v1582_v13 = vsel %vm12197_vm2, %v1320_v54, 0.0  ;;  %v1591_v54 = vsel %vm12197_vm2, %v1323_v34, 0.0  ;;  %v6489_v3 = vpop.eup %6488  ;;  %v1324_v16 = vmul.f32 %v6487_v46, %v7652_v12 }
 0x17f   : > { %v7981_v18 = vpop.xlane.xlu2 %1433  ;;  %v6491_v7 = vpop.eup %6490  ;;  %v1326_v27 = vmul.f32 %v6489_v3, %v7652_v12 }
 0x180   : > { %v7984_v20 = vpop.xlane.xlu1 %1448  ;;  %v1328_v34 = vmul.f32 %v6491_v7, %v7652_v12  ;;  %v6493_v46 = vpop.eup %6492 }
 0x181   : > { %12401 = vst [vmem:[#allocation31_spill] sm:$0xff] %v7984_v20  ;;  %v7987_v25 = vpop.xlane.xlu0 %1418  ;;  %v6495_v3 = vpop.eup %6494 }
 0x182   : > { %12402 = vst [vmem:[#allocation32_spill] sm:$0xff] %v7987_v25 }
 0x184   : > { %1568 = vadd.xlane.f32.xlu2 %v1567_v6  ;;  %v1321_v6 = vmul.f32 %v6481_v8, %v7652_v12  ;;  %v8035_v8 = vld [vmem:[#allocation3] sm:$0xff]  ;;  %v1606_v12 = vsel %vm12197_vm2, %v1328_v34, 0.0 }
 0x185   : > { %1574 = vadd.xlane.f32.xlu1 %v1573_v35 }
 0x186   : > { %1580 = vadd.xlane.f32.xlu0 %v1579_v38  ;;  %v1585_v38 = vsel %vm12197_vm2, %v1321_v6, 0.0 }
 0x187   : > { %v7999_v42 = vpop.xlane.xlu2 %1496 }
 0x188   : > { %12403 = vst [vmem:[#allocation33_spill] sm:$0xff] %v7999_v42  ;;  %v8002_v10 = vpop.xlane.xlu1 %1466 }
 0x189   : > { %12404 = vst [vmem:[#allocation34_spill] sm:$0xff] %v8002_v10  ;;  %v8005_v57 = vpop.xlane.xlu0 %1388 }
 0x18c   : > { %1577 = vadd.xlane.f32.xlu2 %v1576_v5  ;;  %v1597_v5 = vsel %vm12197_vm2, %v1325_v36, 0.0 }
 0x18d   : > { %1583 = vadd.xlane.f32.xlu1 %v1582_v13  ;;  %v974_v13 = vrot.slane %v8035_v8, 5 }
 0x18e   : > { %1589 = vadd.xlane.f32.xlu0 %v1588_v23 }
 0x18f   : > { %v8017_v29 = vpop.xlane.xlu2 %1451  ;;  %v8047_v36 = vperm.slane %v974_v13, 0  ;;  %v8061_v13 = vld [vmem:[%s7534_s22] ss:$0 sm:$0xff] }
 0x190   : > { %12405 = vst [vmem:[#allocation35_spill] sm:$0xff] %v8017_v29  ;;  %v8020_v32 = vpop.xlane.xlu1 %1403  ;;  %v1327_v56 = vmul.f32 %v8061_v13, %v6493_v46 }
 0x191   : > { %12406 = vst [vmem:[#allocation36_spill] sm:$0xff] %v8020_v32  ;;  %v8023_v35 = vpop.xlane.xlu0 %1436  ;;  %v1074_v59 = vadd.f32 %v8047_v36, %v7698_v9  ;;  %v1073_v34 = vadd.f32 %v8047_v36, %v7626_v61  ;;  %v1077_v46 = vadd.f32 %v8047_v36, %v7633_v0 }
 0x192   : > { %v1603_v37 = vsel %vm12197_vm2, %v1327_v56, 0.0 }
 0x193   : > { %6502 = vtanh.f32 %v1074_v59 }
 0x194   : > { %1586 = vadd.xlane.f32.xlu2 %v1585_v38  ;;  %v1594_v38 = vsel %vm12197_vm2, %v1324_v16, 0.0  ;;  %6504 = vtanh.f32 %v1073_v34  ;;  %v1078_v34 = vadd.f32 %v8047_v36, %v7622_v58 }
 0x195   : > { %1592 = vadd.xlane.f32.xlu1 %v1591_v54  ;;  %v1600_v54 = vsel %vm12197_vm2, %v1326_v27, 0.0  ;;  %v1329_v27 = vmul.f32 %v8061_v13, %v6495_v3 }
 0x196   : > { %1598 = vadd.xlane.f32.xlu0 %v1597_v5  ;;  %v6497_v5 = vpop.eup %6496 }
 0x197   : > { %v8038_v15 = vpop.xlane.xlu2 %1469  ;;  %v6499_v4 = vpop.eup %6498  ;;  %v1609_v40 = vsel %vm12197_vm2, %v1329_v27, 0.0 }
 0x198   : > { %12407 = vst [vmem:[#allocation37_spill] sm:$0xff] %v8038_v15  ;;  %v8041_v23 = vpop.xlane.xlu1 %1484  ;;  %v6501_v59 = vpop.eup %6500  ;;  %v1330_v56 = vmul.f32 %v8061_v13, %v6499_v4 }
 0x199   : > { %v8044_v6 = vpop.xlane.xlu0 %1499 }
 0x19a   : > { %12408 = vst [vmem:[#allocation38_spill] sm:$0xff] %v8044_v6 }
 0x19c   : > { %1595 = vadd.xlane.f32.xlu2 %v1594_v38 }
 0x19d   : > { %1601 = vadd.xlane.f32.xlu1 %v1600_v54  ;;  %v1331_v54 = vmul.f32 %v8061_v13, %v6497_v5  ;;  %v6503_v5 = vpop.eup %6502 }
 0x19e   : > { %1607 = vadd.xlane.f32.xlu0 %v1606_v12  ;;  %v1075_v12 = vadd.f32 %v8047_v36, %v7728_v43  ;;  %v1334_v62 = vmul.f32 %v8061_v13, %v6503_v5 }
 0x19f   : > { %v8058_v7 = vpop.xlane.xlu2 %1391  ;;  %v1615_v3 = vsel %vm12197_vm2, %v1331_v54, 0.0  ;;  %v1076_v54 = vadd.f32 %v8047_v36, %v7771_v39 }
 0x1a0   : > { %v8064_v16 = vpop.xlane.xlu1 %1421  ;;  %6506 = vtanh.f32 %v1075_v12  ;;  %v1080_v12 = vadd.f32 %v8047_v36, %v7742_v2 }
 0x1a1   : > { %12409 = vst [vmem:[#allocation39_spill] sm:$0xff] %v8064_v16  ;;  %v8067_v38 = vpop.xlane.xlu0 %1454  ;;  %6508 = vtanh.f32 %v1077_v46 }
 0x1a2   : > { %6510 = vtanh.f32 %v1076_v54  ;;  %v1081_v54 = vadd.f32 %v8047_v36, %v7775_v41 }
 0x1a3   : > { %6512 = vtanh.f32 %v1078_v34 }
 0x1a4   : > { %1604 = vadd.xlane.f32.xlu2 %v1603_v37  ;;  %v1332_v37 = vmul.f32 %v8061_v13, %v6501_v59  ;;  %v1624_v59 = vsel %vm12197_vm2, %v1334_v62, 0.0  ;;  %6514 = vtanh.f32 %v1080_v12  ;;  %v1079_v62 = vadd.f32 %v8047_v36, %v7683_v50 }
 0x1a5   : > { %1610 = vadd.xlane.f32.xlu1 %v1609_v40  ;;  %v1612_v40 = vsel %vm12197_vm2, %v1330_v56, 0.0 }
 0x1a6   : > { %1616 = vadd.xlane.f32.xlu0 %v1615_v3  ;;  %v6505_v3 = vpop.eup %6504  ;;  %v1618_v4 = vsel %vm12197_vm2, %v1332_v37, 0.0  ;;  %6516 = vtanh.f32 %v1079_v62  ;;  %v1084_v62 = vadd.f32 %v8047_v36, %v7669_v33 }
 0x1a7   : > { %v8079_v44 = vpop.xlane.xlu2 %1406  ;;  %v6507_v46 = vpop.eup %6506  ;;  %v1333_v56 = vmul.f32 %v8061_v13, %v6505_v3  ;;  %v1083_v3 = vadd.f32 %v8047_v36, %v7654_v14  ;;  %6518 = vtanh.f32 %v1081_v54  ;;  %v975_v54 = vrot.slane %v8035_v8, 6 }
 0x1a8   : > { %v8082_v45 = vpop.xlane.xlu1 %1439  ;;  %v6509_v5 = vpop.eup %6508 }
 0x1a9   : > { %v8085_v27 = vpop.xlane.xlu0 %1472  ;;  %v1337_v25 = vmul.f32 %v8061_v13, %v6509_v5  ;;  %6520 = vtanh.f32 %v1083_v3  ;;  %v1086_v3 = vadd.f32 %v8047_v36, %v7756_v22  ;;  %v8137_v31 = vperm.slane %v975_v54, 0 }
 0x1aa   : > { %12410 = vst [vmem:[#allocation40_spill] sm:$0xff] %v8085_v27 }
 0x1ac   : > { %1613 = vadd.xlane.f32.xlu2 %v1612_v40  ;;  %v1335_v40 = vmul.f32 %v8061_v13, %v6507_v46  ;;  %v1633_v46 = vsel %vm12197_vm2, %v1337_v25, 0.0  ;;  %v1082_v25 = vadd.f32 %v8047_v36, %v7804_v21 }
 0x1ad   : > { %1619 = vadd.xlane.f32.xlu1 %v1618_v4  ;;  %v1621_v4 = vsel %vm12197_vm2, %v1333_v56, 0.0 }
 0x1ae   : > { %1625 = vadd.xlane.f32.xlu0 %v1624_v59  ;;  %v6511_v59 = vpop.eup %6510  ;;  %v1627_v34 = vsel %vm12197_vm2, %v1335_v40, 0.0  ;;  %6522 = vtanh.f32 %v1082_v25 }
 0x1af   : > { %v8097_v27 = vpop.xlane.xlu2 %1487  ;;  %v6513_v12 = vpop.eup %6512  ;;  %v1336_v56 = vmul.f32 %v8061_v13, %v6511_v59  ;;  %6524 = vtanh.f32 %v1084_v62 }
 0x1b0   : > { %v8100_v10 = vpop.xlane.xlu1 %1502  ;;  %v6515_v5 = vpop.eup %6514  ;;  %6526 = vtanh.f32 %v1086_v3 }
 0x1b1   : > { %v8103_v37 = vpop.xlane.xlu0 %1409  ;;  %v1340_v30 = vmul.f32 %v8061_v13, %v6515_v5 }
 0x1b2   : > { %12411 = vst [vmem:[#allocation41_spill] sm:$0xff] %v8103_v37 }
 0x1b3   : > { %v1642_v5 = vsel %vm12197_vm2, %v1340_v30, 0.0  ;;  %v1085_v30 = vadd.f32 %v8047_v36, %v7713_v28 }
 0x1b4   : > { %1622 = vadd.xlane.f32.xlu2 %v1621_v4  ;;  %v1338_v4 = vmul.f32 %v8061_v13, %v6513_v12 }
 0x1b5   : > { %1628 = vadd.xlane.f32.xlu1 %v1627_v34  ;;  %v1630_v34 = vsel %vm12197_vm2, %v1336_v56, 0.0  ;;  %6528 = vtanh.f32 %v1085_v30  ;;  %v1090_v30 = vadd.f32 %v8137_v31, %v7698_v9 }
 0x1b6   : > { %1634 = vadd.xlane.f32.xlu0 %v1633_v46  ;;  %v6517_v46 = vpop.eup %6516  ;;  %v1636_v59 = vsel %vm12197_vm2, %v1338_v4, 0.0 }
 0x1b7   : > { %v8115_v37 = vpop.xlane.xlu2 %1424  ;;  %v6519_v12 = vpop.eup %6518 }
 0x1b8   : > { %12412 = vst [vmem:[#allocation42_spill] sm:$0xff] %v8115_v37  ;;  %v8118_v63 = vpop.xlane.xlu1 %1457  ;;  %v6521_v37 = vpop.eup %6520  ;;  %v1341_v4 = vmul.f32 %v8061_v13, %v6519_v12  ;;  %v1089_v12 = vadd.f32 %v8137_v31, %v7626_v61 }
 0x1b9   : > { %12413 = vst [vmem:[#allocation43_spill] sm:$0xff] %v8118_v63  ;;  %v8121_v40 = vpop.xlane.xlu0 %1517  ;;  %v1339_v63 = vmul.f32 %v8061_v13, %v6517_v46  ;;  %v1087_v46 = vadd.f32 %v8047_v36, %v7789_v60  ;;  %v6523_v62 = vpop.eup %6522 }
 0x1ba   : > { %12414 = vst [vmem:[#allocation44_spill] sm:$0xff] %v8121_v40  ;;  %v1645_v54 = vsel %vm12197_vm2, %v1341_v4, 0.0  ;;  %v6525_v3 = vpop.eup %6524 }
 0x1bb   : > { %v1639_v25 = vsel %vm12197_vm2, %v1339_v63, 0.0  ;;  %v1342_v63 = vmul.f32 %v8061_v13, %v6523_v62  ;;  %6530 = vtanh.f32 %v1087_v46  ;;  %v1092_v62 = vadd.f32 %v8137_v31, %v7771_v39 }
 0x1bc   : > { %1631 = vadd.xlane.f32.xlu2 %v1630_v34  ;;  %6532 = vtanh.f32 %v1089_v12 }
 0x1bd   : > { %1637 = vadd.xlane.f32.xlu1 %v1636_v59  ;;  %v1343_v59 = vmul.f32 %v8061_v13, %v6521_v37  ;;  %v6527_v37 = vpop.eup %6526 }
 0x1be   : > { %1643 = vadd.xlane.f32.xlu0 %v1642_v5 }
 0x1bf   : > { %v8134_v56 = vpop.xlane.xlu2 %1505  ;;  %v1651_v5 = vsel %vm12197_vm2, %v1343_v59, 0.0  ;;  %v1088_v59 = vadd.f32 %v8047_v36, %v7830_v55 }
 0x1c0   : > { %12415 = vst [vmem:[#allocation45_spill] sm:$0xff] %v8134_v56  ;;  %v8139_v34 = vpop.xlane.xlu1 %1520  ;;  %v1346_v56 = vmul.f32 %v8061_v13, %v6527_v37 }
 0x1c1   : > { %12416 = vst [vmem:[#allocation46_spill] sm:$0xff] %v8139_v34  ;;  %v8142_v42 = vpop.xlane.xlu0 %1427  ;;  %6534 = vtanh.f32 %v1088_v59  ;;  %v1093_v59 = vadd.f32 %v8137_v31, %v7633_v0 }
 0x1c2   : > { %12417 = vst [vmem:[#allocation47_spill] sm:$0xff] %v8142_v42  ;;  %6536 = vtanh.f32 %v1090_v30 }
 0x1c3   : > { %6538 = vtanh.f32 %v1092_v62 }
 0x1c4   : > { %1640 = vadd.xlane.f32.xlu2 %v1639_v25  ;;  %v1344_v25 = vmul.f32 %v8061_v13, %v6525_v3  ;;  %v1660_v3 = vsel %vm12197_vm2, %v1346_v56, 0.0  ;;  %v1091_v56 = vadd.f32 %v8137_v31, %v7728_v43 }
 0x1c5   : > { %1646 = vadd.xlane.f32.xlu1 %v1645_v54  ;;  %v1648_v54 = vsel %vm12197_vm2, %v1342_v63, 0.0 }
 0x1c6   : > { %1652 = vadd.xlane.f32.xlu0 %v1651_v5  ;;  %v6529_v5 = vpop.eup %6528  ;;  %v1654_v46 = vsel %vm12197_vm2, %v1344_v25, 0.0  ;;  %6540 = vtanh.f32 %v1091_v56  ;;  %v1096_v56 = vadd.f32 %v8137_v31, %v7742_v2 }
 0x1c7   : > { %v8154_v34 = vpop.xlane.xlu2 %1514  ;;  %v6531_v12 = vpop.eup %6530  ;;  %v1345_v63 = vmul.f32 %v8061_v13, %v6529_v5  ;;  %v1095_v5 = vadd.f32 %v8137_v31, %v7683_v50  ;;  %6542 = vtanh.f32 %v1093_v59 }
 0x1c8   : > { %12418 = vst [vmem:[#allocation48_spill] sm:$0xff] %v8154_v34  ;;  %v8157_v42 = vpop.xlane.xlu1 %1475  ;;  %v6533_v37 = vpop.eup %6532 }
 0x1c9   : > { %12419 = vst [vmem:[#allocation49_spill] sm:$0xff] %v8157_v42  ;;  %v8160_v4 = vpop.xlane.xlu0 %1526  ;;  %v1349_v34 = vmul.f32 %v8061_v13, %v6533_v37  ;;  %6544 = vtanh.f32 %v1095_v5 }
 0x1cc   : > { %1649 = vadd.xlane.f32.xlu2 %v1648_v54  ;;  %v1347_v54 = vmul.f32 %v8061_v13, %v6531_v12  ;;  %v1669_v12 = vsel %vm12197_vm2, %v1349_v34, 0.0  ;;  %v1094_v34 = vadd.f32 %v8137_v31, %v7622_v58 }
 0x1cd   : > { %1655 = vadd.xlane.f32.xlu1 %v1654_v46  ;;  %v1657_v46 = vsel %vm12197_vm2, %v1345_v63, 0.0 }
 0x1ce   : > { %1661 = vadd.xlane.f32.xlu0 %v1660_v3  ;;  %v6535_v3 = vpop.eup %6534  ;;  %v1663_v30 = vsel %vm12197_vm2, %v1347_v54, 0.0  ;;  %6546 = vtanh.f32 %v1094_v34  ;;  %v1099_v34 = vadd.f32 %v8137_v31, %v7654_v14 }
 0x1cf   : > { %v8172_v36 = vpop.xlane.xlu2 %1523  ;;  %v6537_v62 = vpop.eup %6536  ;;  %v1348_v63 = vmul.f32 %v8061_v13, %v6535_v3  ;;  %v1098_v3 = vadd.f32 %v8137_v31, %v7804_v21  ;;  %6548 = vtanh.f32 %v1096_v56 }
 0x1d0   : > { %12420 = vst [vmem:[#allocation50_spill] sm:$0xff] %v8172_v36  ;;  %v8175_v42 = vpop.xlane.xlu1 %1529  ;;  %v6539_v37 = vpop.eup %6538 }
 0x1d1   : > { %v8178_v25 = vpop.xlane.xlu0 %1535  ;;  %v1352_v26 = vmul.f32 %v8061_v13, %v6539_v37  ;;  %6550 = vtanh.f32 %v1098_v3 }
 0x1d4   : > { %1658 = vadd.xlane.f32.xlu2 %v1657_v46  ;;  %v1350_v46 = vmul.f32 %v8061_v13, %v6537_v62  ;;  %v1678_v62 = vsel %vm12197_vm2, %v1352_v26, 0.0  ;;  %v1097_v26 = vadd.f32 %v8137_v31, %v7775_v41 }
 0x1d5   : > { %1664 = vadd.xlane.f32.xlu1 %v1663_v30  ;;  %v1666_v30 = vsel %vm12197_vm2, %v1348_v63, 0.0 }
 0x1d6   : > { %1670 = vadd.xlane.f32.xlu0 %v1669_v12  ;;  %v6541_v12 = vpop.eup %6540  ;;  %v1672_v59 = vsel %vm12197_vm2, %v1350_v46, 0.0  ;;  %6552 = vtanh.f32 %v1097_v26 }
 0x1d7   : > { %v8190_v36 = vpop.xlane.xlu2 %1532  ;;  %v6543_v5 = vpop.eup %6542  ;;  %v1351_v63 = vmul.f32 %v8061_v13, %v6541_v12  ;;  %v1101_v12 = vadd.f32 %v8137_v31, %v7713_v28  ;;  %6554 = vtanh.f32 %v1099_v34 }
 0x1d8   : > { %v8193_v20 = vpop.xlane.xlu1 %1538  ;;  %v6545_v37 = vpop.eup %6544 }
 0x1d9   : > { %v8196_v54 = vpop.xlane.xlu0 %1544  ;;  %v1355_v29 = vmul.f32 %v8061_v13, %v6545_v37  ;;  %6556 = vtanh.f32 %v1101_v12  ;;  %v1104_v12 = vadd.f32 %v8137_v31, %v7830_v55 }
 0x1da   : > { %12421 = vst [vmem:[#allocation51_spill] sm:$0xff] %v8196_v54 }
 0x1dc   : > { %1667 = vadd.xlane.f32.xlu2 %v1666_v30  ;;  %v1353_v30 = vmul.f32 %v8061_v13, %v6543_v5  ;;  %v1687_v5 = vsel %vm12197_vm2, %v1355_v29, 0.0  ;;  %v1100_v29 = vadd.f32 %v8137_v31, %v7669_v33 }
 0x1dd   : > { %1673 = vadd.xlane.f32.xlu1 %v1672_v59  ;;  %v1675_v59 = vsel %vm12197_vm2, %v1351_v63, 0.0 }
 0x1de   : > { %1679 = vadd.xlane.f32.xlu0 %v1678_v62  ;;  %v6547_v62 = vpop.eup %6546  ;;  %v1681_v56 = vsel %vm12197_vm2, %v1353_v30, 0.0  ;;  %6558 = vtanh.f32 %v1100_v29 }
 0x1df   : > { %v8208_v54 = vpop.xlane.xlu2 %1541  ;;  %v6549_v3 = vpop.eup %6548  ;;  %v1354_v63 = vmul.f32 %v8061_v13, %v6547_v62  ;;  %v1102_v62 = vadd.f32 %v8137_v31, %v7756_v22 }
 0x1e0   : > { %v8211_v6 = vpop.xlane.xlu1 %1547  ;;  %v6551_v37 = vpop.eup %6550 }
 0x1e1   : > { %12422 = vst [vmem:[#allocation52_spill] sm:$0xff] %v8211_v6  ;;  %v8214_v46 = vpop.xlane.xlu0 %1553  ;;  %v1358_v32 = vmul.f32 %v8061_v13, %v6551_v37  ;;  %v1684_v26 = vsel %vm12197_vm2, %v1354_v63, 0.0  ;;  %v6553_v34 = vpop.eup %6552  ;;  %6560 = vtanh.f32 %v1102_v62 }
 0x1e2   : > { %12423 = vst [vmem:[#allocation53_spill] sm:$0xff] %v8214_v46  ;;  %6562 = vtanh.f32 %v1104_v12 }
 0x1e3   : > { %v1696_v37 = vsel %vm12197_vm2, %v1358_v32, 0.0  ;;  %v1103_v32 = vadd.f32 %v8137_v31, %v7789_v60 }
 0x1e4   : > { %1676 = vadd.xlane.f32.xlu2 %v1675_v59  ;;  %v1356_v59 = vmul.f32 %v8061_v13, %v6549_v3  ;;  %v6555_v3 = vpop.eup %6554 }
 0x1e5   : > { %1682 = vadd.xlane.f32.xlu1 %v1681_v56  ;;  %v976_v56 = vrot.slane %v8035_v8, 7  ;;  %6564 = vtanh.f32 %v1103_v32 }
 0x1e6   : > { %1688 = vadd.xlane.f32.xlu0 %v1687_v5  ;;  %v1690_v5 = vsel %vm12197_vm2, %v1356_v59, 0.0  ;;  %v1359_v59 = vmul.f32 %v8061_v13, %v6555_v3 }
 0x1e7   : > { %v8226_v46 = vpop.xlane.xlu2 %1550  ;;  %v8245_v8 = vperm.slane %v976_v56, 0 }
 0x1e8   : > { %v8229_v6 = vpop.xlane.xlu1 %1556  ;;  %v1699_v62 = vsel %vm12197_vm2, %v1359_v59, 0.0 }
 0x1e9   : > { %12424 = vst [vmem:[#allocation54_spill] sm:$0xff] %v8229_v6  ;;  %v8232_v30 = vpop.xlane.xlu0 %1562  ;;  %v1357_v6 = vmul.f32 %v8061_v13, %v6553_v34  ;;  %v1105_v56 = vadd.f32 %v8245_v8, %v7626_v61  ;;  %v1107_v34 = vadd.f32 %v8245_v8, %v7728_v43  ;;  %v1108_v32 = vadd.f32 %v8245_v8, %v7771_v39 }
 0x1ea   : > { %12425 = vst [vmem:[#allocation55_spill] sm:$0xff] %v8232_v30  ;;  %v6557_v30 = vpop.eup %6556 }
 0x1eb   : > { %v1693_v29 = vsel %vm12197_vm2, %v1357_v6, 0.0  ;;  %6566 = vtanh.f32 %v1105_v56 }
 0x1ec   : > { %1685 = vadd.xlane.f32.xlu2 %v1684_v26  ;;  %6568 = vtanh.f32 %v1107_v34 }
 0x1ed   : > { %1691 = vadd.xlane.f32.xlu1 %v1690_v5  ;;  %v1361_v5 = vmul.f32 %v8061_v13, %v6557_v30 }
 0x1ee   : > { %1697 = vadd.xlane.f32.xlu0 %v1696_v37  ;;  %v6559_v37 = vpop.eup %6558 }
 0x1ef   : > { %v8247_v63 = vpop.xlane.xlu2 %1559  ;;  %v6561_v12 = vpop.eup %6560  ;;  %v1705_v3 = vsel %vm12197_vm2, %v1361_v5, 0.0  ;;  %v1360_v6 = vmul.f32 %v8061_v13, %v6559_v37  ;;  %v1106_v5 = vadd.f32 %v8245_v8, %v7698_v9  ;;  %v1110_v37 = vadd.f32 %v8245_v8, %v7622_v58 }
 0x1f0   : > { %12426 = vst [vmem:[#allocation56_spill] sm:$0xff] %v8247_v63  ;;  %v8250_v26 = vpop.xlane.xlu1 %1565  ;;  %v6563_v30 = vpop.eup %6562 }
 0x1f1   : > { %12427 = vst [vmem:[#allocation57_spill] sm:$0xff] %v8250_v26  ;;  %v8253_v40 = vpop.xlane.xlu0 %1571  ;;  %v1364_v43 = vmul.f32 %v8061_v13, %v6563_v30  ;;  %6570 = vtanh.f32 %v1106_v5  ;;  %v1111_v5 = vadd.f32 %v8245_v8, %v7683_v50 }
 0x1f2   : > { %12428 = vst [vmem:[#allocation58_spill] sm:$0xff] %v8253_v40  ;;  %6572 = vtanh.f32 %v1108_v32 }
 0x1f3   : > { %6574 = vtanh.f32 %v1110_v37 }
 0x1f4   : > { %1694 = vadd.xlane.f32.xlu2 %v1693_v29  ;;  %v1362_v29 = vmul.f32 %v8061_v13, %v6561_v12  ;;  %v1714_v12 = vsel %vm12197_vm2, %v1364_v43, 0.0  ;;  %v1109_v43 = vadd.f32 %v8245_v8, %v7633_v0 }
 0x1f5   : > { %1700 = vadd.xlane.f32.xlu1 %v1699_v62  ;;  %v1702_v62 = vsel %vm12197_vm2, %v1360_v6, 0.0 }
 0x1f6   : > { %1706 = vadd.xlane.f32.xlu0 %v1705_v3  ;;  %v6565_v3 = vpop.eup %6564  ;;  %v1708_v56 = vsel %vm12197_vm2, %v1362_v29, 0.0  ;;  %6576 = vtanh.f32 %v1109_v43  ;;  %v1114_v43 = vadd.f32 %v8245_v8, %v7804_v21 }
 0x1f7   : > { %v8265_v31 = vpop.xlane.xlu2 %1568  ;;  %v6567_v34 = vpop.eup %6566  ;;  %v1363_v6 = vmul.f32 %v8061_v13, %v6565_v3  ;;  %v1113_v3 = vadd.f32 %v8245_v8, %v7775_v41  ;;  %6578 = vtanh.f32 %v1111_v5 }
 0x1f8   : > { %12429 = vst [vmem:[#allocation59_spill] sm:$0xff] %v8265_v31  ;;  %v8268_v61 = vpop.xlane.xlu1 %1574  ;;  %v6569_v30 = vpop.eup %6568 }
 0x1f9   : > { %v8271_v59 = vpop.xlane.xlu0 %1580  ;;  %v1367_v58 = vmul.f32 %v8061_v13, %v6569_v30  ;;  %6580 = vtanh.f32 %v1113_v3 }
 0x1fc   : > { %1703 = vadd.xlane.f32.xlu2 %v1702_v62  ;;  %v1365_v62 = vmul.f32 %v8061_v13, %v6567_v34  ;;  %v1723_v34 = vsel %vm12197_vm2, %v1367_v58, 0.0  ;;  %v1112_v58 = vadd.f32 %v8245_v8, %v7742_v2 }
 0x1fd   : > { %1709 = vadd.xlane.f32.xlu1 %v1708_v56  ;;  %v1711_v56 = vsel %vm12197_vm2, %v1363_v6, 0.0 }
 0x1fe   : > { %1715 = vadd.xlane.f32.xlu0 %v1714_v12  ;;  %v6571_v12 = vpop.eup %6570  ;;  %v1717_v32 = vsel %vm12197_vm2, %v1365_v62, 0.0  ;;  %6582 = vtanh.f32 %v1112_v58 }
 0x1ff   : > { %v8283_v9 = vpop.xlane.xlu2 %1577  ;;  %v6573_v37 = vpop.eup %6572  ;;  %v1366_v6 = vmul.f32 %v8061_v13, %v6571_v12  ;;  %v1116_v12 = vadd.f32 %v8245_v8, %v7669_v33  ;;  %6584 = vtanh.f32 %v1114_v43 }
 0x200   : > { %v8286_v39 = vpop.xlane.xlu1 %1583  ;;  %v6575_v30 = vpop.eup %6574 }
 0x201   : > { %v8289_v29 = vpop.xlane.xlu0 %1589  ;;  %v1370_v41 = vmul.f32 %v8061_v13, %v6575_v30  ;;  %6586 = vtanh.f32 %v1116_v12 }
 0x204   : > { %1712 = vadd.xlane.f32.xlu2 %v1711_v56  ;;  %v1368_v56 = vmul.f32 %v8061_v13, %v6573_v37  ;;  %v1732_v37 = vsel %vm12197_vm2, %v1370_v41, 0.0  ;;  %v1115_v41 = vadd.f32 %v8245_v8, %v7654_v14 }
 0x205   : > { %1718 = vadd.xlane.f32.xlu1 %v1717_v32  ;;  %v1720_v32 = vsel %vm12197_vm2, %v1366_v6, 0.0 }
 0x206   : > { %1724 = vadd.xlane.f32.xlu0 %v1723_v34  ;;  %v6577_v34 = vpop.eup %6576  ;;  %v1726_v5 = vsel %vm12197_vm2, %v1368_v56, 0.0  ;;  %6588 = vtanh.f32 %v1115_v41 }
 0x207   : > { %v8301_v0 = vpop.xlane.xlu2 %1586  ;;  %v6579_v3 = vpop.eup %6578  ;;  %v1369_v6 = vmul.f32 %v8061_v13, %v6577_v34 }
 0x208   : > { %v8304_v50 = vpop.xlane.xlu1 %1592  ;;  %v6581_v30 = vpop.eup %6580 }
 0x209   : > { %12430 = vst [vmem:[#allocation60_spill] sm:$0xff] %v8304_v50  ;;  %v8307_v62 = vpop.xlane.xlu0 %1598  ;;  %v1373_v33 = vmul.f32 %v8061_v13, %v6581_v30  ;;  %v1729_v58 = vsel %vm12197_vm2, %v1369_v6, 0.0  ;;  %v6583_v34 = vpop.eup %6582 }
 0x20a   : > { %v6585_v30 = vpop.eup %6584 }
 0x20b   : > { %v1741_v31 = vsel %vm12197_vm2, %v1373_v33, 0.0 }
 0x20c   : > { %1721 = vadd.xlane.f32.xlu2 %v1720_v32  ;;  %v1371_v32 = vmul.f32 %v8061_v13, %v6579_v3  ;;  %v1119_v3 = vadd.f32 %v8245_v8, %v7789_v60 }
 0x20d   : > { %1727 = vadd.xlane.f32.xlu1 %v1726_v5  ;;  %v12060_v5 = vlaneseq }
 0x20e   : > { %1733 = vadd.xlane.f32.xlu0 %v1732_v37  ;;  %v1117_v37 = vadd.f32 %v8245_v8, %v7713_v28  ;;  %v1735_v12 = vsel %vm12197_vm2, %v1371_v32, 0.0  ;;  %v6587_v28 = vpop.eup %6586  ;;  %v1374_v32 = vmul.f32 %v8061_v13, %v6585_v30 }
 0x20f   : > { %v8319_v2 = vpop.xlane.xlu2 %1595  ;;  %v8334_v43 = vshrl.u32 %v12060_v5, 7  ;;  %v6589_v5 = vpop.eup %6588 }
 0x210   : > { %12431 = vst [vmem:[#allocation61_spill] sm:$0xff] %v8319_v2  ;;  %v8322_v21 = vpop.xlane.xlu1 %1601  ;;  %6590 = vtanh.f32 %v1117_v37  ;;  %v1120_v37 = vadd.f32 %v8245_v8, %v7830_v55  ;;  %v1744_v30 = vsel %vm12197_vm2, %v1374_v32, 0.0 }
 0x211   : > { %12432 = vst [vmem:[#allocation62_spill] sm:$0xff] %v8322_v21  ;;  %v8325_v56 = vpop.xlane.xlu0 %1607  ;;  %v8341_v14 = vadd.s32 8, %v8334_v43  ;;  %6322 = vset.pattern.permute.xlu2 %v8334_v43  ;;  %6592 = vtanh.f32 %v1119_v3  ;;  %v8357_v41 = vadd.s32 16, %v8334_v43  ;;  %v8497_v2 = vadd.s32 120, %v8334_v43 }
 0x212   : > { %12433 = vst [vmem:[#allocation63_spill] sm:$0xff] %v8325_v56  ;;  %v8424_v56 = vadd.s32 24, %v8334_v43  ;;  %v8517_v26 = vadd.s32 112, %v8334_v43 }
 0x213   : > { %12434 = vst [vmem:[#allocation64_spill] sm:$0xff] %v8334_v43  ;;  %6323 = vset.pattern.permute.xlu0 %v8341_v14  ;;  %6324 = vset.pattern.permute.xlu1 %v8357_v41 }
 0x214   : > { %1730 = vadd.xlane.f32.xlu2 %v1729_v58  ;;  %12435 = vst [vmem:[#allocation65_spill] sm:$0xff] %v8341_v14  ;;  %v1372_v58 = vmul.f32 %v8061_v13, %v6583_v34 }
 0x215   : > { %1736 = vadd.xlane.f32.xlu1 %v1735_v12  ;;  %v1376_v12 = vmul.f32 %v8061_v13, %v6587_v28  ;;  %12439 = vst [vmem:[#allocation69_spill] sm:$0xff] %v8357_v41 }
 0x216   : > { %1742 = vadd.xlane.f32.xlu0 %v1741_v31  ;;  %v1118_v31 = vadd.f32 %v8245_v8, %v7756_v22  ;;  %v1738_v34 = vsel %vm12197_vm2, %v1372_v58, 0.0  ;;  %v6591_v3 = vpop.eup %6590  ;;  %v1375_v58 = vmul.f32 %v8061_v13, %v6589_v5  ;;  %12452 = vst [vmem:[#allocation81_spill] sm:$0xff] %v8424_v56 }
 0x217   : > { %v8344_v6 = vpop.xlane.xlu2 %1604  ;;  %v1750_v28 = vsel %vm12197_vm2, %v1376_v12, 0.0  ;;  %v6593_v14 = vpop.eup %6592  ;;  %v1377_v55 = vmul.f32 %v8061_v13, %v6591_v3  ;;  %12471 = vst [vmem:[#allocation100_spill] sm:$0xff] %v8497_v2 }
 0x218   : > { %12436 = vst [vmem:[#allocation66_spill] sm:$0xff] %v8344_v6  ;;  %v8348_v60 = vpop.xlane.xlu1 %1610  ;;  %6594 = vtanh.f32 %v1118_v31  ;;  %v1379_v32 = vmul.f32 %v8061_v13, %v6593_v14 }
 0x219   : > { %12437 = vst [vmem:[#allocation67_spill] sm:$0xff] %v8348_v60  ;;  %v8351_v33 = vpop.xlane.xlu0 %1616  ;;  %6596 = vtanh.f32 %v1120_v37  ;;  %v1753_v12 = vsel %vm12197_vm2, %v1377_v55, 0.0 }
 0x21a   : > { %12438 = vst [vmem:[#allocation68_spill] sm:$0xff] %v8351_v33  ;;  %v1759_v5 = vsel %vm12197_vm2, %v1379_v32, 0.0 }
 0x21b   : > { %12475 = vst [vmem:[#allocation104_spill] sm:$0xff] %v8517_v26 }
 0x21c   : > { %1739 = vadd.xlane.f32.xlu2 %v1738_v34  ;;  %v1747_v34 = vsel %vm12197_vm2, %v1375_v58, 0.0 }
 0x21d   : > { %1745 = vadd.xlane.f32.xlu1 %v1744_v30 }
 0x21e   : > { %1751 = vadd.xlane.f32.xlu0 %v1750_v28  ;;  %v6595_v30 = vpop.eup %6594 }
 0x21f   : > { %v8365_v22 = vpop.xlane.xlu2 %1613  ;;  %v6597_v31 = vpop.eup %6596  ;;  %v1378_v3 = vmul.f32 %v8061_v13, %v6595_v30  ;;  %v8398_v30 = vld [vmem:[%s12443_s29] ss:$0 sm:$0xff] }
 0x220   : > { %12440 = vst [vmem:[#allocation70_spill] sm:$0xff] %v8365_v22  ;;  %v8368_v33 = vpop.xlane.xlu1 %1619  ;;  %v1380_v14 = vmul.f32 %v8061_v13, %v6597_v31  ;;  %v8514_v22 = vadd.s32 96, %v8334_v43 }
 0x221   : > { %12441 = vst [vmem:[#allocation71_spill] sm:$0xff] %v8368_v33  ;;  %v8371_v8 = vpop.xlane.xlu0 %1625  ;;  %v1756_v58 = vsel %vm12197_vm2, %v1378_v3, 0.0  ;;  %v8408_v3 = vadd.s32 64, %v8334_v43 }
 0x222   : > { %v1762_v55 = vsel %vm12197_vm2, %v1380_v14, 0.0  ;;  %12474 = vst [vmem:[#allocation103_spill] sm:$0xff] %v8514_v22 }
 0x223   : > { %12446 = vst [vmem:[#allocation75_spill] sm:$0xff] %v8408_v3 }
 0x224   : > { %1748 = vadd.xlane.f32.xlu2 %v1747_v34 }
 0x225   : > { %1754 = vadd.xlane.f32.xlu1 %v1753_v12 }
 0x226   : > { %1760 = vadd.xlane.f32.xlu0 %v1759_v5 }
 0x227   : > { %v8377_v37 = vpop.xlane.xlu2 %1622 }
 0x228   : > { %v8380_v28 = vpop.xlane.xlu1 %1628 }
 0x229   : > { %v8383_v41 = vpop.xlane.xlu0 %1634 }
 0x22c   : > { %1757 = vadd.xlane.f32.xlu2 %v1756_v58 }
 0x22d   : > { %1763 = vadd.xlane.f32.xlu1 %v1762_v55 }
 0x22f   : > { %v8387_v34 = vpop.xlane.xlu2 %1631 }
 0x230   : > { %v8389_v32 = vpop.xlane.xlu1 %1637 }
 0x231   : > { %v8391_v12 = vpop.xlane.xlu0 %1643 }
 0x232   : > { %12442 = vst [vmem:[#allocation72_spill] sm:$0xff] %v8391_v12 }
 0x237   : > { %v8400_v13 = vpop.xlane.xlu2 %1640 }
 0x238   : > { %12444 = vst [vmem:[#allocation73_spill] sm:$0xff] %v8400_v13  ;;  %v8402_v31 = vpop.xlane.xlu1 %1646  ;;  %v8472_v13 = vadd.s32 56, %v8334_v43 }
 0x239   : > { %v8404_v5 = vpop.xlane.xlu0 %1652 }
 0x23a   : > { %12445 = vst [vmem:[#allocation74_spill] sm:$0xff] %v8404_v5  ;;  %1778 = vperm.xlu0 %6323, %v8398_v30  }
 0x23b   : > { %12462 = vst [vmem:[#allocation91_spill] sm:$0xff] %v8472_v13 }
 0x23f   : > { %v8410_v14 = vpop.xlane.xlu2 %1649 }
 0x240   : > { %12447 = vst [vmem:[#allocation76_spill] sm:$0xff] %v8410_v14  ;;  %v8412_v58 = vpop.xlane.xlu1 %1655 }
 0x241   : > { %12448 = vst [vmem:[#allocation77_spill] sm:$0xff] %v8412_v58  ;;  %v8414_v55 = vpop.xlane.xlu0 %1661  ;;  %v8430_v58 = vadd.s32 32, %v8334_v43 }
 0x242   : > { %12449 = vst [vmem:[#allocation78_spill] sm:$0xff] %v8414_v55  ;;  %6330 = vset.pattern.permute.xlu0 %v8408_v3  ;;  %v8435_v3 = vadd.s32 104, %v8334_v43 }
 0x243   : > { %12453 = vst [vmem:[#allocation82_spill] sm:$0xff] %v8430_v58 }
 0x244   : > { %1772 = vperm.xlu2 %6322, %v8398_v30   ;;  %12454 = vst [vmem:[#allocation83_spill] sm:$0xff] %v8435_v3 }
 0x246   : > { %1784 = vperm.xlu1 %6324, %v8398_v30  }
 0x247   : > { %v8419_v33 = vpop.xlane.xlu2 %1658 }
 0x248   : > { %12450 = vst [vmem:[#allocation79_spill] sm:$0xff] %v8419_v33  ;;  %v8421_v40 = vpop.xlane.xlu1 %1664 }
 0x249   : > { %12451 = vst [vmem:[#allocation80_spill] sm:$0xff] %v8421_v40  ;;  %v8426_v63 = vpop.xlane.xlu0 %1670 }
 0x24a   : > { %1820 = vperm.xlu0 %6330, %v8398_v30  }
 0x24c   : > { %6325 = vset.pattern.permute.xlu2 %v8424_v56 }
 0x24e   : > { %6326 = vset.pattern.permute.xlu1 %v8430_v58  ;;  %v8451_v58 = vadd.s32 40, %v8334_v43 }
 0x24f   : > { %v8437_v33 = vpop.xlane.xlu2 %1667 }
 0x250   : > { %12455 = vst [vmem:[#allocation84_spill] sm:$0xff] %v8437_v33  ;;  %v8439_v40 = vpop.xlane.xlu1 %1673  ;;  %v8457_v33 = vadd.s32 48, %v8334_v43 }
 0x251   : > { %v8441_v60 = vpop.xlane.xlu0 %1679  ;;  %12457 = vst [vmem:[#allocation86_spill] sm:$0xff] %v8451_v58 }
 0x252   : > { %6335 = vset.pattern.permute.xlu0 %v8435_v3  ;;  %12459 = vst [vmem:[#allocation88_spill] sm:$0xff] %v8457_v33 }
 0x254   : > { %1790 = vperm.xlu2 %6325, %v8398_v30  }
 0x256   : > { %1796 = vperm.xlu1 %6326, %v8398_v30  }
 0x257   : > { %v8446_v14 = vpop.xlane.xlu2 %1676 }
 0x258   : > { %v8448_v56 = vpop.xlane.xlu1 %1682 }
 0x259   : > { %12456 = vst [vmem:[#allocation85_spill] sm:$0xff] %v8448_v56  ;;  %v8453_v21 = vpop.xlane.xlu0 %1688 }
 0x25a   : > { %12458 = vst [vmem:[#allocation87_spill] sm:$0xff] %v8453_v21  ;;  %1850 = vperm.xlu0 %6335, %v8398_v30  }
 0x25c   : > { %6327 = vset.pattern.permute.xlu2 %v8451_v58 }
 0x25e   : > { %6328 = vset.pattern.permute.xlu1 %v8457_v33  ;;  %v8479_v33 = vadd.s32 72, %v8334_v43 }
 0x25f   : > { %v8461_v3 = vpop.xlane.xlu2 %1685 }
 0x260   : > { %v8463_v5 = vpop.xlane.xlu1 %1691  ;;  %12465 = vst [vmem:[#allocation94_spill] sm:$0xff] %v8479_v33 }
 0x261   : > { %12460 = vst [vmem:[#allocation89_spill] sm:$0xff] %v8463_v5  ;;  %v8465_v6 = vpop.xlane.xlu0 %1697 }
 0x262   : > { %12461 = vst [vmem:[#allocation90_spill] sm:$0xff] %v8465_v6  ;;  %6338 = vset.pattern.permute.xlu0 %v8497_v2 }
 0x264   : > { %1802 = vperm.xlu2 %6327, %v8398_v30  }
 0x266   : > { %1808 = vperm.xlu1 %6328, %v8398_v30  }
 0x267   : > { %v8469_v21 = vpop.xlane.xlu2 %1694 }
 0x268   : > { %v8476_v58 = vpop.xlane.xlu1 %1700 }
 0x269   : > { %v8474_v50 = vpop.xlane.xlu0 %1706  ;;  %12464 = vst [vmem:[#allocation93_spill] sm:$0xff] %v8476_v58  ;;  %v8494_v58 = vadd.s32 80, %v8334_v43 }
 0x26a   : > { %12463 = vst [vmem:[#allocation92_spill] sm:$0xff] %v8474_v50 }
 0x26b   : > { %12470 = vst [vmem:[#allocation99_spill] sm:$0xff] %v8494_v58 }
 0x26c   : > { %6329 = vset.pattern.permute.xlu2 %v8472_v13 }
 0x26e   : > { %6331 = vset.pattern.permute.xlu1 %v8479_v33  ;;  %v8500_v33 = vadd.s32 88, %v8334_v43 }
 0x26f   : > { %v8483_v6 = vpop.xlane.xlu2 %1703 }
 0x270   : > { %12466 = vst [vmem:[#allocation95_spill] sm:$0xff] %v8483_v6  ;;  %v8487_v12 = vpop.xlane.xlu1 %1709 }
 0x271   : > { %v8485_v5 = vpop.xlane.xlu0 %1715  ;;  %12468 = vst [vmem:[#allocation97_spill] sm:$0xff] %v8487_v12 }
 0x272   : > { %12467 = vst [vmem:[#allocation96_spill] sm:$0xff] %v8485_v5 }
 0x273   : > { %12472 = vst [vmem:[#allocation101_spill] sm:$0xff] %v8500_v33 }
 0x274   : > { %1814 = vperm.xlu2 %6329, %v8398_v30  }
 0x276   : > { %1826 = vperm.xlu1 %6331, %v8398_v30  }
 0x277   : > { %v8491_v50 = vpop.xlane.xlu2 %1712 }
 0x278   : > { %12469 = vst [vmem:[#allocation98_spill] sm:$0xff] %v8491_v50  ;;  %v1719_v5 = vpop.xlane.xlu1 %1718 }
 0x279   : > { %v8503_v13 = vpop.xlane.xlu0 %1724 }
 0x27c   : > { %6332 = vset.pattern.permute.xlu2 %v8494_v58 }
 0x27e   : > { %6333 = vset.pattern.permute.xlu1 %v8500_v33 }
 0x27f   : > { %v1722_v6 = vpop.xlane.xlu2 %1721 }
 0x280   : > { %v1728_v55 = vpop.xlane.xlu1 %1727 }
 0x281   : > { %v8508_v50 = vpop.xlane.xlu0 %1733 }
 0x284   : > { %1832 = vperm.xlu2 %6332, %v8398_v30  }
 0x286   : > { %1838 = vperm.xlu1 %6333, %v8398_v30  }
 0x287   : > { %v8511_v12 = vpop.xlane.xlu2 %1730 }
 0x288   : > { %12473 = vst [vmem:[#allocation102_spill] sm:$0xff] %v8511_v12  ;;  %v8523_v15 = vpop.xlane.xlu1 %1736 }
 0x289   : > { %v1743_v33 = vpop.xlane.xlu0 %1742  ;;  %12477 = vst [vmem:[#allocation106_spill] sm:$0xff] %v8523_v15 }
 0x28c   : > { %6334 = vset.pattern.permute.xlu2 %v8514_v22 }
 0x28e   : > { %6336 = vset.pattern.permute.xlu1 %v8517_v26 }
 0x28f   : > { %v8521_v58 = vpop.xlane.xlu2 %1739 }
 0x290   : > { %12476 = vst [vmem:[#allocation105_spill] sm:$0xff] %v8521_v58  ;;  %v8531_v56 = vpop.xlane.xlu1 %1745 }
 0x291   : > { %v8529_v12 = vpop.xlane.xlu0 %1751  ;;  %12480 = vst [vmem:[#allocation109_spill] sm:$0xff] %v8531_v56 }
 0x292   : > { %12479 = vst [vmem:[#allocation108_spill] sm:$0xff] %v8529_v12 }
 0x294   : > { %1844 = vperm.xlu2 %6334, %v8398_v30  }
 0x296   : > { %1856 = vperm.xlu1 %6336, %v8398_v30  }
 0x297   : > { %v8527_v16 = vpop.xlane.xlu2 %1748 }
 0x298   : > { %12478 = vst [vmem:[#allocation107_spill] sm:$0xff] %v8527_v16  ;;  %v8539_v22 = vpop.xlane.xlu1 %1754 }
 0x299   : > { %v8536_v26 = vpop.xlane.xlu0 %1760 }
 0x29a   : > { %12481 = vst [vmem:[#allocation110_spill] sm:$0xff] %v8536_v26 }
 0x29c   : > { %6337 = vset.pattern.permute.xlu2 %v8497_v2 }
 0x29f   : > { %v8534_v43 = vpop.xlane.xlu2 %1757 }
 0x2a4   : > { %1862 = vperm.xlu2 %6337, %v8398_v30  }
 0x2a7   : > { %v1773_v15 = vpop.permute.xlu2 %1772 }
 0x2a8   : > { %v8542_v58 = vadd.f32 %v1773_v15, %v7873_v48  ;;  %v8545_v16 = vadd.f32 %v1773_v15, %v7927_v52  ;;  %v8548_v12 = vadd.f32 %v1773_v15, %v7924_v49  ;;  %v8551_v2 = vadd.f32 %v1773_v15, %v8160_v4 }
 0x2a9   : > { %v8554_v56 = vadd.f32 %v1773_v15, %v8268_v61  ;;  %v8557_v30 = vadd.f32 %v1773_v15, %v8377_v37  ;;  %v8560_v26 = vadd.f32 %v1773_v15, %v8426_v63  ;;  %v8562_v48 = vadd.f32 %v1773_v15, %v1719_v5 }
 0x2aa   : > { %12482 = vst [vmem:[#allocation111_spill] sm:$0xff] %v8542_v58 }
 0x2ab   : > { %12483 = vst [vmem:[#allocation112_spill] sm:$0xff] %v8545_v16 }
 0x2ac   : > { %12484 = vst [vmem:[#allocation113_spill] sm:$0xff] %v8548_v12  ;;  %v1779_v58 = vpop.permute.xlu0 %1778 }
 0x2ad   : > { %12485 = vst [vmem:[#allocation114_spill] sm:$0xff] %v8551_v2  ;;  %v8565_v52 = vadd.f32 %v1779_v58, %v7963_v19  ;;  %v8568_v49 = vadd.f32 %v1779_v58, %v7981_v18  ;;  %v8571_v4 = vadd.f32 %v1779_v58, %v7969_v47  ;;  %v8574_v61 = vadd.f32 %v1779_v58, %v8175_v42  ;;  %v8587_v18 = vpop.xlane.xlu1 %1763 }
 0x2ae   : > { %12486 = vst [vmem:[#allocation115_spill] sm:$0xff] %v8554_v56  ;;  %v8577_v37 = vadd.f32 %v1779_v58, %v8283_v9  ;;  %v8580_v63 = vadd.f32 %v1779_v58, %v8371_v8  ;;  %v8583_v15 = vadd.f32 %v1779_v58, %v8439_v40  ;;  %v8585_v19 = vadd.f32 %v1779_v58, %v1722_v6 }
 0x2af   : > { %12487 = vst [vmem:[#allocation116_spill] sm:$0xff] %v8557_v30  ;;  %v1791_v5 = vpop.permute.xlu2 %1790 }
 0x2b0   : > { %12488 = vst [vmem:[#allocation117_spill] sm:$0xff] %v8560_v26  ;;  %v8590_v47 = vadd.f32 %v1791_v5, %v8058_v7  ;;  %v8593_v42 = vadd.f32 %v1791_v5, %v8082_v45  ;;  %v8596_v9 = vadd.f32 %v1791_v5, %v8097_v27  ;;  %v8599_v8 = vadd.f32 %v1791_v5, %v8178_v25 }
 0x2b1   : > { %12489 = vst [vmem:[#allocation118_spill] sm:$0xff] %v8562_v48  ;;  %v8602_v40 = vadd.f32 %v1791_v5, %v8286_v39  ;;  %v8605_v6 = vadd.f32 %v1791_v5, %v8387_v34  ;;  %v8608_v58 = vadd.f32 %v1791_v5, %v8441_v60  ;;  %v8610_v7 = vadd.f32 %v1791_v5, %v1728_v55 }
 0x2b2   : > { %12490 = vst [vmem:[#allocation119_spill] sm:$0xff] %v8565_v52 }
 0x2b3   : > { %12491 = vst [vmem:[#allocation120_spill] sm:$0xff] %v8568_v49 }
 0x2b4   : > { %12492 = vst [vmem:[#allocation121_spill] sm:$0xff] %v8571_v4 }
 0x2b5   : > { %12493 = vst [vmem:[#allocation122_spill] sm:$0xff] %v8574_v61 }
 0x2b6   : > { %12494 = vst [vmem:[#allocation123_spill] sm:$0xff] %v8577_v37 }
 0x2b7   : > { %12495 = vst [vmem:[#allocation124_spill] sm:$0xff] %v8580_v63 }
 0x2b8   : > { %12496 = vst [vmem:[#allocation125_spill] sm:$0xff] %v8583_v15  ;;  %v1785_v48 = vpop.permute.xlu1 %1784 }
 0x2b9   : > { %12497 = vst [vmem:[#allocation126_spill] sm:$0xff] %v8585_v19  ;;  %v8613_v45 = vadd.f32 %v1785_v48, %v8005_v57  ;;  %v8616_v27 = vadd.f32 %v1785_v48, %v8023_v35  ;;  %v8619_v25 = vadd.f32 %v1785_v48, %v8041_v23  ;;  %v8622_v39 = vadd.f32 %v1785_v48, %v8190_v36 }
 0x2ba   : > { %12498 = vst [vmem:[#allocation127_spill] sm:$0xff] %v8590_v47  ;;  %v8625_v34 = vadd.f32 %v1785_v48, %v8271_v59  ;;  %v8628_v60 = vadd.f32 %v1785_v48, %v8380_v28  ;;  %v8631_v55 = vadd.f32 %v1785_v48, %v8446_v14  ;;  %v8634_v57 = vadd.f32 %v1785_v48, %v8503_v13 }
 0x2bb   : > { %12499 = vst [vmem:[#allocation128_spill] sm:$0xff] %v8593_v42 }
 0x2bc   : > { %12500 = vst [vmem:[#allocation129_spill] sm:$0xff] %v8596_v9  ;;  %v1821_v35 = vpop.permute.xlu0 %1820 }
 0x2bd   : > { %12501 = vst [vmem:[#allocation130_spill] sm:$0xff] %v8599_v8  ;;  %v8637_v5 = vadd.f32 %v1821_v35, %v8079_v44  ;;  %v8640_v23 = vadd.f32 %v1821_v35, %v8067_v38  ;;  %v8643_v36 = vadd.f32 %v1821_v35, %v8100_v10  ;;  %v8646_v59 = vadd.f32 %v1821_v35, %v8226_v46 }
 0x2be   : > { %12502 = vst [vmem:[#allocation131_spill] sm:$0xff] %v8602_v40  ;;  %v8649_v28 = vadd.f32 %v1821_v35, %v8307_v62  ;;  %v8652_v14 = vadd.f32 %v1821_v35, %v8402_v31  ;;  %v8655_v13 = vadd.f32 %v1821_v35, %v8469_v21  ;;  %v8657_v44 = vadd.f32 %v1821_v35, %v1743_v33  ;;  %v1803_v48 = vpop.permute.xlu2 %1802 }
 0x2bf   : > { %12503 = vst [vmem:[#allocation132_spill] sm:$0xff] %v8605_v6  ;;  %v8660_v38 = vadd.f32 %v1803_v48, %v7870_v1  ;;  %v8663_v10 = vadd.f32 %v1803_v48, %v7876_v51  ;;  %v8666_v46 = vadd.f32 %v1803_v48, %v7948_v24  ;;  %v8669_v62 = vadd.f32 %v1803_v48, %v8208_v54  ;;  %v12587_v6 = vld [vmem:[#allocation25_spill] sm:$0xff] }
 0x2c0   : > { %12504 = vst [vmem:[#allocation133_spill] sm:$0xff] %v8608_v58  ;;  %v8672_v31 = vadd.f32 %v1803_v48, %v8289_v29  ;;  %v8675_v21 = vadd.f32 %v1803_v48, %v8389_v32  ;;  %v8678_v33 = vadd.f32 %v1803_v48, %v8461_v3  ;;  %v8681_v1 = vadd.f32 %v1803_v48, %v8508_v50  ;;  %v12536_v50 = vld [vmem:[#allocation85_spill] sm:$0xff] }
 0x2c1   : > { %12505 = vst [vmem:[#allocation134_spill] sm:$0xff] %v8610_v7 }
 0x2c2   : > { %12506 = vst [vmem:[#allocation135_spill] sm:$0xff] %v8613_v45 }
 0x2c3   : > { %12507 = vst [vmem:[#allocation136_spill] sm:$0xff] %v8616_v27 }
 0x2c4   : > { %12508 = vst [vmem:[#allocation137_spill] sm:$0xff] %v8619_v25 }
 0x2c5   : > { %12509 = vst [vmem:[#allocation138_spill] sm:$0xff] %v8622_v39 }
 0x2c6   : > { %12510 = vst [vmem:[#allocation139_spill] sm:$0xff] %v8625_v34 }
 0x2c7   : > { %12511 = vst [vmem:[#allocation140_spill] sm:$0xff] %v8628_v60 }
 0x2c8   : > { %12512 = vst [vmem:[#allocation141_spill] sm:$0xff] %v8631_v55  ;;  %v1797_v51 = vpop.permute.xlu1 %1796 }
 0x2c9   : > { %12513 = vst [vmem:[#allocation142_spill] sm:$0xff] %v8634_v57  ;;  %v8684_v35 = vadd.f32 %v1797_v51, %v7891_v53  ;;  %v8687_v24 = vadd.f32 %v1797_v51, %v7888_v11  ;;  %v8690_v54 = vadd.f32 %v1797_v51, %v7894_v17  ;;  %v8693_v29 = vadd.f32 %v1797_v51, %v8193_v20  ;;  %v12538_v53 = vld [vmem:[#allocation102_spill] sm:$0xff]  ;;  %v12542_v17 = vld [vmem:[#allocation37_spill] sm:$0xff]  ;;  %v12544_v20 = vld [vmem:[#allocation44_spill] sm:$0xff] }
 0x2ca   : > { %12514 = vst [vmem:[#allocation143_spill] sm:$0xff] %v8637_v5  ;;  %v8696_v32 = vadd.f32 %v1797_v51, %v8301_v0  ;;  %v8699_v3 = vadd.f32 %v1797_v51, %v8383_v41  ;;  %v8702_v48 = vadd.f32 %v1797_v51, %v12536_v50  ;;  %v12546_v0 = vld [vmem:[#allocation57_spill] sm:$0xff]  ;;  %v12548_v41 = vld [vmem:[#allocation70_spill] sm:$0xff] }
 0x2cb   : > { %12515 = vst [vmem:[#allocation144_spill] sm:$0xff] %v8640_v23  ;;  %v12550_v50 = vld [vmem:[#allocation78_spill] sm:$0xff] }
 0x2cc   : > { %12516 = vst [vmem:[#allocation145_spill] sm:$0xff] %v8643_v36  ;;  %v1851_v11 = vpop.permute.xlu0 %1850 }
 0x2cd   : > { %12517 = vst [vmem:[#allocation146_spill] sm:$0xff] %v8646_v59  ;;  %v8711_v7 = vadd.f32 %v1851_v11, %v12542_v17  ;;  %v8714_v19 = vadd.f32 %v1851_v11, %v12544_v20  ;;  %v8720_v58 = vadd.f32 %v1851_v11, %v12548_v41  ;;  %v12557_v20 = vld [vmem:[#allocation35_spill] sm:$0xff]  ;;  %v12561_v41 = vld [vmem:[#allocation52_spill] sm:$0xff] }
 0x2ce   : > { %12518 = vst [vmem:[#allocation147_spill] sm:$0xff] %v8649_v28  ;;  %v1815_v17 = vpop.permute.xlu2 %1814 }
 0x2cf   : > { %12519 = vst [vmem:[#allocation148_spill] sm:$0xff] %v8652_v14  ;;  %v8735_v26 = vadd.f32 %v1815_v17, %v12557_v20  ;;  %v8741_v55 = vadd.f32 %v1815_v17, %v12561_v41  ;;  %v12571_v14 = vld [vmem:[#allocation29_spill] sm:$0xff] }
 0x2d0   : > { %12520 = vst [vmem:[#allocation149_spill] sm:$0xff] %v8655_v13  ;;  %v8717_v13 = vadd.f32 %v1851_v11, %v12546_v0  ;;  %v12559_v0 = vld [vmem:[#allocation38_spill] sm:$0xff]  ;;  %v12575_v41 = vld [vmem:[#allocation33_spill] sm:$0xff] }
 0x2d1   : > { %12521 = vst [vmem:[#allocation150_spill] sm:$0xff] %v8657_v44  ;;  %v8705_v44 = vadd.f32 %v1797_v51, %v12538_v53  ;;  %v12552_v51 = vld [vmem:[#allocation97_spill] sm:$0xff]  ;;  %v8738_v15 = vadd.f32 %v1815_v17, %v12559_v0  ;;  %v12573_v0 = vld [vmem:[#allocation31_spill] sm:$0xff] }
 0x2d2   : > { %12522 = vst [vmem:[#allocation151_spill] sm:$0xff] %v8660_v38  ;;  %v8726_v53 = vadd.f32 %v1851_v11, %v12552_v51  ;;  %v12565_v51 = vld [vmem:[#allocation72_spill] sm:$0xff] }
 0x2d3   : > { %12523 = vst [vmem:[#allocation152_spill] sm:$0xff] %v8663_v10 }
 0x2d4   : > { %12524 = vst [vmem:[#allocation153_spill] sm:$0xff] %v8666_v46 }
 0x2d5   : > { %12525 = vst [vmem:[#allocation154_spill] sm:$0xff] %v8669_v62 }
 0x2d6   : > { %12526 = vst [vmem:[#allocation155_spill] sm:$0xff] %v8672_v31 }
 0x2d7   : > { %12527 = vst [vmem:[#allocation156_spill] sm:$0xff] %v8675_v21 }
 0x2d8   : > { %12528 = vst [vmem:[#allocation157_spill] sm:$0xff] %v8678_v33  ;;  %v1809_v20 = vpop.permute.xlu1 %1808 }
 0x2d9   : > { %12529 = vst [vmem:[#allocation158_spill] sm:$0xff] %v8681_v1  ;;  %v12540_v1 = vld [vmem:[#allocation39_spill] sm:$0xff]  ;;  %v8759_v21 = vadd.f32 %v1809_v20, %v12573_v0  ;;  %v8762_v63 = vadd.f32 %v1809_v20, %v12575_v41  ;;  %v12589_v41 = vld [vmem:[#allocation24_spill] sm:$0xff] }
 0x2da   : > { %12530 = vst [vmem:[#allocation159_spill] sm:$0xff] %v8684_v35  ;;  %v8708_v57 = vadd.f32 %v1851_v11, %v12540_v1  ;;  %v8729_v1 = vadd.f32 %v1851_v11, %v8534_v43  ;;  %v12567_v43 = vld [vmem:[#allocation89_spill] sm:$0xff] }
 0x2db   : > { %12531 = vst [vmem:[#allocation160_spill] sm:$0xff] %v8687_v24 }
 0x2dc   : > { %12532 = vst [vmem:[#allocation161_spill] sm:$0xff] %v8690_v54 }
 0x2dd   : > { %12533 = vst [vmem:[#allocation162_spill] sm:$0xff] %v8693_v29 }
 0x2de   : > { %12534 = vst [vmem:[#allocation163_spill] sm:$0xff] %v8696_v32  ;;  %v1833_v0 = vpop.permute.xlu2 %1832  ;;  %v12619_v32 = vld [vmem:[#allocation32_spill] sm:$0xff] }
 0x2df   : > { %12535 = vst [vmem:[#allocation164_spill] sm:$0xff] %v8699_v3  ;;  %v8756_v3 = vadd.f32 %v1809_v20, %v12571_v14  ;;  %v12585_v14 = vld [vmem:[#allocation106_spill] sm:$0xff]  ;;  %v8780_v30 = vadd.f32 %v1833_v0, %v12587_v6  ;;  %v12601_v6 = vld [vmem:[#allocation107_spill] sm:$0xff] }
 0x2e0   : > { %12537 = vst [vmem:[#allocation85_spill] sm:$0xff] %v8702_v48  ;;  %v8723_v48 = vadd.f32 %v1851_v11, %v12550_v50  ;;  %v12563_v50 = vld [vmem:[#allocation61_spill] sm:$0xff]  ;;  %v8750_v11 = vadd.f32 %v1815_v17, %v12567_v43 }
 0x2e1   : > { %12539 = vst [vmem:[#allocation102_spill] sm:$0xff] %v8705_v44  ;;  %v12555_v44 = vld [vmem:[#allocation36_spill] sm:$0xff]  ;;  %v12581_v43 = vld [vmem:[#allocation73_spill] sm:$0xff] }
 0x2e2   : > { %12541 = vst [vmem:[#allocation39_spill] sm:$0xff] %v8708_v57  ;;  %v8732_v33 = vadd.f32 %v1815_v17, %v12555_v44  ;;  %v12569_v44 = vld [vmem:[#allocation105_spill] sm:$0xff] }
 0x2e3   : > { %12543 = vst [vmem:[#allocation37_spill] sm:$0xff] %v8711_v7 }
 0x2e4   : > { %12545 = vst [vmem:[#allocation44_spill] sm:$0xff] %v8714_v19 }
 0x2e5   : > { %12547 = vst [vmem:[#allocation57_spill] sm:$0xff] %v8717_v13 }
 0x2e6   : > { %12549 = vst [vmem:[#allocation70_spill] sm:$0xff] %v8720_v58  ;;  %v8783_v58 = vadd.f32 %v1833_v0, %v12589_v41 }
 0x2e7   : > { %12551 = vst [vmem:[#allocation78_spill] sm:$0xff] %v8723_v48  ;;  %v8744_v48 = vadd.f32 %v1815_v17, %v12563_v50  ;;  %v12577_v50 = vld [vmem:[#allocation51_spill] sm:$0xff] }
 0x2e8   : > { %12553 = vst [vmem:[#allocation97_spill] sm:$0xff] %v8726_v53  ;;  %v8747_v53 = vadd.f32 %v1815_v17, %v12565_v51  ;;  %v8765_v60 = vadd.f32 %v1809_v20, %v12577_v50  ;;  %v12579_v51 = vld [vmem:[#allocation60_spill] sm:$0xff]  ;;  %v12591_v50 = vld [vmem:[#allocation26_spill] sm:$0xff]  ;;  %v1827_v41 = vpop.permute.xlu1 %1826 }
 0x2e9   : > { %12554 = vst [vmem:[#allocation165_spill] sm:$0xff] %v8729_v1  ;;  %v8753_v1 = vadd.f32 %v1815_v17, %v12569_v44  ;;  %v12583_v17 = vld [vmem:[#allocation87_spill] sm:$0xff]  ;;  %v8786_v28 = vadd.f32 %v1833_v0, %v12591_v50 }
 0x2ea   : > { %12556 = vst [vmem:[#allocation36_spill] sm:$0xff] %v8732_v33  ;;  %v8774_v44 = vadd.f32 %v1809_v20, %v12583_v17  ;;  %v12597_v17 = vld [vmem:[#allocation74_spill] sm:$0xff]  ;;  %v12605_v50 = vld [vmem:[#allocation43_spill] sm:$0xff] }
 0x2eb   : > { %12558 = vst [vmem:[#allocation35_spill] sm:$0xff] %v8735_v26  ;;  %v8807_v34 = vadd.f32 %v1827_v41, %v12605_v50 }
 0x2ec   : > { %12560 = vst [vmem:[#allocation38_spill] sm:$0xff] %v8738_v15 }
 0x2ed   : > { %12562 = vst [vmem:[#allocation52_spill] sm:$0xff] %v8741_v55 }
 0x2ee   : > { %12564 = vst [vmem:[#allocation61_spill] sm:$0xff] %v8744_v48  ;;  %v1845_v50 = vpop.permute.xlu2 %1844 }
 0x2ef   : > { %12566 = vst [vmem:[#allocation72_spill] sm:$0xff] %v8747_v53  ;;  %v8768_v53 = vadd.f32 %v1809_v20, %v12579_v51  ;;  %v12593_v51 = vld [vmem:[#allocation54_spill] sm:$0xff]  ;;  %v8828_v56 = vadd.f32 %v1845_v50, %v12619_v32  ;;  %v8849_v32 = vadd.f32 %v1845_v50, %v8539_v22  ;;  %v12646_v22 = vld [vmem:[#allocation95_spill] sm:$0xff] }
 0x2f0   : > { %12568 = vst [vmem:[#allocation89_spill] sm:$0xff] %v8750_v11  ;;  %v8771_v11 = vadd.f32 %v1809_v20, %v12581_v43  ;;  %v8789_v31 = vadd.f32 %v1833_v0, %v12593_v51  ;;  %v12595_v43 = vld [vmem:[#allocation66_spill] sm:$0xff]  ;;  %v12607_v51 = vld [vmem:[#allocation45_spill] sm:$0xff] }
 0x2f1   : > { %12570 = vst [vmem:[#allocation105_spill] sm:$0xff] %v8753_v1  ;;  %v8777_v1 = vadd.f32 %v1809_v20, %v12585_v14  ;;  %v12599_v20 = vld [vmem:[#allocation93_spill] sm:$0xff]  ;;  %v8810_v40 = vadd.f32 %v1827_v41, %v12607_v51  ;;  %v12621_v51 = vld [vmem:[#allocation34_spill] sm:$0xff] }
 0x2f2   : > { %12572 = vst [vmem:[#allocation29_spill] sm:$0xff] %v8756_v3  ;;  %v8798_v14 = vadd.f32 %v1833_v0, %v12599_v20  ;;  %v12613_v20 = vld [vmem:[#allocation76_spill] sm:$0xff]  ;;  %v8831_v37 = vadd.f32 %v1845_v50, %v12621_v51 }
 0x2f3   : > { %12574 = vst [vmem:[#allocation31_spill] sm:$0xff] %v8759_v21 }
 0x2f4   : > { %12576 = vst [vmem:[#allocation33_spill] sm:$0xff] %v8762_v63 }
 0x2f5   : > { %12578 = vst [vmem:[#allocation51_spill] sm:$0xff] %v8765_v60  ;;  %v12650_v60 = vld [vmem:[#allocation47_spill] sm:$0xff] }
 0x2f6   : > { %12580 = vst [vmem:[#allocation60_spill] sm:$0xff] %v8768_v53  ;;  %v12603_v53 = vld [vmem:[#allocation41_spill] sm:$0xff] }
 0x2f7   : > { %12582 = vst [vmem:[#allocation73_spill] sm:$0xff] %v8771_v11  ;;  %v8792_v11 = vadd.f32 %v1833_v0, %v12595_v43  ;;  %v8804_v48 = vadd.f32 %v1827_v41, %v12603_v53  ;;  %v12609_v43 = vld [vmem:[#allocation53_spill] sm:$0xff] }
 0x2f8   : > { %12584 = vst [vmem:[#allocation87_spill] sm:$0xff] %v8774_v44  ;;  %v8795_v44 = vadd.f32 %v1833_v0, %v12597_v17  ;;  %v12611_v17 = vld [vmem:[#allocation62_spill] sm:$0xff]  ;;  %v12617_v53 = vld [vmem:[#allocation109_spill] sm:$0xff]  ;;  %v1839_v51 = vpop.permute.xlu1 %1838 }
 0x2f9   : > { %12586 = vst [vmem:[#allocation106_spill] sm:$0xff] %v8777_v1  ;;  %v8801_v1 = vadd.f32 %v1833_v0, %v12601_v6  ;;  %v12615_v0 = vld [vmem:[#allocation90_spill] sm:$0xff] }
 0x2fa   : > { %12588 = vst [vmem:[#allocation25_spill] sm:$0xff] %v8780_v30  ;;  %v8822_v6 = vadd.f32 %v1827_v41, %v12615_v0  ;;  %v12629_v0 = vld [vmem:[#allocation79_spill] sm:$0xff] }
 0x2fb   : > { %12590 = vst [vmem:[#allocation24_spill] sm:$0xff] %v8783_v58 }
 0x2fc   : > { %12592 = vst [vmem:[#allocation26_spill] sm:$0xff] %v8786_v28 }
 0x2fd   : > { %12594 = vst [vmem:[#allocation54_spill] sm:$0xff] %v8789_v31 }
 0x2fe   : > { %12596 = vst [vmem:[#allocation66_spill] sm:$0xff] %v8792_v11  ;;  %v8813_v11 = vadd.f32 %v1827_v41, %v12609_v43  ;;  %v12623_v43 = vld [vmem:[#allocation48_spill] sm:$0xff] }
 0x2ff   : > { %12598 = vst [vmem:[#allocation74_spill] sm:$0xff] %v8795_v44  ;;  %v8816_v44 = vadd.f32 %v1827_v41, %v12611_v17  ;;  %v8834_v13 = vadd.f32 %v1845_v50, %v12623_v43  ;;  %v12625_v17 = vld [vmem:[#allocation55_spill] sm:$0xff] }
 0x300   : > { %12600 = vst [vmem:[#allocation93_spill] sm:$0xff] %v8798_v14  ;;  %v8819_v14 = vadd.f32 %v1827_v41, %v12613_v20  ;;  %v12627_v20 = vld [vmem:[#allocation67_spill] sm:$0xff] }
 0x301   : > { %12602 = vst [vmem:[#allocation107_spill] sm:$0xff] %v8801_v1  ;;  %v8825_v1 = vadd.f32 %v1827_v41, %v12617_v53  ;;  %v12631_v41 = vld [vmem:[#allocation92_spill] sm:$0xff]  ;;  %v12636_v43 = vld [vmem:[#allocation27_spill] sm:$0xff] }
 0x302   : > { %12604 = vst [vmem:[#allocation41_spill] sm:$0xff] %v8804_v48  ;;  %v8846_v53 = vadd.f32 %v1845_v50, %v12631_v41  ;;  %v8855_v31 = vadd.f32 %v1839_v51, %v12636_v43  ;;  %v12644_v41 = vld [vmem:[#allocation77_spill] sm:$0xff]  ;;  %v1863_v43 = vpop.permute.xlu2 %1862 }
 0x303   : > { %12606 = vst [vmem:[#allocation43_spill] sm:$0xff] %v8807_v34  ;;  %v8876_v55 = vadd.f32 %v1863_v43, %v12650_v60  ;;  %v8897_v60 = vadd.f32 %v1863_v43, %v8587_v18  ;;  %v12677_v18 = vld [vmem:[#allocation98_spill] sm:$0xff] }
 0x304   : > { %12608 = vst [vmem:[#allocation45_spill] sm:$0xff] %v8810_v40 }
 0x305   : > { %12610 = vst [vmem:[#allocation53_spill] sm:$0xff] %v8813_v11 }
 0x306   : > { %12612 = vst [vmem:[#allocation62_spill] sm:$0xff] %v8816_v44  ;;  %v8837_v44 = vadd.f32 %v1845_v50, %v12625_v17  ;;  %v12638_v17 = vld [vmem:[#allocation30_spill] sm:$0xff] }
 0x307   : > { %12614 = vst [vmem:[#allocation76_spill] sm:$0xff] %v8819_v14  ;;  %v8840_v14 = vadd.f32 %v1845_v50, %v12627_v20  ;;  %v12640_v20 = vld [vmem:[#allocation56_spill] sm:$0xff] }
 0x308   : > { %12616 = vst [vmem:[#allocation90_spill] sm:$0xff] %v8822_v6  ;;  %v8843_v6 = vadd.f32 %v1845_v50, %v12629_v0  ;;  %v12642_v0 = vld [vmem:[#allocation63_spill] sm:$0xff]  ;;  %v8870_v50 = vadd.f32 %v1839_v51, %v12646_v22  ;;  %v12660_v22 = vld [vmem:[#allocation84_spill] sm:$0xff] }
 0x309   : > { %12618 = vst [vmem:[#allocation109_spill] sm:$0xff] %v8825_v1  ;;  %v12634_v1 = vld [vmem:[#allocation28_spill] sm:$0xff] }
 0x30a   : > { %12620 = vst [vmem:[#allocation32_spill] sm:$0xff] %v8828_v56  ;;  %v8852_v11 = vadd.f32 %v1839_v51, %v12634_v1  ;;  %v12648_v1 = vld [vmem:[#allocation108_spill] sm:$0xff] }
 0x30b   : > { %12622 = vst [vmem:[#allocation34_spill] sm:$0xff] %v8831_v37 }
 0x30c   : > { %12624 = vst [vmem:[#allocation48_spill] sm:$0xff] %v8834_v13 }
 0x30d   : > { %12626 = vst [vmem:[#allocation55_spill] sm:$0xff] %v8837_v44  ;;  %v8858_v44 = vadd.f32 %v1839_v51, %v12638_v17  ;;  %v12652_v17 = vld [vmem:[#allocation49_spill] sm:$0xff] }
 0x30e   : > { %12628 = vst [vmem:[#allocation67_spill] sm:$0xff] %v8840_v14  ;;  %v8861_v14 = vadd.f32 %v1839_v51, %v12640_v20  ;;  %v8879_v59 = vadd.f32 %v1863_v43, %v12652_v17  ;;  %v12654_v20 = vld [vmem:[#allocation50_spill] sm:$0xff]  ;;  %v1857_v17 = vpop.permute.xlu1 %1856 }
 0x30f   : > { %12630 = vst [vmem:[#allocation79_spill] sm:$0xff] %v8843_v6  ;;  %v8864_v6 = vadd.f32 %v1839_v51, %v12642_v0  ;;  %v12656_v0 = vld [vmem:[#allocation58_spill] sm:$0xff] }
 0x310   : > { %12632 = vst [vmem:[#allocation92_spill] sm:$0xff] %v8846_v53  ;;  %v8867_v53 = vadd.f32 %v1839_v51, %v12644_v41  ;;  %v12658_v41 = vld [vmem:[#allocation71_spill] sm:$0xff] }
 0x311   : > { %12633 = vst [vmem:[#allocation166_spill] sm:$0xff] %v8849_v32  ;;  %v8873_v32 = vadd.f32 %v1839_v51, %v12648_v1  ;;  %v12662_v51 = vld [vmem:[#allocation96_spill] sm:$0xff] }
 0x312   : > { %12635 = vst [vmem:[#allocation28_spill] sm:$0xff] %v8852_v11  ;;  %v8894_v1 = vadd.f32 %v1863_v43, %v12662_v51  ;;  %v12675_v51 = vld [vmem:[#allocation80_spill] sm:$0xff] }
 0x313   : > { %12637 = vst [vmem:[#allocation27_spill] sm:$0xff] %v8855_v31 }
 0x314   : > { %12639 = vst [vmem:[#allocation30_spill] sm:$0xff] %v8858_v44 }
 0x315   : > { %12641 = vst [vmem:[#allocation56_spill] sm:$0xff] %v8861_v14  ;;  %v8882_v14 = vadd.f32 %v1863_v43, %v12654_v20  ;;  %v12667_v20 = vld [vmem:[#allocation40_spill] sm:$0xff] }
 0x316   : > { %12643 = vst [vmem:[#allocation63_spill] sm:$0xff] %v8864_v6  ;;  %v8885_v6 = vadd.f32 %v1863_v43, %v12656_v0  ;;  %v8903_v29 = vadd.f32 %v1857_v17, %v12667_v20  ;;  %v12669_v0 = vld [vmem:[#allocation46_spill] sm:$0xff] }
 0x317   : > { %12645 = vst [vmem:[#allocation77_spill] sm:$0xff] %v8867_v53  ;;  %v8888_v53 = vadd.f32 %v1863_v43, %v12658_v41  ;;  %v12671_v41 = vld [vmem:[#allocation59_spill] sm:$0xff] }
 0x318   : > { %12647 = vst [vmem:[#allocation95_spill] sm:$0xff] %v8870_v50  ;;  %v8891_v50 = vadd.f32 %v1863_v43, %v12660_v22  ;;  %v12673_v22 = vld [vmem:[#allocation68_spill] sm:$0xff]  ;;  %v8918_v43 = vadd.f32 %v1857_v17, %v12677_v18 }
 0x319   : > { %12649 = vst [vmem:[#allocation108_spill] sm:$0xff] %v8873_v32  ;;  %v12665_v32 = vld [vmem:[#allocation42_spill] sm:$0xff] }
 0x31a   : > { %12651 = vst [vmem:[#allocation47_spill] sm:$0xff] %v8876_v55  ;;  %v8900_v8 = vadd.f32 %v1857_v17, %v12665_v32  ;;  %v12679_v32 = vld [vmem:[#allocation110_spill] sm:$0xff] }
 0x31b   : > { %12653 = vst [vmem:[#allocation49_spill] sm:$0xff] %v8879_v59 }
 0x31c   : > { %12655 = vst [vmem:[#allocation50_spill] sm:$0xff] %v8882_v14 }
 0x31d   : > { %12657 = vst [vmem:[#allocation58_spill] sm:$0xff] %v8885_v6  ;;  %v8906_v6 = vadd.f32 %v1857_v17, %v12669_v0 }
 0x31e   : > { %12659 = vst [vmem:[#allocation71_spill] sm:$0xff] %v8888_v53  ;;  %v8909_v53 = vadd.f32 %v1857_v17, %v12671_v41 }
 0x31f   : > { %12661 = vst [vmem:[#allocation84_spill] sm:$0xff] %v8891_v50  ;;  %v8912_v50 = vadd.f32 %v1857_v17, %v12673_v22 }
 0x320   : > { %12663 = vst [vmem:[#allocation96_spill] sm:$0xff] %v8894_v1  ;;  %v8915_v1 = vadd.f32 %v1857_v17, %v12675_v51 }
 0x321   : > { %12664 = vst [vmem:[#allocation167_spill] sm:$0xff] %v8897_v60  ;;  %v8921_v60 = vadd.f32 %v1857_v17, %v12679_v32 }
 0x322   : > { %12666 = vst [vmem:[#allocation42_spill] sm:$0xff] %v8900_v8 }
 0x323   : > { %12668 = vst [vmem:[#allocation40_spill] sm:$0xff] %v8903_v29 }
 0x324   : > { %12670 = vst [vmem:[#allocation46_spill] sm:$0xff] %v8906_v6 }
 0x325   : > { %12672 = vst [vmem:[#allocation59_spill] sm:$0xff] %v8909_v53  ;;  %2011 = sbr.rel (%p6218_p4) target bundleno = 1270 (0x4f6), region = 72 }
 0x326   : > { %12674 = vst [vmem:[#allocation68_spill] sm:$0xff] %v8912_v50 }
 0x327   : > { %12676 = vst [vmem:[#allocation80_spill] sm:$0xff] %v8915_v1 }
 0x328   : > { %12678 = vst [vmem:[#allocation98_spill] sm:$0xff] %v8918_v43 }
 0x329   : > { %12680 = vst [vmem:[#allocation110_spill] sm:$0xff] %v8921_v60 }
 0x32a   : > { %v7340_v20 = vmov 0   ;;  %v12681_v0 = vld [vmem:[#allocation111_spill] sm:$0xff]  ;;  %vm2530_vm3 = vcmask 130112   ;;  %vm2534_vm4 = vcmask 195712   ;;  %vm2538_vm5 = vcmask 261312  }
 0x32b   : > { %6602 = vset.pattern.permute.xlu2 %v7340_v20  ;;  %6601 = vset.pattern.permute.xlu1 %v7340_v20  ;;  %vm2542_vm6 = vcmask 326912   ;;  %vm2546_vm7 = vcmask 392512   ;;  %vm2550_vm8 = vcmask 458112   ;;  %vm2554_vm9 = vcmask 523712  }
 0x32c   : > { %6600 = vset.pattern.permute.xlu0 %v7340_v20  ;;  %2154 = vperm.xlu2 %6602, %v8684_v35   ;;  %v12682_v20 = vlaneseq  ;;  %vm2558_vm10 = vcmask 589312   ;;  %vm2562_vm11 = vcmask 654912   ;;  %vm2566_vm12 = vcmask 720512  }
 0x32d   : > { %2148 = vperm.xlu1 %6601, %v8613_v45   ;;  %2142 = vperm.xlu0 %6600, %v12681_v0   ;;  %vm2570_vm13 = vcmask 786112   ;;  %vm2574_vm14 = vcmask 851712   ;;  %vm2578_vm15 = vcmask 917312   ;;  %vm2582_vm0 = vcmask 982912  }
 0x32e   : > { %v8974_v0 = vand.u32 127, %v12682_v20  ;;  %vm2586_vm2 = vcmask 1048512   ;;  %vm2805_vm1 = vcmask 1041409  }
 0x330   : > { %v8991_v20 = vadd.s32 4294967264, %v8974_v0 }
 0x334   : > { %2157 = vperm.xlu2 %6602, %v8660_v38  }
 0x335   : > { %2151 = vperm.xlu1 %6601, %v8590_v47   ;;  %2145 = vperm.xlu0 %6600, %v8565_v52  }
 0x33c   : > { %2166 = vperm.xlu2 %6602, %v8637_v5  }
 0x33d   : > { %2163 = vperm.xlu1 %6601, %v8732_v33   ;;  %2160 = vperm.xlu0 %6600, %v8756_v3  }
 0x344   : > { %2175 = vperm.xlu2 %6602, %v8852_v11  }
 0x345   : > { %2172 = vperm.xlu1 %6601, %v8780_v30   ;;  %2169 = vperm.xlu0 %6600, %v8804_v48  }
 0x34c   : > { %2184 = vperm.xlu2 %6602, %v8900_v8  }
 0x34d   : > { %2181 = vperm.xlu1 %6601, %v8708_v57   ;;  %2178 = vperm.xlu0 %6600, %v8828_v56  }
 0x354   : > { %2193 = vperm.xlu2 %6602, %v8568_v49  }
 0x355   : > { %2190 = vperm.xlu1 %6601, %v8545_v16   ;;  %2187 = vperm.xlu0 %6600, %v8876_v55  }
 0x35c   : > { %2202 = vperm.xlu2 %6602, %v8687_v24  }
 0x35d   : > { %2199 = vperm.xlu1 %6601, %v8593_v42   ;;  %2196 = vperm.xlu0 %6600, %v8616_v27  }
 0x364   : > { %2211 = vperm.xlu2 %6602, %v8735_v26  }
 0x365   : > { %2208 = vperm.xlu1 %6601, %v8759_v21   ;;  %2205 = vperm.xlu0 %6600, %v8663_v10  }
 0x36c   : > { %2220 = vperm.xlu2 %6602, %v8783_v58  }
 0x36d   : > { %2217 = vperm.xlu1 %6601, %v8807_v34   ;;  %2214 = vperm.xlu0 %6600, %v8640_v23  }
 0x374   : > { %2229 = vperm.xlu2 %6602, %v8711_v7  }
 0x375   : > { %2226 = vperm.xlu1 %6601, %v8831_v37   ;;  %2223 = vperm.xlu0 %6600, %v8855_v31   ;;  %v12689_v31 = vld [vmem:[#allocation54_spill] sm:$0xff] }
 0x37c   : > { %2238 = vperm.xlu2 %6602, %v8548_v12   ;;  %v9065_v12 = vadd.s32 4294967176, %v8974_v0 }
 0x37d   : > { %2235 = vperm.xlu1 %6601, %v8879_v59   ;;  %2232 = vperm.xlu0 %6600, %v8903_v29   ;;  %v12686_v29 = vld [vmem:[#allocation52_spill] sm:$0xff] }
 0x384   : > { %2247 = vperm.xlu2 %6602, %v8596_v9  }
 0x385   : > { %2244 = vperm.xlu1 %6601, %v8619_v25   ;;  %2241 = vperm.xlu0 %6600, %v8571_v4  }
 0x386   : > { %v2155_v17 = vpop.permute.xlu2 %2154 }
 0x387   : > { %v2541_v4 = vperm.slane %v2155_v17, %v8991_v20 }
 0x38c   : > { %2256 = vperm.xlu2 %6602, %v8762_v63  }
 0x38d   : > { %2253 = vperm.xlu1 %6601, %v8666_v46   ;;  %2250 = vperm.xlu0 %6600, %v8690_v54  }
 0x38e   : > { %v2158_v41 = vpop.permute.xlu2 %2157 }
 0x394   : > { %2265 = vperm.xlu2 %6602, %v8810_v40   ;;  %v8994_v40 = vadd.s32 4294967256, %v8974_v0 }
 0x395   : > { %2262 = vperm.xlu1 %6601, %v8643_v36   ;;  %2259 = vperm.xlu0 %6600, %v8738_v15   ;;  %v8978_v36 = vadd.s32 4294967288, %v8974_v0  ;;  %v8981_v15 = vadd.s32 4294967280, %v8974_v0 }
 0x396   : > { %v2167_v22 = vpop.permute.xlu2 %2166  ;;  %v2545_v9 = vperm.slane %v2158_v41, %v8994_v40 }
 0x39c   : > { %2274 = vperm.xlu2 %6602, %v8834_v13  }
 0x39d   : > { %2271 = vperm.xlu1 %6601, %v8858_v44   ;;  %2268 = vperm.xlu0 %6600, %v8786_v28   ;;  %v8988_v44 = vadd.s32 4294967272, %v8974_v0 }
 0x39e   : > { %v8971_v51 = vpop.permute.xlu2 %2175 }
 0x39f   : > { %v2149_v18 = vpop.permute.xlu1 %2148  ;;  %v2143_v32 = vpop.permute.xlu0 %2142 }
 0x3a0   : > { %v2527_v54 = vperm.slane %v2143_v32, %v8974_v0 }
 0x3a4   : > { %2283 = vperm.xlu2 %6602, %v8882_v14  }
 0x3a5   : > { %2280 = vperm.xlu1 %6601, %v8906_v6   ;;  %2277 = vperm.xlu0 %6600, %v8714_v19   ;;  %v2533_v19 = vperm.slane %v2149_v18, %v8981_v15  ;;  %v9010_v18 = vadd.s32 4294967248, %v8974_v0 }
 0x3a6   : > { %v8985_v28 = vpop.permute.xlu2 %2184 }
 0x3a7   : > { %v2152_v13 = vpop.permute.xlu1 %2151  ;;  %v2146_v14 = vpop.permute.xlu0 %2145 }
 0x3a8   : > { %v2529_v6 = vperm.slane %v2146_v14, %v8978_v36  ;;  %v2537_v46 = vperm.slane %v2152_v13, %v8988_v44  ;;  %v9007_v14 = vadd.s32 4294967240, %v8974_v0 }
 0x3aa   : > { %v2531_v63 = vsel %vm2530_vm3, %v2529_v6, %v2527_v54 }
 0x3ab   : > { %v2535_v25 = vsel %vm2534_vm4, %v2533_v19, %v2531_v63  ;;  %v9016_v63 = vadd.s32 4294967232, %v8974_v0 }
 0x3ac   : > { %v2539_v32 = vsel %vm2538_vm5, %v2537_v46, %v2535_v25  ;;  %2292 = vperm.xlu2 %6602, %v8622_v39  }
 0x3ad   : > { %2289 = vperm.xlu1 %6601, %v8574_v61   ;;  %2286 = vperm.xlu0 %6600, %v8551_v2   ;;  %v2543_v13 = vsel %vm2542_vm6, %v2541_v4, %v2539_v32  ;;  %v2557_v41 = vperm.slane %v2167_v22, %v9016_v63  ;;  %v9026_v32 = vadd.s32 4294967216, %v8974_v0  ;;  %v9035_v22 = vadd.s32 4294967208, %v8974_v0 }
 0x3ae   : > { %v2194_v19 = vpop.permute.xlu2 %2193  ;;  %v2547_v25 = vsel %vm2546_vm7, %v2545_v9, %v2543_v13  ;;  %v9030_v13 = vadd.s32 4294967224, %v8974_v0  ;;  %v9045_v61 = vadd.s32 4294967192, %v8974_v0 }
 0x3af   : > { %v2164_v46 = vpop.permute.xlu1 %2163  ;;  %v2161_v54 = vpop.permute.xlu0 %2160 }
 0x3b0   : > { %v2553_v6 = vperm.slane %v2164_v46, %v9007_v14  ;;  %v2549_v17 = vperm.slane %v2161_v54, %v9010_v18  ;;  %v12683_v46 = vld [vmem:[#allocation162_spill] sm:$0xff] }
 0x3b1   : > { %v12684_v54 = vld [vmem:[#allocation130_spill] sm:$0xff] }
 0x3b2   : > { %v2551_v2 = vsel %vm2550_vm8, %v2549_v17, %v2547_v25 }
 0x3b3   : > { %v2555_v4 = vsel %vm2554_vm9, %v2553_v6, %v2551_v2 }
 0x3b4   : > { %2301 = vperm.xlu2 %6602, %v8669_v62   ;;  %v2559_v9 = vsel %vm2558_vm10, %v2557_v41, %v2555_v4  ;;  %v2569_v41 = vperm.slane %v8971_v51, %v9035_v22  ;;  %v9054_v51 = vadd.s32 4294967184, %v8974_v0 }
 0x3b5   : > { %2298 = vperm.xlu1 %6601, %v12683_v46   ;;  %2295 = vperm.xlu0 %6600, %v12684_v54   ;;  %v12685_v54 = vld [vmem:[#allocation146_spill] sm:$0xff] }
 0x3b6   : > { %v2203_v25 = vpop.permute.xlu2 %2202 }
 0x3b7   : > { %v2173_v17 = vpop.permute.xlu1 %2172  ;;  %v2170_v2 = vpop.permute.xlu0 %2169 }
 0x3b8   : > { %v2565_v6 = vperm.slane %v2173_v17, %v9026_v32  ;;  %v2561_v62 = vperm.slane %v2170_v2, %v9030_v13  ;;  %v9049_v17 = vadd.s32 4294967200, %v8974_v0  ;;  %v12687_v2 = vld [vmem:[#allocation51_spill] sm:$0xff] }
 0x3ba   : > { %v2563_v4 = vsel %vm2562_vm11, %v2561_v62, %v2559_v9 }
 0x3bb   : > { %v2567_v46 = vsel %vm2566_vm12, %v2565_v6, %v2563_v4 }
 0x3bc   : > { %2310 = vperm.xlu2 %6602, %v12685_v54   ;;  %v2571_v39 = vsel %vm2570_vm13, %v2569_v41, %v2567_v46  ;;  %v2581_v41 = vperm.slane %v8985_v28, %v9054_v51  ;;  %v2589_v28 = vperm.slane %v2194_v19, %v8978_v36 }
 0x3bd   : > { %2307 = vperm.xlu1 %6601, %v12686_v29   ;;  %2304 = vperm.xlu0 %6600, %v12687_v2   ;;  %v12688_v2 = vld [vmem:[#allocation56_spill] sm:$0xff] }
 0x3be   : > { %v2212_v62 = vpop.permute.xlu2 %2211 }
 0x3bf   : > { %v2182_v9 = vpop.permute.xlu1 %2181  ;;  %v2179_v6 = vpop.permute.xlu0 %2178 }
 0x3c0   : > { %v2577_v4 = vperm.slane %v2182_v9, %v9045_v61  ;;  %v2573_v54 = vperm.slane %v2179_v6, %v9049_v17  ;;  %v12690_v9 = vld [vmem:[#allocation53_spill] sm:$0xff] }
 0x3c2   : > { %v2575_v29 = vsel %vm2574_vm14, %v2573_v54, %v2571_v39 }
 0x3c3   : > { %v2579_v46 = vsel %vm2578_vm15, %v2577_v4, %v2575_v29  ;;  %v12691_v29 = vld [vmem:[#allocation57_spill] sm:$0xff] }
 0x3c4   : > { %2319 = vperm.xlu2 %6602, %v12688_v2   ;;  %v2583_v59 = vsel %vm2582_vm0, %v2581_v41, %v2579_v46 }
 0x3c5   : > { %2316 = vperm.xlu1 %6601, %v12689_v31   ;;  %2313 = vperm.xlu0 %6600, %v12690_v9   ;;  %v12692_v31 = vld [vmem:[#allocation55_spill] sm:$0xff] }
 0x3c6   : > { %v2221_v6 = vpop.permute.xlu2 %2220 }
 0x3c7   : > { %v2191_v37 = vpop.permute.xlu1 %2190  ;;  %v2188_v7 = vpop.permute.xlu0 %2187 }
 0x3c8   : > { %v2588_v39 = vperm.slane %v2191_v37, %v8974_v0  ;;  %v2585_v4 = vperm.slane %v2188_v7, %v9065_v12  ;;  %v2595_v37 = vperm.slane %v2203_v25, %v8991_v20  ;;  %v2601_v25 = vperm.slane %v2212_v62, %v9007_v14 }
 0x3c9   : > { %v2607_v62 = vperm.slane %v2221_v6, %v9026_v32 }
 0x3ca   : > { %v2590_v54 = vsel %vm2530_vm3, %v2589_v28, %v2588_v39  ;;  %v2587_v41 = vsel %vm2586_vm2, %v2585_v4, %v2583_v59  ;;  %v12693_v59 = vld [vmem:[#allocation123_spill] sm:$0xff] }
 0x3cb   : > { %v12694_v4 = vld [vmem:[#allocation115_spill] sm:$0xff] }
 0x3cc   : > { %2328 = vperm.xlu2 %6602, %v8909_v53  }
 0x3cd   : > { %2325 = vperm.xlu1 %6601, %v12691_v29   ;;  %2322 = vperm.xlu0 %6600, %v12692_v31   ;;  %v12695_v29 = vld [vmem:[#allocation58_spill] sm:$0xff] }
 0x3ce   : > { %v2230_v46 = vpop.permute.xlu2 %2229 }
 0x3cf   : > { %v2200_v2 = vpop.permute.xlu1 %2199  ;;  %v2197_v9 = vpop.permute.xlu0 %2196  ;;  %v2613_v6 = vperm.slane %v2230_v46, %v9045_v61 }
 0x3d0   : > { %v2593_v23 = vperm.slane %v2200_v2, %v8988_v44  ;;  %v2591_v19 = vperm.slane %v2197_v9, %v8981_v15 }
 0x3d2   : > { %v2592_v7 = vsel %vm2534_vm4, %v2591_v19, %v2590_v54  ;;  %v12696_v19 = vld [vmem:[#allocation163_spill] sm:$0xff] }
 0x3d3   : > { %v2594_v28 = vsel %vm2538_vm5, %v2593_v23, %v2592_v7  ;;  %v12697_v7 = vld [vmem:[#allocation131_spill] sm:$0xff] }
 0x3d4   : > { %2337 = vperm.xlu2 %6602, %v12693_v59   ;;  %v2596_v39 = vsel %vm2542_vm6, %v2595_v37, %v2594_v28  ;;  %v12698_v28 = vld [vmem:[#allocation139_spill] sm:$0xff] }
 0x3d5   : > { %2334 = vperm.xlu1 %6601, %v12694_v4   ;;  %2331 = vperm.xlu0 %6600, %v12695_v29  }
 0x3d6   : > { %v2239_v31 = vpop.permute.xlu2 %2238 }
 0x3d7   : > { %v2209_v53 = vpop.permute.xlu1 %2208  ;;  %v2206_v34 = vpop.permute.xlu0 %2205 }
 0x3d8   : > { %v2599_v2 = vperm.slane %v2209_v53, %v9010_v18  ;;  %v2597_v9 = vperm.slane %v2206_v34, %v8994_v40 }
 0x3da   : > { %v2598_v54 = vsel %vm2546_vm7, %v2597_v9, %v2596_v39  ;;  %v12699_v9 = vld [vmem:[#allocation61_spill] sm:$0xff] }
 0x3db   : > { %v2600_v23 = vsel %vm2550_vm8, %v2599_v2, %v2598_v54  ;;  %v12700_v54 = vld [vmem:[#allocation60_spill] sm:$0xff] }
 0x3dc   : > { %2346 = vperm.xlu2 %6602, %v12696_v19   ;;  %v2602_v37 = vsel %vm2554_vm9, %v2601_v25, %v2600_v23  ;;  %v12701_v23 = vld [vmem:[#allocation155_spill] sm:$0xff] }
 0x3dd   : > { %2343 = vperm.xlu1 %6601, %v12697_v7   ;;  %2340 = vperm.xlu0 %6600, %v12698_v28  }
 0x3de   : > { %v2248_v59 = vpop.permute.xlu2 %2247 }
 0x3df   : > { %v2218_v4 = vpop.permute.xlu1 %2217  ;;  %v2215_v29 = vpop.permute.xlu0 %2214 }
 0x3e0   : > { %v2605_v53 = vperm.slane %v2218_v4, %v9030_v13  ;;  %v2603_v34 = vperm.slane %v2215_v29, %v9016_v63 }
 0x3e2   : > { %v2604_v39 = vsel %vm2558_vm10, %v2603_v34, %v2602_v37  ;;  %v12702_v34 = vld [vmem:[#allocation66_spill] sm:$0xff] }
 0x3e3   : > { %v2606_v2 = vsel %vm2562_vm11, %v2605_v53, %v2604_v39  ;;  %v12703_v39 = vld [vmem:[#allocation62_spill] sm:$0xff] }
 0x3e4   : > { %2355 = vperm.xlu2 %6602, %v12699_v9   ;;  %v2608_v25 = vsel %vm2566_vm12, %v2607_v62, %v2606_v2  ;;  %v12704_v2 = vld [vmem:[#allocation147_spill] sm:$0xff] }
 0x3e5   : > { %2352 = vperm.xlu1 %6601, %v12700_v54   ;;  %2349 = vperm.xlu0 %6600, %v12701_v23  }
 0x3e6   : > { %v2257_v19 = vpop.permute.xlu2 %2256 }
 0x3e7   : > { %v2227_v7 = vpop.permute.xlu1 %2226  ;;  %v2224_v28 = vpop.permute.xlu0 %2223 }
 0x3e8   : > { %v2611_v4 = vperm.slane %v2227_v7, %v9049_v17  ;;  %v2609_v29 = vperm.slane %v2224_v28, %v9035_v22 }
 0x3ea   : > { %v2610_v37 = vsel %vm2570_vm13, %v2609_v29, %v2608_v25  ;;  %v12705_v29 = vld [vmem:[#allocation70_spill] sm:$0xff] }
 0x3eb   : > { %v2612_v53 = vsel %vm2574_vm14, %v2611_v4, %v2610_v37  ;;  %v12707_v37 = vld [vmem:[#allocation63_spill] sm:$0xff] }
 0x3ec   : > { %2364 = vperm.xlu2 %6602, %v12702_v34   ;;  %v2614_v62 = vsel %vm2578_vm15, %v2613_v6, %v2612_v53  ;;  %v12706_v6 = vld [vmem:[#allocation67_spill] sm:$0xff] }
 0x3ed   : > { %2361 = vperm.xlu1 %6601, %v12703_v39   ;;  %2358 = vperm.xlu0 %6600, %v12704_v2   ;;  %v2619_v2 = vperm.slane %v2239_v31, %v8974_v0 }
 0x3ee   : > { %v2266_v9 = vpop.permute.xlu2 %2265 }
 0x3ef   : > { %v2236_v54 = vpop.permute.xlu1 %2235  ;;  %v2233_v23 = vpop.permute.xlu0 %2232 }
 0x3f0   : > { %v2617_v7 = vperm.slane %v2236_v54, %v9065_v12  ;;  %v2615_v28 = vperm.slane %v2233_v23, %v9054_v51 }
 0x3f2   : > { %v2616_v46 = vsel %vm2582_vm0, %v2615_v28, %v2614_v62  ;;  %v2624_v62 = vperm.slane %v2248_v59, %v8988_v44  ;;  %v12708_v28 = vld [vmem:[#allocation116_spill] sm:$0xff]  ;;  %v2630_v59 = vperm.slane %v2257_v19, %v9010_v18  ;;  %v2636_v19 = vperm.slane %v2266_v9, %v9030_v13 }
 0x3f3   : > { %v2618_v25 = vsel %vm2586_vm2, %v2617_v7, %v2616_v46 }
 0x3f4   : > { %v9117_v4 = vsel %vm2805_vm1, %v2618_v25, %v2587_v41  ;;  %2373 = vperm.xlu2 %6602, %v12705_v29   ;;  %v12709_v25 = vld [vmem:[#allocation71_spill] sm:$0xff]  ;;  %vm2807_vm1 = vcmask 1042434  }
 0x3f5   : > { %2370 = vperm.xlu1 %6601, %v12706_v6   ;;  %2367 = vperm.xlu0 %6600, %v12707_v37  }
 0x3f6   : > { %v2275_v53 = vpop.permute.xlu2 %2274 }
 0x3f7   : > { %v2245_v34 = vpop.permute.xlu1 %2244  ;;  %v2242_v39 = vpop.permute.xlu0 %2241  ;;  %v2642_v9 = vperm.slane %v2275_v53, %v9049_v17 }
 0x3f8   : > { %v2622_v54 = vperm.slane %v2245_v34, %v8981_v15  ;;  %v2620_v23 = vperm.slane %v2242_v39, %v8978_v36 }
 0x3fa   : > { %v2621_v41 = vsel %vm2530_vm3, %v2620_v23, %v2619_v2 }
 0x3fb   : > { %v2623_v7 = vsel %vm2534_vm4, %v2622_v54, %v2621_v41  ;;  %v12710_v54 = vld [vmem:[#allocation132_spill] sm:$0xff] }
 0x3fc   : > { %2382 = vperm.xlu2 %6602, %v12708_v28   ;;  %v2625_v46 = vsel %vm2538_vm5, %v2624_v62, %v2623_v7  ;;  %v12711_v62 = vld [vmem:[#allocation140_spill] sm:$0xff] }
 0x3fd   : > { %2379 = vperm.xlu1 %6601, %v12709_v25   ;;  %2376 = vperm.xlu0 %6600, %v8912_v50   ;;  %v12712_v41 = vld [vmem:[#allocation124_spill] sm:$0xff] }
 0x3fe   : > { %v2284_v29 = vpop.permute.xlu2 %2283 }
 0x3ff   : > { %v2254_v31 = vpop.permute.xlu1 %2253  ;;  %v2251_v6 = vpop.permute.xlu0 %2250  ;;  %v2648_v53 = vperm.slane %v2284_v29, %v9065_v12 }
 0x400   : > { %v2628_v37 = vperm.slane %v2254_v31, %v8994_v40  ;;  %v2626_v34 = vperm.slane %v2251_v6, %v8991_v20 }
 0x402   : > { %v2627_v39 = vsel %vm2542_vm6, %v2626_v34, %v2625_v46  ;;  %v12713_v34 = vld [vmem:[#allocation73_spill] sm:$0xff] }
 0x403   : > { %v2629_v2 = vsel %vm2546_vm7, %v2628_v37, %v2627_v39  ;;  %v12714_v39 = vld [vmem:[#allocation156_spill] sm:$0xff] }
 0x404   : > { %2391 = vperm.xlu2 %6602, %v12710_v54   ;;  %v2631_v23 = vsel %vm2550_vm8, %v2630_v59, %v2629_v2  ;;  %v12715_v2 = vld [vmem:[#allocation164_spill] sm:$0xff] }
 0x405   : > { %2388 = vperm.xlu1 %6601, %v12711_v62   ;;  %2385 = vperm.xlu0 %6600, %v12712_v41  }
 0x406   : > { %v2293_v7 = vpop.permute.xlu2 %2292 }
 0x407   : > { %v2263_v28 = vpop.permute.xlu1 %2262  ;;  %v2260_v25 = vpop.permute.xlu0 %2259 }
 0x408   : > { %v2634_v31 = vperm.slane %v2263_v28, %v9016_v63  ;;  %v2632_v6 = vperm.slane %v2260_v25, %v9007_v14 }
 0x40a   : > { %v2633_v46 = vsel %vm2554_vm9, %v2632_v6, %v2631_v23  ;;  %v12716_v6 = vld [vmem:[#allocation76_spill] sm:$0xff] }
 0x40b   : > { %v2635_v37 = vsel %vm2558_vm10, %v2634_v31, %v2633_v46  ;;  %v12717_v46 = vld [vmem:[#allocation148_spill] sm:$0xff] }
 0x40c   : > { %2400 = vperm.xlu2 %6602, %v12713_v34   ;;  %v2637_v59 = vsel %vm2562_vm11, %v2636_v19, %v2635_v37  ;;  %v12718_v37 = vld [vmem:[#allocation72_spill] sm:$0xff] }
 0x40d   : > { %2397 = vperm.xlu1 %6601, %v12714_v39   ;;  %2394 = vperm.xlu0 %6600, %v12715_v2  }
 0x40e   : > { %v2302_v54 = vpop.permute.xlu2 %2301 }
 0x40f   : > { %v2272_v62 = vpop.permute.xlu1 %2271  ;;  %v2269_v41 = vpop.permute.xlu0 %2268 }
 0x410   : > { %v2640_v28 = vperm.slane %v2272_v62, %v9035_v22  ;;  %v2638_v25 = vperm.slane %v2269_v41, %v9026_v32 }
 0x412   : > { %v2639_v23 = vsel %vm2566_vm12, %v2638_v25, %v2637_v59 }
 0x413   : > { %v2641_v31 = vsel %vm2570_vm13, %v2640_v28, %v2639_v23  ;;  %v12720_v23 = vld [vmem:[#allocation77_spill] sm:$0xff] }
 0x414   : > { %2409 = vperm.xlu2 %6602, %v12716_v6   ;;  %v2643_v19 = vsel %vm2574_vm14, %v2642_v9, %v2641_v31  ;;  %v12719_v9 = vld [vmem:[#allocation79_spill] sm:$0xff]  ;;  %v12721_v31 = vld [vmem:[#allocation74_spill] sm:$0xff] }
 0x415   : > { %2406 = vperm.xlu1 %6601, %v12717_v46   ;;  %2403 = vperm.xlu0 %6600, %v12718_v37  }
 0x416   : > { %v2311_v34 = vpop.permute.xlu2 %2310 }
 0x417   : > { %v2281_v39 = vpop.permute.xlu1 %2280  ;;  %v2278_v2 = vpop.permute.xlu0 %2277 }
 0x418   : > { %v2646_v62 = vperm.slane %v2281_v39, %v9054_v51  ;;  %v2644_v41 = vperm.slane %v2278_v2, %v9045_v61  ;;  %v2653_v2 = vperm.slane %v2293_v7, %v8981_v15 }
 0x41a   : > { %v2645_v59 = vsel %vm2578_vm15, %v2644_v41, %v2643_v19 }
 0x41b   : > { %v2647_v28 = vsel %vm2582_vm0, %v2646_v62, %v2645_v59  ;;  %v12723_v59 = vld [vmem:[#allocation78_spill] sm:$0xff] }
 0x41c   : > { %v2649_v25 = vsel %vm2586_vm2, %v2648_v53, %v2647_v28  ;;  %2418 = vperm.xlu2 %6602, %v12719_v9   ;;  %v12722_v53 = vld [vmem:[#allocation84_spill] sm:$0xff] }
 0x41d   : > { %2415 = vperm.xlu1 %6601, %v12720_v23   ;;  %2412 = vperm.xlu0 %6600, %v12721_v31   ;;  %v9169_v6 = vsel %vm2807_vm1, %v2649_v25, %v9117_v4  ;;  %v2659_v31 = vperm.slane %v2302_v54, %v8994_v40  ;;  %v2665_v54 = vperm.slane %v2311_v34, %v9016_v63  ;;  %vm2809_vm1 = vcmask 1043459  }
 0x41e   : > { %v2320_v46 = vpop.permute.xlu2 %2319 }
 0x41f   : > { %v2290_v37 = vpop.permute.xlu1 %2289  ;;  %v2287_v39 = vpop.permute.xlu0 %2286  ;;  %v2671_v34 = vperm.slane %v2320_v46, %v9035_v22 }
 0x420   : > { %v2651_v29 = vperm.slane %v2290_v37, %v8978_v36  ;;  %v2650_v19 = vperm.slane %v2287_v39, %v8974_v0  ;;  %v12724_v39 = vld [vmem:[#allocation141_spill] sm:$0xff] }
 0x422   : > { %v2652_v62 = vsel %vm2530_vm3, %v2651_v29, %v2650_v19  ;;  %v12725_v19 = vld [vmem:[#allocation125_spill] sm:$0xff] }
 0x423   : > { %v2654_v41 = vsel %vm2534_vm4, %v2653_v2, %v2652_v62  ;;  %v12726_v2 = vld [vmem:[#allocation117_spill] sm:$0xff] }
 0x424   : > { %2427 = vperm.xlu2 %6602, %v12722_v53  }
 0x425   : > { %2424 = vperm.xlu1 %6601, %v8915_v1   ;;  %2421 = vperm.xlu0 %6600, %v12723_v59  }
 0x426   : > { %v2329_v4 = vpop.permute.xlu2 %2328 }
 0x427   : > { %v2299_v28 = vpop.permute.xlu1 %2298  ;;  %v2296_v25 = vpop.permute.xlu0 %2295  ;;  %v2677_v46 = vperm.slane %v2329_v4, %v9054_v51 }
 0x428   : > { %v2657_v9 = vperm.slane %v2299_v28, %v8991_v20  ;;  %v2655_v23 = vperm.slane %v2296_v25, %v8988_v44 }
 0x42a   : > { %v2656_v7 = vsel %vm2538_vm5, %v2655_v23, %v2654_v41  ;;  %v12727_v23 = vld [vmem:[#allocation157_spill] sm:$0xff] }
 0x42b   : > { %v2658_v37 = vsel %vm2542_vm6, %v2657_v9, %v2656_v7  ;;  %v12728_v7 = vld [vmem:[#allocation85_spill] sm:$0xff] }
 0x42c   : > { %2436 = vperm.xlu2 %6602, %v12724_v39   ;;  %v2660_v29 = vsel %vm2546_vm7, %v2659_v31, %v2658_v37  ;;  %v12729_v37 = vld [vmem:[#allocation133_spill] sm:$0xff] }
 0x42d   : > { %2433 = vperm.xlu1 %6601, %v12725_v19   ;;  %2430 = vperm.xlu0 %6600, %v12726_v2  }
 0x42e   : > { %v2338_v62 = vpop.permute.xlu2 %2337 }
 0x42f   : > { %v2308_v53 = vpop.permute.xlu1 %2307  ;;  %v2305_v59 = vpop.permute.xlu0 %2304 }
 0x430   : > { %v2663_v28 = vperm.slane %v2308_v53, %v9007_v14  ;;  %v2661_v25 = vperm.slane %v2305_v59, %v9010_v18 }
 0x432   : > { %v2662_v41 = vsel %vm2550_vm8, %v2661_v25, %v2660_v29  ;;  %v12730_v25 = vld [vmem:[#allocation149_spill] sm:$0xff] }
 0x433   : > { %v2664_v9 = vsel %vm2554_vm9, %v2663_v28, %v2662_v41  ;;  %v12731_v41 = vld [vmem:[#allocation89_spill] sm:$0xff] }
 0x434   : > { %2445 = vperm.xlu2 %6602, %v12727_v23   ;;  %v2666_v31 = vsel %vm2558_vm10, %v2665_v54, %v2664_v9  ;;  %v12732_v9 = vld [vmem:[#allocation87_spill] sm:$0xff] }
 0x435   : > { %2442 = vperm.xlu1 %6601, %v12728_v7   ;;  %2439 = vperm.xlu0 %6600, %v12729_v37  }
 0x436   : > { %v2347_v39 = vpop.permute.xlu2 %2346 }
 0x437   : > { %v2317_v19 = vpop.permute.xlu1 %2316  ;;  %v2314_v2 = vpop.permute.xlu0 %2313 }
 0x438   : > { %v2669_v53 = vperm.slane %v2317_v19, %v9026_v32  ;;  %v2667_v59 = vperm.slane %v2314_v2, %v9030_v13 }
 0x43a   : > { %v2668_v29 = vsel %vm2562_vm11, %v2667_v59, %v2666_v31  ;;  %v12733_v59 = vld [vmem:[#allocation95_spill] sm:$0xff] }
 0x43b   : > { %v2670_v28 = vsel %vm2566_vm12, %v2669_v53, %v2668_v29  ;;  %v12734_v29 = vld [vmem:[#allocation93_spill] sm:$0xff] }
 0x43c   : > { %2454 = vperm.xlu2 %6602, %v12730_v25   ;;  %v2672_v54 = vsel %vm2570_vm13, %v2671_v34, %v2670_v28  ;;  %v12735_v28 = vld [vmem:[#allocation90_spill] sm:$0xff] }
 0x43d   : > { %2451 = vperm.xlu1 %6601, %v12731_v41   ;;  %2448 = vperm.xlu0 %6600, %v12732_v9  }
 0x43e   : > { %v2356_v23 = vpop.permute.xlu2 %2355 }
 0x43f   : > { %v2326_v7 = vpop.permute.xlu1 %2325  ;;  %v2323_v37 = vpop.permute.xlu0 %2322 }
 0x440   : > { %v2675_v19 = vperm.slane %v2326_v7, %v9045_v61  ;;  %v2673_v2 = vperm.slane %v2323_v37, %v9049_v17  ;;  %v2682_v7 = vperm.slane %v2338_v62, %v8978_v36 }
 0x442   : > { %v2674_v31 = vsel %vm2574_vm14, %v2673_v2, %v2672_v54 }
 0x443   : > { %v2676_v53 = vsel %vm2578_vm15, %v2675_v19, %v2674_v31  ;;  %v12737_v31 = vld [vmem:[#allocation92_spill] sm:$0xff] }
 0x444   : > { %2463 = vperm.xlu2 %6602, %v12733_v59   ;;  %v2678_v34 = vsel %vm2582_vm0, %v2677_v46, %v2676_v53  ;;  %v12736_v46 = vld [vmem:[#allocation97_spill] sm:$0xff] }
 0x445   : > { %2460 = vperm.xlu1 %6601, %v12734_v29   ;;  %2457 = vperm.xlu0 %6600, %v12735_v28  }
 0x446   : > { %v2365_v25 = vpop.permute.xlu2 %2364 }
 0x447   : > { %v2335_v41 = vpop.permute.xlu1 %2334  ;;  %v2332_v9 = vpop.permute.xlu0 %2331 }
 0x448   : > { %v2681_v37 = vperm.slane %v2335_v41, %v8974_v0  ;;  %v2679_v4 = vperm.slane %v2332_v9, %v9065_v12  ;;  %v2688_v41 = vperm.slane %v2347_v39, %v8991_v20  ;;  %v2694_v39 = vperm.slane %v2356_v23, %v9007_v14 }
 0x449   : > { %v2700_v23 = vperm.slane %v2365_v25, %v9026_v32 }
 0x44a   : > { %v2683_v54 = vsel %vm2530_vm3, %v2682_v7, %v2681_v37  ;;  %v2680_v19 = vsel %vm2586_vm2, %v2679_v4, %v2678_v34  ;;  %v12739_v37 = vld [vmem:[#allocation118_spill] sm:$0xff]  ;;  %v12740_v4 = vld [vmem:[#allocation96_spill] sm:$0xff] }
 0x44b   : > { %v2810_v2 = vsel %vm2809_vm1, %v2680_v19, %v9169_v6  ;;  %v12738_v6 = vld [vmem:[#allocation126_spill] sm:$0xff]  ;;  %vm2811_vm1 = vcmask 1044484  }
 0x44c   : > { %2472 = vperm.xlu2 %6602, %v8918_v43  }
 0x44d   : > { %2469 = vperm.xlu1 %6601, %v12736_v46   ;;  %2466 = vperm.xlu0 %6600, %v12737_v31  }
 0x44e   : > { %v2374_v53 = vpop.permute.xlu2 %2373 }
 0x44f   : > { %v2344_v59 = vpop.permute.xlu1 %2343  ;;  %v2341_v62 = vpop.permute.xlu0 %2340  ;;  %v2706_v25 = vperm.slane %v2374_v53, %v9045_v61 }
 0x450   : > { %v2686_v29 = vperm.slane %v2344_v59, %v8988_v44  ;;  %v2684_v28 = vperm.slane %v2341_v62, %v8981_v15 }
 0x452   : > { %v2685_v9 = vsel %vm2534_vm4, %v2684_v28, %v2683_v54  ;;  %v12741_v28 = vld [vmem:[#allocation102_spill] sm:$0xff] }
 0x453   : > { %v2687_v34 = vsel %vm2538_vm5, %v2686_v29, %v2685_v9  ;;  %v12742_v9 = vld [vmem:[#allocation134_spill] sm:$0xff] }
 0x454   : > { %2481 = vperm.xlu2 %6602, %v12738_v6   ;;  %v2689_v7 = vsel %vm2542_vm6, %v2688_v41, %v2687_v34  ;;  %v12743_v34 = vld [vmem:[#allocation142_spill] sm:$0xff] }
 0x455   : > { %2478 = vperm.xlu1 %6601, %v12739_v37   ;;  %2475 = vperm.xlu0 %6600, %v12740_v4  }
 0x456   : > { %v2383_v19 = vpop.permute.xlu2 %2382 }
 0x457   : > { %v2353_v46 = vpop.permute.xlu1 %2352  ;;  %v2350_v31 = vpop.permute.xlu0 %2349 }
 0x458   : > { %v2692_v59 = vperm.slane %v2353_v46, %v9010_v18  ;;  %v2690_v62 = vperm.slane %v2350_v31, %v8994_v40 }
 0x45a   : > { %v2691_v54 = vsel %vm2546_vm7, %v2690_v62, %v2689_v7  ;;  %v12744_v62 = vld [vmem:[#allocation105_spill] sm:$0xff] }
 0x45b   : > { %v2693_v29 = vsel %vm2550_vm8, %v2692_v59, %v2691_v54  ;;  %v12745_v54 = vld [vmem:[#allocation106_spill] sm:$0xff] }
 0x45c   : > { %2490 = vperm.xlu2 %6602, %v12741_v28   ;;  %v2695_v41 = vsel %vm2554_vm9, %v2694_v39, %v2693_v29  ;;  %v12746_v29 = vld [vmem:[#allocation158_spill] sm:$0xff] }
 0x45d   : > { %2487 = vperm.xlu1 %6601, %v12742_v9   ;;  %2484 = vperm.xlu0 %6600, %v12743_v34  }
 0x45e   : > { %v2392_v4 = vpop.permute.xlu2 %2391 }
 0x45f   : > { %v2362_v6 = vpop.permute.xlu1 %2361  ;;  %v2359_v37 = vpop.permute.xlu0 %2358 }
 0x460   : > { %v2698_v46 = vperm.slane %v2362_v6, %v9030_v13  ;;  %v2696_v31 = vperm.slane %v2359_v37, %v9016_v63 }
 0x462   : > { %v2697_v7 = vsel %vm2558_vm10, %v2696_v31, %v2695_v41  ;;  %v12747_v31 = vld [vmem:[#allocation107_spill] sm:$0xff] }
 0x463   : > { %v2699_v59 = vsel %vm2562_vm11, %v2698_v46, %v2697_v7  ;;  %v12748_v7 = vld [vmem:[#allocation109_spill] sm:$0xff] }
 0x464   : > { %2499 = vperm.xlu2 %6602, %v12744_v62   ;;  %v2701_v39 = vsel %vm2566_vm12, %v2700_v23, %v2699_v59  ;;  %v12749_v59 = vld [vmem:[#allocation150_spill] sm:$0xff] }
 0x465   : > { %2496 = vperm.xlu1 %6601, %v12745_v54   ;;  %2493 = vperm.xlu0 %6600, %v12746_v29  }
 0x466   : > { %v2401_v37 = vpop.permute.xlu2 %2400 }
 0x467   : > { %v2371_v28 = vpop.permute.xlu1 %2370  ;;  %v2368_v9 = vpop.permute.xlu0 %2367 }
 0x468   : > { %v2704_v34 = vperm.slane %v2371_v28, %v9049_v17  ;;  %v2702_v6 = vperm.slane %v2368_v9, %v9035_v22 }
 0x46a   : > { %v2703_v41 = vsel %vm2570_vm13, %v2702_v6, %v2701_v39  ;;  %v12750_v6 = vld [vmem:[#allocation165_spill] sm:$0xff] }
 0x46b   : > { %v2705_v46 = vsel %vm2574_vm14, %v2704_v34, %v2703_v41  ;;  %v12752_v41 = vld [vmem:[#allocation108_spill] sm:$0xff] }
 0x46c   : > { %2508 = vperm.xlu2 %6602, %v12747_v31   ;;  %v2707_v23 = vsel %vm2578_vm15, %v2706_v25, %v2705_v46  ;;  %v12751_v25 = vld [vmem:[#allocation166_spill] sm:$0xff] }
 0x46d   : > { %2505 = vperm.xlu1 %6601, %v12748_v7   ;;  %2502 = vperm.xlu0 %6600, %v12749_v59   ;;  %v2712_v7 = vperm.slane %v2383_v19, %v8974_v0 }
 0x46e   : > { %v2410_v9 = vpop.permute.xlu2 %2409 }
 0x46f   : > { %v2380_v62 = vpop.permute.xlu1 %2379  ;;  %v2377_v54 = vpop.permute.xlu0 %2376 }
 0x470   : > { %v2710_v29 = vperm.slane %v2380_v62, %v9065_v12  ;;  %v2708_v28 = vperm.slane %v2377_v54, %v9054_v51 }
 0x472   : > { %v2709_v53 = vsel %vm2582_vm0, %v2708_v28, %v2707_v23  ;;  %v2717_v23 = vperm.slane %v2392_v4, %v8988_v44  ;;  %v12753_v28 = vld [vmem:[#allocation167_spill] sm:$0xff] }
 0x473   : > { %v2711_v39 = vsel %vm2586_vm2, %v2710_v29, %v2709_v53 }
 0x474   : > { %v2812_v34 = vsel %vm2811_vm1, %v2711_v39, %v2810_v2  ;;  %2517 = vperm.xlu2 %6602, %v12750_v6   ;;  %vm2813_vm1 = vcmask 1045509  }
 0x475   : > { %2514 = vperm.xlu1 %6601, %v12751_v25   ;;  %2511 = vperm.xlu0 %6600, %v12752_v41   ;;  %v2723_v41 = vperm.slane %v2401_v37, %v9010_v18 }
 0x476   : > { %v2419_v53 = vpop.permute.xlu2 %2418 }
 0x477   : > { %v2389_v46 = vpop.permute.xlu1 %2388  ;;  %v2386_v31 = vpop.permute.xlu0 %2385 }
 0x478   : > { %v2715_v59 = vperm.slane %v2389_v46, %v8981_v15  ;;  %v2713_v62 = vperm.slane %v2386_v31, %v8978_v36 }
 0x47a   : > { %v2714_v54 = vsel %vm2530_vm3, %v2713_v62, %v2712_v7 }
 0x47b   : > { %v2716_v2 = vsel %vm2534_vm4, %v2715_v59, %v2714_v54 }
 0x47c   : > { %v2718_v29 = vsel %vm2538_vm5, %v2717_v23, %v2716_v2  ;;  %v2729_v2 = vperm.slane %v2410_v9, %v9030_v13 }
 0x47d   : > { %2523 = vperm.xlu1 %6601, %v12753_v28   ;;  %2520 = vperm.xlu0 %6600, %v8921_v60  }
 0x47e   : > { %v2428_v62 = vpop.permute.xlu2 %2427 }
 0x47f   : > { %v2398_v39 = vpop.permute.xlu1 %2397  ;;  %v2395_v6 = vpop.permute.xlu0 %2394 }
 0x480   : > { %v2721_v19 = vperm.slane %v2398_v39, %v8994_v40  ;;  %v2719_v25 = vperm.slane %v2395_v6, %v8991_v20 }
 0x482   : > { %v2720_v4 = vsel %vm2542_vm6, %v2719_v25, %v2718_v29 }
 0x483   : > { %v2722_v46 = vsel %vm2546_vm7, %v2721_v19, %v2720_v4 }
 0x484   : > { %v2724_v31 = vsel %vm2550_vm8, %v2723_v41, %v2722_v46  ;;  %v2735_v41 = vperm.slane %v2419_v53, %v9049_v17 }
 0x486   : > { %v2437_v4 = vpop.permute.xlu2 %2436 }
 0x487   : > { %v2407_v7 = vpop.permute.xlu1 %2406  ;;  %v2404_v59 = vpop.permute.xlu0 %2403 }
 0x488   : > { %v2727_v23 = vperm.slane %v2407_v7, %v9016_v63  ;;  %v2725_v54 = vperm.slane %v2404_v59, %v9007_v14 }
 0x48a   : > { %v2726_v28 = vsel %vm2554_vm9, %v2725_v54, %v2724_v31 }
 0x48b   : > { %v2728_v39 = vsel %vm2558_vm10, %v2727_v23, %v2726_v28 }
 0x48c   : > { %v2730_v37 = vsel %vm2562_vm11, %v2729_v2, %v2728_v39  ;;  %v2741_v2 = vperm.slane %v2428_v62, %v9065_v12 }
 0x48e   : > { %v2446_v39 = vpop.permute.xlu2 %2445 }
 0x48f   : > { %v2416_v29 = vpop.permute.xlu1 %2415  ;;  %v2413_v6 = vpop.permute.xlu0 %2412 }
 0x490   : > { %v2733_v19 = vperm.slane %v2416_v29, %v9035_v22  ;;  %v2731_v25 = vperm.slane %v2413_v6, %v9026_v32 }
 0x492   : > { %v2732_v46 = vsel %vm2566_vm12, %v2731_v25, %v2730_v37 }
 0x493   : > { %v2734_v7 = vsel %vm2570_vm13, %v2733_v19, %v2732_v46 }
 0x494   : > { %v2736_v9 = vsel %vm2574_vm14, %v2735_v41, %v2734_v7 }
 0x496   : > { %v2455_v7 = vpop.permute.xlu2 %2454 }
 0x497   : > { %v2425_v31 = vpop.permute.xlu1 %2424  ;;  %v2422_v59 = vpop.permute.xlu0 %2421 }
 0x498   : > { %v2739_v23 = vperm.slane %v2425_v31, %v9054_v51  ;;  %v2737_v54 = vperm.slane %v2422_v59, %v9045_v61  ;;  %v2746_v59 = vperm.slane %v2437_v4, %v8981_v15 }
 0x49a   : > { %v2738_v28 = vsel %vm2578_vm15, %v2737_v54, %v2736_v9 }
 0x49b   : > { %v2740_v53 = vsel %vm2582_vm0, %v2739_v23, %v2738_v28 }
 0x49c   : > { %v2742_v37 = vsel %vm2586_vm2, %v2741_v2, %v2740_v53 }
 0x49d   : > { %v2814_v29 = vsel %vm2813_vm1, %v2742_v37, %v2812_v34  ;;  %vm2815_vm1 = vcmask 1046534  }
 0x49e   : > { %v2464_v53 = vpop.permute.xlu2 %2463 }
 0x49f   : > { %v2434_v6 = vpop.permute.xlu1 %2433  ;;  %v2431_v19 = vpop.permute.xlu0 %2430 }
 0x4a0   : > { %v2744_v25 = vperm.slane %v2434_v6, %v8978_v36  ;;  %v2743_v41 = vperm.slane %v2431_v19, %v8974_v0  ;;  %v2752_v19 = vperm.slane %v2446_v39, %v8994_v40 }
 0x4a2   : > { %v2745_v46 = vsel %vm2530_vm3, %v2744_v25, %v2743_v41 }
 0x4a3   : > { %v2747_v54 = vsel %vm2534_vm4, %v2746_v59, %v2745_v46  ;;  %v2758_v59 = vperm.slane %v2455_v7, %v9016_v63 }
 0x4a7   : > { %v2443_v31 = vpop.permute.xlu1 %2442  ;;  %v2440_v62 = vpop.permute.xlu0 %2439 }
 0x4a8   : > { %v2748_v9 = vperm.slane %v2440_v62, %v8988_v44  ;;  %v2750_v23 = vperm.slane %v2443_v31, %v8991_v20 }
 0x4aa   : > { %v2749_v34 = vsel %vm2538_vm5, %v2748_v9, %v2747_v54  ;;  %v2473_v54 = vpop.permute.xlu2 %2472 }
 0x4ab   : > { %v2751_v37 = vsel %vm2542_vm6, %v2750_v23, %v2749_v34 }
 0x4ac   : > { %v2753_v41 = vsel %vm2546_vm7, %v2752_v19, %v2751_v37 }
 0x4af   : > { %v2452_v2 = vpop.permute.xlu1 %2451  ;;  %v2449_v28 = vpop.permute.xlu0 %2448 }
 0x4b0   : > { %v2754_v6 = vperm.slane %v2449_v28, %v9010_v18  ;;  %v2756_v25 = vperm.slane %v2452_v2, %v9007_v14 }
 0x4b2   : > { %v2755_v4 = vsel %vm2550_vm8, %v2754_v6, %v2753_v41  ;;  %v2764_v6 = vperm.slane %v2464_v53, %v9035_v22 }
 0x4b3   : > { %v2757_v46 = vsel %vm2554_vm9, %v2756_v25, %v2755_v4  ;;  %v2482_v4 = vpop.permute.xlu2 %2481 }
 0x4b4   : > { %v2759_v34 = vsel %vm2558_vm10, %v2758_v59, %v2757_v46 }
 0x4b7   : > { %v2461_v31 = vpop.permute.xlu1 %2460  ;;  %v2458_v62 = vpop.permute.xlu0 %2457 }
 0x4b8   : > { %v2760_v9 = vperm.slane %v2458_v62, %v9030_v13  ;;  %v2762_v23 = vperm.slane %v2461_v31, %v9026_v32  ;;  %v2770_v62 = vperm.slane %v2473_v54, %v9054_v51 }
 0x4ba   : > { %v2761_v39 = vsel %vm2562_vm11, %v2760_v9, %v2759_v34 }
 0x4bb   : > { %v2763_v2 = vsel %vm2566_vm12, %v2762_v23, %v2761_v39  ;;  %v2491_v39 = vpop.permute.xlu2 %2490 }
 0x4bc   : > { %v2765_v41 = vsel %vm2570_vm13, %v2764_v6, %v2763_v2 }
 0x4bf   : > { %v2470_v28 = vpop.permute.xlu1 %2469  ;;  %v2467_v37 = vpop.permute.xlu0 %2466 }
 0x4c0   : > { %v2766_v19 = vperm.slane %v2467_v37, %v9049_v17  ;;  %v2768_v25 = vperm.slane %v2470_v28, %v9045_v61 }
 0x4c2   : > { %v2767_v7 = vsel %vm2574_vm14, %v2766_v19, %v2765_v41  ;;  %v2775_v19 = vperm.slane %v2482_v4, %v8978_v36 }
 0x4c3   : > { %v2769_v31 = vsel %vm2578_vm15, %v2768_v25, %v2767_v7 }
 0x4c4   : > { %v2771_v53 = vsel %vm2582_vm0, %v2770_v62, %v2769_v31  ;;  %v2500_v62 = vpop.permute.xlu2 %2499 }
 0x4c7   : > { %v2479_v46 = vpop.permute.xlu1 %2478  ;;  %v2476_v9 = vpop.permute.xlu0 %2475 }
 0x4c8   : > { %v2772_v59 = vperm.slane %v2476_v9, %v9065_v12  ;;  %v2774_v37 = vperm.slane %v2479_v46, %v8974_v0 }
 0x4ca   : > { %v2773_v23 = vsel %vm2586_vm2, %v2772_v59, %v2771_v53  ;;  %v2776_v54 = vsel %vm2530_vm3, %v2775_v19, %v2774_v37  ;;  %v2781_v59 = vperm.slane %v2491_v39, %v8991_v20  ;;  %vm2817_vm3 = vcmask 1047559  }
 0x4cb   : > { %v2816_v34 = vsel %vm2815_vm1, %v2773_v23, %v2814_v29  ;;  %v2787_v23 = vperm.slane %v2500_v62, %v9007_v14 }
 0x4cf   : > { %v2488_v28 = vpop.permute.xlu1 %2487  ;;  %v2485_v2 = vpop.permute.xlu0 %2484 }
 0x4d0   : > { %v2777_v6 = vperm.slane %v2485_v2, %v8981_v15  ;;  %v2779_v25 = vperm.slane %v2488_v28, %v8988_v44  ;;  %v2509_v28 = vpop.permute.xlu2 %2508 }
 0x4d2   : > { %v2778_v41 = vsel %vm2534_vm4, %v2777_v6, %v2776_v54  ;;  %v2793_v6 = vperm.slane %v2509_v28, %v9026_v32 }
 0x4d3   : > { %v2780_v29 = vsel %vm2538_vm5, %v2779_v25, %v2778_v41 }
 0x4d4   : > { %v2782_v15 = vsel %vm2542_vm6, %v2781_v59, %v2780_v29 }
 0x4d7   : > { %v2497_v7 = vpop.permute.xlu1 %2496  ;;  %v2494_v31 = vpop.permute.xlu0 %2493 }
 0x4d8   : > { %v2783_v9 = vperm.slane %v2494_v31, %v8994_v40  ;;  %v2785_v0 = vperm.slane %v2497_v7, %v9010_v18 }
 0x4da   : > { %v2784_v36 = vsel %vm2546_vm7, %v2783_v9, %v2782_v15 }
 0x4db   : > { %v2786_v44 = vsel %vm2550_vm8, %v2785_v0, %v2784_v36 }
 0x4dc   : > { %v2788_v40 = vsel %vm2554_vm9, %v2787_v23, %v2786_v44 }
 0x4df   : > { %v2506_v4 = vpop.permute.xlu1 %2505  ;;  %v2503_v46 = vpop.permute.xlu0 %2502 }
 0x4e0   : > { %v2789_v53 = vperm.slane %v2503_v46, %v9016_v63  ;;  %v2791_v2 = vperm.slane %v2506_v4, %v9030_v13  ;;  %v2518_v13 = vpop.permute.xlu2 %2517 }
 0x4e1   : > { %v2799_v41 = vperm.slane %v2518_v13, %v9045_v61 }
 0x4e2   : > { %v2790_v20 = vsel %vm2558_vm10, %v2789_v53, %v2788_v40 }
 0x4e3   : > { %v2792_v18 = vsel %vm2562_vm11, %v2791_v2, %v2790_v20 }
 0x4e4   : > { %v2794_v14 = vsel %vm2566_vm12, %v2793_v6, %v2792_v18 }
 0x4e7   : > { %v2515_v39 = vpop.permute.xlu1 %2514  ;;  %v2512_v37 = vpop.permute.xlu0 %2511 }
 0x4e8   : > { %v2795_v19 = vperm.slane %v2512_v37, %v9035_v22  ;;  %v2797_v63 = vperm.slane %v2515_v39, %v9049_v17 }
 0x4ea   : > { %v2796_v54 = vsel %vm2570_vm13, %v2795_v19, %v2794_v14 }
 0x4eb   : > { %v2798_v25 = vsel %vm2574_vm14, %v2797_v63, %v2796_v54 }
 0x4ec   : > { %v2800_v22 = vsel %vm2578_vm15, %v2799_v41, %v2798_v25 }
 0x4ef   : > { %v2524_v7 = vpop.permute.xlu1 %2523  ;;  %v2521_v31 = vpop.permute.xlu0 %2520 }
 0x4f0   : > { %v2803_v62 = vperm.slane %v2524_v7, %v9065_v12  ;;  %v2801_v32 = vperm.slane %v2521_v31, %v9054_v51 }
 0x4f2   : > { %v2802_v17 = vsel %vm2582_vm0, %v2801_v32, %v2800_v22 }
 0x4f3   : > { %v2804_v29 = vsel %vm2586_vm2, %v2803_v62, %v2802_v17 }
 0x4f4   : > { %v2818_v9 = vsel %vm2817_vm3, %v2804_v29, %v2816_v34 }
 0x4f5   : > { %2823 = vst [vmem:[%s7542_s26] sm:$0xff] %v2818_v9 }
 0x4f6 PF: > { %v12754_v59 = vmov 0   ;;  %v12755_v12 = vld [vmem:[#allocation111_spill] sm:$0xff]  ;;  %v12757_v51 = vld [vmem:[#allocation144_spill] sm:$0xff]  ;;  %v12758_v34 = vld [vmem:[#allocation37_spill] sm:$0xff]  ;;  %vm3342_vm2 = vcmask 130112   ;;  %vm3346_vm4 = vcmask 195712   ;;  %s13241_s0 = scalar_lea.vmem %s12036_s3, %s7478_s25 }
 0x4f7   : > { %6605 = vset.pattern.permute.xlu2 %v12754_v59  ;;  %6604 = vset.pattern.permute.xlu1 %v12754_v59  ;;  %v12756_v61 = vld [vmem:[#allocation43_spill] sm:$0xff]  ;;  %v12759_v0 = vld [vmem:[#allocation34_spill] sm:$0xff]  ;;  %v12761_v36 = vld [vmem:[#allocation113_spill] sm:$0xff]  ;;  %vm3350_vm5 = vcmask 261312   ;;  %vm3354_vm6 = vcmask 326912   ;;  %vm12237_vm7 = vcmask 392512  }
 0x4f8   : > { %6603 = vset.pattern.permute.xlu0 %v12754_v59  ;;  %2966 = vperm.xlu2 %6605, %v8684_v35   ;;  %v12760_v15 = vld [vmem:[#allocation27_spill] sm:$0xff]  ;;  %v12762_v4 = vld [vmem:[#allocation49_spill] sm:$0xff]  ;;  %v12763_v46 = vld [vmem:[#allocation40_spill] sm:$0xff]  ;;  %vm3362_vm8 = vcmask 458112   ;;  %vm3366_vm9 = vcmask 523712   ;;  %vm3370_vm10 = vcmask 589312  }
 0x4f9   : > { %2960 = vperm.xlu1 %6604, %v8613_v45   ;;  %2954 = vperm.xlu0 %6603, %v12755_v12   ;;  %v12764_v44 = vld [vmem:[#allocation129_spill] sm:$0xff]  ;;  %v12772_v6 = vld [vmem:[#allocation38_spill] sm:$0xff]  ;;  %v12773_v63 = vld [vmem:[#allocation48_spill] sm:$0xff]  ;;  %vm12238_vm11 = vcmask 654912   ;;  %vm3378_vm12 = vcmask 720512   ;;  %vm3382_vm13 = vcmask 786112  }
 0x4fa   : > { %v12765_v53 = vld [vmem:[#allocation137_spill] sm:$0xff]  ;;  %v12774_v14 = vld [vmem:[#allocation30_spill] sm:$0xff]  ;;  %v12778_v62 = vld [vmem:[#allocation44_spill] sm:$0xff]  ;;  %vm12242_vm14 = vcmask 851712   ;;  %vm3390_vm15 = vcmask 917312   ;;  %vm3394_vm0 = vcmask 982912  }
 0x4fb   : > { %v12766_v23 = vld [vmem:[#allocation121_spill] sm:$0xff]  ;;  %v12775_v54 = vld [vmem:[#allocation26_spill] sm:$0xff]  ;;  %vm3398_vm1 = vcmask 1048512   ;;  %vm12239_vm3 = vcmask 1041409  }
 0x4fc   : > { %v12767_v2 = vld [vmem:[#allocation33_spill] sm:$0xff]  ;;  %v12776_v7 = vld [vmem:[#allocation50_spill] sm:$0xff] }
 0x4fd   : > { %v12768_v40 = vld [vmem:[#allocation153_spill] sm:$0xff]  ;;  %v12777_v31 = vld [vmem:[#allocation46_spill] sm:$0xff] }
 0x4fe   : > { %v12769_v20 = vld [vmem:[#allocation161_spill] sm:$0xff]  ;;  %v12779_v29 = vld [vmem:[#allocation138_spill] sm:$0xff] }
 0x4ff   : > { %v12770_v39 = vld [vmem:[#allocation45_spill] sm:$0xff]  ;;  %v12780_v9 = vld [vmem:[#allocation122_spill] sm:$0xff] }
 0x500   : > { %2969 = vperm.xlu2 %6605, %v8660_v38   ;;  %v12771_v37 = vld [vmem:[#allocation145_spill] sm:$0xff]  ;;  %v12781_v59 = vld [vmem:[#allocation114_spill] sm:$0xff]  ;;  %v12822_v38 = vld [vmem:[#allocation72_spill] sm:$0xff] }
 0x501   : > { %2963 = vperm.xlu1 %6604, %v8590_v47   ;;  %2957 = vperm.xlu0 %6603, %v8565_v52   ;;  %v12828_v47 = vld [vmem:[#allocation74_spill] sm:$0xff] }
 0x508   : > { %2978 = vperm.xlu2 %6605, %v8637_v5  }
 0x509   : > { %2975 = vperm.xlu1 %6604, %v8732_v33   ;;  %2972 = vperm.xlu0 %6603, %v8756_v3   ;;  %v12819_v33 = vld [vmem:[#allocation164_spill] sm:$0xff] }
 0x510   : > { %2987 = vperm.xlu2 %6605, %v8852_v11  }
 0x511   : > { %2984 = vperm.xlu1 %6604, %v8780_v30   ;;  %2981 = vperm.xlu0 %6603, %v8804_v48   ;;  %v12816_v30 = vld [vmem:[#allocation124_spill] sm:$0xff] }
 0x518   : > { %2996 = vperm.xlu2 %6605, %v8900_v8  }
 0x519   : > { %2993 = vperm.xlu1 %6604, %v8708_v57   ;;  %2990 = vperm.xlu0 %6603, %v8828_v56  }
 0x520   : > { %3005 = vperm.xlu2 %6605, %v8568_v49  }
 0x521   : > { %3002 = vperm.xlu1 %6604, %v8545_v16   ;;  %2999 = vperm.xlu0 %6603, %v8876_v55  }
 0x528   : > { %3014 = vperm.xlu2 %6605, %v8687_v24  }
 0x529   : > { %3011 = vperm.xlu1 %6604, %v8593_v42   ;;  %3008 = vperm.xlu0 %6603, %v8616_v27  }
 0x530   : > { %3023 = vperm.xlu2 %6605, %v8735_v26  }
 0x531   : > { %3020 = vperm.xlu1 %6604, %v8759_v21   ;;  %3017 = vperm.xlu0 %6603, %v8663_v10  }
 0x538   : > { %3032 = vperm.xlu2 %6605, %v8783_v58  }
 0x539   : > { %3029 = vperm.xlu1 %6604, %v12756_v61   ;;  %3026 = vperm.xlu0 %6603, %v12757_v51  }
 0x540   : > { %3041 = vperm.xlu2 %6605, %v12758_v34  }
 0x541   : > { %3038 = vperm.xlu1 %6604, %v12759_v0   ;;  %3035 = vperm.xlu0 %6603, %v12760_v15  }
 0x548   : > { %3050 = vperm.xlu2 %6605, %v12761_v36  }
 0x549   : > { %3047 = vperm.xlu1 %6604, %v12762_v4   ;;  %3044 = vperm.xlu0 %6603, %v12763_v46   ;;  %v12809_v4 = vld [vmem:[#allocation63_spill] sm:$0xff] }
 0x550   : > { %3059 = vperm.xlu2 %6605, %v12764_v44   ;;  %v12787_v44 = vld [vmem:[#allocation51_spill] sm:$0xff] }
 0x551   : > { %3056 = vperm.xlu1 %6604, %v12765_v53   ;;  %3053 = vperm.xlu0 %6603, %v12766_v23   ;;  %v12785_v23 = vld [vmem:[#allocation146_spill] sm:$0xff]  ;;  %v12805_v53 = vld [vmem:[#allocation147_spill] sm:$0xff] }
 0x552   : > { %v9402_v28 = vpop.permute.xlu2 %2966 }
 0x558   : > { %3068 = vperm.xlu2 %6605, %v12767_v2  }
 0x559   : > { %3065 = vperm.xlu1 %6604, %v12768_v40   ;;  %3062 = vperm.xlu0 %6603, %v12769_v20   ;;  %v12802_v40 = vld [vmem:[#allocation155_spill] sm:$0xff] }
 0x55a   : > { %v9407_v18 = vpop.permute.xlu2 %2969 }
 0x560   : > { %3077 = vperm.xlu2 %6605, %v12770_v39   ;;  %v12784_v39 = vld [vmem:[#allocation130_spill] sm:$0xff] }
 0x561   : > { %3074 = vperm.xlu1 %6604, %v12771_v37   ;;  %3071 = vperm.xlu0 %6603, %v12772_v6   ;;  %v12782_v6 = vld [vmem:[#allocation154_spill] sm:$0xff]  ;;  %v12799_v37 = vld [vmem:[#allocation139_spill] sm:$0xff] }
 0x562   : > { %v9412_v19 = vpop.permute.xlu2 %2978 }
 0x568   : > { %3086 = vperm.xlu2 %6605, %v12773_v63  }
 0x569   : > { %3083 = vperm.xlu1 %6604, %v12774_v14   ;;  %3080 = vperm.xlu0 %6603, %v12775_v54   ;;  %v12796_v14 = vld [vmem:[#allocation58_spill] sm:$0xff] }
 0x56a   : > { %v9417_v13 = vpop.permute.xlu2 %2987 }
 0x56b   : > { %v9419_v25 = vpop.permute.xlu1 %2960  ;;  %v9421_v41 = vpop.permute.xlu0 %2954 }
 0x570   : > { %3095 = vperm.xlu2 %6605, %v12776_v7  }
 0x571   : > { %3092 = vperm.xlu1 %6604, %v12777_v31   ;;  %3089 = vperm.xlu0 %6603, %v12778_v62   ;;  %v12783_v62 = vld [vmem:[#allocation162_spill] sm:$0xff]  ;;  %v12793_v31 = vld [vmem:[#allocation55_spill] sm:$0xff] }
 0x572   : > { %v9426_v32 = vpop.permute.xlu2 %2996 }
 0x573   : > { %v9428_v22 = vpop.permute.xlu1 %2963  ;;  %v9430_v17 = vpop.permute.xlu0 %2957 }
 0x578   : > { %3104 = vperm.xlu2 %6605, %v12779_v29  }
 0x579   : > { %3101 = vperm.xlu1 %6604, %v12780_v9   ;;  %3098 = vperm.xlu0 %6603, %v12781_v59   ;;  %v12786_v59 = vld [vmem:[#allocation52_spill] sm:$0xff]  ;;  %v12790_v9 = vld [vmem:[#allocation53_spill] sm:$0xff] }
 0x57a   : > { %v9435_v54 = vpop.permute.xlu2 %3005 }
 0x57b   : > { %v9437_v63 = vpop.permute.xlu1 %2975  ;;  %v9439_v7 = vpop.permute.xlu0 %2972 }
 0x580   : > { %3113 = vperm.xlu2 %6605, %v12782_v6  }
 0x581   : > { %3110 = vperm.xlu1 %6604, %v12783_v62   ;;  %3107 = vperm.xlu0 %6603, %v12784_v39   ;;  %v12788_v62 = vld [vmem:[#allocation56_spill] sm:$0xff]  ;;  %v12789_v39 = vld [vmem:[#allocation54_spill] sm:$0xff] }
 0x582   : > { %v9444_v20 = vpop.permute.xlu2 %3014 }
 0x583   : > { %v9446_v2 = vpop.permute.xlu1 %2984  ;;  %v9448_v29 = vpop.permute.xlu0 %2981 }
 0x588   : > { %3122 = vperm.xlu2 %6605, %v12785_v23  }
 0x589   : > { %3119 = vperm.xlu1 %6604, %v12786_v59   ;;  %3116 = vperm.xlu0 %6603, %v12787_v44   ;;  %v12791_v59 = vld [vmem:[#allocation59_spill] sm:$0xff]  ;;  %v12792_v44 = vld [vmem:[#allocation57_spill] sm:$0xff] }
 0x58a   : > { %v9453_v46 = vpop.permute.xlu2 %3023 }
 0x58b   : > { %v9455_v36 = vpop.permute.xlu1 %2993  ;;  %v9457_v6 = vpop.permute.xlu0 %2990 }
 0x590   : > { %3131 = vperm.xlu2 %6605, %v12788_v62  }
 0x591   : > { %3128 = vperm.xlu1 %6604, %v12789_v39   ;;  %3125 = vperm.xlu0 %6603, %v12790_v9   ;;  %v12794_v39 = vld [vmem:[#allocation123_spill] sm:$0xff] }
 0x592   : > { %v9462_v15 = vpop.permute.xlu2 %3032  ;;  %v12795_v9 = vld [vmem:[#allocation115_spill] sm:$0xff] }
 0x593   : > { %v9464_v34 = vpop.permute.xlu1 %3002  ;;  %v9466_v23 = vpop.permute.xlu0 %2999 }
 0x598   : > { %3140 = vperm.xlu2 %6605, %v12791_v59  }
 0x599   : > { %3137 = vperm.xlu1 %6604, %v12792_v44   ;;  %3134 = vperm.xlu0 %6603, %v12793_v31   ;;  %v12797_v44 = vld [vmem:[#allocation163_spill] sm:$0xff] }
 0x59a   : > { %v9471_v51 = vpop.permute.xlu2 %3041  ;;  %v12798_v31 = vld [vmem:[#allocation131_spill] sm:$0xff] }
 0x59b   : > { %v9473_v58 = vpop.permute.xlu1 %3011  ;;  %v9475_v62 = vpop.permute.xlu0 %3008 }
 0x5a0   : > { %3149 = vperm.xlu2 %6605, %v12794_v39  }
 0x5a1   : > { %3146 = vperm.xlu1 %6604, %v12795_v9   ;;  %3143 = vperm.xlu0 %6603, %v12796_v14   ;;  %v12800_v9 = vld [vmem:[#allocation61_spill] sm:$0xff]  ;;  %v12801_v14 = vld [vmem:[#allocation60_spill] sm:$0xff] }
 0x5a2   : > { %v9480_v10 = vpop.permute.xlu2 %3050 }
 0x5a3   : > { %v9482_v26 = vpop.permute.xlu1 %3020  ;;  %v9484_v59 = vpop.permute.xlu0 %3017 }
 0x5a8   : > { %3158 = vperm.xlu2 %6605, %v12797_v44  }
 0x5a9   : > { %3155 = vperm.xlu1 %6604, %v12798_v31   ;;  %3152 = vperm.xlu0 %6603, %v12799_v37   ;;  %v12803_v31 = vld [vmem:[#allocation66_spill] sm:$0xff] }
 0x5aa   : > { %v9489_v27 = vpop.permute.xlu2 %3059  ;;  %v12804_v37 = vld [vmem:[#allocation62_spill] sm:$0xff] }
 0x5ab   : > { %v9491_v24 = vpop.permute.xlu1 %3029  ;;  %v9493_v39 = vpop.permute.xlu0 %3026 }
 0x5b0   : > { %3167 = vperm.xlu2 %6605, %v12800_v9  }
 0x5b1   : > { %3164 = vperm.xlu1 %6604, %v12801_v14   ;;  %3161 = vperm.xlu0 %6603, %v12802_v40   ;;  %v12807_v14 = vld [vmem:[#allocation70_spill] sm:$0xff]  ;;  %v12808_v40 = vld [vmem:[#allocation67_spill] sm:$0xff] }
 0x5b2   : > { %v9498_v55 = vpop.permute.xlu2 %3068 }
 0x5b3   : > { %v9500_v49 = vpop.permute.xlu1 %3038  ;;  %v9502_v44 = vpop.permute.xlu0 %3035 }
 0x5b8   : > { %3176 = vperm.xlu2 %6605, %v12803_v31  }
 0x5b9   : > { %3173 = vperm.xlu1 %6604, %v12804_v37   ;;  %3170 = vperm.xlu0 %6603, %v12805_v53   ;;  %v12811_v37 = vld [vmem:[#allocation116_spill] sm:$0xff]  ;;  %v12812_v53 = vld [vmem:[#allocation71_spill] sm:$0xff] }
 0x5ba   : > { %v9507_v57 = vpop.permute.xlu2 %3077 }
 0x5bb   : > { %v9509_v8 = vpop.permute.xlu1 %3047  ;;  %v9511_v9 = vpop.permute.xlu0 %3044 }
 0x5bc   : > { %12806 = vst [vmem:[#allocation168_spill] sm:$0xff] %v9509_v8 }
 0x5c0   : > { %3185 = vperm.xlu2 %6605, %v12807_v14  }
 0x5c1   : > { %3182 = vperm.xlu1 %6604, %v12808_v40   ;;  %3179 = vperm.xlu0 %6603, %v12809_v4   ;;  %v12814_v40 = vld [vmem:[#allocation132_spill] sm:$0xff] }
 0x5c2   : > { %v9516_v11 = vpop.permute.xlu2 %3086  ;;  %v12815_v4 = vld [vmem:[#allocation140_spill] sm:$0xff] }
 0x5c3   : > { %12810 = vst [vmem:[#allocation169_spill] sm:$0xff] %v9516_v11  ;;  %v9518_v56 = vpop.permute.xlu1 %3056  ;;  %v9520_v31 = vpop.permute.xlu0 %3053 }
 0x5c8   : > { %3194 = vperm.xlu2 %6605, %v12811_v37  }
 0x5c9   : > { %3191 = vperm.xlu1 %6604, %v12812_v53   ;;  %3188 = vperm.xlu0 %6603, %v8912_v50   ;;  %v12817_v53 = vld [vmem:[#allocation73_spill] sm:$0xff]  ;;  %v12818_v50 = vld [vmem:[#allocation156_spill] sm:$0xff] }
 0x5ca   : > { %v9525_v0 = vpop.permute.xlu2 %3095 }
 0x5cb   : > { %12813 = vst [vmem:[#allocation170_spill] sm:$0xff] %v9525_v0  ;;  %v9527_v5 = vpop.permute.xlu1 %3065  ;;  %v9529_v14 = vpop.permute.xlu0 %3062  ;;  %v12835_v0 = vld [vmem:[#allocation117_spill] sm:$0xff] }
 0x5d0   : > { %3203 = vperm.xlu2 %6605, %v12814_v40  }
 0x5d1   : > { %3200 = vperm.xlu1 %6604, %v12815_v4   ;;  %3197 = vperm.xlu0 %6603, %v12816_v30   ;;  %v12820_v4 = vld [vmem:[#allocation76_spill] sm:$0xff] }
 0x5d2   : > { %v9534_v61 = vpop.permute.xlu2 %3104  ;;  %v12821_v30 = vld [vmem:[#allocation148_spill] sm:$0xff] }
 0x5d3   : > { %v9536_v3 = vpop.permute.xlu1 %3074  ;;  %v9538_v37 = vpop.permute.xlu0 %3071 }
 0x5d8   : > { %3212 = vperm.xlu2 %6605, %v12817_v53  }
 0x5d9   : > { %3209 = vperm.xlu1 %6604, %v12818_v50   ;;  %3206 = vperm.xlu0 %6603, %v12819_v33   ;;  %v12826_v50 = vld [vmem:[#allocation79_spill] sm:$0xff]  ;;  %v12827_v33 = vld [vmem:[#allocation77_spill] sm:$0xff] }
 0x5da   : > { %v9543_v21 = vpop.permute.xlu2 %3113 }
 0x5db   : > { %v9545_v35 = vpop.permute.xlu1 %3083  ;;  %v9547_v40 = vpop.permute.xlu0 %3080 }
 0x5e0   : > { %3221 = vperm.xlu2 %6605, %v12820_v4  }
 0x5e1   : > { %3218 = vperm.xlu1 %6604, %v12821_v30   ;;  %3215 = vperm.xlu0 %6603, %v12822_v38   ;;  %v12830_v30 = vld [vmem:[#allocation84_spill] sm:$0xff]  ;;  %v12831_v38 = vld [vmem:[#allocation78_spill] sm:$0xff] }
 0x5e2   : > { %v9552_v42 = vpop.permute.xlu2 %3122 }
 0x5e3   : > { %12823 = vst [vmem:[#allocation171_spill] sm:$0xff] %v9552_v42  ;;  %v9554_v45 = vpop.permute.xlu1 %3092  ;;  %v9556_v53 = vpop.permute.xlu0 %3089 }
 0x5e4   : > { %12824 = vst [vmem:[#allocation172_spill] sm:$0xff] %v9554_v45 }
 0x5e5   : > { %12825 = vst [vmem:[#allocation173_spill] sm:$0xff] %v9556_v53 }
 0x5e8   : > { %3230 = vperm.xlu2 %6605, %v12826_v50  }
 0x5e9   : > { %3227 = vperm.xlu1 %6604, %v12827_v33   ;;  %3224 = vperm.xlu0 %6603, %v12828_v47   ;;  %v12833_v33 = vld [vmem:[#allocation141_spill] sm:$0xff] }
 0x5ea   : > { %v9561_v16 = vpop.permute.xlu2 %3131  ;;  %v12834_v47 = vld [vmem:[#allocation125_spill] sm:$0xff] }
 0x5eb   : > { %12829 = vst [vmem:[#allocation174_spill] sm:$0xff] %v9561_v16  ;;  %v9563_v12 = vpop.permute.xlu1 %3101  ;;  %v9565_v4 = vpop.permute.xlu0 %3098 }
 0x5f0   : > { %3239 = vperm.xlu2 %6605, %v12830_v30  }
 0x5f1   : > { %3236 = vperm.xlu1 %6604, %v8915_v1   ;;  %3233 = vperm.xlu0 %6603, %v12831_v38   ;;  %v12837_v1 = vld [vmem:[#allocation157_spill] sm:$0xff] }
 0x5f2   : > { %v9570_v52 = vpop.permute.xlu2 %3140  ;;  %v12838_v38 = vld [vmem:[#allocation85_spill] sm:$0xff] }
 0x5f3   : > { %12832 = vst [vmem:[#allocation175_spill] sm:$0xff] %v9570_v52  ;;  %v9572_v48 = vpop.permute.xlu1 %3110  ;;  %v9574_v50 = vpop.permute.xlu0 %3107  ;;  %v12839_v52 = vld [vmem:[#allocation133_spill] sm:$0xff] }
 0x5f8   : > { %3248 = vperm.xlu2 %6605, %v12833_v33  }
 0x5f9   : > { %3245 = vperm.xlu1 %6604, %v12834_v47   ;;  %3242 = vperm.xlu0 %6603, %v12835_v0   ;;  %v12843_v47 = vld [vmem:[#allocation149_spill] sm:$0xff] }
 0x5fa   : > { %v9579_v16 = vpop.permute.xlu2 %3149  ;;  %v12844_v0 = vld [vmem:[#allocation89_spill] sm:$0xff] }
 0x5fb   : > { %12836 = vst [vmem:[#allocation176_spill] sm:$0xff] %v9579_v16  ;;  %v9581_v53 = vpop.permute.xlu1 %3119  ;;  %v9583_v30 = vpop.permute.xlu0 %3116  ;;  %v12845_v16 = vld [vmem:[#allocation87_spill] sm:$0xff] }
 0x600   : > { %3257 = vperm.xlu2 %6605, %v12837_v1  }
 0x601   : > { %3254 = vperm.xlu1 %6604, %v12838_v38   ;;  %3251 = vperm.xlu0 %6603, %v12839_v52   ;;  %v12849_v38 = vld [vmem:[#allocation95_spill] sm:$0xff]  ;;  %v12850_v52 = vld [vmem:[#allocation93_spill] sm:$0xff] }
 0x602   : > { %v9588_v45 = vpop.permute.xlu2 %3158 }
 0x603   : > { %12840 = vst [vmem:[#allocation177_spill] sm:$0xff] %v9588_v45  ;;  %v9590_v42 = vpop.permute.xlu1 %3128  ;;  %v9592_v33 = vpop.permute.xlu0 %3125  ;;  %v12851_v45 = vld [vmem:[#allocation90_spill] sm:$0xff] }
 0x604   : > { %12841 = vst [vmem:[#allocation178_spill] sm:$0xff] %v9590_v42 }
 0x605   : > { %12842 = vst [vmem:[#allocation179_spill] sm:$0xff] %v9592_v33 }
 0x608   : > { %3266 = vperm.xlu2 %6605, %v12843_v47  }
 0x609   : > { %3263 = vperm.xlu1 %6604, %v12844_v0   ;;  %3260 = vperm.xlu0 %6603, %v12845_v16   ;;  %v12855_v16 = vld [vmem:[#allocation97_spill] sm:$0xff]  ;;  %v12856_v0 = vld [vmem:[#allocation92_spill] sm:$0xff] }
 0x60a   : > { %v9597_v11 = vpop.permute.xlu2 %3167 }
 0x60b   : > { %12846 = vst [vmem:[#allocation180_spill] sm:$0xff] %v9597_v11  ;;  %v9599_v8 = vpop.permute.xlu1 %3137  ;;  %v9601_v1 = vpop.permute.xlu0 %3134 }
 0x60c   : > { %12847 = vst [vmem:[#allocation181_spill] sm:$0xff] %v9599_v8 }
 0x60d   : > { %12848 = vst [vmem:[#allocation182_spill] sm:$0xff] %v9601_v1 }
 0x610   : > { %3275 = vperm.xlu2 %6605, %v12849_v38  }
 0x611   : > { %3272 = vperm.xlu1 %6604, %v12850_v52   ;;  %3269 = vperm.xlu0 %6603, %v12851_v45   ;;  %v12860_v52 = vld [vmem:[#allocation126_spill] sm:$0xff] }
 0x612   : > { %v9606_v42 = vpop.permute.xlu2 %3176  ;;  %v12861_v45 = vld [vmem:[#allocation118_spill] sm:$0xff] }
 0x613   : > { %12852 = vst [vmem:[#allocation183_spill] sm:$0xff] %v9606_v42  ;;  %v9608_v33 = vpop.permute.xlu1 %3146  ;;  %v9610_v47 = vpop.permute.xlu0 %3143  ;;  %v12862_v42 = vld [vmem:[#allocation96_spill] sm:$0xff] }
 0x614   : > { %12853 = vst [vmem:[#allocation184_spill] sm:$0xff] %v9608_v33 }
 0x615   : > { %12854 = vst [vmem:[#allocation185_spill] sm:$0xff] %v9610_v47 }
 0x618   : > { %3284 = vperm.xlu2 %6605, %v8918_v43  }
 0x619   : > { %3281 = vperm.xlu1 %6604, %v12855_v16   ;;  %3278 = vperm.xlu0 %6603, %v12856_v0   ;;  %v12866_v16 = vld [vmem:[#allocation102_spill] sm:$0xff] }
 0x61a   : > { %v9615_v8 = vpop.permute.xlu2 %3185  ;;  %v12867_v0 = vld [vmem:[#allocation134_spill] sm:$0xff] }
 0x61b   : > { %12857 = vst [vmem:[#allocation186_spill] sm:$0xff] %v9615_v8  ;;  %v9617_v1 = vpop.permute.xlu1 %3155  ;;  %v9619_v38 = vpop.permute.xlu0 %3152  ;;  %v12868_v8 = vld [vmem:[#allocation142_spill] sm:$0xff] }
 0x61c   : > { %12858 = vst [vmem:[#allocation187_spill] sm:$0xff] %v9617_v1 }
 0x61d   : > { %12859 = vst [vmem:[#allocation188_spill] sm:$0xff] %v9619_v38 }
 0x620   : > { %3293 = vperm.xlu2 %6605, %v12860_v52  }
 0x621   : > { %3290 = vperm.xlu1 %6604, %v12861_v45   ;;  %3287 = vperm.xlu0 %6603, %v12862_v42   ;;  %v12872_v45 = vld [vmem:[#allocation105_spill] sm:$0xff]  ;;  %v12873_v42 = vld [vmem:[#allocation106_spill] sm:$0xff] }
 0x622   : > { %v9624_v11 = vpop.permute.xlu2 %3194 }
 0x623   : > { %12863 = vst [vmem:[#allocation189_spill] sm:$0xff] %v9624_v11  ;;  %v9626_v47 = vpop.permute.xlu1 %3164  ;;  %v9628_v43 = vpop.permute.xlu0 %3161  ;;  %v12874_v11 = vld [vmem:[#allocation158_spill] sm:$0xff] }
 0x624   : > { %12864 = vst [vmem:[#allocation190_spill] sm:$0xff] %v9626_v47 }
 0x625   : > { %12865 = vst [vmem:[#allocation191_spill] sm:$0xff] %v9628_v43 }
 0x628   : > { %3302 = vperm.xlu2 %6605, %v12866_v16  }
 0x629   : > { %3299 = vperm.xlu1 %6604, %v12867_v0   ;;  %3296 = vperm.xlu0 %6603, %v12868_v8   ;;  %v12878_v0 = vld [vmem:[#allocation107_spill] sm:$0xff]  ;;  %v12879_v8 = vld [vmem:[#allocation109_spill] sm:$0xff] }
 0x62a   : > { %v9637_v52 = vpop.permute.xlu2 %3203 }
 0x62b   : > { %v9633_v1 = vpop.permute.xlu1 %3173  ;;  %v9635_v38 = vpop.permute.xlu0 %3170  ;;  %12871 = vst [vmem:[#allocation194_spill] sm:$0xff] %v9637_v52 }
 0x62c   : > { %12869 = vst [vmem:[#allocation192_spill] sm:$0xff] %v9633_v1  ;;  %v12880_v1 = vld [vmem:[#allocation150_spill] sm:$0xff] }
 0x62d   : > { %12870 = vst [vmem:[#allocation193_spill] sm:$0xff] %v9635_v38 }
 0x630   : > { %3311 = vperm.xlu2 %6605, %v12872_v45  }
 0x631   : > { %3308 = vperm.xlu1 %6604, %v12873_v42   ;;  %3305 = vperm.xlu0 %6603, %v12874_v11   ;;  %v12884_v42 = vld [vmem:[#allocation165_spill] sm:$0xff]  ;;  %v12885_v11 = vld [vmem:[#allocation166_spill] sm:$0xff] }
 0x632   : > { %v9646_v16 = vpop.permute.xlu2 %3212 }
 0x633   : > { %v9642_v47 = vpop.permute.xlu1 %3182  ;;  %v9644_v43 = vpop.permute.xlu0 %3179  ;;  %12877 = vst [vmem:[#allocation197_spill] sm:$0xff] %v9646_v16 }
 0x634   : > { %12875 = vst [vmem:[#allocation195_spill] sm:$0xff] %v9642_v47  ;;  %v12886_v47 = vld [vmem:[#allocation108_spill] sm:$0xff] }
 0x635   : > { %12876 = vst [vmem:[#allocation196_spill] sm:$0xff] %v9644_v43 }
 0x638   : > { %3320 = vperm.xlu2 %6605, %v12878_v0   ;;  %v12889_v0 = vld [vmem:[#allocation167_spill] sm:$0xff] }
 0x639   : > { %3317 = vperm.xlu1 %6604, %v12879_v8   ;;  %3314 = vperm.xlu0 %6603, %v12880_v1  }
 0x63a   : > { %v9655_v45 = vpop.permute.xlu2 %3221 }
 0x63b   : > { %v9651_v38 = vpop.permute.xlu1 %3191  ;;  %v9653_v52 = vpop.permute.xlu0 %3188  ;;  %12883 = vst [vmem:[#allocation200_spill] sm:$0xff] %v9655_v45 }
 0x63c   : > { %12881 = vst [vmem:[#allocation198_spill] sm:$0xff] %v9651_v38 }
 0x63d   : > { %12882 = vst [vmem:[#allocation199_spill] sm:$0xff] %v9653_v52 }
 0x640   : > { %3329 = vperm.xlu2 %6605, %v12884_v42  }
 0x641   : > { %3326 = vperm.xlu1 %6604, %v12885_v11   ;;  %3323 = vperm.xlu0 %6603, %v12886_v47  }
 0x642   : > { %v9666_v1 = vpop.permute.xlu2 %3230 }
 0x643   : > { %v9660_v43 = vpop.permute.xlu1 %3200  ;;  %v9662_v16 = vpop.permute.xlu0 %3197  ;;  %12890 = vst [vmem:[#allocation203_spill] sm:$0xff] %v9666_v1  ;;  %v12901_v1 = vlaneseq }
 0x644   : > { %12887 = vst [vmem:[#allocation201_spill] sm:$0xff] %v9660_v43 }
 0x645   : > { %12888 = vst [vmem:[#allocation202_spill] sm:$0xff] %v9662_v16 }
 0x649   : > { %3335 = vperm.xlu1 %6604, %v12889_v0   ;;  %3332 = vperm.xlu0 %6603, %v8921_v60  }
 0x64a   : > { %v9676_v11 = vpop.permute.xlu2 %3239 }
 0x64b   : > { %v9668_v8 = vpop.permute.xlu1 %3209  ;;  %v9670_v38 = vpop.permute.xlu0 %3206  ;;  %12895 = vst [vmem:[#allocation208_spill] sm:$0xff] %v9676_v11 }
 0x64c   : > { %12891 = vst [vmem:[#allocation204_spill] sm:$0xff] %v9668_v8  ;;  %v9689_v8 = vand.u32 127, %v12901_v1 }
 0x64d   : > { %12892 = vst [vmem:[#allocation205_spill] sm:$0xff] %v9670_v38 }
 0x64e   : > { %v9692_v38 = vadd.s32 4294967288, %v9689_v8  ;;  %v3339_v1 = vperm.slane %v9421_v41, %v9689_v8 }
 0x652   : > { %v9682_v43 = vpop.permute.xlu2 %3248 }
 0x653   : > { %v9672_v52 = vpop.permute.xlu1 %3218  ;;  %v9674_v42 = vpop.permute.xlu0 %3215  ;;  %12898 = vst [vmem:[#allocation211_spill] sm:$0xff] %v9682_v43 }
 0x654   : > { %12893 = vst [vmem:[#allocation206_spill] sm:$0xff] %v9672_v52 }
 0x655   : > { %12894 = vst [vmem:[#allocation207_spill] sm:$0xff] %v9674_v42 }
 0x65a   : > { %v9694_v52 = vpop.permute.xlu2 %3257 }
 0x65b   : > { %v9678_v47 = vpop.permute.xlu1 %3227  ;;  %v9680_v45 = vpop.permute.xlu0 %3224  ;;  %12902 = vst [vmem:[#allocation214_spill] sm:$0xff] %v9694_v52 }
 0x65c   : > { %12896 = vst [vmem:[#allocation209_spill] sm:$0xff] %v9678_v47  ;;  %v3341_v47 = vperm.slane %v9430_v17, %v9692_v38  ;;  %v9716_v17 = vadd.s32 4294967264, %v9689_v8 }
 0x65d   : > { %12897 = vst [vmem:[#allocation210_spill] sm:$0xff] %v9680_v45  ;;  %v9703_v45 = vadd.s32 4294967280, %v9689_v8 }
 0x65f   : > { %12905 = vst [vmem:[#allocation217_spill] sm:$0xff] %v9703_v45  ;;  %v3345_v52 = vperm.slane %v9419_v25, %v9703_v45  ;;  %v3400_v25 = vperm.slane %v9464_v34, %v9689_v8 }
 0x662   : > { %v9713_v43 = vpop.permute.xlu2 %3266 }
 0x663   : > { %v9684_v0 = vpop.permute.xlu1 %3236  ;;  %v9686_v60 = vpop.permute.xlu0 %3233  ;;  %12907 = vst [vmem:[#allocation219_spill] sm:$0xff] %v9713_v43  ;;  %v9732_v43 = vadd.s32 4294967248, %v9689_v8 }
 0x664   : > { %12899 = vst [vmem:[#allocation212_spill] sm:$0xff] %v9684_v0  ;;  %v9708_v0 = vadd.s32 4294967272, %v9689_v8 }
 0x665   : > { %12900 = vst [vmem:[#allocation213_spill] sm:$0xff] %v9686_v60  ;;  %v3343_v60 = vsel %vm3342_vm2, %v3341_v47, %v3339_v1  ;;  %v9726_v47 = vadd.s32 4294967256, %v9689_v8 }
 0x666   : > { %12906 = vst [vmem:[#allocation218_spill] sm:$0xff] %v9708_v0  ;;  %v3349_v33 = vperm.slane %v9428_v22, %v9708_v0  ;;  %v3401_v22 = vperm.slane %v9435_v54, %v9692_v38  ;;  %v3432_v54 = vperm.slane %v9520_v31, %v9692_v38  ;;  %v3431_v31 = vperm.slane %v9480_v10, %v9689_v8 }
 0x667   : > { %v3411_v10 = vperm.slane %v9482_v26, %v9732_v43  ;;  %v9796_v26 = vadd.s32 4294967208, %v9689_v8 }
 0x66b   : > { %v9696_v42 = vpop.permute.xlu1 %3245  ;;  %v9698_v11 = vpop.permute.xlu0 %3242 }
 0x66c   : > { %12903 = vst [vmem:[#allocation215_spill] sm:$0xff] %v9696_v42 }
 0x66d   : > { %12904 = vst [vmem:[#allocation216_spill] sm:$0xff] %v9698_v11  ;;  %v3347_v11 = vsel %vm3346_vm4, %v3345_v52, %v3343_v60  ;;  %v3403_v52 = vperm.slane %v9475_v62, %v9703_v45  ;;  %v3353_v60 = vperm.slane %v9402_v28, %v9716_v17  ;;  %v3357_v62 = vperm.slane %v9407_v18, %v9726_v47 }
 0x66e   : > { %v3351_v1 = vsel %vm3350_vm5, %v3349_v33, %v3347_v11  ;;  %v3402_v33 = vsel %vm3342_vm2, %v3401_v22, %v3400_v25  ;;  %v3405_v11 = vperm.slane %v9473_v58, %v9708_v0  ;;  %v3361_v28 = vperm.slane %v9439_v7, %v9732_v43 }
 0x66f   : > { %v3355_v34 = vsel %vm3354_vm6, %v3353_v60, %v3351_v1  ;;  %v9759_v25 = vadd.s32 4294967232, %v9689_v8  ;;  %v9763_v18 = vadd.s32 4294967224, %v9689_v8  ;;  %v9765_v60 = vpop.permute.xlu2 %3275  ;;  %v3409_v22 = vperm.slane %v9484_v59, %v9726_v47 }
 0x670   : > { %v3359_v58 = vsel %vm12237_vm7, %v3357_v62, %v3355_v34  ;;  %12910 = vst [vmem:[#allocation222_spill] sm:$0xff] %v9765_v60  ;;  %v3407_v34 = vperm.slane %v9444_v20, %v9716_v17  ;;  %v3434_v62 = vperm.slane %v9518_v56, %v9703_v45  ;;  %v3433_v60 = vsel %vm3342_vm2, %v3432_v54, %v3431_v31 }
 0x671   : > { %v3369_v56 = vperm.slane %v9412_v19, %v9759_v25  ;;  %v3438_v54 = vperm.slane %v9529_v14, %v9716_v17  ;;  %v3415_v31 = vperm.slane %v9493_v39, %v9759_v25  ;;  %v9827_v39 = vadd.s32 4294967184, %v9689_v8 }
 0x673   : > { %v9719_v42 = vpop.permute.xlu1 %3254  ;;  %v9721_v41 = vpop.permute.xlu0 %3251  ;;  %12912 = vst [vmem:[#allocation224_spill] sm:$0xff] %v9827_v39 }
 0x674   : > { %12908 = vst [vmem:[#allocation220_spill] sm:$0xff] %v9719_v42  ;;  %v9741_v42 = vadd.s32 4294967240, %v9689_v8 }
 0x675   : > { %12909 = vst [vmem:[#allocation221_spill] sm:$0xff] %v9721_v41  ;;  %v3404_v41 = vsel %vm3346_vm4, %v3403_v52, %v3402_v33  ;;  %v3363_v33 = vsel %vm3362_vm8, %v3361_v28, %v3359_v58  ;;  %v3435_v28 = vsel %vm3346_vm4, %v3434_v62, %v3433_v60  ;;  %v9799_v58 = vadd.s32 4294967200, %v9689_v8 }
 0x676   : > { %v3365_v7 = vperm.slane %v9437_v63, %v9741_v42  ;;  %v3406_v52 = vsel %vm3350_vm5, %v3405_v11, %v3404_v41  ;;  %v9781_v63 = vadd.s32 4294967216, %v9689_v8  ;;  %v3373_v11 = vperm.slane %v9448_v29, %v9763_v18 }
 0x677   : > { %v3408_v41 = vsel %vm3354_vm6, %v3407_v34, %v3406_v52  ;;  %12911 = vst [vmem:[#allocation223_spill] sm:$0xff] %v9799_v58  ;;  %v3436_v29 = vperm.slane %v9489_v27, %v9708_v0  ;;  %v3440_v27 = vperm.slane %v9527_v5, %v9726_v47 }
 0x678   : > { %v3367_v59 = vsel %vm3366_vm9, %v3365_v7, %v3363_v33  ;;  %v3410_v20 = vsel %vm12237_vm7, %v3409_v22, %v3408_v41  ;;  %v3377_v19 = vperm.slane %v9446_v2, %v9781_v63  ;;  %v3413_v33 = vperm.slane %v9453_v46, %v9741_v42  ;;  %v9824_v41 = vpop.permute.xlu2 %3284 }
 0x679   : > { %v3371_v60 = vsel %vm3370_vm10, %v3369_v56, %v3367_v59  ;;  %v3412_v14 = vsel %vm3362_vm8, %v3411_v10, %v3410_v20  ;;  %v3437_v34 = vsel %vm3350_vm5, %v3436_v29, %v3435_v28  ;;  %v3463_v2 = vperm.slane %v9563_v12, %v9692_v38 }
 0x67a   : > { %v3375_v22 = vsel %vm12238_vm11, %v3373_v11, %v3371_v60  ;;  %v3439_v62 = vsel %vm3354_vm6, %v3438_v54, %v3437_v34  ;;  %v3462_v10 = vperm.slane %v9565_v4, %v9689_v8  ;;  %v3417_v46 = vperm.slane %v9491_v24, %v9763_v18 }
 0x67b   : > { %v9754_v16 = vpop.permute.xlu1 %3263  ;;  %v9756_v1 = vpop.permute.xlu0 %3260  ;;  %v3414_v5 = vsel %vm3366_vm9, %v3413_v33, %v3412_v14  ;;  %v3381_v59 = vperm.slane %v9417_v13, %v9796_v26  ;;  %v3379_v11 = vsel %vm3378_vm12, %v3377_v19, %v3375_v22  ;;  %v9836_v12 = vadd.s32 4294967192, %v9689_v8 }
 0x67c   : > { %v3416_v4 = vsel %vm3370_vm10, %v3415_v31, %v3414_v5  ;;  %v3385_v20 = vperm.slane %v9457_v6, %v9799_v58  ;;  %v3441_v56 = vsel %vm12237_vm7, %v3440_v27, %v3439_v62  ;;  %v3444_v24 = vperm.slane %v9538_v37, %v9741_v42 }
 0x67d   : > { %12913 = vst [vmem:[#allocation225_spill] sm:$0xff] %v9836_v12  ;;  %v3442_v13 = vperm.slane %v9498_v55, %v9732_v43  ;;  %v3464_v28 = vsel %vm3342_vm2, %v3463_v2, %v3462_v10  ;;  %v3467_v54 = vperm.slane %v9574_v50, %v9708_v0  ;;  %v3383_v29 = vsel %vm3382_vm13, %v3381_v59, %v3379_v11 }
 0x67e   : > { %v3418_v19 = vsel %vm12238_vm11, %v3417_v46, %v3416_v4  ;;  %v3421_v6 = vperm.slane %v9502_v44, %v9796_v26  ;;  %v3465_v60 = vperm.slane %v9534_v61, %v9703_v45  ;;  %v3389_v55 = vperm.slane %v9455_v36, %v9836_v12 }
 0x67f   : > { %v3419_v50 = vperm.slane %v9462_v15, %v9781_v63  ;;  %v3446_v31 = vperm.slane %v9536_v3, %v9759_v25  ;;  %v3443_v22 = vsel %vm3362_vm8, %v3442_v13, %v3441_v56  ;;  %v3387_v44 = vsel %vm12242_vm14, %v3385_v20, %v3383_v29 }
 0x680   : > { %v3445_v33 = vsel %vm3366_vm9, %v3444_v24, %v3443_v22  ;;  %v3469_v61 = vperm.slane %v9572_v48, %v9716_v17  ;;  %v3466_v27 = vsel %vm3346_vm4, %v3465_v60, %v3464_v28  ;;  %v9872_v34 = vadd.s32 4294967176, %v9689_v8  ;;  %v9885_v5 = vpop.permute.xlu2 %3293  ;;  %v12917_v60 = vld [vmem:[#allocation184_spill] sm:$0xff] }
 0x681   : > { %v3423_v15 = vperm.slane %v9500_v49, %v9799_v58  ;;  %v3420_v36 = vsel %vm3378_vm12, %v3419_v50, %v3418_v19  ;;  %v3468_v3 = vsel %vm3350_vm5, %v3467_v54, %v3466_v27  ;;  %v3393_v2 = vperm.slane %v9426_v32, %v9827_v39  ;;  %v12915_v54 = vld [vmem:[#allocation202_spill] sm:$0xff] }
 0x682   : > { %12914 = vst [vmem:[#allocation226_spill] sm:$0xff] %v9872_v34  ;;  %v3422_v62 = vsel %vm3382_vm13, %v3421_v6, %v3420_v36  ;;  %v3391_v48 = vsel %vm3390_vm15, %v3389_v55, %v3387_v44  ;;  %v3447_v10 = vsel %vm3370_vm10, %v3446_v31, %v3445_v33  ;;  %v3450_v46 = vperm.slane %v9547_v40, %v9781_v63  ;;  %v12918_v31 = vld [vmem:[#allocation188_spill] sm:$0xff]  ;;  %v12919_v44 = vld [vmem:[#allocation189_spill] sm:$0xff] }
 0x683   : > { %v9803_v7 = vpop.permute.xlu1 %3272  ;;  %v9805_v52 = vpop.permute.xlu0 %3269  ;;  %v3448_v49 = vperm.slane %v9507_v57, %v9763_v18  ;;  %v3470_v59 = vsel %vm3354_vm6, %v3469_v61, %v3468_v3  ;;  %v3473_v11 = vperm.slane %v9583_v30, %v9732_v43  ;;  %v3397_v32 = vperm.slane %v9466_v23, %v9872_v34  ;;  %v12920_v61 = vld [vmem:[#allocation169_spill] sm:$0xff]  ;;  %v12921_v36 = vld [vmem:[#allocation176_spill] sm:$0xff] }
 0x684   : > { %v3424_v4 = vsel %vm12242_vm14, %v3423_v15, %v3422_v62  ;;  %v3427_v20 = vperm.slane %v9511_v9, %v9827_v39  ;;  %v3471_v40 = vperm.slane %v9543_v21, %v9726_v47  ;;  %v3395_v56 = vsel %vm3394_vm0, %v3393_v2, %v3391_v48  ;;  %v12922_v62 = vld [vmem:[#allocation201_spill] sm:$0xff] }
 0x685   : > { %v3425_v57 = vperm.slane %v9471_v51, %v9836_v12  ;;  %v3452_v24 = vperm.slane %v9545_v35, %v9796_v26  ;;  %v3449_v30 = vsel %vm12238_vm11, %v3448_v49, %v3447_v10  ;;  %v3475_v9 = vperm.slane %v9581_v53, %v9741_v42  ;;  %v12916_v51 = vld [vmem:[#allocation168_spill] sm:$0xff] }
 0x686   : > { %v3451_v28 = vsel %vm3378_vm12, %v3450_v46, %v3449_v30  ;;  %v3472_v21 = vsel %vm12237_vm7, %v3471_v40, %v3470_v59  ;;  %v3525_v29 = vperm.slane %v12915_v54, %v9692_v38  ;;  %v3429_v19 = vperm.slane %v12916_v51, %v9872_v34  ;;  %v12923_v46 = vld [vmem:[#allocation215_spill] sm:$0xff]  ;;  %v12924_v59 = vld [vmem:[#allocation216_spill] sm:$0xff]  ;;  %v12929_v51 = vld [vmem:[#allocation177_spill] sm:$0xff] }
 0x687   : > { %v3426_v35 = vsel %vm3390_vm15, %v3425_v57, %v3424_v4  ;;  %v3474_v6 = vsel %vm3362_vm8, %v3473_v11, %v3472_v21  ;;  %v3493_v55 = vperm.slane %v12917_v60, %v9689_v8  ;;  %v9920_v50 = vsel %vm3398_vm1, %v3397_v32, %v3395_v56  ;;  %v12925_v4 = vld [vmem:[#allocation171_spill] sm:$0xff]  ;;  %v12930_v60 = vld [vmem:[#allocation205_spill] sm:$0xff] }
 0x688   : > { %v3428_v53 = vsel %vm3394_vm0, %v3427_v20, %v3426_v35  ;;  %v3496_v22 = vperm.slane %v12918_v31, %v9703_v45  ;;  %v3524_v33 = vperm.slane %v12919_v44, %v9689_v8  ;;  %v3454_v27 = vperm.slane %v12920_v61, %v9799_v58  ;;  %v12926_v56 = vld [vmem:[#allocation187_spill] sm:$0xff]  ;;  %v12931_v44 = vld [vmem:[#allocation178_spill] sm:$0xff] }
 0x689   : > { %v3453_v15 = vsel %vm3382_vm13, %v3452_v24, %v3451_v28  ;;  %v3494_v3 = vperm.slane %v12921_v36, %v9692_v38  ;;  %v3527_v2 = vperm.slane %v12922_v62, %v9703_v45  ;;  %v3476_v48 = vsel %vm3366_vm9, %v3475_v9, %v3474_v6  ;;  %v12927_v24 = vld [vmem:[#allocation172_spill] sm:$0xff]  ;;  %v12928_v9 = vld [vmem:[#allocation179_spill] sm:$0xff]  ;;  %v12932_v61 = vld [vmem:[#allocation194_spill] sm:$0xff] }
 0x68a   : > { %v3526_v10 = vsel %vm3342_vm2, %v3525_v29, %v3524_v33  ;;  %v3556_v49 = vperm.slane %v12923_v46, %v9692_v38  ;;  %v3555_v11 = vperm.slane %v12924_v59, %v9689_v8  ;;  %v9941_v32 = vsel %vm3398_vm1, %v3429_v19, %v3428_v53  ;;  %v9954_v29 = vpop.permute.xlu2 %3302  ;;  %v12934_v62 = vld [vmem:[#allocation191_spill] sm:$0xff] }
 0x68b   : > { %v9855_v37 = vpop.permute.xlu1 %3281  ;;  %v9857_v14 = vpop.permute.xlu0 %3278  ;;  %v3477_v20 = vperm.slane %v12925_v4, %v9759_v25  ;;  %v3495_v40 = vsel %vm3342_vm2, %v3494_v3, %v3493_v55  ;;  %v3498_v57 = vperm.slane %v12926_v56, %v9708_v0  ;;  %v3458_v30 = vperm.slane %v12927_v24, %v9827_v39  ;;  %v12936_v4 = vld [vmem:[#allocation204_spill] sm:$0xff] }
 0x68c   : > { %v3455_v28 = vsel %vm12242_vm14, %v3454_v27, %v3453_v15  ;;  %v3479_v21 = vperm.slane %v12928_v9, %v9763_v18  ;;  %v3497_v54 = vsel %vm3346_vm4, %v3496_v22, %v3495_v40  ;;  %v3500_v19 = vperm.slane %v12929_v51, %v9716_v17  ;;  %v12933_v15 = vld [vmem:[#allocation221_spill] sm:$0xff]  ;;  %v12937_v56 = vld [vmem:[#allocation220_spill] sm:$0xff]  ;;  %v12939_v51 = vld [vmem:[#allocation190_spill] sm:$0xff] }
 0x68d   : > { %v3478_v35 = vsel %vm3370_vm10, %v3477_v20, %v3476_v48  ;;  %v3528_v6 = vsel %vm3346_vm4, %v3527_v2, %v3526_v10  ;;  %v3531_v55 = vperm.slane %v12930_v60, %v9716_v17  ;;  %v3481_v33 = vperm.slane %v12931_v44, %v9781_v63  ;;  %v12935_v48 = vld [vmem:[#allocation211_spill] sm:$0xff] }
 0x68e   : > { %v3529_v22 = vperm.slane %v12932_v61, %v9708_v0  ;;  %v3557_v27 = vsel %vm3342_vm2, %v3556_v49, %v3555_v11  ;;  %v3560_v36 = vperm.slane %v12933_v15, %v9708_v0  ;;  %v3499_v3 = vsel %vm3350_vm5, %v3498_v57, %v3497_v54  ;;  %v12941_v15 = vld [vmem:[#allocation207_spill] sm:$0xff] }
 0x68f   : > { %v3502_v2 = vperm.slane %v12934_v62, %v9726_v47  ;;  %v3558_v10 = vperm.slane %v12935_v48, %v9703_v45  ;;  %v3480_v59 = vsel %vm12238_vm11, %v3479_v21, %v3478_v35  ;;  %v3533_v20 = vperm.slane %v12936_v4, %v9726_v47  ;;  %v12943_v48 = vld [vmem:[#allocation197_spill] sm:$0xff] }
 0x690   : > { %v3530_v49 = vsel %vm3350_vm5, %v3529_v22, %v3528_v6  ;;  %v3562_v57 = vperm.slane %v12937_v56, %v9716_v17  ;;  %v3587_v54 = vperm.slane %v9885_v5, %v9692_v38  ;;  %v3504_v35 = vperm.slane %v12939_v51, %v9732_v43 }
 0x691   : > { %v3532_v40 = vsel %vm3354_vm6, %v3531_v55, %v3530_v49  ;;  %v3559_v9 = vsel %vm3346_vm4, %v3558_v10, %v3557_v27  ;;  %v3501_v6 = vsel %vm3354_vm6, %v3500_v19, %v3499_v3  ;;  %v12940_v55 = vld [vmem:[#allocation174_spill] sm:$0xff]  ;;  %v3482_v5 = vsel %vm3378_vm12, %v3481_v33, %v3480_v59  ;;  %v12945_v49 = vld [vmem:[#allocation193_spill] sm:$0xff] }
 0x692   : > { %v3561_v60 = vsel %vm3350_vm5, %v3560_v36, %v3559_v9  ;;  %v3503_v44 = vsel %vm12237_vm7, %v3502_v2, %v3501_v6  ;;  %v3534_v27 = vsel %vm12237_vm7, %v3533_v20, %v3532_v40  ;;  %v3537_v62 = vperm.slane %v12941_v15, %v9741_v42  ;;  %v12942_v36 = vld [vmem:[#allocation180_spill] sm:$0xff]  ;;  %v12944_v59 = vld [vmem:[#allocation182_spill] sm:$0xff]  ;;  %v3312_v9 = vpop.permute.xlu2 %3311 }
 0x693   : > { %v3291_v13 = vpop.permute.xlu1 %3290  ;;  %v9905_v23 = vpop.permute.xlu0 %3287  ;;  %v3506_v3 = vperm.slane %v12942_v36, %v9741_v42  ;;  %v3535_v10 = vperm.slane %v12943_v48, %v9732_v43  ;;  %v3563_v2 = vsel %vm3354_vm6, %v3562_v57, %v3561_v60  ;;  %v3485_v4 = vperm.slane %v12944_v59, %v9799_v58  ;;  %v12946_v40 = vld [vmem:[#allocation214_spill] sm:$0xff]  ;;  %v12949_v48 = vld [vmem:[#allocation181_spill] sm:$0xff] }
 0x694   : > { %v3586_v46 = vperm.slane %v3291_v13, %v9689_v8  ;;  %v12938_v13 = vld [vmem:[#allocation173_spill] sm:$0xff]  ;;  %v3505_v20 = vsel %vm3362_vm8, %v3504_v35, %v3503_v44  ;;  %v3564_v56 = vperm.slane %v12946_v40, %v9726_v47  ;;  %v3568_v35 = vperm.slane %v9754_v16, %v9741_v42  ;;  %v12954_v40 = vld [vmem:[#allocation219_spill] sm:$0xff] }
 0x695   : > { %v3456_v21 = vperm.slane %v12938_v13, %v9836_v12  ;;  %v3536_v13 = vsel %vm3362_vm8, %v3535_v10, %v3534_v27  ;;  %v3507_v27 = vsel %vm3366_vm9, %v3506_v3, %v3505_v20 }
 0x696   : > { %v3588_v61 = vsel %vm3342_vm2, %v3587_v54, %v3586_v46  ;;  %v12947_v54 = vld [vmem:[#allocation206_spill] sm:$0xff]  ;;  %v3538_v6 = vsel %vm3366_vm9, %v3537_v62, %v3536_v13  ;;  %v3565_v60 = vsel %vm12237_vm7, %v3564_v56, %v3563_v2  ;;  %v3570_v56 = vperm.slane %v12954_v40, %v9759_v25  ;;  %v12964_v40 = vld [vmem:[#allocation199_spill] sm:$0xff] }
 0x697   : > { %v3539_v57 = vperm.slane %v12947_v54, %v9759_v25  ;;  %v3457_v44 = vsel %vm3390_vm15, %v3456_v21, %v3455_v28  ;;  %v12950_v21 = vld [vmem:[#allocation210_spill] sm:$0xff] }
 0x698   : > { %v3543_v10 = vperm.slane %v12950_v21, %v9781_v63 }
 0x699   : > { %v3540_v28 = vsel %vm3370_vm10, %v3539_v57, %v3538_v6  ;;  %v12955_v57 = vld [vmem:[#allocation209_spill] sm:$0xff] }
 0x69a   : > { %v3545_v13 = vperm.slane %v12955_v57, %v9796_v26 }
 0x69b   : > { %v3300_v53 = vpop.permute.xlu1 %3299  ;;  %v3297_v31 = vpop.permute.xlu0 %3296 }
 0x69c   : > { %v3589_v11 = vperm.slane %v3297_v31, %v9703_v45  ;;  %v3483_v31 = vperm.slane %v12940_v55, %v9796_v26  ;;  %v3591_v22 = vperm.slane %v3300_v53, %v9708_v0  ;;  %v3566_v53 = vperm.slane %v9756_v1, %v9732_v43 }
 0x69d   : > { %v3593_v55 = vperm.slane %v9954_v29, %v9716_v17  ;;  %v3487_v29 = vperm.slane %v12949_v48, %v9836_v12 }
 0x69e   : > { %v3590_v19 = vsel %vm3346_vm4, %v3589_v11, %v3588_v61  ;;  %v3508_v11 = vperm.slane %v12945_v49, %v9759_v25  ;;  %v12948_v61 = vld [vmem:[#allocation192_spill] sm:$0xff] }
 0x69f   : > { %v3592_v1 = vsel %vm3350_vm5, %v3591_v22, %v3590_v19  ;;  %v3510_v15 = vperm.slane %v12948_v61, %v9763_v18  ;;  %v3567_v22 = vsel %vm3362_vm8, %v3566_v53, %v3565_v60  ;;  %v3484_v19 = vsel %vm3382_vm13, %v3483_v31, %v3482_v5  ;;  %v12951_v31 = vld [vmem:[#allocation200_spill] sm:$0xff]  ;;  %v12956_v61 = vld [vmem:[#allocation170_spill] sm:$0xff] }
 0x6a0   : > { %v3509_v62 = vsel %vm3370_vm10, %v3508_v11, %v3507_v27  ;;  %v3594_v36 = vsel %vm3354_vm6, %v3593_v55, %v3592_v1  ;;  %v3486_v2 = vsel %vm12242_vm14, %v3485_v4, %v3484_v19  ;;  %v3541_v5 = vperm.slane %v12951_v31, %v9763_v18  ;;  %v12953_v49 = vld [vmem:[#allocation196_spill] sm:$0xff]  ;;  %v12957_v27 = vld [vmem:[#allocation195_spill] sm:$0xff] }
 0x6a1   : > { %v3569_v53 = vsel %vm3366_vm9, %v3568_v35, %v3567_v22  ;;  %v3511_v20 = vsel %vm12238_vm11, %v3510_v15, %v3509_v62  ;;  %v3514_v11 = vperm.slane %v12953_v49, %v9796_v26  ;;  %v3574_v35 = vperm.slane %v9803_v7, %v9781_v63  ;;  %v12963_v49 = vld [vmem:[#allocation222_spill] sm:$0xff] }
 0x6a2   : > { %v3542_v1 = vsel %vm12238_vm11, %v3541_v5, %v3540_v28  ;;  %v3571_v60 = vsel %vm3370_vm10, %v3570_v56, %v3569_v53  ;;  %v3599_v55 = vperm.slane %v3312_v9, %v9741_v42  ;;  %v3460_v15 = vperm.slane %v12956_v61, %v9872_v34  ;;  %v12958_v28 = vld [vmem:[#allocation175_spill] sm:$0xff] }
 0x6a3   : > { %v3309_v46 = vpop.permute.xlu1 %3308  ;;  %v3306_v33 = vpop.permute.xlu0 %3305  ;;  %v3544_v6 = vsel %vm3378_vm12, %v3543_v10, %v3542_v1  ;;  %v3516_v22 = vperm.slane %v12957_v27, %v9799_v58  ;;  %v3459_v7 = vsel %vm3394_vm0, %v3458_v30, %v3457_v44  ;;  %v3489_v21 = vperm.slane %v12958_v28, %v9827_v39  ;;  %v12959_v5 = vld [vmem:[#allocation203_spill] sm:$0xff]  ;;  %v12960_v30 = vld [vmem:[#allocation213_spill] sm:$0xff] }
 0x6a4   : > { %v3595_v51 = vperm.slane %v3306_v33, %v9726_v47  ;;  %v3597_v16 = vperm.slane %v3309_v46, %v9732_v43  ;;  %v3572_v46 = vperm.slane %v9805_v52, %v9763_v18  ;;  %v12952_v33 = vld [vmem:[#allocation183_spill] sm:$0xff]  ;;  %v3488_v10 = vsel %vm3390_vm15, %v3487_v29, %v3486_v2  ;;  %v12962_v29 = vld [vmem:[#allocation186_spill] sm:$0xff] }
 0x6a5   : > { %v3512_v59 = vperm.slane %v12952_v33, %v9781_v63  ;;  %v3547_v24 = vperm.slane %v12959_v5, %v9799_v58  ;;  %v3549_v44 = vperm.slane %v12960_v30, %v9836_v12  ;;  %v12961_v33 = vld [vmem:[#allocation185_spill] sm:$0xff]  ;;  %v3518_v2 = vperm.slane %v12962_v29, %v9836_v12 }
 0x6a6   : > { %v3596_v3 = vsel %vm12237_vm7, %v3595_v51, %v3594_v36  ;;  %vm12240_vm7 = vcmask 1042434   ;;  %v3573_v62 = vsel %vm12238_vm11, %v3572_v46, %v3571_v60  ;;  %v3578_v46 = vperm.slane %v9857_v14, %v9799_v58 }
 0x6a7   : > { %v3598_v52 = vsel %vm3362_vm8, %v3597_v16, %v3596_v3  ;;  %v3513_v19 = vsel %vm3378_vm12, %v3512_v59, %v3511_v20  ;;  %v3321_v16 = vpop.permute.xlu2 %3320  ;;  %v3546_v3 = vsel %vm3382_vm13, %v3545_v13, %v3544_v6  ;;  %v3575_v53 = vsel %vm3378_vm12, %v3574_v35, %v3573_v62 }
 0x6a8   : > { %v3515_v36 = vsel %vm3382_vm13, %v3514_v11, %v3513_v19  ;;  %v3600_v48 = vsel %vm3366_vm9, %v3599_v55, %v3598_v52  ;;  %v3491_v59 = vperm.slane %v12961_v33, %v9872_v34  ;;  %v3576_v11 = vperm.slane %v12963_v49, %v9796_v26 }
 0x6a9   : > { %v3517_v20 = vsel %vm12242_vm14, %v3516_v22, %v3515_v36  ;;  %v3520_v56 = vperm.slane %v12964_v40, %v9827_v39  ;;  %v3548_v57 = vsel %vm12242_vm14, %v3547_v24, %v3546_v3  ;;  %v3580_v52 = vperm.slane %v9855_v37, %v9836_v12  ;;  %v12966_v22 = vld [vmem:[#allocation198_spill] sm:$0xff] }
 0x6aa   : > { %v3605_v6 = vperm.slane %v3321_v16, %v9781_v63  ;;  %v3461_v60 = vsel %vm3398_vm1, %v3460_v15, %v3459_v7  ;;  %v3490_v55 = vsel %vm3394_vm0, %v3489_v21, %v3488_v10  ;;  %v3550_v61 = vsel %vm3390_vm15, %v3549_v44, %v3548_v57 }
 0x6ab   : > { %v3318_v4 = vpop.permute.xlu1 %3317  ;;  %v3315_v54 = vpop.permute.xlu0 %3314  ;;  %v3522_v19 = vperm.slane %v12966_v22, %v9872_v34  ;;  %v3519_v62 = vsel %vm3390_vm15, %v3518_v2, %v3517_v20  ;;  %v3492_v16 = vsel %vm3398_vm1, %v3491_v59, %v3490_v55  ;;  %v3584_v21 = vperm.slane %v9905_v23, %v9872_v34 }
 0x6ac   : > { %v3601_v51 = vperm.slane %v3315_v54, %v9759_v25  ;;  %v3603_v9 = vperm.slane %v3318_v4, %v9763_v18  ;;  %v12965_v4 = vld [vmem:[#allocation212_spill] sm:$0xff]  ;;  %v3521_v15 = vsel %vm3394_vm0, %v3520_v56, %v3519_v62  ;;  %v3582_v24 = vperm.slane %v9824_v41, %v9827_v39 }
 0x6ad   : > { %v3551_v54 = vperm.slane %v12965_v4, %v9827_v39 }
 0x6ae   : > { %v3602_v31 = vsel %vm3370_vm10, %v3601_v51, %v3600_v48  ;;  %v3577_v51 = vsel %vm3382_vm13, %v3576_v11, %v3575_v53 }
 0x6af   : > { %v3604_v14 = vsel %vm12238_vm11, %v3603_v9, %v3602_v31  ;;  %v3579_v27 = vsel %vm12242_vm14, %v3578_v46, %v3577_v51  ;;  %vm12241_vm11 = vcmask 1043459   ;;  %v3618_v9 = vsel %vm12239_vm3, %v9941_v32, %v9920_v50  ;;  %v3330_v10 = vpop.permute.xlu2 %3329  ;;  %v12967_v31 = vld [vmem:[#allocation208_spill] sm:$0xff] }
 0x6b0   : > { %v3606_v36 = vsel %vm3378_vm12, %v3605_v6, %v3604_v14  ;;  %v3552_v48 = vsel %vm3394_vm0, %v3551_v54, %v3550_v61  ;;  %v3581_v28 = vsel %vm3390_vm15, %v3580_v52, %v3579_v27  ;;  %v3620_v3 = vsel %vm12240_vm7, %v3461_v60, %v3618_v9  ;;  %v10148_v54 = vld [vmem:[#allocation4] sm:$0xff]  ;;  %v12972_v60 = vld [vmem:[#allocation119_spill] sm:$0xff] }
 0x6b1   : > { %v3553_v5 = vperm.slane %v12967_v31, %v9872_v34  ;;  %v3622_v30 = vsel %vm12241_vm11, %v3492_v16, %v3620_v3  ;;  %v3523_v50 = vsel %vm3398_vm1, %v3522_v19, %v3521_v15  ;;  %vm12243_vm3 = vcmask 1044484   ;;  %12968 = vst [vmem:[#allocation202_spill] sm:$0xff] %v10148_v54  ;;  %v12971_v6 = vld [vmem:[#allocation41_spill] sm:$0xff]  ;;  %v12973_v61 = vld [vmem:[#allocation111_spill] sm:$0xff] }
 0x6b2   : > { %v3611_v44 = vperm.slane %v3330_v10, %v9836_v12  ;;  %v3583_v33 = vsel %vm3394_vm0, %v3582_v24, %v3581_v28  ;;  %vm3625_vm7 = vcmask 1045509   ;;  %vm12346_vm11 = vcmask 1046534   ;;  %v12975_v16 = vld [vmem:[#allocation127_spill] sm:$0xff] }
 0x6b3   : > { %v3327_v13 = vpop.permute.xlu1 %3326  ;;  %v3324_v1 = vpop.permute.xlu0 %3323  ;;  %v3554_v46 = vsel %vm3398_vm1, %v3553_v5, %v3552_v48  ;;  %v3585_v29 = vsel %vm3398_vm1, %v3584_v21, %v3583_v33  ;;  %v3624_v20 = vsel %vm12243_vm3, %v3523_v50, %v3622_v30  ;;  %vm12970_vm3 = vcmask 7168   ;;  %v12980_v5 = vld [vmem:[#allocation128_spill] sm:$0xff]  ;;  %v12981_v30 = vld [vmem:[#allocation151_spill] sm:$0xff] }
 0x6b4   : > { %v3607_v35 = vperm.slane %v3324_v1, %v9796_v26  ;;  %v3609_v37 = vperm.slane %v3327_v13, %v9799_v58  ;;  %v3626_v11 = vsel %vm3625_vm7, %v3554_v46, %v3624_v20  ;;  %v12987_v20 = vld [vmem:[#allocation36_spill] sm:$0xff] }
 0x6b5   : > { %v3628_v56 = vsel %vm12346_vm11, %v3585_v29, %v3626_v11  ;;  %v12986_v29 = vld [vmem:[#allocation31_spill] sm:$0xff]  ;;  %v12988_v11 = vld [vmem:[#allocation29_spill] sm:$0xff]  ;;  %vm13233_vm11 = vcmask 1043459  }
 0x6b6   : > { %v3608_v7 = vsel %vm3382_vm13, %v3607_v35, %v3606_v36 }
 0x6b7   : > { %v3610_v32 = vsel %vm12242_vm14, %v3609_v37, %v3608_v7  ;;  %vm12345_vm14 = vcmask 1047559   ;;  %v12974_v37 = vld [vmem:[#allocation112_spill] sm:$0xff]  ;;  %v12976_v7 = vld [vmem:[#allocation135_spill] sm:$0xff] }
 0x6b8   : > { %v3612_v2 = vsel %vm3390_vm15, %v3611_v44, %v3610_v32  ;;  %v12982_v32 = vld [vmem:[#allocation159_spill] sm:$0xff] }
 0x6bb   : > { %v3336_v53 = vpop.permute.xlu1 %3335  ;;  %v3333_v23 = vpop.permute.xlu0 %3332 }
 0x6bc   : > { %v3615_v59 = vperm.slane %v3336_v53, %v9872_v34  ;;  %v3613_v41 = vperm.slane %v3333_v23, %v9827_v39 }
 0x6be   : > { %v3614_v49 = vsel %vm3394_vm0, %v3613_v41, %v3612_v2 }
 0x6bf   : > { %v3616_v40 = vsel %vm3398_vm1, %v3615_v59, %v3614_v49 }
 0x6c0   : > { %v3630_v4 = vsel %vm12345_vm14, %v3616_v40, %v3628_v56 }
 0x6c1   : > { %3632 = vmax.xlane.f32.xlu2 %v3630_v4 }
 0x734   : > { %v3633_v57 = vpop.xlane.xlu2 %3632 }
 0x735   : > { %v10151_v14 = vmax.f32 %v10148_v54, %v3633_v57 }
 0x737   : > { %12969 = vst [vmem:[#allocation168_spill] sm:$0xff] %v10151_v14  ;;  %3640 = vperm.xlu0 %6603, %v10151_v14  }
 0x738   : > { %5873 = vst.msk [vmem:[#allocation4] sm:$0xff] %vm12970_vm3, %v10151_v14  ;;  %vm13170_vm3 = vcmask 392512  }
 0x7a9   : > { %v10158_v1 = vpop.permute.xlu0 %3640 }
 0x7aa   : > { %v10161_v52 = vperm.slane %v10158_v1, 0  ;;  %v10164_v51 = vperm.slane %v10158_v1, 1 }
 0x7ac   : > { %v3667_v35 = vsub.f32 %v12971_v6, %v10161_v52  ;;  %v3659_v55 = vsub.f32 %v12972_v60, %v10161_v52  ;;  %v3658_v27 = vsub.f32 %v12973_v61, %v10161_v52  ;;  %v3674_v36 = vsub.f32 %v12974_v37, %v10164_v51 }
 0x7ad   : > { %v3661_v15 = vsub.f32 %v12975_v16, %v10161_v52  ;;  %v3660_v9 = vsub.f32 %v12976_v7, %v10161_v52  ;;  %v3677_v24 = vsub.f32 %v12980_v5, %v10164_v51  ;;  %v3663_v50 = vsub.f32 %v12981_v30, %v10161_v52 }
 0x7ae   : > { %v3804_v22 = vmul.f32 1.442695, %v3667_v35  ;;  %v3788_v19 = vmul.f32 1.442695, %v3659_v55  ;;  %v3786_v62 = vmul.f32 1.442695, %v3658_v27  ;;  %v3662_v44 = vsub.f32 %v12982_v32, %v10161_v52 }
 0x7af   : > { %v3818_v48 = vmul.f32 1.442695, %v3674_v36  ;;  %v3792_v28 = vmul.f32 1.442695, %v3661_v15  ;;  %v3790_v10 = vmul.f32 1.442695, %v3660_v9  ;;  %v3680_v2 = vsub.f32 %v12986_v29, %v10164_v51 }
 0x7b0   : > { %6946 = vpow2.f32 %v3804_v22  ;;  %v3824_v53 = vmul.f32 1.442695, %v3677_v24  ;;  %v3796_v23 = vmul.f32 1.442695, %v3663_v50  ;;  %v3794_v33 = vmul.f32 1.442695, %v3662_v44 }
 0x7b1   : > { %6948 = vpow2.f32 %v3788_v19  ;;  %v3665_v49 = vsub.f32 %v12987_v20, %v10161_v52  ;;  %v3664_v40 = vsub.f32 %v12988_v11, %v10161_v52  ;;  %v3830_v56 = vmul.f32 1.442695, %v3680_v2  ;;  %v12992_v55 = vld [vmem:[#allocation43_spill] sm:$0xff]  ;;  %v12993_v27 = vld [vmem:[#allocation25_spill] sm:$0xff]  ;;  %v13000_v24 = vld [vmem:[#allocation28_spill] sm:$0xff] }
 0x7b2   : > { %6950 = vpow2.f32 %v3786_v62  ;;  %v3683_v61 = vsub.f32 %v12992_v55, %v10164_v51  ;;  %v3668_v22 = vsub.f32 %v12993_v27, %v10161_v52  ;;  %v12994_v19 = vld [vmem:[#allocation143_spill] sm:$0xff]  ;;  %v3669_v30 = vsub.f32 %v13000_v24, %v10161_v52  ;;  %v13004_v29 = vld [vmem:[#allocation49_spill] sm:$0xff]  ;;  %v13005_v20 = vld [vmem:[#allocation42_spill] sm:$0xff] }
 0x7b3   : > { %6952 = vpow2.f32 %v3818_v48  ;;  %v3800_v4 = vmul.f32 1.442695, %v3665_v49  ;;  %v3798_v6 = vmul.f32 1.442695, %v3664_v40  ;;  %v3666_v62 = vsub.f32 %v12994_v19, %v10161_v52  ;;  %v12998_v48 = vld [vmem:[#allocation34_spill] sm:$0xff]  ;;  %v13006_v11 = vld [vmem:[#allocation39_spill] sm:$0xff] }
 0x7b4   : > { %6954 = vpow2.f32 %v3792_v28  ;;  %v3836_v37 = vmul.f32 1.442695, %v3683_v61  ;;  %v3806_v36 = vmul.f32 1.442695, %v3668_v22  ;;  %v3686_v28 = vsub.f32 %v12998_v48, %v10164_v51  ;;  %v13010_v19 = vld [vmem:[#allocation137_spill] sm:$0xff] }
 0x7b5   : > { %6956 = vpow2.f32 %v3790_v10  ;;  %v3802_v15 = vmul.f32 1.442695, %v3666_v62  ;;  %v12999_v10 = vld [vmem:[#allocation32_spill] sm:$0xff]  ;;  %v3689_v2 = vsub.f32 %v13004_v29, %v10164_v51  ;;  %v3672_v49 = vsub.f32 %v13005_v20, %v10161_v52 }
 0x7b6   : > { %v10178_v21 = vpop.eup %6946  ;;  %6958 = vpow2.f32 %v3824_v53  ;;  %v3670_v5 = vsub.f32 %v12999_v10, %v10161_v52  ;;  %v3842_v50 = vmul.f32 1.442695, %v3686_v28  ;;  %v3808_v53 = vmul.f32 1.442695, %v3669_v30 }
 0x7b7   : > { %12977 = vst [vmem:[#allocation184_spill] sm:$0xff] %v10178_v21  ;;  %v10180_v3 = vpop.eup %6948  ;;  %4200 = vperm.xlu2 %6605, %v10178_v21   ;;  %6960 = vpow2.f32 %v3796_v23  ;;  %v3671_v40 = vsub.f32 %v13006_v11, %v10161_v52 }
 0x7b8   : > { %12978 = vst [vmem:[#allocation188_spill] sm:$0xff] %v10180_v3  ;;  %v10183_v31 = vpop.eup %6950  ;;  %4176 = vperm.xlu0 %6603, %v10180_v3   ;;  %6962 = vpow2.f32 %v3794_v33  ;;  %v3810_v32 = vmul.f32 1.442695, %v3670_v5 }
 0x7b9   : > { %12979 = vst [vmem:[#allocation189_spill] sm:$0xff] %v10183_v31  ;;  %4173 = vperm.xlu1 %6604, %v10183_v31   ;;  %v10193_v46 = vpop.eup %6952  ;;  %6964 = vpow2.f32 %v3830_v56  ;;  %v10254_v56 = vperm.slane %v10158_v1, 2  ;;  %v3812_v61 = vmul.f32 1.442695, %v3671_v40 }
 0x7ba   : > { %12983 = vst [vmem:[#allocation169_spill] sm:$0xff] %v10193_v46  ;;  %v10195_v59 = vpop.eup %6954  ;;  %6966 = vpow2.f32 %v3800_v4  ;;  %v3848_v4 = vmul.f32 1.442695, %v3689_v2  ;;  %v13018_v2 = vld [vmem:[#allocation136_spill] sm:$0xff] }
 0x7bb   : > { %12984 = vst [vmem:[#allocation176_spill] sm:$0xff] %v10195_v59  ;;  %v10198_v41 = vpop.eup %6956  ;;  %6968 = vpow2.f32 %v3798_v6  ;;  %v3814_v6 = vmul.f32 1.442695, %v3672_v49  ;;  %v3692_v62 = vsub.f32 %v13010_v19, %v10254_v56  ;;  %v3676_v20 = vsub.f32 %v13018_v2, %v10164_v51  ;;  %v13022_v19 = vld [vmem:[#allocation145_spill] sm:$0xff] }
 0x7bc   : > { %12985 = vst [vmem:[#allocation201_spill] sm:$0xff] %v10198_v41  ;;  %v10208_v57 = vpop.eup %6958  ;;  %6970 = vpow2.f32 %v3836_v37  ;;  %v13011_v37 = vld [vmem:[#allocation120_spill] sm:$0xff] }
 0x7bd   : > { %12989 = vst [vmem:[#allocation215_spill] sm:$0xff] %v10208_v57  ;;  %v10210_v35 = vpop.eup %6960  ;;  %6972 = vpow2.f32 %v3806_v36  ;;  %v3675_v36 = vsub.f32 %v13011_v37, %v10164_v51  ;;  %v3854_v28 = vmul.f32 1.442695, %v3692_v62  ;;  %v3698_v62 = vsub.f32 %v13022_v19, %v10254_v56  ;;  %v13023_v37 = vld [vmem:[#allocation35_spill] sm:$0xff] }
 0x7be   : > { %12990 = vst [vmem:[#allocation216_spill] sm:$0xff] %v10210_v35  ;;  %v10213_v60 = vpop.eup %6962  ;;  %6974 = vpow2.f32 %v3802_v15  ;;  %v13012_v15 = vld [vmem:[#allocation47_spill] sm:$0xff] }
 0x7bf   : > { %4221 = vperm.xlu2 %6605, %v10193_v46   ;;  %12991 = vst [vmem:[#allocation171_spill] sm:$0xff] %v10213_v60  ;;  %v10223_v16 = vpop.eup %6964  ;;  %6976 = vpow2.f32 %v3842_v50  ;;  %v3673_v48 = vsub.f32 %v13012_v15, %v10161_v52  ;;  %v3820_v10 = vmul.f32 1.442695, %v3675_v36  ;;  %v13017_v52 = vld [vmem:[#allocation160_spill] sm:$0xff]  ;;  %v3681_v36 = vsub.f32 %v13023_v37, %v10164_v51 }
 0x7c0   : > { %4182 = vperm.xlu0 %6603, %v10195_v59   ;;  %12995 = vst [vmem:[#allocation187_spill] sm:$0xff] %v10223_v16  ;;  %v10225_v7 = vpop.eup %6966  ;;  %6978 = vpow2.f32 %v3810_v32  ;;  %v13016_v32 = vld [vmem:[#allocation153_spill] sm:$0xff]  ;;  %v3678_v29 = vsub.f32 %v13017_v52, %v10164_v51  ;;  %v13024_v15 = vld [vmem:[#allocation152_spill] sm:$0xff] }
 0x7c1   : > { %4179 = vperm.xlu1 %6604, %v10198_v41   ;;  %12996 = vst [vmem:[#allocation172_spill] sm:$0xff] %v10225_v7  ;;  %v10228_v9 = vpop.eup %6968  ;;  %6980 = vpow2.f32 %v3808_v53  ;;  %v3816_v24 = vmul.f32 1.442695, %v3673_v48  ;;  %v3695_v53 = vsub.f32 %v13016_v32, %v10254_v56  ;;  %v3679_v48 = vsub.f32 %v13024_v15, %v10164_v51 }
 0x7c2   : > { %12997 = vst [vmem:[#allocation179_spill] sm:$0xff] %v10228_v9  ;;  %v10238_v44 = vpop.eup %6970  ;;  %6982 = vpow2.f32 %v3848_v4  ;;  %v3826_v11 = vmul.f32 1.442695, %v3678_v29  ;;  %v3822_v4 = vmul.f32 1.442695, %v3676_v20  ;;  %v13028_v29 = vld [vmem:[#allocation30_spill] sm:$0xff] }
 0x7c3   : > { %13001 = vst [vmem:[#allocation177_spill] sm:$0xff] %v10238_v44  ;;  %v10240_v23 = vpop.eup %6972  ;;  %6984 = vpow2.f32 %v3814_v6  ;;  %v3860_v49 = vmul.f32 1.442695, %v3695_v53  ;;  %v3828_v32 = vmul.f32 1.442695, %v3679_v48  ;;  %v3701_v2 = vsub.f32 %v13028_v29, %v10254_v56  ;;  %v13029_v20 = vld [vmem:[#allocation24_spill] sm:$0xff] }
 0x7c4   : > { %13002 = vst [vmem:[#allocation205_spill] sm:$0xff] %v10240_v23  ;;  %v10243_v33 = vpop.eup %6974  ;;  %6986 = vpow2.f32 %v3812_v61 }
 0x7c5   : > { %13003 = vst [vmem:[#allocation178_spill] sm:$0xff] %v10243_v33  ;;  %v10256_v55 = vpop.eup %6976  ;;  %6988 = vpow2.f32 %v3854_v28  ;;  %v3866_v28 = vmul.f32 1.442695, %v3698_v62  ;;  %v3872_v19 = vmul.f32 1.442695, %v3701_v2  ;;  %v13036_v2 = vld [vmem:[#allocation27_spill] sm:$0xff] }
 0x7c6   : > { %13007 = vst [vmem:[#allocation194_spill] sm:$0xff] %v10256_v55  ;;  %v10258_v27 = vpop.eup %6978  ;;  %6990 = vpow2.f32 %v3820_v10  ;;  %v3832_v10 = vmul.f32 1.442695, %v3681_v36 }
 0x7c7   : > { %4230 = vperm.xlu2 %6605, %v10208_v57   ;;  %13008 = vst [vmem:[#allocation221_spill] sm:$0xff] %v10258_v27  ;;  %v10261_v22 = vpop.eup %6980  ;;  %6992 = vpow2.f32 %v3816_v24 }
 0x7c8   : > { %4188 = vperm.xlu0 %6603, %v10210_v35   ;;  %13009 = vst [vmem:[#allocation191_spill] sm:$0xff] %v10261_v22  ;;  %v10271_v5 = vpop.eup %6982  ;;  %6994 = vpow2.f32 %v3860_v49  ;;  %v3684_v49 = vsub.f32 %v13029_v20, %v10164_v51  ;;  %v3685_v20 = vsub.f32 %v13036_v2, %v10164_v51 }
 0x7c9   : > { %4185 = vperm.xlu1 %6604, %v10213_v60   ;;  %13013 = vst [vmem:[#allocation211_spill] sm:$0xff] %v10271_v5  ;;  %v10273_v30 = vpop.eup %6984  ;;  %6996 = vpow2.f32 %v3826_v11  ;;  %v13030_v11 = vld [vmem:[#allocation144_spill] sm:$0xff] }
 0x7ca   : > { %13014 = vst [vmem:[#allocation204_spill] sm:$0xff] %v10273_v30  ;;  %v10276_v50 = vpop.eup %6986  ;;  %6998 = vpow2.f32 %v3822_v4  ;;  %v3682_v4 = vsub.f32 %v13030_v11, %v10164_v51  ;;  %v3838_v62 = vmul.f32 1.442695, %v3684_v49  ;;  %v10332_v49 = vperm.slane %v10158_v1, 3 }
 0x7cb   : > { %13015 = vst [vmem:[#allocation220_spill] sm:$0xff] %v10276_v50  ;;  %v10286_v40 = vpop.eup %6988  ;;  %7000 = vpow2.f32 %v3866_v28  ;;  %v13034_v28 = vld [vmem:[#allocation46_spill] sm:$0xff] }
 0x7cc   : > { %13019 = vst [vmem:[#allocation173_spill] sm:$0xff] %v10286_v40  ;;  %v10288_v6 = vpop.eup %6990  ;;  %7002 = vpow2.f32 %v3832_v10  ;;  %v3834_v36 = vmul.f32 1.442695, %v3682_v4  ;;  %v3704_v10 = vsub.f32 %v13034_v28, %v10254_v56 }
 0x7cd   : > { %13020 = vst [vmem:[#allocation190_spill] sm:$0xff] %v10288_v6  ;;  %v10291_v61 = vpop.eup %6992  ;;  %7004 = vpow2.f32 %v3828_v32  ;;  %v13035_v32 = vld [vmem:[#allocation37_spill] sm:$0xff] }
 0x7ce   : > { %13021 = vst [vmem:[#allocation174_spill] sm:$0xff] %v10291_v61  ;;  %v10301_v24 = vpop.eup %6994  ;;  %7006 = vpow2.f32 %v3872_v19  ;;  %v3687_v29 = vsub.f32 %v13035_v32, %v10164_v51  ;;  %v3878_v11 = vmul.f32 1.442695, %v3704_v10  ;;  %v3840_v19 = vmul.f32 1.442695, %v3685_v20  ;;  %v13041_v10 = vld [vmem:[#allocation113_spill] sm:$0xff] }
 0x7cf   : > { %4239 = vperm.xlu2 %6605, %v10223_v16   ;;  %13025 = vst [vmem:[#allocation207_spill] sm:$0xff] %v10301_v24  ;;  %v10303_v53 = vpop.eup %6996  ;;  %7008 = vpow2.f32 %v3838_v62  ;;  %v3690_v32 = vsub.f32 %v13041_v10, %v10254_v56  ;;  %v13049_v10 = vld [vmem:[#allocation121_spill] sm:$0xff] }
 0x7d0   : > { %4194 = vperm.xlu0 %6603, %v10225_v7   ;;  %13026 = vst [vmem:[#allocation180_spill] sm:$0xff] %v10303_v53  ;;  %v10306_v52 = vpop.eup %6998  ;;  %7010 = vpow2.f32 %v3834_v36  ;;  %v3844_v4 = vmul.f32 1.442695, %v3687_v29  ;;  %v13040_v36 = vld [vmem:[#allocation122_spill] sm:$0xff]  ;;  %v13042_v29 = vld [vmem:[#allocation40_spill] sm:$0xff] }
 0x7d1   : > { %4191 = vperm.xlu1 %6604, %v10228_v9   ;;  %13027 = vst [vmem:[#allocation197_spill] sm:$0xff] %v10306_v52  ;;  %v10316_v37 = vpop.eup %7000  ;;  %7012 = vpow2.f32 %v3878_v11  ;;  %v3707_v28 = vsub.f32 %v13040_v36, %v10332_v49  ;;  %v3688_v2 = vsub.f32 %v13042_v29, %v10164_v51  ;;  %v13048_v36 = vld [vmem:[#allocation129_spill] sm:$0xff] }
 0x7d2   : > { %13031 = vst [vmem:[#allocation182_spill] sm:$0xff] %v10316_v37  ;;  %v10318_v15 = vpop.eup %7002  ;;  %7014 = vpow2.f32 %v3844_v4  ;;  %v13046_v4 = vld [vmem:[#allocation162_spill] sm:$0xff] }
 0x7d3   : > { %13032 = vst [vmem:[#allocation193_spill] sm:$0xff] %v10318_v15  ;;  %v10321_v48 = vpop.eup %7004  ;;  %7016 = vpow2.f32 %v3840_v19  ;;  %v3884_v20 = vmul.f32 1.442695, %v3707_v28  ;;  %v3710_v19 = vsub.f32 %v13046_v4, %v10332_v49  ;;  %v3693_v28 = vsub.f32 %v13048_v36, %v10254_v56 }
 0x7d4   : > { %13033 = vst [vmem:[#allocation214_spill] sm:$0xff] %v10321_v48  ;;  %v10334_v13 = vpop.eup %7006 }
 0x7d5   : > { %13037 = vst [vmem:[#allocation206_spill] sm:$0xff] %v10334_v13  ;;  %7018 = vpow2.f32 %v3884_v20  ;;  %v3890_v29 = vmul.f32 1.442695, %v3710_v19  ;;  %v13054_v19 = vld [vmem:[#allocation33_spill] sm:$0xff] }
 0x7d7   : > { %4248 = vperm.xlu2 %6605, %v10238_v44  }
 0x7d8   : > { %4203 = vperm.xlu0 %6603, %v10240_v23  }
 0x7d9   : > { %4197 = vperm.xlu1 %6604, %v10243_v33  }
 0x7df   : > { %4257 = vperm.xlu2 %6605, %v10256_v55  }
 0x7e0   : > { %4209 = vperm.xlu0 %6603, %v10258_v27  }
 0x7e1   : > { %4206 = vperm.xlu1 %6604, %v10261_v22  }
 0x7e7   : > { %4266 = vperm.xlu2 %6605, %v10271_v5  }
 0x7e8   : > { %4215 = vperm.xlu0 %6603, %v10273_v30  }
 0x7e9   : > { %4212 = vperm.xlu1 %6604, %v10276_v50  }
 0x7ef   : > { %4275 = vperm.xlu2 %6605, %v10286_v40  }
 0x7f0   : > { %4224 = vperm.xlu0 %6603, %v10288_v6  }
 0x7f1   : > { %4218 = vperm.xlu1 %6604, %v10291_v61  }
 0x7f7   : > { %4284 = vperm.xlu2 %6605, %v10301_v24   ;;  %v3846_v24 = vmul.f32 1.442695, %v3688_v2  ;;  %v3856_v2 = vmul.f32 1.442695, %v3693_v28  ;;  %v3696_v28 = vsub.f32 %v13054_v19, %v10254_v56 }
 0x7f8   : > { %4233 = vperm.xlu0 %6603, %v10303_v53  }
 0x7f9   : > { %4227 = vperm.xlu1 %6604, %v10306_v52   ;;  %v3862_v5 = vmul.f32 1.442695, %v3696_v28 }
 0x7ff   : > { %4293 = vperm.xlu2 %6605, %v10316_v37   ;;  %v10336_v37 = vpop.eup %7008 }
 0x800   : > { %4242 = vperm.xlu0 %6603, %v10318_v15   ;;  %13038 = vst [vmem:[#allocation192_spill] sm:$0xff] %v10336_v37  ;;  %v10339_v62 = vpop.eup %7010 }
 0x801   : > { %4236 = vperm.xlu1 %6604, %v10321_v48   ;;  %13039 = vst [vmem:[#allocation181_spill] sm:$0xff] %v10339_v62  ;;  %v10349_v40 = vpop.eup %7012 }
 0x802   : > { %13043 = vst [vmem:[#allocation210_spill] sm:$0xff] %v10349_v40  ;;  %v10351_v55 = vpop.eup %7014 }
 0x803   : > { %13044 = vst [vmem:[#allocation200_spill] sm:$0xff] %v10351_v55  ;;  %v10354_v11 = vpop.eup %7016 }
 0x804   : > { %13045 = vst [vmem:[#allocation183_spill] sm:$0xff] %v10354_v11 }
 0x807   : > { %4302 = vperm.xlu2 %6605, %v10334_v13   ;;  %v3850_v13 = vmul.f32 1.442695, %v3690_v32  ;;  %v3691_v32 = vsub.f32 %v13049_v10, %v10254_v56  ;;  %v13055_v10 = vld [vmem:[#allocation161_spill] sm:$0xff] }
 0x808   : > { %4251 = vperm.xlu0 %6603, %v10336_v37  }
 0x809   : > { %4245 = vperm.xlu1 %6604, %v10339_v62   ;;  %7020 = vpow2.f32 %v3850_v13  ;;  %v3852_v20 = vmul.f32 1.442695, %v3691_v32  ;;  %v13053_v13 = vld [vmem:[#allocation52_spill] sm:$0xff]  ;;  %v3694_v32 = vsub.f32 %v13055_v10, %v10254_v56  ;;  %v13061_v10 = vld [vmem:[#allocation38_spill] sm:$0xff]  ;;  %v10420_v62 = vperm.slane %v10158_v1, 4 }
 0x80a   : > { %7022 = vpow2.f32 %v3846_v24  ;;  %v3713_v24 = vsub.f32 %v13053_v13, %v10332_v49 }
 0x80b   : > { %7024 = vpow2.f32 %v3890_v29  ;;  %v3858_v29 = vmul.f32 1.442695, %v3694_v32  ;;  %v3697_v32 = vsub.f32 %v13061_v10, %v10254_v56  ;;  %v13067_v10 = vld [vmem:[#allocation26_spill] sm:$0xff] }
 0x80c   : > { %7026 = vpow2.f32 %v3856_v2  ;;  %v13059_v2 = vld [vmem:[#allocation54_spill] sm:$0xff] }
 0x80d   : > { %7028 = vpow2.f32 %v3852_v20  ;;  %v3716_v20 = vsub.f32 %v13059_v2, %v10332_v49 }
 0x80f   : > { %4311 = vperm.xlu2 %6605, %v10349_v40   ;;  %v10366_v40 = vpop.eup %7018 }
 0x810   : > { %4260 = vperm.xlu0 %6603, %v10351_v55   ;;  %13050 = vst [vmem:[#allocation219_spill] sm:$0xff] %v10366_v40  ;;  %v10368_v55 = vpop.eup %7020 }
 0x811   : > { %4254 = vperm.xlu1 %6604, %v10354_v11   ;;  %v10360_v51 = vpop.permute.xlu2 %4200  ;;  %13051 = vst [vmem:[#allocation209_spill] sm:$0xff] %v10368_v55  ;;  %v10371_v4 = vpop.eup %7022 }
 0x812   : > { %13047 = vst [vmem:[#allocation196_spill] sm:$0xff] %v10360_v51  ;;  %v10383_v15 = vpop.eup %7024 }
 0x813   : > { %13052 = vst [vmem:[#allocation170_spill] sm:$0xff] %v10371_v4  ;;  %v10385_v16 = vpop.eup %7026 }
 0x814   : > { %13056 = vst [vmem:[#allocation195_spill] sm:$0xff] %v10383_v15  ;;  %v10388_v13 = vpop.eup %7028 }
 0x815   : > { %13057 = vst [vmem:[#allocation175_spill] sm:$0xff] %v10385_v16 }
 0x816   : > { %13058 = vst [vmem:[#allocation203_spill] sm:$0xff] %v10388_v13 }
 0x817   : > { %4320 = vperm.xlu2 %6605, %v10366_v40   ;;  %v3896_v40 = vmul.f32 1.442695, %v3713_v24  ;;  %v13060_v24 = vld [vmem:[#allocation45_spill] sm:$0xff] }
 0x818   : > { %4269 = vperm.xlu0 %6603, %v10368_v55   ;;  %v3699_v19 = vsub.f32 %v13060_v24, %v10254_v56 }
 0x819   : > { %4263 = vperm.xlu1 %6604, %v10371_v4   ;;  %v10377_v36 = vpop.permute.xlu2 %4221  ;;  %7030 = vpow2.f32 %v3896_v40  ;;  %v3864_v40 = vmul.f32 1.442695, %v3697_v32  ;;  %v3700_v32 = vsub.f32 %v13067_v10, %v10254_v56 }
 0x81a   : > { %7032 = vpow2.f32 %v3862_v5  ;;  %v3868_v4 = vmul.f32 1.442695, %v3699_v19  ;;  %v13065_v5 = vld [vmem:[#allocation57_spill] sm:$0xff] }
 0x81b   : > { %7034 = vpow2.f32 %v3858_v29  ;;  %v3719_v29 = vsub.f32 %v13065_v5, %v10332_v49 }
 0x81d   : > { %v3908_v5 = vmul.f32 1.442695, %v3719_v29  ;;  %v13072_v29 = vld [vmem:[#allocation50_spill] sm:$0xff] }
 0x81f   : > { %4329 = vperm.xlu2 %6605, %v10383_v15   ;;  %v3902_v15 = vmul.f32 1.442695, %v3716_v20  ;;  %v10400_v44 = vpop.eup %7030  ;;  %v13066_v20 = vld [vmem:[#allocation48_spill] sm:$0xff] }
 0x820   : > { %4278 = vperm.xlu0 %6603, %v10385_v16   ;;  %13062 = vst [vmem:[#allocation213_spill] sm:$0xff] %v10400_v44  ;;  %v10402_v16 = vpop.eup %7032  ;;  %v3702_v24 = vsub.f32 %v13066_v20, %v10254_v56  ;;  %v13071_v20 = vld [vmem:[#allocation115_spill] sm:$0xff] }
 0x821   : > { %4272 = vperm.xlu1 %6604, %v10388_v13   ;;  %v10396_v28 = vpop.permute.xlu2 %4230  ;;  %13063 = vst [vmem:[#allocation185_spill] sm:$0xff] %v10402_v16  ;;  %v10405_v2 = vpop.eup %7034  ;;  %7036 = vpow2.f32 %v3902_v15  ;;  %v3722_v10 = vsub.f32 %v13071_v20, %v10420_v62 }
 0x822   : > { %13064 = vst [vmem:[#allocation186_spill] sm:$0xff] %v10405_v2  ;;  %7038 = vpow2.f32 %v3868_v4  ;;  %v3874_v50 = vmul.f32 1.442695, %v3702_v24  ;;  %v3870_v4 = vmul.f32 1.442695, %v3700_v32  ;;  %v3705_v24 = vsub.f32 %v13072_v29, %v10254_v56  ;;  %v13073_v32 = vld [vmem:[#allocation44_spill] sm:$0xff] }
 0x823   : > { %7040 = vpow2.f32 %v3864_v40  ;;  %v3914_v52 = vmul.f32 1.442695, %v3722_v10  ;;  %v13078_v10 = vld [vmem:[#allocation138_spill] sm:$0xff] }
 0x824   : > { %7042 = vpow2.f32 %v3908_v5  ;;  %v3708_v29 = vsub.f32 %v13078_v10, %v10332_v49 }
 0x825   : > { %7044 = vpow2.f32 %v3874_v50 }
 0x826   : > { %7046 = vpow2.f32 %v3870_v4 }
 0x827   : > { %4338 = vperm.xlu2 %6605, %v10400_v44   ;;  %7048 = vpow2.f32 %v3914_v52 }
 0x828   : > { %4287 = vperm.xlu0 %6603, %v10402_v16  }
 0x829   : > { %4281 = vperm.xlu1 %6604, %v10405_v2   ;;  %v10422_v15 = vpop.permute.xlu2 %4239  ;;  %v10424_v2 = vpop.eup %7036 }
 0x82a   : > { %v10413_v19 = vpop.permute.xlu0 %4176  ;;  %13068 = vst [vmem:[#allocation222_spill] sm:$0xff] %v10424_v2  ;;  %v10426_v27 = vpop.eup %7038 }
 0x82b   : > { %v10417_v44 = vpop.permute.xlu1 %4173  ;;  %13069 = vst [vmem:[#allocation199_spill] sm:$0xff] %v10426_v27  ;;  %v10429_v40 = vpop.eup %7040 }
 0x82c   : > { %13070 = vst [vmem:[#allocation212_spill] sm:$0xff] %v10429_v40  ;;  %v10443_v5 = vpop.eup %7042 }
 0x82d   : > { %13074 = vst [vmem:[#allocation198_spill] sm:$0xff] %v10443_v5 }
 0x82f   : > { %4347 = vperm.xlu2 %6605, %v10424_v2   ;;  %v3703_v2 = vsub.f32 %v13073_v32, %v10254_v56  ;;  %v13077_v56 = vld [vmem:[#allocation131_spill] sm:$0xff] }
 0x830   : > { %4296 = vperm.xlu0 %6603, %v10426_v27   ;;  %v3880_v27 = vmul.f32 1.442695, %v3705_v24  ;;  %v3725_v4 = vsub.f32 %v13077_v56, %v10420_v62 }
 0x831   : > { %4290 = vperm.xlu1 %6604, %v10429_v40   ;;  %v10445_v13 = vpop.permute.xlu2 %4248  ;;  %v3876_v20 = vmul.f32 1.442695, %v3703_v2  ;;  %v10447_v40 = vpop.eup %7044  ;;  %v13079_v2 = vld [vmem:[#allocation114_spill] sm:$0xff] }
 0x832   : > { %v10437_v57 = vpop.permute.xlu0 %4182  ;;  %13075 = vst [vmem:[#allocation208_spill] sm:$0xff] %v10447_v40  ;;  %v10450_v50 = vpop.eup %7046  ;;  %7050 = vpow2.f32 %v3880_v27  ;;  %v3706_v32 = vsub.f32 %v13079_v2, %v10332_v49  ;;  %v3920_v61 = vmul.f32 1.442695, %v3725_v4  ;;  %v13085_v4 = vld [vmem:[#allocation154_spill] sm:$0xff] }
 0x833   : > { %v10441_v16 = vpop.permute.xlu1 %4179  ;;  %13076 = vst [vmem:[#allocation41_spill] sm:$0xff] %v10450_v50  ;;  %7052 = vpow2.f32 %v3876_v20  ;;  %v10464_v52 = vpop.eup %7048  ;;  %v13084_v20 = vld [vmem:[#allocation60_spill] sm:$0xff] }
 0x834   : > { %13080 = vst [vmem:[#allocation119_spill] sm:$0xff] %v10464_v52  ;;  %v3882_v30 = vmul.f32 1.442695, %v3706_v32  ;;  %7054 = vpow2.f32 %v3920_v61  ;;  %v3728_v2 = vsub.f32 %v13084_v20, %v10420_v62 }
 0x836   : > { %v3926_v11 = vmul.f32 1.442695, %v3728_v2 }
 0x837   : > { %4356 = vperm.xlu2 %6605, %v10443_v5  }
 0x838   : > { %4305 = vperm.xlu0 %6603, %v10447_v40   ;;  %v3886_v40 = vmul.f32 1.442695, %v3708_v29  ;;  %v10466_v56 = vpop.eup %7050  ;;  %v3711_v29 = vsub.f32 %v13085_v4, %v10332_v49 }
 0x839   : > { %4299 = vperm.xlu1 %6604, %v10450_v50   ;;  %13081 = vst [vmem:[#allocation111_spill] sm:$0xff] %v10466_v56  ;;  %v10469_v27 = vpop.eup %7052  ;;  %v10471_v10 = vpop.permute.xlu2 %4257 }
 0x83a   : > { %v10458_v24 = vpop.permute.xlu0 %4188  ;;  %13082 = vst [vmem:[#allocation112_spill] sm:$0xff] %v10469_v27  ;;  %7056 = vpow2.f32 %v3886_v40  ;;  %v10485_v61 = vpop.eup %7054 }
 0x83b   : > { %v10462_v5 = vpop.permute.xlu1 %4185  ;;  %13083 = vst [vmem:[#allocation127_spill] sm:$0xff] %v10471_v10  ;;  %7058 = vpow2.f32 %v3882_v30  ;;  %v13090_v30 = vld [vmem:[#allocation62_spill] sm:$0xff] }
 0x83c   : > { %13087 = vst [vmem:[#allocation135_spill] sm:$0xff] %v10485_v61  ;;  %7060 = vpow2.f32 %v3926_v11  ;;  %v3731_v4 = vsub.f32 %v13090_v30, %v10420_v62 }
 0x83e   : > { %v3932_v11 = vmul.f32 1.442695, %v3731_v4 }
 0x83f   : > { %4365 = vperm.xlu2 %6605, %v10464_v52   ;;  %v13086_v52 = vld [vmem:[#allocation130_spill] sm:$0xff] }
 0x840   : > { %4314 = vperm.xlu0 %6603, %v10466_v56   ;;  %v3709_v50 = vsub.f32 %v13086_v52, %v10332_v49  ;;  %v3892_v56 = vmul.f32 1.442695, %v3711_v29  ;;  %v10487_v20 = vpop.eup %7056  ;;  %v13091_v52 = vld [vmem:[#allocation146_spill] sm:$0xff] }
 0x841   : > { %4308 = vperm.xlu1 %6604, %v10469_v27   ;;  %13088 = vst [vmem:[#allocation128_spill] sm:$0xff] %v10487_v20  ;;  %v10490_v40 = vpop.eup %7058  ;;  %v3714_v2 = vsub.f32 %v13091_v52, %v10332_v49  ;;  %v10498_v29 = vpop.permute.xlu2 %4266 }
 0x842   : > { %v10479_v32 = vpop.permute.xlu0 %4194  ;;  %v3888_v37 = vmul.f32 1.442695, %v3709_v50  ;;  %13089 = vst [vmem:[#allocation151_spill] sm:$0xff] %v10490_v40  ;;  %7062 = vpow2.f32 %v3892_v56  ;;  %v10506_v53 = vpop.eup %7060 }
 0x843   : > { %v10483_v55 = vpop.permute.xlu1 %4191  ;;  %13092 = vst [vmem:[#allocation159_spill] sm:$0xff] %v10498_v29 }
 0x844   : > { %7064 = vpow2.f32 %v3888_v37  ;;  %13095 = vst [vmem:[#allocation36_spill] sm:$0xff] %v10506_v53  ;;  %v13098_v37 = vld [vmem:[#allocation67_spill] sm:$0xff] }
 0x845   : > { %7066 = vpow2.f32 %v3932_v11  ;;  %v3734_v52 = vsub.f32 %v13098_v37, %v10420_v62 }
 0x847   : > { %4374 = vperm.xlu2 %6605, %v10485_v61   ;;  %v13094_v61 = vld [vmem:[#allocation51_spill] sm:$0xff]  ;;  %v3938_v11 = vmul.f32 1.442695, %v3734_v52 }
 0x848   : > { %4323 = vperm.xlu0 %6603, %v10487_v20   ;;  %v3712_v27 = vsub.f32 %v13094_v61, %v10332_v49  ;;  %v3898_v20 = vmul.f32 1.442695, %v3714_v2  ;;  %v13099_v61 = vld [vmem:[#allocation56_spill] sm:$0xff]  ;;  %v13107_v52 = vld [vmem:[#allocation59_spill] sm:$0xff] }
 0x849   : > { %4317 = vperm.xlu1 %6604, %v10490_v40   ;;  %v10508_v40 = vpop.eup %7062  ;;  %v3717_v4 = vsub.f32 %v13099_v61, %v10332_v49  ;;  %v10525_v46 = vpop.permute.xlu2 %4275 }
 0x84a   : > { %v10500_v50 = vpop.permute.xlu0 %4203  ;;  %v3894_v30 = vmul.f32 1.442695, %v3712_v27  ;;  %13096 = vst [vmem:[#allocation29_spill] sm:$0xff] %v10508_v40  ;;  %v10511_v56 = vpop.eup %7064  ;;  %7068 = vpow2.f32 %v3898_v20  ;;  %v13101_v27 = vld [vmem:[#allocation53_spill] sm:$0xff] }
 0x84b   : > { %13093 = vst [vmem:[#allocation31_spill] sm:$0xff] %v10500_v50  ;;  %v10504_v48 = vpop.permute.xlu1 %4197  ;;  %v10527_v22 = vpop.eup %7066 }
 0x84c   : > { %13097 = vst [vmem:[#allocation43_spill] sm:$0xff] %v10511_v56  ;;  %7070 = vpow2.f32 %v3894_v30  ;;  %v13106_v30 = vld [vmem:[#allocation71_spill] sm:$0xff] }
 0x84d   : > { %13103 = vst [vmem:[#allocation34_spill] sm:$0xff] %v10527_v22  ;;  %7072 = vpow2.f32 %v3938_v11  ;;  %v3737_v61 = vsub.f32 %v13106_v30, %v10420_v62 }
 0x84f   : > { %4383 = vperm.xlu2 %6605, %v10506_v53   ;;  %v3715_v53 = vsub.f32 %v13101_v27, %v10332_v49  ;;  %v3944_v11 = vmul.f32 1.442695, %v3737_v61  ;;  %v13115_v61 = vld [vmem:[#allocation123_spill] sm:$0xff] }
 0x850   : > { %4332 = vperm.xlu0 %6603, %v10508_v40   ;;  %v3904_v40 = vmul.f32 1.442695, %v3717_v4  ;;  %v3720_v4 = vsub.f32 %v13107_v52, %v10332_v49  ;;  %v13114_v52 = vld [vmem:[#allocation140_spill] sm:$0xff] }
 0x851   : > { %4326 = vperm.xlu1 %6604, %v10511_v56   ;;  %v3900_v37 = vmul.f32 1.442695, %v3715_v53  ;;  %v10529_v56 = vpop.eup %7068  ;;  %v13109_v53 = vld [vmem:[#allocation55_spill] sm:$0xff] }
 0x852   : > { %v10519_v2 = vpop.permute.xlu0 %4209  ;;  %13104 = vst [vmem:[#allocation32_spill] sm:$0xff] %v10529_v56  ;;  %v10532_v20 = vpop.eup %7070  ;;  %7074 = vpow2.f32 %v3904_v40  ;;  %v3910_v21 = vmul.f32 1.442695, %v3720_v4  ;;  %v3723_v4 = vsub.f32 %v13115_v61, %v10420_v62 }
 0x853   : > { %13100 = vst [vmem:[#allocation25_spill] sm:$0xff] %v10519_v2  ;;  %v10523_v6 = vpop.permute.xlu1 %4206  ;;  %7076 = vpow2.f32 %v3900_v37  ;;  %v10549_v30 = vpop.eup %7072 }
 0x854   : > { %13102 = vst [vmem:[#allocation143_spill] sm:$0xff] %v10523_v6  ;;  %7078 = vpow2.f32 %v3944_v11 }
 0x855   : > { %13105 = vst [vmem:[#allocation28_spill] sm:$0xff] %v10532_v20  ;;  %7080 = vpow2.f32 %v3910_v21 }
 0x856   : > { %13111 = vst [vmem:[#allocation39_spill] sm:$0xff] %v10549_v30 }
 0x857   : > { %4392 = vperm.xlu2 %6605, %v10527_v22   ;;  %v3718_v22 = vsub.f32 %v13109_v53, %v10332_v49 }
 0x858   : > { %4341 = vperm.xlu0 %6603, %v10529_v56   ;;  %v10547_v56 = vperm.slane %v10158_v1, 5  ;;  %v10553_v33 = vpop.eup %7074 }
 0x859   : > { %4335 = vperm.xlu1 %6604, %v10532_v20   ;;  %v10551_v20 = vpop.permute.xlu2 %4284  ;;  %v3906_v40 = vmul.f32 1.442695, %v3718_v22  ;;  %13112 = vst [vmem:[#allocation137_spill] sm:$0xff] %v10553_v33  ;;  %v10556_v37 = vpop.eup %7076  ;;  %v13116_v22 = vld [vmem:[#allocation58_spill] sm:$0xff] }
 0x85a   : > { %v10540_v27 = vpop.permute.xlu0 %4215  ;;  %13113 = vst [vmem:[#allocation120_spill] sm:$0xff] %v10556_v37  ;;  %v3740_v53 = vsub.f32 %v13114_v52, %v10547_v56  ;;  %v10570_v11 = vpop.eup %7078 }
 0x85b   : > { %13108 = vst [vmem:[#allocation49_spill] sm:$0xff] %v10540_v27  ;;  %v10544_v23 = vpop.permute.xlu1 %4212  ;;  %7082 = vpow2.f32 %v3906_v40  ;;  %v10572_v52 = vpop.eup %7080 }
 0x85c   : > { %13110 = vst [vmem:[#allocation42_spill] sm:$0xff] %v10544_v23  ;;  %v3950_v35 = vmul.f32 1.442695, %v3740_v53  ;;  %v13122_v53 = vld [vmem:[#allocation163_spill] sm:$0xff] }
 0x85d   : > { %13118 = vst [vmem:[#allocation153_spill] sm:$0xff] %v10570_v11 }
 0x85e   : > { %13119 = vst [vmem:[#allocation160_spill] sm:$0xff] %v10572_v52  ;;  %7084 = vpow2.f32 %v3950_v35 }
 0x85f   : > { %4401 = vperm.xlu2 %6605, %v10549_v30   ;;  %v3721_v30 = vsub.f32 %v13116_v22, %v10332_v49  ;;  %v13121_v49 = vld [vmem:[#allocation156_spill] sm:$0xff]  ;;  %v13123_v22 = vld [vmem:[#allocation139_spill] sm:$0xff] }
 0x860   : > { %4350 = vperm.xlu0 %6603, %v10553_v33   ;;  %v3916_v33 = vmul.f32 1.442695, %v3723_v4  ;;  %v3743_v40 = vsub.f32 %v13121_v49, %v10547_v56 }
 0x861   : > { %4344 = vperm.xlu1 %6604, %v10556_v37   ;;  %v3912_v60 = vmul.f32 1.442695, %v3721_v30  ;;  %v10575_v21 = vpop.eup %7082  ;;  %v10577_v61 = vpop.permute.xlu2 %4293  ;;  %v3726_v30 = vsub.f32 %v13122_v53, %v10420_v62 }
 0x862   : > { %v10564_v7 = vpop.permute.xlu0 %4224  ;;  %13120 = vst [vmem:[#allocation136_spill] sm:$0xff] %v10575_v21  ;;  %7086 = vpow2.f32 %v3916_v33  ;;  %v3956_v59 = vmul.f32 1.442695, %v3743_v40  ;;  %v13128_v40 = vld [vmem:[#allocation61_spill] sm:$0xff] }
 0x863   : > { %v10568_v9 = vpop.permute.xlu1 %4218  ;;  %7088 = vpow2.f32 %v3912_v60  ;;  %v13127_v60 = vld [vmem:[#allocation148_spill] sm:$0xff] }
 0x864   : > { %13117 = vst [vmem:[#allocation47_spill] sm:$0xff] %v10568_v9  ;;  %v10591_v35 = vpop.eup %7084  ;;  %7090 = vpow2.f32 %v3956_v59  ;;  %v3746_v53 = vsub.f32 %v13127_v60, %v10547_v56 }
 0x865   : > { %13124 = vst [vmem:[#allocation145_spill] sm:$0xff] %v10591_v35 }
 0x866   : > { %v3962_v59 = vmul.f32 1.442695, %v3746_v53 }
 0x867   : > { %4410 = vperm.xlu2 %6605, %v10570_v11   ;;  %v3724_v11 = vsub.f32 %v13123_v22, %v10420_v62 }
 0x868   : > { %4359 = vperm.xlu0 %6603, %v10572_v52   ;;  %v3922_v52 = vmul.f32 1.442695, %v3726_v30  ;;  %v10593_v49 = vpop.eup %7086  ;;  %v3729_v30 = vsub.f32 %v13128_v40, %v10420_v62 }
 0x869   : > { %4353 = vperm.xlu1 %6604, %v10575_v21   ;;  %v3918_v41 = vmul.f32 1.442695, %v3724_v11  ;;  %13125 = vst [vmem:[#allocation35_spill] sm:$0xff] %v10593_v49  ;;  %v10596_v33 = vpop.eup %7088  ;;  %v10604_v22 = vpop.permute.xlu2 %4302 }
 0x86a   : > { %v10585_v4 = vpop.permute.xlu0 %4233  ;;  %13126 = vst [vmem:[#allocation152_spill] sm:$0xff] %v10596_v33  ;;  %7092 = vpow2.f32 %v3922_v52  ;;  %v10612_v31 = vpop.eup %7090 }
 0x86b   : > { %v10589_v37 = vpop.permute.xlu1 %4227  ;;  %7094 = vpow2.f32 %v3918_v41  ;;  %13130 = vst [vmem:[#allocation30_spill] sm:$0xff] %v10612_v31  ;;  %v13133_v41 = vld [vmem:[#allocation77_spill] sm:$0xff] }
 0x86c   : > { %7096 = vpow2.f32 %v3962_v59  ;;  %v3749_v40 = vsub.f32 %v13133_v41, %v10547_v56 }
 0x86e   : > { %v3968_v59 = vmul.f32 1.442695, %v3749_v40  ;;  %v13141_v40 = vld [vmem:[#allocation70_spill] sm:$0xff] }
 0x86f   : > { %4419 = vperm.xlu2 %6605, %v10591_v35   ;;  %v13129_v35 = vld [vmem:[#allocation155_spill] sm:$0xff] }
 0x870   : > { %4368 = vperm.xlu0 %6603, %v10593_v49   ;;  %v3727_v21 = vsub.f32 %v13129_v35, %v10420_v62  ;;  %v3928_v49 = vmul.f32 1.442695, %v3729_v30  ;;  %v13134_v35 = vld [vmem:[#allocation66_spill] sm:$0xff] }
 0x871   : > { %4362 = vperm.xlu1 %6604, %v10596_v33   ;;  %v10614_v33 = vpop.eup %7092  ;;  %v3732_v53 = vsub.f32 %v13134_v35, %v10420_v62  ;;  %v10631_v54 = vpop.permute.xlu2 %4311 }
 0x872   : > { %v10606_v11 = vpop.permute.xlu0 %4242  ;;  %v3924_v60 = vmul.f32 1.442695, %v3727_v21  ;;  %13131 = vst [vmem:[#allocation24_spill] sm:$0xff] %v10614_v33  ;;  %v10617_v52 = vpop.eup %7094  ;;  %7098 = vpow2.f32 %v3928_v49  ;;  %v13136_v21 = vld [vmem:[#allocation147_spill] sm:$0xff] }
 0x873   : > { %v10610_v3 = vpop.permute.xlu1 %4236  ;;  %13132 = vst [vmem:[#allocation144_spill] sm:$0xff] %v10617_v52  ;;  %v10633_v9 = vpop.eup %7096 }
 0x874   : > { %7100 = vpow2.f32 %v3924_v60  ;;  %13137 = vst [vmem:[#allocation37_spill] sm:$0xff] %v10633_v9  ;;  %v13140_v60 = vld [vmem:[#allocation80_spill] sm:$0xff] }
 0x875   : > { %7102 = vpow2.f32 %v3968_v59  ;;  %v3752_v35 = vsub.f32 %v13140_v60, %v10547_v56 }
 0x877   : > { %4428 = vperm.xlu2 %6605, %v10612_v31   ;;  %v3730_v31 = vsub.f32 %v13136_v21, %v10420_v62  ;;  %v3974_v59 = vmul.f32 1.442695, %v3752_v35  ;;  %v13149_v35 = vld [vmem:[#allocation116_spill] sm:$0xff] }
 0x878   : > { %4377 = vperm.xlu0 %6603, %v10614_v33   ;;  %v3934_v33 = vmul.f32 1.442695, %v3732_v53  ;;  %v3735_v53 = vsub.f32 %v13141_v40, %v10420_v62  ;;  %v13148_v40 = vld [vmem:[#allocation125_spill] sm:$0xff] }
 0x879   : > { %4371 = vperm.xlu1 %6604, %v10617_v52   ;;  %v3930_v41 = vmul.f32 1.442695, %v3730_v31  ;;  %v10635_v52 = vpop.eup %7098  ;;  %v13143_v31 = vld [vmem:[#allocation63_spill] sm:$0xff] }
 0x87a   : > { %v10625_v30 = vpop.permute.xlu0 %4251  ;;  %13138 = vst [vmem:[#allocation27_spill] sm:$0xff] %v10635_v52  ;;  %v10638_v49 = vpop.eup %7100  ;;  %7104 = vpow2.f32 %v3934_v33  ;;  %v3940_v27 = vmul.f32 1.442695, %v3735_v53  ;;  %v3738_v53 = vsub.f32 %v13149_v35, %v10547_v56 }
 0x87b   : > { %13135 = vst [vmem:[#allocation46_spill] sm:$0xff] %v10625_v30  ;;  %v10629_v14 = vpop.permute.xlu1 %4245  ;;  %7106 = vpow2.f32 %v3930_v41  ;;  %v10655_v60 = vpop.eup %7102 }
 0x87c   : > { %13139 = vst [vmem:[#allocation122_spill] sm:$0xff] %v10638_v49  ;;  %7108 = vpow2.f32 %v3974_v59  ;;  %v3946_v10 = vmul.f32 1.442695, %v3738_v53  ;;  %v13157_v53 = vld [vmem:[#allocation124_spill] sm:$0xff] }
 0x87d   : > { %13145 = vst [vmem:[#allocation162_spill] sm:$0xff] %v10655_v60  ;;  %7110 = vpow2.f32 %v3940_v27 }
 0x87f   : > { %4437 = vperm.xlu2 %6605, %v10633_v9   ;;  %v3733_v9 = vsub.f32 %v13143_v31, %v10420_v62 }
 0x880   : > { %4386 = vperm.xlu0 %6603, %v10635_v52   ;;  %v10653_v52 = vperm.slane %v10158_v1, 6  ;;  %v10659_v23 = vpop.eup %7104 }
 0x881   : > { %4380 = vperm.xlu1 %6604, %v10638_v49   ;;  %v10657_v49 = vpop.permute.xlu2 %4320  ;;  %v3936_v33 = vmul.f32 1.442695, %v3733_v9  ;;  %13146 = vst [vmem:[#allocation129_spill] sm:$0xff] %v10659_v23  ;;  %v10662_v41 = vpop.eup %7106  ;;  %v13150_v9 = vld [vmem:[#allocation68_spill] sm:$0xff] }
 0x882   : > { %v10646_v21 = vpop.permute.xlu0 %4260  ;;  %13147 = vst [vmem:[#allocation121_spill] sm:$0xff] %v10662_v41  ;;  %v3755_v31 = vsub.f32 %v13148_v40, %v10653_v52  ;;  %v3736_v2 = vsub.f32 %v13150_v9, %v10420_v62  ;;  %v13155_v62 = vld [vmem:[#allocation85_spill] sm:$0xff]  ;;  %v3739_v9 = vsub.f32 %v13157_v53, %v10547_v56 }
 0x883   : > { %13142 = vst [vmem:[#allocation113_spill] sm:$0xff] %v10646_v21  ;;  %v10650_v29 = vpop.permute.xlu1 %4254  ;;  %7112 = vpow2.f32 %v3936_v33  ;;  %v3758_v33 = vsub.f32 %v13155_v62, %v10653_v52 }
 0x884   : > { %13144 = vst [vmem:[#allocation40_spill] sm:$0xff] %v10650_v29  ;;  %v3980_v50 = vmul.f32 1.442695, %v3755_v31  ;;  %v3942_v59 = vmul.f32 1.442695, %v3736_v2  ;;  %v13156_v31 = vld [vmem:[#allocation132_spill] sm:$0xff] }
 0x885   : > { %v3741_v2 = vsub.f32 %v13156_v31, %v10547_v56 }
 0x886   : > { %7114 = vpow2.f32 %v3980_v50 }
 0x887   : > { %4446 = vperm.xlu2 %6605, %v10655_v60   ;;  %7116 = vpow2.f32 %v3946_v10 }
 0x888   : > { %4395 = vperm.xlu0 %6603, %v10659_v23   ;;  %v10674_v23 = vpop.eup %7108  ;;  %7118 = vpow2.f32 %v3942_v59  ;;  %v13161_v59 = vld [vmem:[#allocation89_spill] sm:$0xff] }
 0x889   : > { %4389 = vperm.xlu1 %6604, %v10662_v41   ;;  %13152 = vst [vmem:[#allocation33_spill] sm:$0xff] %v10674_v23  ;;  %v10676_v6 = vpop.eup %7110  ;;  %v10681_v40 = vpop.permute.xlu2 %4329  ;;  %v3986_v41 = vmul.f32 1.442695, %v3758_v33  ;;  %v3761_v33 = vsub.f32 %v13161_v59, %v10653_v52 }
 0x88a   : > { %v4270_v21 = vpop.permute.xlu0 %4269  ;;  %13153 = vst [vmem:[#allocation161_spill] sm:$0xff] %v10676_v6  ;;  %v10679_v27 = vpop.eup %7112 }
 0x88b   : > { %v10672_v60 = vpop.permute.xlu1 %4263  ;;  %13154 = vst [vmem:[#allocation54_spill] sm:$0xff] %v10679_v27  ;;  %v4618_v31 = vperm.slane %v4270_v21, %v9689_v8  ;;  %7120 = vpow2.f32 %v3986_v41  ;;  %v13163_v21 = vld [vmem:[#allocation164_spill] sm:$0xff]  ;;  %v4621_v41 = vperm.slane %v10525_v46, %v9703_v45  ;;  %v3992_v59 = vmul.f32 1.442695, %v3761_v33  ;;  %v13167_v33 = vld [vmem:[#allocation93_spill] sm:$0xff] }
 0x88c   : > { %13151 = vst [vmem:[#allocation52_spill] sm:$0xff] %v10672_v60  ;;  %v3952_v60 = vmul.f32 1.442695, %v3741_v2  ;;  %v10691_v51 = vpop.eup %7114 }
 0x88d   : > { %13158 = vst [vmem:[#allocation45_spill] sm:$0xff] %v10691_v51  ;;  %v10694_v62 = vpop.eup %7116 }
 0x88e   : > { %13159 = vst [vmem:[#allocation38_spill] sm:$0xff] %v10694_v62  ;;  %v10697_v10 = vpop.eup %7118  ;;  %7122 = vpow2.f32 %v3952_v60 }
 0x88f   : > { %4455 = vperm.xlu2 %6605, %v10674_v23   ;;  %13160 = vst [vmem:[#allocation57_spill] sm:$0xff] %v10697_v10 }
 0x890   : > { %4404 = vperm.xlu0 %6603, %v10676_v6   ;;  %v3948_v6 = vmul.f32 1.442695, %v3739_v9 }
 0x891   : > { %4398 = vperm.xlu1 %6604, %v10679_v27   ;;  %v10706_v53 = vpop.permute.xlu2 %4338  ;;  %v3742_v27 = vsub.f32 %v13163_v21, %v10547_v56 }
 0x892   : > { %v4279_v35 = vpop.permute.xlu0 %4278  ;;  %7124 = vpow2.f32 %v3948_v6 }
 0x893   : > { %v4273_v23 = vpop.permute.xlu1 %4272  ;;  %v4623_v29 = vperm.slane %v4279_v35, %v9708_v0  ;;  %7126 = vpow2.f32 %v3992_v59 }
 0x894   : > { %v4619_v50 = vperm.slane %v4273_v23, %v9692_v38  ;;  %v13162_v23 = vld [vmem:[#allocation73_spill] sm:$0xff] }
 0x895   : > { %v3744_v2 = vsub.f32 %v13162_v23, %v10547_v56  ;;  %v10715_v23 = vpop.eup %7120 }
 0x896   : > { %v4620_v9 = vsel %vm3342_vm2, %v4619_v50, %v4618_v31  ;;  %13164 = vst [vmem:[#allocation48_spill] sm:$0xff] %v10715_v23  ;;  %v3954_v50 = vmul.f32 1.442695, %v3742_v27  ;;  %v10718_v31 = vpop.eup %7122  ;;  %v13168_v27 = vld [vmem:[#allocation76_spill] sm:$0xff] }
 0x897   : > { %4464 = vperm.xlu2 %6605, %v10691_v51   ;;  %v3958_v30 = vmul.f32 1.442695, %v3744_v2  ;;  %13165 = vst [vmem:[#allocation26_spill] sm:$0xff] %v10718_v31  ;;  %v3747_v35 = vsub.f32 %v13168_v27, %v10547_v56 }
 0x898   : > { %4413 = vperm.xlu0 %6603, %v10694_v62   ;;  %v10721_v6 = vpop.eup %7124 }
 0x899   : > { %4407 = vperm.xlu1 %6604, %v10697_v10   ;;  %v4622_v10 = vsel %vm3346_vm4, %v4621_v41, %v4620_v9  ;;  %13166 = vst [vmem:[#allocation115_spill] sm:$0xff] %v10721_v6  ;;  %7128 = vpow2.f32 %v3958_v30  ;;  %v4627_v9 = vperm.slane %v10551_v20, %v9726_v47  ;;  %v10735_v59 = vpop.permute.xlu2 %4347  ;;  %v10740_v27 = vpop.eup %7126 }
 0x89a   : > { %v4288_v51 = vpop.permute.xlu0 %4287  ;;  %v4624_v46 = vsel %vm3350_vm5, %v4623_v29, %v4622_v10  ;;  %7130 = vpow2.f32 %v3954_v50  ;;  %v13169_v29 = vld [vmem:[#allocation72_spill] sm:$0xff]  ;;  %13171 = vst [vmem:[#allocation50_spill] sm:$0xff] %v10740_v27 }
 0x89b   : > { %v4282_v62 = vpop.permute.xlu1 %4281  ;;  %v3745_v10 = vsub.f32 %v13169_v29, %v10547_v56  ;;  %v4629_v30 = vperm.slane %v4288_v51, %v9732_v43 }
 0x89c   : > { %v4625_v60 = vperm.slane %v4282_v62, %v9716_v17  ;;  %v3764_v62 = vsub.f32 %v13167_v33, %v10653_v52 }
 0x89e   : > { %v4626_v2 = vsel %vm3354_vm6, %v4625_v60, %v4624_v46  ;;  %v3998_v46 = vmul.f32 1.442695, %v3764_v62  ;;  %v13173_v62 = vld [vmem:[#allocation97_spill] sm:$0xff] }
 0x89f   : > { %4473 = vperm.xlu2 %6605, %v10715_v23   ;;  %v4628_v33 = vsel %vm13170_vm3, %v4627_v9, %v4626_v2  ;;  %v3964_v23 = vmul.f32 1.442695, %v3747_v35  ;;  %v10742_v20 = vpop.eup %7128  ;;  %v3767_v51 = vsub.f32 %v13173_v62, %v10653_v52  ;;  %v4633_v2 = vperm.slane %v10577_v61, %v9759_v25  ;;  %v13174_v35 = vld [vmem:[#allocation79_spill] sm:$0xff] }
 0x8a0   : > { %4422 = vperm.xlu0 %6603, %v10718_v31   ;;  %v3960_v31 = vmul.f32 1.442695, %v3745_v10  ;;  %v4630_v50 = vsel %vm3362_vm8, %v4629_v30, %v4628_v33  ;;  %v10746_v29 = vpop.eup %7130  ;;  %7132 = vpow2.f32 %v3998_v46  ;;  %v3750_v9 = vsub.f32 %v13174_v35, %v10547_v56 }
 0x8a1   : > { %4416 = vperm.xlu1 %6604, %v10721_v6   ;;  %13172 = vst [vmem:[#allocation44_spill] sm:$0xff] %v10746_v29  ;;  %7134 = vpow2.f32 %v3964_v23  ;;  %v10761_v30 = vperm.slane %v10158_v1, 7  ;;  %v4004_v62 = vmul.f32 1.442695, %v3767_v51  ;;  %v10767_v35 = vpop.permute.xlu2 %4356  ;;  %vm13177_vm3 = vcmask 654912   ;;  %v13179_v51 = vld [vmem:[#allocation118_spill] sm:$0xff] }
 0x8a2   : > { %v4297_v21 = vpop.permute.xlu0 %4296  ;;  %7136 = vpow2.f32 %v3960_v31  ;;  %v3970_v23 = vmul.f32 1.442695, %v3750_v9  ;;  %v13180_v9 = vld [vmem:[#allocation84_spill] sm:$0xff] }
 0x8a3   : > { %v4291_v41 = vpop.permute.xlu1 %4290  ;;  %7138 = vpow2.f32 %v4004_v62 }
 0x8a4   : > { %v4631_v60 = vperm.slane %v4291_v41, %v9741_v42  ;;  %v13175_v41 = vld [vmem:[#allocation74_spill] sm:$0xff]  ;;  %7140 = vpow2.f32 %v3970_v23 }
 0x8a5   : > { %v3748_v33 = vsub.f32 %v13175_v41, %v10547_v56 }
 0x8a6   : > { %v4632_v6 = vsel %vm3366_vm9, %v4631_v60, %v4630_v50  ;;  %v4635_v50 = vperm.slane %v4297_v21, %v9763_v18  ;;  %v4639_v21 = vperm.slane %v10604_v22, %v9796_v26 }
 0x8a7   : > { %4482 = vperm.xlu2 %6605, %v10740_v27   ;;  %v4634_v60 = vsel %vm3370_vm10, %v4633_v2, %v4632_v6  ;;  %v10765_v27 = vpop.eup %7132  ;;  %v3770_v2 = vsub.f32 %v13179_v51, %v10761_v30  ;;  %v4645_v51 = vperm.slane %v10631_v54, %v9827_v39 }
 0x8a8   : > { %4431 = vperm.xlu0 %6603, %v10742_v20   ;;  %13176 = vst [vmem:[#allocation131_spill] sm:$0xff] %v10765_v27  ;;  %v4636_v31 = vsel %vm13177_vm3, %v4635_v50, %v4634_v60  ;;  %v10770_v41 = vpop.eup %7134  ;;  %v13181_v50 = vld [vmem:[#allocation78_spill] sm:$0xff]  ;;  %vm13182_vm3 = vcmask 851712  }
 0x8a9   : > { %4425 = vperm.xlu1 %6604, %v10746_v29   ;;  %v3966_v29 = vmul.f32 1.442695, %v3748_v33  ;;  %13178 = vst [vmem:[#allocation138_spill] sm:$0xff] %v10770_v41  ;;  %v10774_v1 = vpop.eup %7136  ;;  %v3753_v33 = vsub.f32 %v13180_v9, %v10547_v56 }
 0x8aa   : > { %v4306_v10 = vpop.permute.xlu0 %4305  ;;  %v10792_v9 = vpop.eup %7138 }
 0x8ab   : > { %v4300_v46 = vpop.permute.xlu1 %4299  ;;  %7142 = vpow2.f32 %v3966_v29  ;;  %v4641_v22 = vperm.slane %v4306_v10, %v9799_v58  ;;  %13183 = vst [vmem:[#allocation114_spill] sm:$0xff] %v10792_v9 }
 0x8ac   : > { %v4637_v61 = vperm.slane %v4300_v46, %v9781_v63 }
 0x8ae   : > { %v4638_v6 = vsel %vm3378_vm12, %v4637_v61, %v4636_v31  ;;  %v3751_v61 = vsub.f32 %v13181_v50, %v10547_v56  ;;  %v10796_v56 = vpop.eup %7140  ;;  %v10802_v50 = vpop.permute.xlu2 %4365 }
 0x8af   : > { %4491 = vperm.xlu2 %6605, %v10765_v27   ;;  %v4640_v60 = vsel %vm3382_vm13, %v4639_v21, %v4638_v6  ;;  %v4010_v27 = vmul.f32 1.442695, %v3770_v2 }
 0x8b0   : > { %4440 = vperm.xlu0 %6603, %v10770_v41   ;;  %v4642_v23 = vsel %vm13182_vm3, %v4641_v22, %v4640_v60  ;;  %v3976_v41 = vmul.f32 1.442695, %v3753_v33  ;;  %v3972_v21 = vmul.f32 1.442695, %v3751_v61  ;;  %v13185_v33 = vld [vmem:[#allocation134_spill] sm:$0xff]  ;;  %vm13196_vm3 = vcmask 392512  }
 0x8b1   : > { %4434 = vperm.xlu1 %6604, %v10774_v1   ;;  %v10800_v2 = vpop.eup %7142  ;;  %7144 = vpow2.f32 %v4010_v27  ;;  %v3773_v60 = vsub.f32 %v13185_v33, %v10761_v30  ;;  %v4588_v27 = vperm.slane %v10564_v7, %v9692_v38  ;;  %v4587_v7 = vperm.slane %v10377_v36, %v9689_v8  ;;  %vm13197_vm14 = vmmov %vm13196_vm3 }
 0x8b2   : > { %v4315_v46 = vpop.permute.xlu0 %4314  ;;  %13184 = vst [vmem:[#allocation60_spill] sm:$0xff] %v10800_v2  ;;  %7146 = vpow2.f32 %v3976_v41  ;;  %v13189_v41 = vld [vmem:[#allocation106_spill] sm:$0xff] }
 0x8b3   : > { %v4309_v31 = vpop.permute.xlu1 %4308  ;;  %v4647_v6 = vperm.slane %v4315_v46, %v9872_v34  ;;  %v13186_v46 = vld [vmem:[#allocation141_spill] sm:$0xff]  ;;  %7148 = vpow2.f32 %v3972_v21  ;;  %v4590_v21 = vperm.slane %v10589_v37, %v9703_v45 }
 0x8b4   : > { %v4643_v62 = vperm.slane %v4309_v31, %v9836_v12  ;;  %v3756_v61 = vsub.f32 %v13186_v46, %v10653_v52  ;;  %v13187_v31 = vld [vmem:[#allocation117_spill] sm:$0xff] }
 0x8b5   : > { %v13193_v37 = vld [vmem:[#allocation133_spill] sm:$0xff] }
 0x8b6   : > { %v4644_v29 = vsel %vm3390_vm15, %v4643_v62, %v4642_v23  ;;  %v3754_v62 = vsub.f32 %v13187_v31, %v10653_v52  ;;  %v4016_v23 = vmul.f32 1.442695, %v3773_v60  ;;  %v13191_v60 = vld [vmem:[#allocation157_spill] sm:$0xff] }
 0x8b7   : > { %v4646_v10 = vsel %vm3394_vm0, %v4645_v51, %v4644_v29  ;;  %4500 = vperm.xlu2 %6605, %v10792_v9   ;;  %v10815_v29 = vpop.eup %7144  ;;  %v3776_v9 = vsub.f32 %v13189_v41, %v10761_v30  ;;  %v3757_v41 = vsub.f32 %v13193_v37, %v10653_v52 }
 0x8b8   : > { %v10805_v54 = vsel %vm3398_vm1, %v4647_v6, %v4646_v10  ;;  %4449 = vperm.xlu0 %6603, %v10796_v56   ;;  %v3982_v6 = vmul.f32 1.442695, %v3756_v61  ;;  %13188 = vst [vmem:[#allocation154_spill] sm:$0xff] %v10815_v29  ;;  %v3978_v33 = vmul.f32 1.442695, %v3754_v62  ;;  %v10822_v46 = vpop.eup %7146  ;;  %v3759_v61 = vsub.f32 %v13191_v60, %v10653_v52 }
 0x8b9   : > { %4443 = vperm.xlu1 %6604, %v10800_v2   ;;  %13190 = vst [vmem:[#allocation130_spill] sm:$0xff] %v10822_v46  ;;  %v10829_v31 = vpop.eup %7148  ;;  %v4650_v62 = vperm.slane %v10657_v49, %v9692_v38  ;;  %7150 = vpow2.f32 %v4016_v23  ;;  %v4589_v60 = vsel %vm3342_vm2, %v4588_v27, %v4587_v7  ;;  %v10841_v2 = vpop.permute.xlu2 %4374  ;;  %v4022_v49 = vmul.f32 1.442695, %v3776_v9  ;;  %v13194_v9 = vld [vmem:[#allocation109_spill] sm:$0xff] }
 0x8ba   : > { %v4324_v22 = vpop.permute.xlu0 %4323  ;;  %13192 = vst [vmem:[#allocation62_spill] sm:$0xff] %v10829_v31  ;;  %7152 = vpow2.f32 %v3982_v6  ;;  %v4557_v23 = vperm.slane %v10413_v19, %v9692_v38  ;;  %v4591_v6 = vsel %vm3346_vm4, %v4590_v21, %v4589_v60  ;;  %v4592_v27 = vperm.slane %v10396_v28, %v9708_v0  ;;  %v13195_v21 = vld [vmem:[#allocation149_spill] sm:$0xff] }
 0x8bb   : > { %v4318_v51 = vpop.permute.xlu1 %4317  ;;  %7154 = vpow2.f32 %v3978_v33  ;;  %v4559_v7 = vperm.slane %v10441_v16, %v9703_v45  ;;  %v3779_v33 = vsub.f32 %v13194_v9, %v10761_v30  ;;  %v4656_v19 = vperm.slane %v10681_v40, %v9716_v17 }
 0x8bc   : > { %v4649_v10 = vperm.slane %v4318_v51, %v9689_v8  ;;  %v4652_v51 = vperm.slane %v4324_v22, %v9703_v45  ;;  %v4556_v22 = vperm.slane %v10417_v44, %v9689_v8  ;;  %v4593_v28 = vsel %vm3350_vm5, %v4592_v27, %v4591_v6  ;;  %v13198_v27 = vld [vmem:[#allocation87_spill] sm:$0xff] }
 0x8bd   : > { %v4596_v16 = vperm.slane %v10610_v3, %v9726_v47  ;;  %7156 = vpow2.f32 %v4022_v49  ;;  %v4565_v49 = vperm.slane %v10458_v24, %v9726_v47  ;;  %v4600_v24 = vperm.slane %v10606_v11, %v9741_v42 }
 0x8be   : > { %v4651_v36 = vsel %vm3342_vm2, %v4650_v62, %v4649_v10  ;;  %v3984_v62 = vmul.f32 1.442695, %v3757_v41  ;;  %v4558_v40 = vsel %vm3342_vm2, %v4557_v23, %v4556_v22  ;;  %v4594_v41 = vperm.slane %v10585_v4, %v9716_v17 }
 0x8bf   : > { %4509 = vperm.xlu2 %6605, %v10815_v29   ;;  %v4653_v44 = vsel %vm3346_vm4, %v4652_v51, %v4651_v36  ;;  %v10861_v37 = vpop.eup %7150  ;;  %v4561_v51 = vperm.slane %v10437_v57, %v9708_v0  ;;  %v4560_v3 = vsel %vm3346_vm4, %v4559_v7, %v4558_v40  ;;  %v3760_v7 = vsub.f32 %v13198_v27, %v10653_v52 }
 0x8c0   : > { %4458 = vperm.xlu0 %6603, %v10822_v46   ;;  %v10868_v9 = vpop.eup %7152  ;;  %v4595_v57 = vsel %vm3354_vm6, %v4594_v41, %v4593_v28  ;;  %v4569_v11 = vperm.slane %v10479_v32, %v9741_v42  ;;  %v4571_v27 = vperm.slane %v10504_v48, %v9759_v25  ;;  %v4604_v32 = vperm.slane %v10445_v13, %v9763_v18 }
 0x8c1   : > { %4452 = vperm.xlu1 %6604, %v10829_v31   ;;  %v3988_v31 = vmul.f32 1.442695, %v3759_v61  ;;  %v3762_v61 = vsub.f32 %v13195_v21, %v10653_v52  ;;  %v10877_v6 = vpop.eup %7154  ;;  %v4597_v4 = vsel %vm13197_vm14, %v4596_v16, %v4595_v57  ;;  %v4567_v16 = vperm.slane %v10483_v55, %v9732_v43  ;;  %vm13201_vm14 = vmmov %vm13196_vm3 }
 0x8c2   : > { %v4333_v29 = vpop.permute.xlu0 %4332 }
 0x8c3   : > { %v4327_v46 = vpop.permute.xlu1 %4326  ;;  %7158 = vpow2.f32 %v3988_v31  ;;  %v10895_v31 = vpop.permute.xlu2 %4383 }
 0x8c4   : > { %v4654_v10 = vperm.slane %v4327_v46, %v9708_v0  ;;  %v4658_v46 = vperm.slane %v4333_v29, %v9726_v47  ;;  %v4563_v29 = vperm.slane %v10462_v5, %v9716_v17  ;;  %7160 = vpow2.f32 %v3984_v62 }
 0x8c5   : > { %v4598_v5 = vperm.slane %v10422_v15, %v9732_v43  ;;  %v3994_v62 = vmul.f32 1.442695, %v3762_v61  ;;  %v4602_v15 = vperm.slane %v10629_v14, %v9759_v25  ;;  %v13199_v14 = vld [vmem:[#allocation166_spill] sm:$0xff] }
 0x8c6   : > { %v4655_v60 = vsel %vm3350_vm5, %v4654_v10, %v4653_v44  ;;  %v4562_v10 = vsel %vm3350_vm5, %v4561_v51, %v4560_v3  ;;  %v4028_v44 = vmul.f32 1.442695, %v3779_v33  ;;  %v4662_v33 = vperm.slane %v10706_v53, %v9741_v42 }
 0x8c7   : > { %v4657_v36 = vsel %vm3354_vm6, %v4656_v19, %v4655_v60  ;;  %4518 = vperm.xlu2 %6605, %v10861_v37   ;;  %v4564_v21 = vsel %vm3354_vm6, %v4563_v29, %v4562_v10  ;;  %v10905_v60 = vpop.eup %7156  ;;  %v3990_v51 = vmul.f32 1.442695, %v3760_v7  ;;  %v3782_v53 = vsub.f32 %v13199_v14, %v10761_v30  ;;  %v13202_v10 = vld [vmem:[#allocation90_spill] sm:$0xff] }
 0x8c8   : > { %4467 = vperm.xlu0 %6603, %v10868_v9   ;;  %v4659_v23 = vsel %vm13196_vm3, %v4658_v46, %v4657_v36  ;;  %v4599_v46 = vsel %vm3362_vm8, %v4598_v5, %v4597_v4  ;;  %7162 = vpow2.f32 %v4028_v44  ;;  %v13200_v36 = vld [vmem:[#allocation95_spill] sm:$0xff]  ;;  %vm13203_vm3 = vcmask 654912  }
 0x8c9   : > { %4461 = vperm.xlu1 %6604, %v10877_v6   ;;  %v10911_v41 = vpop.eup %7158  ;;  %v3765_v3 = vsub.f32 %v13200_v36, %v10653_v52  ;;  %v4601_v57 = vsel %vm3366_vm9, %v4600_v24, %v4599_v46  ;;  %7164 = vpow2.f32 %v3994_v62 }
 0x8ca   : > { %v4342_v22 = vpop.permute.xlu0 %4341  ;;  %v10919_v29 = vpop.eup %7160  ;;  %v4603_v7 = vsel %vm3370_vm10, %v4602_v15, %v4601_v57  ;;  %7166 = vpow2.f32 %v3990_v51 }
 0x8cb   : > { %v4336_v19 = vpop.permute.xlu1 %4335  ;;  %v4664_v40 = vperm.slane %v4342_v22, %v9759_v25  ;;  %v4605_v48 = vsel %vm13203_vm3, %v4604_v32, %v4603_v7 }
 0x8cc   : > { %v4660_v28 = vperm.slane %v4336_v19, %v9732_v43  ;;  %v3763_v19 = vsub.f32 %v13202_v10, %v10653_v52 }
 0x8ce   : > { %v4661_v61 = vsel %vm3362_vm8, %v4660_v28, %v4659_v23  ;;  %v4566_v23 = vsel %vm13201_vm14, %v4565_v49, %v4564_v21  ;;  %v4034_v49 = vmul.f32 1.442695, %v3782_v53  ;;  %v4000_v21 = vmul.f32 1.442695, %v3765_v3  ;;  %v10941_v15 = vpop.eup %7162  ;;  %v10952_v53 = vpop.permute.xlu2 %4392  ;;  %vm13209_vm14 = vmmov %vm13203_vm3 }
 0x8cf   : > { %v4663_v55 = vsel %vm3366_vm9, %v4662_v33, %v4661_v61  ;;  %4527 = vperm.xlu2 %6605, %v10905_v60   ;;  %v4568_v22 = vsel %vm3362_vm8, %v4567_v16, %v4566_v23  ;;  %v13204_v16 = vld [vmem:[#allocation40_spill] sm:$0xff]  ;;  %13205 = vst [vmem:[#allocation146_spill] sm:$0xff] %v10941_v15  ;;  %v13206_v33 = vld [vmem:[#allocation46_spill] sm:$0xff]  ;;  %v13207_v61 = vld [vmem:[#allocation167_spill] sm:$0xff]  ;;  %v10956_v23 = vpop.eup %7164 }
 0x8d0   : > { %4476 = vperm.xlu0 %6603, %v10911_v41   ;;  %v4665_v4 = vsel %vm3370_vm10, %v4664_v40, %v4663_v55  ;;  %v4570_v28 = vsel %vm3366_vm9, %v4569_v11, %v4568_v22  ;;  %v4608_v46 = vperm.slane %v13204_v16, %v9796_v26  ;;  %v4606_v24 = vperm.slane %v13206_v33, %v9781_v63  ;;  %v13208_v55 = vld [vmem:[#allocation196_spill] sm:$0xff]  ;;  %v10963_v7 = vpop.eup %7166 }
 0x8d1   : > { %4470 = vperm.xlu1 %6604, %v10919_v29   ;;  %v4572_v13 = vsel %vm3370_vm10, %v4571_v27, %v4570_v28  ;;  %v4668_v40 = vperm.slane %v10735_v59, %v9781_v63  ;;  %v3785_v51 = vsub.f32 %v13207_v61, %v10761_v30  ;;  %v4573_v14 = vperm.slane %v13208_v55, %v9763_v18  ;;  %v13210_v59 = vld [vmem:[#allocation98_spill] sm:$0xff]  ;;  %v13215_v16 = vld [vmem:[#allocation92_spill] sm:$0xff] }
 0x8d2   : > { %v4351_v5 = vpop.permute.xlu0 %4350  ;;  %v3996_v11 = vmul.f32 1.442695, %v3763_v19  ;;  %v4607_v57 = vsel %vm3378_vm12, %v4606_v24, %v4605_v48  ;;  %7168 = vpow2.f32 %v4034_v49  ;;  %v3768_v27 = vsub.f32 %v13210_v59, %v10653_v52  ;;  %13211 = vst [vmem:[#allocation51_spill] sm:$0xff] %v10963_v7  ;;  %v13214_v49 = vld [vmem:[#allocation31_spill] sm:$0xff]  ;;  %v13218_v55 = vld [vmem:[#allocation52_spill] sm:$0xff] }
 0x8d3   : > { %v4345_v44 = vpop.permute.xlu1 %4344  ;;  %v4670_v36 = vperm.slane %v4351_v5, %v9796_v26  ;;  %v4574_v32 = vsel %vm13203_vm3, %v4573_v14, %v4572_v13  ;;  %v13212_v5 = vld [vmem:[#allocation143_spill] sm:$0xff]  ;;  %v4609_v10 = vsel %vm3382_vm13, %v4608_v46, %v4607_v57  ;;  %v4575_v48 = vperm.slane %v13214_v49, %v9781_v63  ;;  %v13216_v46 = vld [vmem:[#allocation25_spill] sm:$0xff] }
 0x8d4   : > { %v4666_v62 = vperm.slane %v4345_v44, %v9763_v18  ;;  %v13213_v44 = vld [vmem:[#allocation127_spill] sm:$0xff]  ;;  %7170 = vpow2.f32 %v4000_v21  ;;  %v4040_v33 = vmul.f32 1.442695, %v3785_v51  ;;  %v4579_v24 = vperm.slane %v13216_v46, %v9799_v58  ;;  %v13219_v21 = vld [vmem:[#allocation42_spill] sm:$0xff] }
 0x8d5   : > { %v4610_v28 = vperm.slane %v13213_v44, %v9799_v58  ;;  %7172 = vpow2.f32 %v3996_v11  ;;  %v4614_v14 = vperm.slane %v13218_v55, %v9827_v39  ;;  %v4581_v57 = vperm.slane %v13219_v21, %v9836_v12 }
 0x8d6   : > { %v4667_v3 = vsel %vm13209_vm14, %v4666_v62, %v4665_v4  ;;  %v4577_v4 = vperm.slane %v13212_v5, %v9796_v26  ;;  %v3766_v62 = vsub.f32 %v13215_v16, %v10653_v52  ;;  %vm13217_vm14 = vcmask 851712   ;;  %v11012_v55 = vpop.permute.xlu2 %4401 }
 0x8d7   : > { %v4669_v22 = vsel %vm3378_vm12, %v4668_v40, %v4667_v3  ;;  %4536 = vperm.xlu2 %6605, %v10941_v15   ;;  %v4576_v40 = vsel %vm3378_vm12, %v4575_v48, %v4574_v32  ;;  %v4611_v61 = vsel %vm13217_vm14, %v4610_v28, %v4609_v10  ;;  %v4674_v32 = vperm.slane %v10767_v35, %v9836_v12  ;;  %vm13222_vm3 = vmmov %vm13217_vm14  ;;  %v13223_v48 = vld [vmem:[#allocation49_spill] sm:$0xff] }
 0x8d8   : > { %4485 = vperm.xlu0 %6603, %v10956_v23   ;;  %v4671_v19 = vsel %vm3382_vm13, %v4670_v36, %v4669_v22  ;;  %v4578_v3 = vsel %vm3382_vm13, %v4577_v4, %v4576_v40  ;;  %v13220_v22 = vld [vmem:[#allocation113_spill] sm:$0xff]  ;;  %v10990_v59 = vpop.eup %7168  ;;  %v4006_v5 = vmul.f32 1.442695, %v3768_v27  ;;  %v4002_v10 = vmul.f32 1.442695, %v3766_v62  ;;  %vm13224_vm14 = vmmov %vm13222_vm3  ;;  %v13226_v62 = vld [vmem:[#allocation159_spill] sm:$0xff] }
 0x8d9   : > { %4479 = vperm.xlu1 %6604, %v10963_v7   ;;  %v4612_v11 = vperm.slane %v13220_v22, %v9836_v12  ;;  %13221 = vst [vmem:[#allocation67_spill] sm:$0xff] %v10990_v59  ;;  %7174 = vpow2.f32 %v4040_v33  ;;  %v4583_v16 = vperm.slane %v13223_v48, %v9827_v39  ;;  %v4580_v46 = vsel %vm13224_vm14, %v4579_v24, %v4578_v3  ;;  %v13227_v33 = vld [vmem:[#allocation47_spill] sm:$0xff] }
 0x8da   : > { %v4360_v13 = vpop.permute.xlu0 %4359  ;;  %v10997_v49 = vpop.eup %7170  ;;  %7176 = vpow2.f32 %v4006_v5  ;;  %vm13232_vm14 = vcmask 1042434  }
 0x8db   : > { %v4354_v36 = vpop.permute.xlu1 %4353  ;;  %v4613_v44 = vsel %vm3390_vm15, %v4612_v11, %v4611_v61  ;;  %v4676_v28 = vperm.slane %v4360_v13, %v9827_v39  ;;  %v11005_v27 = vpop.eup %7172  ;;  %v4616_v13 = vperm.slane %v13226_v62, %v9872_v34  ;;  %v4585_v61 = vperm.slane %v13227_v33, %v9872_v34  ;;  %v13236_v33 = vld [vmem:[#allocation142_spill] sm:$0xff] }
 0x8dc   : > { %v4672_v51 = vperm.slane %v4354_v36, %v9799_v58  ;;  %v4615_v40 = vsel %vm3394_vm0, %v4614_v14, %v4613_v44  ;;  %13225 = vst [vmem:[#allocation56_spill] sm:$0xff] %v11005_v27  ;;  %v13228_v14 = vld [vmem:[#allocation126_spill] sm:$0xff]  ;;  %7178 = vpow2.f32 %v4002_v10 }
 0x8dd   : > { %v3771_v36 = vsub.f32 %v13228_v14, %v10761_v30  ;;  %v4617_v3 = vsel %vm3398_vm1, %v4616_v13, %v4615_v40 }
 0x8de   : > { %v4673_v4 = vsel %vm13222_vm3, %v4672_v51, %v4671_v19  ;;  %v4582_v19 = vsel %vm3390_vm15, %v4581_v57, %v4580_v46  ;;  %v13229_v57 = vld [vmem:[#allocation96_spill] sm:$0xff]  ;;  %vm13231_vm3 = vcmask 1041409   ;;  %v11044_v13 = vpop.permute.xlu2 %4410 }
 0x8df   : > { %v4675_v35 = vsel %vm3390_vm15, %v4674_v32, %v4673_v4  ;;  %4545 = vperm.xlu2 %6605, %v10990_v59   ;;  %v3769_v22 = vsub.f32 %v13229_v57, %v10653_v52  ;;  %v4584_v11 = vsel %vm3394_vm0, %v4583_v16, %v4582_v19  ;;  %v11023_v32 = vpop.eup %7174  ;;  %v4012_v4 = vmul.f32 1.442695, %v3771_v36 }
 0x8e0   : > { %4494 = vperm.xlu0 %6603, %v10997_v49   ;;  %v4677_v24 = vsel %vm3394_vm0, %v4676_v28, %v4675_v35  ;;  %13230 = vst [vmem:[#allocation53_spill] sm:$0xff] %v11023_v32  ;;  %v4586_v44 = vsel %vm3398_vm1, %v4585_v61, %v4584_v11  ;;  %v11031_v40 = vpop.eup %7176  ;;  %v3772_v61 = vsub.f32 %v13236_v33, %v10761_v30 }
 0x8e1   : > { %4488 = vperm.xlu1 %6604, %v11005_v27   ;;  %v4804_v5 = vsel %vm13231_vm3, %v4617_v3, %v4586_v44  ;;  %v4008_v46 = vmul.f32 1.442695, %v3769_v22  ;;  %7180 = vpow2.f32 %v4012_v4  ;;  %v4685_v3 = vperm.slane %v10841_v2, %v9708_v0  ;;  %v13239_v4 = vld [vmem:[#allocation105_spill] sm:$0xff] }
 0x8e2   : > { %v4369_v21 = vpop.permute.xlu0 %4368  ;;  %v4805_v48 = vsel %vm13232_vm14, %v10805_v54, %v4804_v5  ;;  %v11037_v16 = vpop.eup %7178  ;;  %v13235_v54 = vld [vmem:[#allocation102_spill] sm:$0xff]  ;;  %vm13245_vm3 = vcmask 654912   ;;  %vm13250_vm14 = vcmask 851712  }
 0x8e3   : > { %v4363_v51 = vpop.permute.xlu1 %4362  ;;  %13234 = vst [vmem:[#allocation71_spill] sm:$0xff] %v11037_v16  ;;  %v4681_v35 = vperm.slane %v4369_v21, %v9692_v38  ;;  %v3774_v62 = vsub.f32 %v13235_v54, %v10761_v30  ;;  %7182 = vpow2.f32 %v4008_v46  ;;  %v13240_v46 = vld [vmem:[#allocation158_spill] sm:$0xff] }
 0x8e4   : > { %v4678_v28 = vperm.slane %v4363_v51, %v9872_v34  ;;  %v4014_v51 = vmul.f32 1.442695, %v3772_v61  ;;  %v4691_v61 = vperm.slane %v10895_v31, %v9732_v43  ;;  %v13243_v31 = vld [vmem:[#allocation107_spill] sm:$0xff] }
 0x8e5   : > { %v4018_v57 = vmul.f32 1.442695, %v3774_v62  ;;  %v11074_v62 = vld [vmem:[%s13241_s0] ss:$0 sm:$0xff] }
 0x8e6   : > { %v4679_v10 = vsel %vm3398_vm1, %v4678_v28, %v4677_v24  ;;  %v4680_v24 = vperm.slane %v10802_v50, %v9689_v8  ;;  %v13237_v50 = vld [vmem:[#allocation65_spill] sm:$0xff] }
 0x8e7   : > { %v11034_v52 = vsel %vm13233_vm11, %v4679_v10, %v4805_v48  ;;  %4554 = vperm.xlu2 %6605, %v11023_v32   ;;  %v11056_v44 = vpop.eup %7180  ;;  %7184 = vpow2.f32 %v4018_v57  ;;  %v3777_v48 = vsub.f32 %v13239_v4, %v10761_v30  ;;  %vm13242_vm11 = vcmask 392512  }
 0x8e8   : > { %4503 = vperm.xlu0 %6603, %v11031_v40   ;;  %v4682_v21 = vsel %vm3342_vm2, %v4681_v35, %v4680_v24  ;;  %7186 = vpow2.f32 %v4014_v51  ;;  %v3775_v35 = vsub.f32 %v13240_v46, %v10761_v30  ;;  %v3780_v51 = vsub.f32 %v13243_v31, %v10761_v30 }
 0x8e9   : > { %4497 = vperm.xlu1 %6604, %v11037_v16   ;;  %v11060_v5 = vpop.eup %7182  ;;  %v4024_v24 = vmul.f32 1.442695, %v3777_v48  ;;  %v13267_v16 = vld [vmem:[#allocation168_spill] sm:$0xff] }
 0x8ea   : > { %v4378_v19 = vpop.permute.xlu0 %4377  ;;  %13238 = vst [vmem:[#allocation59_spill] sm:$0xff] %v11060_v5  ;;  %v4030_v46 = vmul.f32 1.442695, %v3780_v51  ;;  %v13249_v51 = vld [vmem:[#allocation108_spill] sm:$0xff] }
 0x8eb   : > { %v4372_v14 = vpop.permute.xlu1 %4371  ;;  %v4687_v22 = vperm.slane %v4378_v19, %v9716_v17  ;;  %v11076_v19 = vpop.permute.xlu2 %4419  ;;  %7188 = vpow2.f32 %v4024_v24 }
 0x8ec   : > { %v4683_v36 = vperm.slane %v4372_v14, %v9703_v45 }
 0x8ee   : > { %v4684_v11 = vsel %vm3346_vm4, %v4683_v36, %v4682_v21  ;;  %v11083_v21 = vpop.eup %7184 }
 0x8ef   : > { %v4686_v28 = vsel %vm3350_vm5, %v4685_v3, %v4684_v11  ;;  %6607 = vset.pattern.permute.xlu2 %v13237_v50  ;;  %v4020_v3 = vmul.f32 1.442695, %v3775_v35  ;;  %v13244_v50 = vld [vmem:[#allocation150_spill] sm:$0xff] }
 0x8f0   : > { %4512 = vperm.xlu0 %6603, %v11056_v44   ;;  %v4688_v2 = vsel %vm3354_vm6, %v4687_v22, %v4686_v28  ;;  %v11087_v22 = vpop.eup %7186 }
 0x8f1   : > { %4506 = vperm.xlu1 %6604, %v11060_v5   ;;  %7190 = vpow2.f32 %v4020_v3  ;;  %v11103_v24 = vpop.eup %7188 }
 0x8f2   : > { %v4387_v10 = vpop.permute.xlu0 %4386  ;;  %7192 = vpow2.f32 %v4030_v46 }
 0x8f3   : > { %v4381_v54 = vpop.permute.xlu1 %4380  ;;  %v4693_v14 = vperm.slane %v4387_v10, %v9741_v42  ;;  %v4697_v10 = vperm.slane %v10952_v53, %v9763_v18  ;;  %v11099_v35 = vpop.permute.xlu2 %4428 }
 0x8f4   : > { %v4689_v33 = vperm.slane %v4381_v54, %v9726_v47 }
 0x8f6   : > { %v4690_v36 = vsel %vm13242_vm11, %v4689_v33, %v4688_v2  ;;  %v3778_v2 = vsub.f32 %v13244_v50, %v10761_v30 }
 0x8f7   : > { %v4692_v57 = vsel %vm3362_vm8, %v4691_v61, %v4690_v36  ;;  %4830 = vperm.xlu2 %6607, %v11074_v62   ;;  %v13246_v36 = vld [vmem:[#allocation81_spill] sm:$0xff]  ;;  %v11107_v3 = vpop.eup %7190 }
 0x8f8   : > { %4521 = vperm.xlu0 %6603, %v11083_v21   ;;  %v4694_v11 = vsel %vm3366_vm9, %v4693_v14, %v4692_v57  ;;  %v4026_v61 = vmul.f32 1.442695, %v3778_v2  ;;  %13247 = vst [vmem:[#allocation55_spill] sm:$0xff] %v11107_v3  ;;  %v13248_v57 = vld [vmem:[#allocation165_spill] sm:$0xff] }
 0x8f9   : > { %4515 = vperm.xlu1 %6604, %v11087_v22   ;;  %v3783_v31 = vsub.f32 %v13248_v57, %v10761_v30 }
 0x8fa   : > { %v4396_v28 = vpop.permute.xlu0 %4395  ;;  %7194 = vpow2.f32 %v4026_v61 }
 0x8fb   : > { %v4390_v4 = vpop.permute.xlu1 %4389  ;;  %v4699_v54 = vperm.slane %v4396_v28, %v9781_v63  ;;  %v3781_v28 = vsub.f32 %v13249_v51, %v10761_v30 }
 0x8fc   : > { %v4695_v48 = vperm.slane %v4390_v4, %v9759_v25  ;;  %v4703_v4 = vperm.slane %v11012_v55, %v9799_v58 }
 0x8fd   : > { %v4032_v46 = vmul.f32 1.442695, %v3781_v28  ;;  %v4709_v28 = vperm.slane %v11044_v13, %v9872_v34 }
 0x8fe   : > { %v4696_v33 = vsel %vm3370_vm10, %v4695_v48, %v4694_v11  ;;  %v4036_v48 = vmul.f32 1.442695, %v3783_v31 }
 0x8ff   : > { %v4698_v14 = vsel %vm13245_vm3, %v4697_v10, %v4696_v33  ;;  %6609 = vset.pattern.permute.xlu2 %v13246_v36  ;;  %v11121_v33 = vpop.eup %7192  ;;  %v4438_v36 = vpop.permute.xlu2 %4437 }
 0x900   : > { %4530 = vperm.xlu0 %6603, %v11103_v24   ;;  %v4700_v53 = vsel %vm3378_vm12, %v4699_v54, %v4698_v14  ;;  %v11125_v61 = vpop.eup %7194  ;;  %7196 = vpow2.f32 %v4036_v48  ;;  %v13254_v48 = vld [vmem:[#allocation86_spill] sm:$0xff] }
 0x901   : > { %4524 = vperm.xlu1 %6604, %v11107_v3   ;;  %13251 = vst [vmem:[#allocation140_spill] sm:$0xff] %v11125_v61  ;;  %7198 = vpow2.f32 %v4032_v46 }
 0x902   : > { %v4405_v11 = vpop.permute.xlu0 %4404 }
 0x903   : > { %v4399_v50 = vpop.permute.xlu1 %4398  ;;  %v4705_v10 = vperm.slane %v4405_v11, %v9836_v12 }
 0x904   : > { %v4701_v2 = vperm.slane %v4399_v50, %v9796_v26 }
 0x906   : > { %v4702_v54 = vsel %vm3382_vm13, %v4701_v2, %v4700_v53  ;;  %v13252_v53 = vld [vmem:[#allocation110_spill] sm:$0xff] }
 0x907   : > { %v4704_v14 = vsel %vm13250_vm14, %v4703_v4, %v4702_v54  ;;  %4842 = vperm.xlu2 %6609, %v11074_v62   ;;  %v3784_v31 = vsub.f32 %v13252_v53, %v10761_v30  ;;  %v11136_v4 = vpop.eup %7196  ;;  %v4447_v30 = vpop.permute.xlu2 %4446  ;;  %v4714_v53 = vperm.slane %v11076_v19, %v9703_v45 }
 0x908   : > { %4539 = vperm.xlu0 %6603, %v11121_v33   ;;  %v4706_v57 = vsel %vm3390_vm15, %v4705_v10, %v4704_v14  ;;  %13253 = vst [vmem:[#allocation123_spill] sm:$0xff] %v11136_v4  ;;  %v11142_v54 = vpop.eup %7198 }
 0x909   : > { %4533 = vperm.xlu1 %6604, %v11125_v61   ;;  %v4038_v2 = vmul.f32 1.442695, %v3784_v31  ;;  %13255 = vst [vmem:[#allocation58_spill] sm:$0xff] %v11142_v54 }
 0x90a   : > { %v4414_v55 = vpop.permute.xlu0 %4413 }
 0x90b   : > { %v4408_v11 = vpop.permute.xlu1 %4407  ;;  %7200 = vpow2.f32 %v4038_v2  ;;  %v4711_v14 = vperm.slane %v4414_v55, %v9689_v8  ;;  %v13257_v2 = vld [vmem:[#allocation103_spill] sm:$0xff] }
 0x90c   : > { %v4707_v51 = vperm.slane %v4408_v11, %v9827_v39 }
 0x90e   : > { %v4708_v50 = vsel %vm3394_vm0, %v4707_v51, %v4706_v57 }
 0x90f   : > { %v11139_v10 = vsel %vm3398_vm1, %v4709_v28, %v4708_v50  ;;  %6611 = vset.pattern.permute.xlu2 %v13254_v48 }
 0x910   : > { %4548 = vperm.xlu0 %6603, %v11136_v4  }
 0x911   : > { %4542 = vperm.xlu1 %6604, %v11142_v54   ;;  %v11154_v28 = vpop.eup %7200  ;;  %v13266_v54 = vld [vmem:[#allocation202_spill] sm:$0xff] }
 0x912   : > { %v4423_v46 = vpop.permute.xlu0 %4422  ;;  %13256 = vst [vmem:[#allocation156_spill] sm:$0xff] %v11154_v28  ;;  %v13268_v59 = vsub.f32 %v13266_v54, %v13267_v16 }
 0x913   : > { %v4417_v13 = vpop.permute.xlu1 %4416  ;;  %v4716_v31 = vperm.slane %v4423_v46, %v9708_v0  ;;  %v4720_v46 = vperm.slane %v11099_v35, %v9726_v47 }
 0x914   : > { %v4712_v57 = vperm.slane %v4417_v13, %v9692_v38  ;;  %v4456_v13 = vpop.permute.xlu2 %4455  ;;  %v3636_v27 = vmul.f32 1.442695, %v13268_v59 }
 0x916   : > { %v4713_v11 = vsel %vm3342_vm2, %v4712_v57, %v4711_v14  ;;  %7202 = vpow2.f32 %v3636_v27 }
 0x917   : > { %v4715_v51 = vsel %vm3346_vm4, %v4714_v53, %v4713_v11  ;;  %4854 = vperm.xlu2 %6611, %v11074_v62   ;;  %v13258_v11 = vld [vmem:[#allocation91_spill] sm:$0xff] }
 0x918   : > { %v4717_v50 = vsel %vm3350_vm5, %v4716_v31, %v4715_v51  ;;  %6618 = vset.pattern.permute.xlu0 %v13257_v2  ;;  %v13259_v51 = vld [vmem:[#allocation64_spill] sm:$0xff] }
 0x919   : > { %4551 = vperm.xlu1 %6604, %v11154_v28  }
 0x91a   : > { %v4432_v55 = vpop.permute.xlu0 %4431 }
 0x91b   : > { %v4426_v48 = vpop.permute.xlu1 %4425  ;;  %v4722_v14 = vperm.slane %v4432_v55, %v9732_v43 }
 0x91c   : > { %v4718_v19 = vperm.slane %v4426_v48, %v9716_v17  ;;  %v4726_v48 = vperm.slane %v4438_v36, %v9759_v25  ;;  %v4465_v28 = vpop.permute.xlu2 %4464 }
 0x91e   : > { %v4719_v57 = vsel %vm3354_vm6, %v4718_v19, %v4717_v50 }
 0x91f   : > { %v4721_v53 = vsel %vm13242_vm11, %v4720_v46, %v4719_v57  ;;  %6613 = vset.pattern.permute.xlu2 %v13258_v11  ;;  %v13260_v11 = vld [vmem:[#allocation94_spill] sm:$0xff] }
 0x920   : > { %v4723_v31 = vsel %vm3362_vm8, %v4722_v14, %v4721_v53 }
 0x921   : > { %6606 = vset.pattern.permute.xlu1 %v13259_v51 }
 0x922   : > { %v4441_v2 = vpop.permute.xlu0 %4440 }
 0x923   : > { %v4435_v4 = vpop.permute.xlu1 %4434  ;;  %v4728_v35 = vperm.slane %v4441_v2, %v9763_v18  ;;  %v13261_v2 = vld [vmem:[#allocation69_spill] sm:$0xff] }
 0x924   : > { %v4724_v5 = vperm.slane %v4435_v4, %v9741_v42  ;;  %v4732_v4 = vperm.slane %v4447_v30, %v9796_v26  ;;  %v4738_v30 = vperm.slane %v4456_v13, %v9827_v39  ;;  %v13263_v13 = vld [vmem:[#allocation82_spill] sm:$0xff] }
 0x926   : > { %v4725_v55 = vsel %vm3366_vm9, %v4724_v5, %v4723_v31  ;;  %v4474_v31 = vpop.permute.xlu2 %4473 }
 0x927   : > { %v4727_v50 = vsel %vm3370_vm10, %v4726_v48, %v4725_v55  ;;  %4866 = vperm.xlu2 %6613, %v11074_v62   ;;  %v4749_v61 = vperm.slane %v4474_v31, %v9716_v17  ;;  %v11221_v31 = vpop.eup %7202 }
 0x928   : > { %v4729_v19 = vsel %vm13245_vm3, %v4728_v35, %v4727_v50 }
 0x929   : > { %4824 = vperm.xlu1 %6606, %v11074_v62  }
 0x92a   : > { %v4450_v46 = vpop.permute.xlu0 %4449 }
 0x92b   : > { %v4444_v14 = vpop.permute.xlu1 %4443  ;;  %v4734_v36 = vperm.slane %v4450_v46, %v9799_v58 }
 0x92c   : > { %v4730_v57 = vperm.slane %v4444_v14, %v9781_v63 }
 0x92e   : > { %v4731_v53 = vsel %vm3378_vm12, %v4730_v57, %v4729_v19  ;;  %v4483_v46 = vpop.permute.xlu2 %4482 }
 0x92f   : > { %v4733_v5 = vsel %vm3382_vm13, %v4732_v4, %v4731_v53  ;;  %6615 = vset.pattern.permute.xlu2 %v13260_v11  ;;  %v4743_v4 = vperm.slane %v4465_v28, %v9692_v38  ;;  %v4755_v54 = vperm.slane %v4483_v46, %v9741_v42 }
 0x930   : > { %v4735_v51 = vsel %vm13250_vm14, %v4734_v36, %v4733_v5  ;;  %v13262_v5 = vld [vmem:[#allocation101_spill] sm:$0xff] }
 0x931   : > { %6608 = vset.pattern.permute.xlu1 %v13261_v2 }
 0x932   : > { %v11184_v48 = vpop.permute.xlu0 %4458 }
 0x933   : > { %v4453_v35 = vpop.permute.xlu1 %4452 }
 0x934   : > { %v4736_v55 = vperm.slane %v4453_v35, %v9836_v12 }
 0x936   : > { %v4737_v50 = vsel %vm3390_vm15, %v4736_v55, %v4735_v51  ;;  %v4492_v2 = vpop.permute.xlu2 %4491 }
 0x937   : > { %v11190_v19 = vsel %vm3394_vm0, %v4738_v30, %v4737_v50  ;;  %4878 = vperm.xlu2 %6615, %v11074_v62   ;;  %v13264_v50 = vld [vmem:[#allocation104_spill] sm:$0xff] }
 0x939   : > { %4836 = vperm.xlu1 %6608, %v11074_v62  }
 0x93a   : > { %v4468_v14 = vpop.permute.xlu0 %4467 }
 0x93b   : > { %v4462_v57 = vpop.permute.xlu1 %4461  ;;  %v4745_v28 = vperm.slane %v4468_v14, %v9703_v45 }
 0x93c   : > { %v4742_v36 = vperm.slane %v4462_v57, %v9689_v8 }
 0x93e   : > { %v4744_v53 = vsel %vm3342_vm2, %v4743_v4, %v4742_v36  ;;  %v4501_v30 = vpop.permute.xlu2 %4500  ;;  %v13265_v4 = vld [vmem:[#allocation88_spill] sm:$0xff] }
 0x93f   : > { %6617 = vset.pattern.permute.xlu2 %v13262_v5  ;;  %v4746_v5 = vsel %vm3346_vm4, %v4745_v28, %v4744_v53 }
 0x941   : > { %6610 = vset.pattern.permute.xlu1 %v13263_v13 }
 0x942   : > { %v4477_v11 = vpop.permute.xlu0 %4476 }
 0x943   : > { %v4471_v51 = vpop.permute.xlu1 %4470 }
 0x944   : > { %v4747_v57 = vperm.slane %v4471_v51, %v9708_v0 }
 0x946   : > { %v4748_v32 = vsel %vm3350_vm5, %v4747_v57, %v4746_v5  ;;  %v4510_v51 = vpop.permute.xlu2 %4509  ;;  %v13270_v57 = vld [vmem:[#allocation75_spill] sm:$0xff] }
 0x947   : > { %4890 = vperm.xlu2 %6617, %v11074_v62   ;;  %v4750_v14 = vsel %vm3354_vm6, %v4749_v61, %v4748_v32 }
 0x949   : > { %4848 = vperm.xlu1 %6610, %v11074_v62  }
 0x94a   : > { %v4486_v35 = vpop.permute.xlu0 %4485 }
 0x94b   : > { %v4480_v55 = vpop.permute.xlu1 %4479 }
 0x94e   : > { %v4519_v5 = vpop.permute.xlu2 %4518 }
 0x94f   : > { %6620 = vset.pattern.permute.xlu2 %v13264_v50  ;;  %v4753_v50 = vperm.slane %v4480_v55, %v9732_v43  ;;  %v4757_v55 = vperm.slane %v4486_v35, %v9759_v25 }
 0x951   : > { %6612 = vset.pattern.permute.xlu1 %v13265_v4  ;;  %v4751_v4 = vperm.slane %v4477_v11, %v9726_v47  ;;  %v13269_v11 = vmov 0  }
 0x952   : > { %v4495_v36 = vpop.permute.xlu0 %4494 }
 0x953   : > { %v4489_v13 = vpop.permute.xlu1 %4488  ;;  %v4752_v53 = vsel %vm13242_vm11, %v4751_v4, %v4750_v14  ;;  %v4763_v35 = vperm.slane %v4495_v36, %v9796_v26  ;;  %vm13271_vm11 = vcmask 1044484  }
 0x954   : > { %v4754_v16 = vsel %vm3362_vm8, %v4753_v50, %v4752_v53  ;;  %v4759_v61 = vperm.slane %v4489_v13, %v9763_v18  ;;  %v4761_v50 = vperm.slane %v4492_v2, %v9781_v63  ;;  %v4807_v36 = vsel %vm13271_vm11, %v11139_v10, %v11034_v52 }
 0x955   : > { %v4756_v32 = vsel %vm3366_vm9, %v4755_v54, %v4754_v16  ;;  %vm13276_vm11 = vcmask 654912  }
 0x956   : > { %v4758_v27 = vsel %vm3370_vm10, %v4757_v55, %v4756_v32  ;;  %v4767_v32 = vperm.slane %v4501_v30, %v9836_v12  ;;  %v4740_v30 = vperm.slane %v11184_v48, %v9872_v34 }
 0x957   : > { %4908 = vperm.xlu2 %6620, %v11074_v62   ;;  %v4760_v14 = vsel %vm13245_vm3, %v4759_v61, %v4758_v27  ;;  %v4528_v27 = vpop.permute.xlu2 %4527  ;;  %vm13273_vm3 = vcmask 1046534  }
 0x958   : > { %v4762_v13 = vsel %vm3378_vm12, %v4761_v50, %v4760_v14 }
 0x959   : > { %4860 = vperm.xlu1 %6612, %v11074_v62   ;;  %v4764_v16 = vsel %vm3382_vm13, %v4763_v35, %v4762_v13  ;;  %v4773_v13 = vperm.slane %v4510_v51, %v9689_v8  ;;  %v4778_v51 = vperm.slane %v4519_v5, %v9708_v0 }
 0x95a   : > { %v4504_v28 = vpop.permute.xlu0 %4503 }
 0x95b   : > { %v4498_v59 = vpop.permute.xlu1 %4497  ;;  %v4769_v14 = vperm.slane %v4504_v28, %v9827_v39  ;;  %v13272_v28 = vld [vmem:[#allocation99_spill] sm:$0xff] }
 0x95c   : > { %v4765_v53 = vperm.slane %v4498_v59, %v9799_v58 }
 0x95e   : > { %v4766_v54 = vsel %vm13250_vm14, %v4765_v53, %v4764_v16  ;;  %vm13274_vm14 = vcmask 392512  }
 0x95f   : > { %6622 = vset.pattern.permute.xlu2 %v13269_v11  ;;  %v4768_v2 = vsel %vm3390_vm15, %v4767_v32, %v4766_v54 }
 0x960   : > { %5063 = vperm.xlu2 %6622, %v11221_v31   ;;  %v4770_v53 = vsel %vm3394_vm0, %v4769_v14, %v4768_v2  ;;  %v4537_v2 = vpop.permute.xlu2 %4536 }
 0x961   : > { %6614 = vset.pattern.permute.xlu1 %v13270_v57 }
 0x962   : > { %v4513_v46 = vpop.permute.xlu0 %4512 }
 0x963   : > { %v4507_v4 = vpop.permute.xlu1 %4506  ;;  %v4774_v59 = vperm.slane %v4513_v46, %v9692_v38  ;;  %v4741_v46 = vsel %vm3398_vm1, %v4740_v30, %v11190_v19 }
 0x964   : > { %v4771_v57 = vperm.slane %v4507_v4, %v9872_v34  ;;  %v4808_v10 = vsel %vm3625_vm7, %v4741_v46, %v4807_v36 }
 0x965   : > { %v4775_v4 = vsel %vm3342_vm2, %v4774_v59, %v4773_v13  ;;  %v4784_v59 = vperm.slane %v4528_v27, %v9732_v43 }
 0x966   : > { %v4772_v35 = vsel %vm3398_vm1, %v4771_v57, %v4770_v53 }
 0x967   : > { %v4809_v48 = vsel %vm13273_vm3, %v4772_v35, %v4808_v10  ;;  %vm13277_vm3 = vcmask 851712  }
 0x968   : > { %v4546_v35 = vpop.permute.xlu2 %4545 }
 0x969   : > { %4872 = vperm.xlu1 %6614, %v11074_v62  }
 0x96a   : > { %v4522_v55 = vpop.permute.xlu0 %4521 }
 0x96b   : > { %v4516_v61 = vpop.permute.xlu1 %4515  ;;  %v4780_v57 = vperm.slane %v4522_v55, %v9716_v17 }
 0x96c   : > { %v4776_v50 = vperm.slane %v4516_v61, %v9703_v45 }
 0x96e   : > { %v4777_v52 = vsel %vm3346_vm4, %v4776_v50, %v4775_v4  ;;  %v4790_v4 = vperm.slane %v4537_v2, %v9763_v18 }
 0x96f   : > { %v4779_v32 = vsel %vm3350_vm5, %v4778_v51, %v4777_v52 }
 0x970   : > { %v4781_v14 = vsel %vm3354_vm6, %v4780_v57, %v4779_v32 }
 0x971   : > { %6616 = vset.pattern.permute.xlu1 %v13272_v28  ;;  %v13275_v28 = vld [vmem:[#allocation83_spill] sm:$0xff] }
 0x972   : > { %v4531_v54 = vpop.permute.xlu0 %4530 }
 0x973   : > { %v4525_v16 = vpop.permute.xlu1 %4524  ;;  %v4786_v13 = vperm.slane %v4531_v54, %v9741_v42  ;;  %v4796_v54 = vperm.slane %v4546_v35, %v9799_v58 }
 0x974   : > { %v4782_v61 = vperm.slane %v4525_v16, %v9726_v47 }
 0x976   : > { %v4783_v19 = vsel %vm13274_vm14, %v4782_v61, %v4781_v14  ;;  %v4555_v61 = vpop.permute.xlu2 %4554  ;;  %vm13278_vm14 = vcmask 1047559  }
 0x977   : > { %v4785_v36 = vsel %vm3362_vm8, %v4784_v59, %v4783_v19  ;;  %v4802_v59 = vperm.slane %v4555_v61, %v9872_v34 }
 0x978   : > { %v4787_v53 = vsel %vm3366_vm9, %v4786_v13, %v4785_v36 }
 0x979   : > { %4884 = vperm.xlu1 %6616, %v11074_v62  }
 0x97a   : > { %v4540_v30 = vpop.permute.xlu0 %4539 }
 0x97b   : > { %v4534_v5 = vpop.permute.xlu1 %4533  ;;  %v4792_v52 = vperm.slane %v4540_v30, %v9781_v63  ;;  %v13279_v30 = vld [vmem:[#allocation100_spill] sm:$0xff] }
 0x97c   : > { %v4788_v50 = vperm.slane %v4534_v5, %v9759_v25 }
 0x97e   : > { %v4789_v55 = vsel %vm3370_vm10, %v4788_v50, %v4787_v53  ;;  %v11289_v53 = vpop.permute.xlu2 %4830 }
 0x97f   : > { %v4791_v46 = vsel %vm13276_vm11, %v4790_v4, %v4789_v55  ;;  %v13280_v55 = vld [vmem:[#allocation189_spill] sm:$0xff]  ;;  %vm13298_vm11 = vcmask 7168  }
 0x980   : > { %v4793_v51 = vsel %vm3378_vm12, %v4792_v52, %v4791_v46 }
 0x981   : > { %6619 = vset.pattern.permute.xlu1 %v13275_v28  ;;  %v13281_v28 = vld [vmem:[#allocation188_spill] sm:$0xff] }
 0x982   : > { %v4549_v32 = vpop.permute.xlu0 %4548  ;;  %v4933_v46 = vmul.f32 %v13281_v28, %v11289_v53 }
 0x983   : > { %v4543_v27 = vpop.permute.xlu1 %4542  ;;  %v4798_v57 = vperm.slane %v4549_v32, %v9836_v12 }
 0x984   : > { %v4794_v10 = vperm.slane %v4543_v27, %v9796_v26 }
 0x986   : > { %v4795_v16 = vsel %vm3382_vm13, %v4794_v10, %v4793_v51  ;;  %v13282_v10 = vld [vmem:[#allocation201_spill] sm:$0xff] }
 0x987   : > { %v4797_v2 = vsel %vm13277_vm3, %v4796_v54, %v4795_v16  ;;  %v13283_v16 = vld [vmem:[#allocation176_spill] sm:$0xff]  ;;  %vm13333_vm3 = vcmask 392512  }
 0x988   : > { %v4799_v5 = vsel %vm3390_vm15, %v4798_v57, %v4797_v2 }
 0x989   : > { %4902 = vperm.xlu1 %6619, %v11074_v62  }
 0x98b   : > { %v4552_v14 = vpop.permute.xlu1 %4551 }
 0x98c   : > { %v4800_v19 = vperm.slane %v4552_v14, %v9827_v39  ;;  %v13285_v14 = vld [vmem:[#allocation216_spill] sm:$0xff] }
 0x98e   : > { %v4801_v36 = vsel %vm3394_vm0, %v4800_v19, %v4799_v5 }
 0x98f   : > { %v4803_v50 = vsel %vm3398_vm1, %v4802_v59, %v4801_v36 }
 0x990   : > { %v4810_v13 = vsel %vm13278_vm14, %v4803_v50, %v4809_v48  ;;  %v11299_v48 = vpop.permute.xlu2 %4842  ;;  %vm13356_vm14 = vcmask 654912  }
 0x991   : > { %6621 = vset.pattern.permute.xlu1 %v13279_v30  ;;  %4812 = vadd.xlane.f32.xlu0 %v4810_v13  ;;  %v4935_v54 = vmul.f32 %v13283_v16, %v11299_v48  ;;  %v13287_v13 = vld [vmem:[#allocation172_spill] sm:$0xff] }
 0x998   : > { %v11308_v61 = vpop.permute.xlu2 %4854 }
 0x999   : > { %4914 = vperm.xlu1 %6621, %v11074_v62   ;;  %v4937_v19 = vmul.f32 %v13285_v14, %v11308_v61  ;;  %v13291_v14 = vld [vmem:[#allocation191_spill] sm:$0xff] }
 0x99b   : > { %v11291_v35 = vpop.permute.xlu1 %4824 }
 0x99c   : > { %v4932_v4 = vmul.f32 %v13280_v55, %v11291_v35 }
 0x99e   : > { %v6624_v27 = vpack.i.bf16 %v4933_v46, %v4932_v4  ;;  %v13288_v46 = vld [vmem:[#allocation178_spill] sm:$0xff] }
 0x9a0   : > { %v11316_v5 = vpop.permute.xlu2 %4866 }
 0x9a1   : > { %6623 = vset.pattern.permute.xlu1 %v13269_v11  ;;  %v4939_v30 = vmul.f32 %v13287_v13, %v11316_v5  ;;  %v13293_v13 = vld [vmem:[#allocation190_spill] sm:$0xff] }
 0x9a2   : > { %6625 = vperm.xlu1 %6623, %v6624_v27  }
 0x9a5   : > { %4896 = vperm.xlu0 %6618, %v11074_v62   ;;  %v13284_v62 = vld [vmem:[#allocation171_spill] sm:$0xff] }
 0x9a8   : > { %v11324_v4 = vpop.permute.xlu2 %4878 }
 0x9ab   : > { %v11301_v52 = vpop.permute.xlu1 %4836 }
 0x9ac   : > { %v4934_v51 = vmul.f32 %v13282_v10, %v11301_v52  ;;  %v13289_v10 = vld [vmem:[#allocation184_spill] sm:$0xff] }
 0x9ad   : > { %6654 = vset.pattern.permute.xlu0 %v13269_v11  ;;  %v13286_v11 = vld [vmem:[#allocation179_spill] sm:$0xff] }
 0x9ae   : > { %v6629_v32 = vpack.i.bf16 %v4935_v54, %v4934_v51  ;;  %v4941_v51 = vmul.f32 %v13289_v10, %v11324_v4  ;;  %v13295_v10 = vld [vmem:[#allocation214_spill] sm:$0xff] }
 0x9b0   : > { %6630 = vperm.xlu2 %6622, %v6629_v32   ;;  %v11332_v54 = vpop.permute.xlu2 %4890 }
 0x9bb   : > { %v11310_v2 = vpop.permute.xlu1 %4848 }
 0x9bc   : > { %v4936_v57 = vmul.f32 %v13284_v62, %v11310_v2  ;;  %v13290_v62 = vld [vmem:[#allocation205_spill] sm:$0xff] }
 0x9be   : > { %v6634_v59 = vpack.i.bf16 %v4937_v19, %v4936_v57  ;;  %v4943_v19 = vmul.f32 %v13291_v14, %v11332_v54  ;;  %v13296_v14 = vld [vmem:[#allocation192_spill] sm:$0xff] }
 0x9c0   : > { %6635 = vperm.xlu1 %6623, %v6634_v59  }
 0x9cb   : > { %v11318_v36 = vpop.permute.xlu1 %4860 }
 0x9cc   : > { %v4938_v50 = vmul.f32 %v13286_v11, %v11318_v36  ;;  %v13292_v11 = vld [vmem:[#allocation169_spill] sm:$0xff] }
 0x9ce   : > { %v6639_v55 = vpack.i.bf16 %v4939_v30, %v4938_v50  ;;  %v4948_v50 = vmul.f32 %v13292_v11, %v11291_v35  ;;  %v4949_v30 = vmul.f32 %v13293_v13, %v11289_v53  ;;  %v13297_v13 = vld [vmem:[#allocation183_spill] sm:$0xff] }
 0x9d0   : > { %6640 = vperm.xlu2 %6622, %v6639_v55   ;;  %v6665_v55 = vpack.i.bf16 %v4949_v30, %v4948_v50  ;;  %v4959_v30 = vmul.f32 %v13297_v13, %v11332_v54  ;;  %v13303_v13 = vld [vmem:[#allocation203_spill] sm:$0xff] }
 0x9db   : > { %v11326_v28 = vpop.permute.xlu1 %4872 }
 0x9dc   : > { %v4940_v27 = vmul.f32 %v13288_v46, %v11326_v28  ;;  %v13294_v46 = vld [vmem:[#allocation180_spill] sm:$0xff] }
 0x9de   : > { %v6644_v16 = vpack.i.bf16 %v4941_v51, %v4940_v27  ;;  %v4952_v27 = vmul.f32 %v13294_v46, %v11310_v2  ;;  %v4953_v51 = vmul.f32 %v13295_v10, %v11308_v61  ;;  %v13300_v10 = vld [vmem:[#allocation209_spill] sm:$0xff] }
 0x9e0   : > { %6645 = vperm.xlu1 %6623, %v6644_v16   ;;  %v6675_v16 = vpack.i.bf16 %v4953_v51, %v4952_v27  ;;  %v4964_v51 = vmul.f32 %v13300_v10, %v11291_v35  ;;  %v13305_v10 = vld [vmem:[#allocation185_spill] sm:$0xff] }
 0x9eb   : > { %v11334_v32 = vpop.permute.xlu1 %4884 }
 0x9ec   : > { %v4942_v57 = vmul.f32 %v13290_v62, %v11334_v32  ;;  %v11348_v62 = vpop.permute.xlu2 %4908 }
 0x9ee   : > { %v6649_v59 = vpack.i.bf16 %v4943_v19, %v4942_v57  ;;  %v4042_v57 = vld [vmem:[#allocation5] sm:$0xff]  ;;  %v4958_v19 = vmul.f32 %v13296_v14, %v11334_v32  ;;  %v13301_v14 = vld [vmem:[#allocation204_spill] sm:$0xff] }
 0x9ef   : > { %v4043_v11 = vmul.f32 %v11221_v31, %v4042_v57  ;;  %v4946_v15 = vmul.f32 %v13301_v14, %v11348_v62  ;;  %v13302_v31 = vld [vmem:[#allocation174_spill] sm:$0xff]  ;;  %v13306_v14 = vld [vmem:[#allocation215_spill] sm:$0xff] }
 0x9f0   : > { %6650 = vperm.xlu2 %6622, %v6649_v59   ;;  %v6690_v46 = vpack.i.bf16 %v4959_v30, %v4958_v19  ;;  %v4951_v58 = vmul.f32 %v13306_v14, %v11299_v48  ;;  %v13308_v14 = vld [vmem:[#allocation221_spill] sm:$0xff] }
 0x9f4   : > { %v11358_v27 = vpop.permute.xlu2 %5063 }
 0x9f5   : > { %13299 = vst [vmem:[#allocation163_spill] sm:$0xff] %v11358_v27  ;;  %v4970_v27 = vmul.f32 %v13305_v10, %v11318_v36 }
 0x9f8   : > { %6666 = vperm.xlu2 %6622, %v6665_v55  }
 0x9fb   : > { %v11352_v59 = vpop.permute.xlu1 %4902 }
 0xa00   : > { %6676 = vperm.xlu2 %6622, %v6675_v16  }
 0xa04   : > { %v4813_v50 = vpop.xlane.xlu0 %4812 }
 0xa05   : > { %v4814_v55 = vadd.f32 %v4813_v50, %v4043_v11  ;;  %v4965_v11 = vmul.f32 %v13303_v13, %v11289_v53 }
 0xa07   : > { %4816 = vst.msk [vmem:[#allocation5] sm:$0xff] %vm13298_vm11, %v4814_v55  ;;  %v6705_v50 = vpack.i.bf16 %v4965_v11, %v4964_v51  ;;  %v13304_v55 = vld [vmem:[#allocation197_spill] sm:$0xff]  ;;  %vm13387_vm11 = vmmov %vm13333_vm3 }
 0xa08   : > { %6691 = vperm.xlu2 %6622, %v6690_v46   ;;  %v4950_v46 = vmul.f32 %v13304_v55, %v11301_v52 }
 0xa0a   : > { %v6631_v30 = vpop.permute.xlu2 %6630 }
 0xa0b   : > { %v11362_v16 = vpop.permute.xlu1 %4914  ;;  %v6632_v34 = vunpack.i.l.bf16 %v6631_v30  ;;  %v6633_v13 = vunpack.i.h.bf16 %v6631_v30 }
 0xa0c   : > { %v4947_v57 = vmul.f32 %v13302_v31, %v11362_v16  ;;  %v13307_v31 = vld [vmem:[#allocation212_spill] sm:$0xff] }
 0xa0d   : > { %v4971_v12 = vmul.f32 %v13307_v31, %v11316_v5  ;;  %v5598_v10 = vperm.slane %v6632_v34, %v9703_v45  ;;  %v13309_v31 = vld [vmem:[#allocation220_spill] sm:$0xff]  ;;  %v13332_v45 = vld [vmem:[#allocation182_spill] sm:$0xff] }
 0xa0e   : > { %v6660_v19 = vpack.i.bf16 %v4947_v57, %v4946_v15  ;;  %v6670_v57 = vpack.i.bf16 %v4951_v58, %v4950_v46  ;;  %v4945_v30 = vmul.f32 %v13309_v31, %v11352_v59  ;;  %v13310_v46 = vld [vmem:[#allocation181_spill] sm:$0xff]  ;;  %v13311_v34 = vld [vmem:[#allocation208_spill] sm:$0xff] }
 0xa0f   : > { %v6720_v11 = vpack.i.bf16 %v4971_v12, %v4970_v27  ;;  %v13313_v31 = vld [vmem:[#allocation112_spill] sm:$0xff] }
 0xa10   : > { %6661 = vperm.xlu1 %6623, %v6660_v19   ;;  %6706 = vperm.xlu2 %6622, %v6705_v50  }
 0xa14   : > { %v6626_v39 = vpop.permute.xlu1 %6625 }
 0xa15   : > { %v6628_v15 = vunpack.i.h.bf16 %v6626_v39  ;;  %v6627_v51 = vunpack.i.l.bf16 %v6626_v39  ;;  %v5600_v39 = vperm.slane %v6633_v13, %v9708_v0  ;;  %v4977_v13 = vmul.f32 %v13313_v31, %v11352_v59  ;;  %v13320_v31 = vld [vmem:[#allocation194_spill] sm:$0xff] }
 0xa17   : > { %v5596_v19 = vperm.slane %v6628_v15, %v9692_v38  ;;  %v5595_v50 = vperm.slane %v6627_v51, %v9689_v8  ;;  %v11380_v55 = vpop.permute.xlu0 %4896  ;;  %v4956_v15 = vmul.f32 %v13310_v46, %v11326_v28 }
 0xa18   : > { %6671 = vperm.xlu1 %6623, %v6670_v57   ;;  %6721 = vperm.xlu2 %6622, %v6720_v11   ;;  %v4944_v3 = vmul.f32 %v13308_v14, %v11380_v55  ;;  %v4976_v51 = vmul.f32 %v13311_v34, %v11380_v55  ;;  %v13312_v11 = vld [vmem:[#allocation177_spill] sm:$0xff]  ;;  %v13318_v34 = vld [vmem:[#allocation170_spill] sm:$0xff] }
 0xa19   : > { %v5597_v58 = vsel %vm3342_vm2, %v5596_v19, %v5595_v50  ;;  %v4957_v14 = vmul.f32 %v13312_v11, %v11324_v4  ;;  %v13314_v50 = vld [vmem:[#allocation187_spill] sm:$0xff] }
 0xa1a   : > { %v5599_v12 = vsel %vm3346_vm4, %v5598_v10, %v5597_v58  ;;  %v6655_v27 = vpack.i.bf16 %v4945_v30, %v4944_v3  ;;  %v6735_v19 = vpack.i.bf16 %v4977_v13, %v4976_v51  ;;  %v4954_v3 = vmul.f32 %v13314_v50, %v11318_v36  ;;  %v13315_v10 = vld [vmem:[#allocation193_spill] sm:$0xff]  ;;  %v13319_v51 = vld [vmem:[#allocation43_spill] sm:$0xff] }
 0xa1b   : > { %v5601_v57 = vsel %vm3350_vm5, %v5600_v39, %v5599_v12  ;;  %v6685_v7 = vpack.i.bf16 %v4957_v14, %v4956_v15  ;;  %v4955_v30 = vmul.f32 %v13315_v10, %v11316_v5  ;;  %v13316_v39 = vld [vmem:[#allocation211_spill] sm:$0xff]  ;;  %v4962_v15 = vmul.f32 %v13318_v34, %v11348_v62  ;;  %v13322_v10 = vld [vmem:[#allocation186_spill] sm:$0xff] }
 0xa1c   : > { %6656 = vperm.xlu0 %6654, %v6655_v27   ;;  %v4963_v12 = vmul.f32 %v13316_v39, %v11362_v16  ;;  %v13317_v27 = vld [vmem:[#allocation128_spill] sm:$0xff]  ;;  %v4983_v11 = vmul.f32 %v13319_v51, %v11299_v48  ;;  %v4960_v13 = vmul.f32 %v13320_v31, %v11380_v55  ;;  %v13327_v31 = vld [vmem:[#allocation175_spill] sm:$0xff] }
 0xa1d   : > { %v6680_v58 = vpack.i.bf16 %v4955_v30, %v4954_v3  ;;  %v4982_v46 = vmul.f32 %v13317_v27, %v11301_v52  ;;  %v4968_v30 = vmul.f32 %v13322_v10, %v11310_v2  ;;  %v13324_v27 = vld [vmem:[#allocation207_spill] sm:$0xff] }
 0xa1e   : > { %v6700_v14 = vpack.i.bf16 %v4963_v12, %v4962_v15  ;;  %v4969_v12 = vmul.f32 %v13324_v27, %v11308_v61 }
 0xa20   : > { %6686 = vperm.xlu1 %6623, %v6685_v7   ;;  %6736 = vperm.xlu2 %6622, %v6735_v19   ;;  %v6750_v7 = vpack.i.bf16 %v4983_v11, %v4982_v46  ;;  %v13321_v19 = vld [vmem:[#allocation200_spill] sm:$0xff]  ;;  %v6715_v15 = vpack.i.bf16 %v4969_v12, %v4968_v30  ;;  %v13326_v11 = vld [vmem:[#allocation173_spill] sm:$0xff] }
 0xa21   : > { %v4961_v50 = vmul.f32 %v13321_v19, %v11352_v59  ;;  %v13325_v46 = vld [vmem:[#allocation120_spill] sm:$0xff] }
 0xa22   : > { %v4989_v34 = vmul.f32 %v13325_v46, %v11324_v4 }
 0xa23   : > { %v6695_v3 = vpack.i.bf16 %v4961_v50, %v4960_v13  ;;  %v4967_v13 = vmul.f32 %v13327_v31, %v11299_v48 }
 0xa24   : > { %6681 = vperm.xlu0 %6654, %v6680_v58   ;;  %v13323_v58 = vld [vmem:[#allocation32_spill] sm:$0xff] }
 0xa25   : > { %v4988_v39 = vmul.f32 %v13323_v58, %v11326_v28  ;;  %v13329_v58 = vld [vmem:[#allocation152_spill] sm:$0xff] }
 0xa26   : > { %v4995_v27 = vmul.f32 %v13329_v58, %v11362_v16  ;;  %v4972_v58 = vmul.f32 %v13332_v45, %v11326_v28  ;;  %v13336_v45 = vld [vmem:[#allocation24_spill] sm:$0xff] }
 0xa27   : > { %v6765_v51 = vpack.i.bf16 %v4989_v34, %v4988_v39  ;;  %v13330_v34 = vld [vmem:[#allocation206_spill] sm:$0xff] }
 0xa28   : > { %6701 = vperm.xlu1 %6623, %v6700_v14   ;;  %6751 = vperm.xlu2 %6622, %v6750_v7   ;;  %v4966_v14 = vmul.f32 %v13326_v11, %v11301_v52 }
 0xa2a   : > { %v6641_v7 = vpop.permute.xlu2 %6640  ;;  %v6710_v50 = vpack.i.bf16 %v4967_v13, %v4966_v14 }
 0xa2b   : > { %v6642_v46 = vunpack.i.l.bf16 %v6641_v7  ;;  %v6643_v12 = vunpack.i.h.bf16 %v6641_v7 }
 0xa2c   : > { %6696 = vperm.xlu0 %6654, %v6695_v3   ;;  %v13328_v3 = vld [vmem:[#allocation41_spill] sm:$0xff] }
 0xa2d   : > { %v4974_v10 = vmul.f32 %v13328_v3, %v11334_v32  ;;  %v5606_v0 = vperm.slane %v6642_v46, %v9732_v43  ;;  %v5000_v46 = vmul.f32 %v13336_v45, %v11310_v2 }
 0xa30   : > { %6716 = vperm.xlu1 %6623, %v6715_v15   ;;  %6766 = vperm.xlu2 %6622, %v6765_v51   ;;  %v4975_v15 = vmul.f32 %v13330_v34, %v11332_v54  ;;  %v13331_v51 = vld [vmem:[#allocation160_spill] sm:$0xff]  ;;  %v13334_v34 = vld [vmem:[#allocation199_spill] sm:$0xff] }
 0xa31   : > { %v4994_v11 = vmul.f32 %v13331_v51, %v11348_v62 }
 0xa32   : > { %v6636_v19 = vpop.permute.xlu1 %6635  ;;  %v6730_v13 = vpack.i.bf16 %v4975_v15, %v4974_v10 }
 0xa33   : > { %v6638_v30 = vunpack.i.h.bf16 %v6636_v19  ;;  %v6637_v39 = vunpack.i.l.bf16 %v6636_v19  ;;  %v6780_v3 = vpack.i.bf16 %v4995_v27, %v4994_v11  ;;  %v5608_v19 = vperm.slane %v6643_v12, %v9741_v42  ;;  %v13335_v27 = vld [vmem:[#allocation151_spill] sm:$0xff]  ;;  %v13338_v11 = vld [vmem:[#allocation122_spill] sm:$0xff] }
 0xa34   : > { %6711 = vperm.xlu0 %6654, %v6710_v50   ;;  %v4980_v15 = vmul.f32 %v13335_v27, %v11291_v35  ;;  %v13337_v12 = vld [vmem:[#allocation219_spill] sm:$0xff] }
 0xa35   : > { %v5604_v31 = vperm.slane %v6638_v30, %v9726_v47  ;;  %v5602_v14 = vperm.slane %v6637_v39, %v9716_v17  ;;  %v4973_v30 = vmul.f32 %v13334_v34, %v11324_v4  ;;  %v4981_v51 = vmul.f32 %v13337_v12, %v11289_v53 }
 0xa37   : > { %v5603_v7 = vsel %vm3354_vm6, %v5602_v14, %v5601_v57  ;;  %v6725_v10 = vpack.i.bf16 %v4973_v30, %v4972_v58  ;;  %v6745_v14 = vpack.i.bf16 %v4981_v51, %v4980_v15  ;;  %v13340_v58 = vld [vmem:[#allocation210_spill] sm:$0xff]  ;;  %v13342_v30 = vld [vmem:[#allocation129_spill] sm:$0xff]  ;;  %v13345_v51 = vld [vmem:[#allocation195_spill] sm:$0xff] }
 0xa38   : > { %v5605_v50 = vsel %vm13333_vm3, %v5604_v31, %v5603_v7  ;;  %6731 = vperm.xlu1 %6623, %v6730_v13   ;;  %6781 = vperm.xlu2 %6622, %v6780_v3   ;;  %v5001_v31 = vmul.f32 %v13338_v11, %v11308_v61  ;;  %v4978_v7 = vmul.f32 %v13340_v58, %v11348_v62  ;;  %v13344_v15 = vld [vmem:[#allocation54_spill] sm:$0xff]  ;;  %vm13390_vm3 = vcmask 851712  }
 0xa39   : > { %v5607_v39 = vsel %vm3362_vm8, %v5606_v0, %v5605_v50  ;;  %v13339_v0 = vld [vmem:[#allocation111_spill] sm:$0xff]  ;;  %v5007_v45 = vmul.f32 %v13344_v15, %v11332_v54  ;;  %v4984_v11 = vmul.f32 %v13345_v51, %v11310_v2  ;;  %v13348_v58 = vld [vmem:[#allocation38_spill] sm:$0xff] }
 0xa3a   : > { %v5609_v57 = vsel %vm3366_vm9, %v5608_v19, %v5607_v39  ;;  %v6795_v13 = vpack.i.bf16 %v5001_v31, %v5000_v46  ;;  %v4979_v3 = vmul.f32 %v13339_v0, %v11362_v16  ;;  %v13341_v19 = vld [vmem:[#allocation28_spill] sm:$0xff]  ;;  %v5006_v39 = vmul.f32 %v13342_v30, %v11334_v32  ;;  %v13346_v31 = vld [vmem:[#allocation29_spill] sm:$0xff] }
 0xa3b   : > { %v4986_v34 = vmul.f32 %v13341_v19, %v11318_v36  ;;  %v13347_v0 = vld [vmem:[#allocation136_spill] sm:$0xff] }
 0xa3c   : > { %6726 = vperm.xlu0 %6654, %v6725_v10   ;;  %v6740_v50 = vpack.i.bf16 %v4979_v3, %v4978_v7  ;;  %v13343_v10 = vld [vmem:[#allocation213_spill] sm:$0xff]  ;;  %v6810_v12 = vpack.i.bf16 %v5007_v45, %v5006_v39  ;;  %v4992_v3 = vmul.f32 %v13347_v0, %v11380_v55  ;;  %v5012_v7 = vmul.f32 %v13348_v58, %v11291_v35 }
 0xa3d   : > { %v4987_v27 = vmul.f32 %v13343_v10, %v11316_v5 }
 0xa3f   : > { %v6760_v46 = vpack.i.bf16 %v4987_v27, %v4986_v34  ;;  %v13350_v34 = vld [vmem:[#allocation115_spill] sm:$0xff]  ;;  %v13351_v27 = vld [vmem:[#allocation222_spill] sm:$0xff] }
 0xa40   : > { %6746 = vperm.xlu1 %6623, %v6745_v14   ;;  %6796 = vperm.xlu2 %6622, %v6795_v13   ;;  %v4985_v14 = vmul.f32 %v13346_v31, %v11308_v61  ;;  %v5013_v30 = vmul.f32 %v13350_v34, %v11289_v53  ;;  %v4990_v15 = vmul.f32 %v13351_v27, %v11334_v32  ;;  %v13353_v31 = vld [vmem:[#allocation144_spill] sm:$0xff]  ;;  %v13355_v27 = vld [vmem:[#allocation119_spill] sm:$0xff] }
 0xa42   : > { %v6755_v13 = vpack.i.bf16 %v4985_v14, %v4984_v11  ;;  %v6825_v10 = vpack.i.bf16 %v5013_v30, %v5012_v7  ;;  %v4998_v14 = vmul.f32 %v13353_v31, %v11301_v52  ;;  %v13354_v7 = vld [vmem:[#allocation135_spill] sm:$0xff] }
 0xa44   : > { %6741 = vperm.xlu0 %6654, %v6740_v50   ;;  %v13349_v50 = vld [vmem:[#allocation198_spill] sm:$0xff] }
 0xa45   : > { %v4993_v19 = vmul.f32 %v13349_v50, %v11352_v59  ;;  %v4999_v50 = vmul.f32 %v13354_v7, %v11299_v48 }
 0xa47   : > { %v6775_v39 = vpack.i.bf16 %v4993_v19, %v4992_v3  ;;  %v5019_v19 = vmul.f32 %v10774_v1, %v11316_v5 }
 0xa48   : > { %6761 = vperm.xlu1 %6623, %v6760_v46   ;;  %6811 = vperm.xlu2 %6622, %v6810_v12   ;;  %v13352_v46 = vld [vmem:[#allocation137_spill] sm:$0xff] }
 0xa49   : > { %v4991_v12 = vmul.f32 %v13352_v46, %v11332_v54 }
 0xa4a   : > { %v11481_v45 = vpop.permute.xlu2 %6650 }
 0xa4b   : > { %v6770_v11 = vpack.i.bf16 %v4991_v12, %v4990_v15  ;;  %v6652_v0 = vunpack.i.l.bf16 %v11481_v45 }
 0xa4c   : > { %6756 = vperm.xlu0 %6654, %v6755_v13   ;;  %v5018_v13 = vmul.f32 %v10742_v20, %v11318_v36  ;;  %v4996_v20 = vmul.f32 %v13355_v27, %v11291_v35 }
 0xa4d   : > { %v5614_v15 = vperm.slane %v6652_v0, %v9781_v63  ;;  %v13359_v0 = vld [vmem:[#allocation34_spill] sm:$0xff] }
 0xa50   : > { %6776 = vperm.xlu1 %6623, %v6775_v39   ;;  %6826 = vperm.xlu2 %6622, %v6825_v10   ;;  %v6790_v39 = vpack.i.bf16 %v4999_v50, %v4998_v14  ;;  %v6840_v10 = vpack.i.bf16 %v5019_v19, %v5018_v13  ;;  %v13358_v14 = vld [vmem:[#allocation121_spill] sm:$0xff] }
 0xa51   : > { %v5004_v13 = vmul.f32 %v13358_v14, %v11326_v28 }
 0xa52   : > { %v6646_v51 = vpop.permute.xlu1 %6645 }
 0xa53   : > { %v6648_v3 = vunpack.i.h.bf16 %v6646_v51  ;;  %v6647_v58 = vunpack.i.l.bf16 %v6646_v51  ;;  %v13357_v51 = vld [vmem:[#allocation35_spill] sm:$0xff] }
 0xa54   : > { %6771 = vperm.xlu0 %6654, %v6770_v11   ;;  %v4997_v1 = vmul.f32 %v13357_v51, %v11289_v53  ;;  %v13365_v51 = vld [vmem:[#allocation57_spill] sm:$0xff] }
 0xa55   : > { %v5612_v34 = vperm.slane %v6648_v3, %v9763_v18  ;;  %v5610_v30 = vperm.slane %v6647_v58, %v9759_v25  ;;  %v5024_v3 = vmul.f32 %v10796_v56, %v11380_v55  ;;  %v13360_v58 = vld [vmem:[#allocation62_spill] sm:$0xff]  ;;  %v13363_v56 = vld [vmem:[#allocation153_spill] sm:$0xff] }
 0xa56   : > { %v6785_v31 = vpack.i.bf16 %v4997_v1, %v4996_v20  ;;  %v5025_v7 = vmul.f32 %v13360_v58, %v11352_v59  ;;  %v5011_v20 = vmul.f32 %v13363_v56, %v11362_v16  ;;  %v5010_v1 = vmul.f32 %v13365_v51, %v11348_v62 }
 0xa57   : > { %v5611_v46 = vsel %vm3370_vm10, %v5610_v30, %v5609_v57  ;;  %v5005_v57 = vmul.f32 %v13359_v0, %v11324_v4 }
 0xa58   : > { %v5613_v12 = vsel %vm13356_vm14, %v5612_v34, %v5611_v46  ;;  %6791 = vperm.xlu1 %6623, %v6790_v39   ;;  %6841 = vperm.xlu2 %6622, %v6840_v10   ;;  %v6855_v19 = vpack.i.bf16 %v5025_v7, %v5024_v3  ;;  %v13361_v34 = vld [vmem:[#allocation36_spill] sm:$0xff]  ;;  %v13362_v39 = vld [vmem:[#allocation27_spill] sm:$0xff]  ;;  %v6820_v14 = vpack.i.bf16 %v5011_v20, %v5010_v1 }
 0xa59   : > { %v5615_v11 = vsel %vm3378_vm12, %v5614_v15, %v5613_v12  ;;  %v6805_v50 = vpack.i.bf16 %v5005_v57, %v5004_v13  ;;  %v5002_v30 = vmul.f32 %v13361_v34, %v11318_v36  ;;  %v5003_v10 = vmul.f32 %v13362_v39, %v11316_v5  ;;  %v13364_v15 = vld [vmem:[#allocation154_spill] sm:$0xff]  ;;  %v11520_v12 = vpop.permute.xlu2 %6666  ;;  %v13366_v3 = vld [vmem:[#allocation39_spill] sm:$0xff]  ;;  %v13367_v57 = vld [vmem:[#allocation161_spill] sm:$0xff] }
 0xa5a   : > { %v5044_v46 = vmul.f32 %v13364_v15, %v11291_v35  ;;  %v5008_v0 = vmul.f32 %v13366_v3, %v11380_v55  ;;  %v5009_v58 = vmul.f32 %v13367_v57, %v11352_v59  ;;  %v5048_v34 = vmul.f32 %v11083_v21, %v11310_v2  ;;  %v13370_v15 = vld [vmem:[#allocation145_spill] sm:$0xff]  ;;  %v13371_v21 = vld [vmem:[#allocation26_spill] sm:$0xff] }
 0xa5b   : > { %v6800_v27 = vpack.i.bf16 %v5003_v10, %v5002_v30  ;;  %v6653_v30 = vunpack.i.h.bf16 %v11481_v45  ;;  %v5033_v10 = vmul.f32 %v10911_v41, %v11308_v61  ;;  %v5015_v45 = vmul.f32 %v13371_v21, %v11299_v48  ;;  %v13372_v41 = vld [vmem:[#allocation60_spill] sm:$0xff]  ;;  %v13373_v3 = vld [vmem:[#allocation162_spill] sm:$0xff] }
 0xa5c   : > { %6786 = vperm.xlu0 %6654, %v6785_v31   ;;  %v5045_v31 = vmul.f32 %v11056_v44, %v11289_v53  ;;  %v6815_v7 = vpack.i.bf16 %v5009_v58, %v5008_v0  ;;  %v13369_v44 = vld [vmem:[#allocation30_spill] sm:$0xff]  ;;  %v5023_v0 = vmul.f32 %v13373_v3, %v11332_v54  ;;  %v5051_v57 = vmul.f32 %v11103_v24, %v11316_v5 }
 0xa5d   : > { %v5017_v39 = vmul.f32 %v13369_v44, %v11308_v61  ;;  %v6885_v20 = vpack.i.bf16 %v5048_v34, %v5033_v10  ;;  %v5616_v51 = vperm.slane %v6653_v30, %v9796_v26  ;;  %v13375_v34 = vld [vmem:[#allocation138_spill] sm:$0xff]  ;;  %v5030_v44 = vmul.f32 %v10868_v9, %v11301_v52  ;;  %v13376_v10 = vld [vmem:[#allocation45_spill] sm:$0xff] }
 0xa5e   : > { %v6870_v13 = vpack.i.bf16 %v5045_v31, %v5044_v46  ;;  %v5014_v46 = vmul.f32 %v13370_v15, %v11301_v52  ;;  %v5021_v30 = vmul.f32 %v13375_v34, %v11324_v4  ;;  %v5877_v24 = vld [vmem:[#allocation5] sm:$0xff]  ;;  %v5028_v9 = vmul.f32 %v10877_v6, %v11291_v35 }
 0xa5f   : > { %v11547_v1 = vsel %vm3382_vm13, %v5616_v51, %v5615_v11  ;;  %7204 = vrcp.f32 %v5877_v24  ;;  %v13377_v51 = vld [vmem:[#allocation33_spill] sm:$0xff]  ;;  %v5047_v3 = vmul.f32 %v10861_v37, %v11299_v48  ;;  %v5046_v6 = vmul.f32 %v11087_v22, %v11301_v52 }
 0xa60   : > { %6806 = vperm.xlu1 %6623, %v6805_v50   ;;  %6856 = vperm.xlu2 %6622, %v6855_v19   ;;  %v13368_v50 = vld [vmem:[#allocation44_spill] sm:$0xff]  ;;  %v6830_v31 = vpack.i.bf16 %v5015_v45, %v5014_v46  ;;  %v5026_v21 = vmul.f32 %v13377_v51, %v11348_v62  ;;  %v6669_v35 = vunpack.i.h.bf16 %v11520_v12 }
 0xa61   : > { %v5016_v19 = vmul.f32 %v13368_v50, %v11310_v2  ;;  %v13374_v50 = vld [vmem:[#allocation37_spill] sm:$0xff]  ;;  %v13378_v45 = vld [vmem:[#allocation48_spill] sm:$0xff] }
 0xa62   : > { %v5020_v11 = vmul.f32 %v13374_v50, %v11326_v28  ;;  %v5031_v50 = vmul.f32 %v10919_v29, %v11299_v48  ;;  %v13380_v48 = vld [vmem:[#allocation50_spill] sm:$0xff] }
 0xa63   : > { %v6835_v56 = vpack.i.bf16 %v5017_v39, %v5016_v19  ;;  %v5054_v39 = vmul.f32 %v11121_v33, %v11334_v32 }
 0xa64   : > { %6801 = vperm.xlu0 %6654, %v6800_v27   ;;  %v11539_v27 = vpop.permute.xlu2 %6676  ;;  %v6875_v37 = vpack.i.bf16 %v5046_v6, %v5031_v50  ;;  %v13385_v6 = vld [vmem:[#allocation225_spill] sm:$0xff] }
 0xa65   : > { %v6678_v22 = vunpack.i.l.bf16 %v11539_v27  ;;  %v6679_v29 = vunpack.i.h.bf16 %v11539_v27 }
 0xa67   : > { %v5633_v51 = vperm.slane %v6678_v22, %v9716_v17  ;;  %v13391_v22 = vld [vmem:[#allocation226_spill] sm:$0xff] }
 0xa68   : > { %6821 = vperm.xlu1 %6623, %v6820_v14   ;;  %6871 = vperm.xlu2 %6622, %v6870_v13   ;;  %v5022_v14 = vmul.f32 %v13372_v41, %v11334_v32  ;;  %v5036_v13 = vmul.f32 %v10956_v23, %v11326_v28  ;;  %v6845_v23 = vpack.i.bf16 %v5021_v30, %v5020_v11 }
 0xa69   : > { %v6860_v41 = vpack.i.bf16 %v5028_v9, %v5026_v21  ;;  %v5050_v11 = vmul.f32 %v10905_v60, %v11318_v36 }
 0xa6a   : > { %v6850_v58 = vpack.i.bf16 %v5023_v0, %v5022_v14  ;;  %v5042_v0 = vmul.f32 %v11031_v40, %v11348_v62  ;;  %v5627_v40 = vperm.slane %v6669_v35, %v9692_v38 }
 0xa6c   : > { %6816 = vperm.xlu0 %6654, %v6815_v7   ;;  %v6900_v7 = vpack.i.bf16 %v5051_v57, %v5036_v13  ;;  %v11559_v19 = vpop.permute.xlu2 %6691  ;;  %v7205_v13 = vpop.eup %7204 }
 0xa70   : > { %6836 = vperm.xlu1 %6623, %v6835_v56   ;;  %6886 = vperm.xlu2 %6622, %v6885_v20   ;;  %v5029_v56 = vmul.f32 %v13376_v10, %v11289_v53  ;;  %v5039_v20 = vmul.f32 %v10997_v49, %v11332_v54  ;;  %v13379_v49 = vld [vmem:[#allocation130_spill] sm:$0xff]  ;;  %v13382_v10 = vld [vmem:[#allocation217_spill] sm:$0xff] }
 0xa71   : > { %v5027_v14 = vmul.f32 %v13379_v49, %v11362_v16 }
 0xa72   : > { %v6865_v15 = vpack.i.bf16 %v5030_v44, %v5029_v56  ;;  %v6915_v46 = vpack.i.bf16 %v5054_v39, %v5039_v20  ;;  %v5035_v39 = vmul.f32 %v13380_v48, %v11316_v5  ;;  %v13383_v20 = vld [vmem:[#allocation51_spill] sm:$0xff]  ;;  %v5635_v5 = vperm.slane %v6679_v29, %v9726_v47 }
 0xa74   : > { %6831 = vperm.xlu0 %6654, %v6830_v31   ;;  %v11575_v33 = vpop.permute.xlu2 %6706  ;;  %v5032_v31 = vmul.f32 %v13378_v45, %v11310_v2  ;;  %v6668_v2 = vunpack.i.l.bf16 %v11520_v12  ;;  %v6895_v9 = vpack.i.bf16 %v5050_v11, %v5035_v39  ;;  %v13389_v11 = vld [vmem:[#allocation224_spill] sm:$0xff] }
 0xa76   : > { %v6880_v57 = vpack.i.bf16 %v5047_v3, %v5032_v31  ;;  %v5626_v34 = vperm.slane %v6668_v2, %v9689_v8 }
 0xa78   : > { %6851 = vperm.xlu1 %6623, %v6850_v58   ;;  %6901 = vperm.xlu2 %6622, %v6900_v7   ;;  %v6930_v58 = vpack.i.bf16 %v5042_v0, %v5027_v14  ;;  %v5879_v7 = vmul.f32 %v7205_v13, %v5877_v24  ;;  %v13381_v24 = vld [vmem:[#allocation218_spill] sm:$0xff] }
 0xa7a   : > { %v5880_v30 = vsub.f32 2.0, %v5879_v7 }
 0xa7c   : > { %6846 = vperm.xlu0 %6654, %v6845_v23   ;;  %v11596_v12 = vpop.permute.xlu2 %6721  ;;  %v5881_v45 = vmul.f32 %v7205_v13, %v5880_v30  ;;  %v13386_v13 = vld [vmem:[#allocation223_spill] sm:$0xff]  ;;  %v13392_v30 = vld [vmem:[#allocation146_spill] sm:$0xff] }
 0xa80   : > { %6866 = vperm.xlu1 %6623, %v6865_v15   ;;  %6916 = vperm.xlu2 %6622, %v6915_v46   ;;  %v5034_v15 = vmul.f32 %v13383_v20, %v11318_v36  ;;  %v5628_v46 = vsel %vm3342_vm2, %v5627_v40, %v5626_v34  ;;  %v13384_v36 = vld [vmem:[#allocation55_spill] sm:$0xff] }
 0xa81   : > { %v5049_v0 = vmul.f32 %v13384_v36, %v11308_v61 }
 0xa82   : > { %v6662_v53 = vpop.permute.xlu1 %6661 }
 0xa83   : > { %v6663_v31 = vunpack.i.l.bf16 %v6662_v53  ;;  %v6664_v14 = vunpack.i.h.bf16 %v6662_v53  ;;  %v6890_v7 = vpack.i.bf16 %v5049_v0, %v5034_v15  ;;  %v13396_v0 = vld [vmem:[#allocation114_spill] sm:$0xff] }
 0xa84   : > { %6861 = vperm.xlu0 %6654, %v6860_v41  }
 0xa85   : > { %v5622_v40 = vperm.slane %v6663_v31, %v13389_v11  ;;  %v5624_v61 = vperm.slane %v6664_v14, %v13391_v22 }
 0xa88   : > { %6881 = vperm.xlu1 %6623, %v6880_v57   ;;  %6931 = vperm.xlu2 %6622, %v6930_v58  }
 0xa8a   : > { %v6672_v52 = vpop.permute.xlu1 %6671 }
 0xa8b   : > { %v6674_v23 = vunpack.i.h.bf16 %v6672_v52  ;;  %v6673_v44 = vunpack.i.l.bf16 %v6672_v52 }
 0xa8c   : > { %6876 = vperm.xlu0 %6654, %v6875_v37   ;;  %v13388_v37 = vld [vmem:[#allocation131_spill] sm:$0xff] }
 0xa8d   : > { %v5631_v60 = vperm.slane %v6674_v23, %v13381_v24  ;;  %v5629_v56 = vperm.slane %v6673_v44, %v13382_v10  ;;  %v5038_v53 = vmul.f32 %v13388_v37, %v11334_v32  ;;  %v5053_v23 = vmul.f32 %v13392_v30, %v11324_v4  ;;  %v11625_v44 = vpop.permute.xlu2 %6736 }
 0xa8e   : > { %v6657_v21 = vpop.permute.xlu0 %6656 }
 0xa8f   : > { %v5630_v27 = vsel %vm3346_vm4, %v5629_v56, %v5628_v46  ;;  %v6659_v41 = vunpack.i.h.bf16 %v6657_v21  ;;  %v6658_v49 = vunpack.i.l.bf16 %v6657_v21  ;;  %v6910_v39 = vpack.i.bf16 %v5053_v23, %v5038_v53 }
 0xa90   : > { %v5632_v3 = vsel %vm3350_vm5, %v5631_v60, %v5630_v27  ;;  %6896 = vperm.xlu1 %6623, %v6895_v9   ;;  %5885 = vperm.xlu2 %6622, %v5881_v45   ;;  %v13393_v60 = vld [vmem:[#allocation140_spill] sm:$0xff]  ;;  %v6693_v9 = vunpack.i.l.bf16 %v11559_v19  ;;  %v6694_v27 = vunpack.i.h.bf16 %v11559_v19 }
 0xa91   : > { %v5634_v57 = vsel %vm3354_vm6, %v5633_v51, %v5632_v3  ;;  %v5620_v35 = vperm.slane %v6659_v41, %v13385_v6  ;;  %v5618_v2 = vperm.slane %v6658_v49, %v13386_v13  ;;  %v13394_v51 = vld [vmem:[#allocation56_spill] sm:$0xff] }
 0xa92   : > { %v6687_v58 = vpop.permute.xlu1 %6686  ;;  %v5636_v50 = vsel %vm13387_vm11, %v5635_v5, %v5634_v57  ;;  %v5037_v21 = vmul.f32 %v13394_v51, %v11324_v4  ;;  %v5041_v57 = vmul.f32 %v13396_v0, %v11352_v59  ;;  %vm13400_vm11 = vmmov %vm13390_vm3 }
 0xa93   : > { %v5619_v34 = vsel %vm13390_vm3, %v5618_v2, %v11547_v1  ;;  %v5052_v1 = vmul.f32 %v13393_v60, %v11326_v28  ;;  %v6688_v56 = vunpack.i.l.bf16 %v6687_v58  ;;  %v6689_v46 = vunpack.i.h.bf16 %v6687_v58  ;;  %v13395_v28 = vld [vmem:[#allocation67_spill] sm:$0xff] }
 0xa94   : > { %v5621_v52 = vsel %vm3390_vm15, %v5620_v35, %v5619_v34  ;;  %6891 = vperm.xlu0 %6654, %v6890_v7   ;;  %v5056_v5 = vmul.f32 %v13395_v28, %v11380_v55  ;;  %v5645_v35 = vperm.slane %v6693_v9, %v9781_v63  ;;  %v5647_v2 = vperm.slane %v6694_v27, %v9796_v26 }
 0xa95   : > { %v5623_v29 = vsel %vm3394_vm0, %v5622_v40, %v5621_v52  ;;  %v6905_v49 = vpack.i.bf16 %v5052_v1, %v5037_v21  ;;  %v5641_v14 = vperm.slane %v6688_v56, %v9759_v25  ;;  %v5643_v36 = vperm.slane %v6689_v46, %v9763_v18  ;;  %v11653_v40 = vpop.permute.xlu2 %6751  ;;  %v13399_v46 = vld [vmem:[#allocation53_spill] sm:$0xff] }
 0xa96   : > { %v11629_v48 = vsel %vm3398_vm1, %v5624_v61, %v5623_v29  ;;  %v6682_v32 = vpop.permute.xlu0 %6681  ;;  %v6925_v37 = vpack.i.bf16 %v5056_v5, %v5041_v57  ;;  %v6708_v56 = vunpack.i.l.bf16 %v11575_v33  ;;  %v5059_v51 = vmul.f32 %v13399_v46, %v11362_v16 }
 0xa97   : > { %v6684_v20 = vunpack.i.h.bf16 %v6682_v32  ;;  %v6683_v15 = vunpack.i.l.bf16 %v6682_v32  ;;  %v13398_v32 = vld [vmem:[#allocation58_spill] sm:$0xff]  ;;  %vm13403_vm3 = vcmask 1041409   ;;  %v6738_v46 = vunpack.i.l.bf16 %v11625_v44 }
 0xa98   : > { %6911 = vperm.xlu1 %6623, %v6910_v39   ;;  %v5055_v39 = vmul.f32 %v13398_v32, %v11332_v54  ;;  %v5657_v5 = vperm.slane %v6708_v56, %v9689_v8 }
 0xa99   : > { %v5639_v45 = vperm.slane %v6684_v20, %v9741_v42  ;;  %v5637_v31 = vperm.slane %v6683_v15, %v9732_v43 }
 0xa9a   : > { %v6702_v41 = vpop.permute.xlu1 %6701 }
 0xa9b   : > { %v5638_v3 = vsel %vm3362_vm8, %v5637_v31, %v5636_v50  ;;  %v13397_v50 = vld [vmem:[#allocation71_spill] sm:$0xff]  ;;  %v6703_v34 = vunpack.i.l.bf16 %v6702_v41  ;;  %v6704_v23 = vunpack.i.h.bf16 %v6702_v41  ;;  %v13401_v31 = vld [vmem:[#allocation156_spill] sm:$0xff] }
 0xa9c   : > { %v5640_v4 = vsel %vm3366_vm9, %v5639_v45, %v5638_v3  ;;  %6906 = vperm.xlu0 %6654, %v6905_v49   ;;  %v5040_v53 = vmul.f32 %v13397_v50, %v11380_v55  ;;  %v6709_v55 = vunpack.i.h.bf16 %v11575_v33  ;;  %v5058_v27 = vmul.f32 %v13401_v31, %v11348_v62  ;;  %v13402_v33 = vld [vmem:[#allocation59_spill] sm:$0xff] }
 0xa9d   : > { %v5642_v19 = vsel %vm3370_vm10, %v5641_v14, %v5640_v4  ;;  %v5653_v21 = vperm.slane %v6703_v34, %v13389_v11  ;;  %v5655_v45 = vperm.slane %v6704_v23, %v13391_v22  ;;  %v5043_v49 = vmul.f32 %v13402_v33, %v11362_v16 }
 0xa9e   : > { %v5644_v58 = vsel %vm13356_vm14, %v5643_v36, %v5642_v19  ;;  %v6697_v7 = vpop.permute.xlu0 %6696  ;;  %v6920_v15 = vpack.i.bf16 %v5055_v39, %v5040_v53  ;;  %v5658_v28 = vperm.slane %v6709_v55, %v9692_v38  ;;  %v6940_v36 = vpack.i.bf16 %v5059_v51, %v5058_v27  ;;  %v13404_v19 = vld [vmem:[#allocation123_spill] sm:$0xff] }
 0xa9f   : > { %v6699_v61 = vunpack.i.h.bf16 %v6697_v7  ;;  %v6698_v52 = vunpack.i.l.bf16 %v6697_v7  ;;  %v5646_v30 = vsel %vm3378_vm12, %v5645_v35, %v5644_v58  ;;  %v5057_v16 = vmul.f32 %v13404_v19, %v11352_v59  ;;  %v11684_v58 = vpop.permute.xlu2 %6766 }
 0xaa0   : > { %v5648_v29 = vsel %vm3382_vm13, %v5647_v2, %v5646_v30  ;;  %6926 = vperm.xlu1 %6623, %v6925_v37   ;;  %v6723_v2 = vunpack.i.l.bf16 %v11596_v12  ;;  %v5659_v50 = vsel %vm3342_vm2, %v5658_v28, %v5657_v5  ;;  %v6724_v53 = vunpack.i.h.bf16 %v11596_v12 }
 0xaa1   : > { %v5651_v60 = vperm.slane %v6699_v61, %v13385_v6  ;;  %v5649_v1 = vperm.slane %v6698_v52, %v13386_v13  ;;  %vm13405_vm14 = vcmask 392512  }
 0xaa2   : > { %v6717_v20 = vpop.permute.xlu1 %6716  ;;  %v5668_v23 = vperm.slane %v6723_v2, %v9732_v43  ;;  %v5670_v32 = vperm.slane %v6724_v53, %v9741_v42 }
 0xaa3   : > { %v5650_v9 = vsel %vm13400_vm11, %v5649_v1, %v5648_v29  ;;  %v6718_v4 = vunpack.i.l.bf16 %v6717_v20  ;;  %v6719_v62 = vunpack.i.h.bf16 %v6717_v20  ;;  %vm13406_vm11 = vcmask 654912  }
 0xaa4   : > { %v5652_v54 = vsel %vm3390_vm15, %v5651_v60, %v5650_v9  ;;  %6921 = vperm.xlu0 %6654, %v6920_v15   ;;  %v6739_v9 = vunpack.i.h.bf16 %v11625_v44 }
 0xaa5   : > { %v5654_v41 = vsel %vm3394_vm0, %v5653_v21, %v5652_v54  ;;  %v5664_v61 = vperm.slane %v6718_v4, %v9716_v17  ;;  %v5666_v59 = vperm.slane %v6719_v62, %v9726_v47  ;;  %v6753_v54 = vunpack.i.l.bf16 %v11653_v40 }
 0xaa6   : > { %v5656_v14 = vsel %vm3398_vm1, %v5655_v45, %v5654_v41  ;;  %v6712_v3 = vpop.permute.xlu0 %6711  ;;  %v6754_v45 = vunpack.i.h.bf16 %v11653_v40  ;;  %v5682_v4 = vperm.slane %v6739_v9, %v13385_v6 }
 0xaa7   : > { %v6714_v0 = vunpack.i.h.bf16 %v6712_v3  ;;  %v6713_v57 = vunpack.i.l.bf16 %v6712_v3  ;;  %v11679_v35 = vsel %vm13403_vm3, %v5656_v14, %v11629_v48  ;;  %v6935_v48 = vpack.i.bf16 %v5043_v49, %v5057_v16  ;;  %v11706_v27 = vpop.permute.xlu2 %6781 }
 0xaa8   : > { %6941 = vperm.xlu1 %6623, %v6940_v36   ;;  %v5680_v3 = vperm.slane %v6738_v46, %v13386_v13  ;;  %vm13407_vm3 = vcmask 851712  }
 0xaa9   : > { %v5662_v7 = vperm.slane %v6714_v0, %v13381_v24  ;;  %v5660_v37 = vperm.slane %v6713_v57, %v13382_v10  ;;  %v5693_v0 = vperm.slane %v6754_v45, %v13381_v24  ;;  %v5691_v57 = vperm.slane %v6753_v54, %v13382_v10 }
 0xaaa   : > { %v6732_v34 = vpop.permute.xlu1 %6731 }
 0xaab   : > { %v5661_v52 = vsel %vm3346_vm4, %v5660_v37, %v5659_v50  ;;  %v6733_v60 = vunpack.i.l.bf16 %v6732_v34  ;;  %v6734_v20 = vunpack.i.h.bf16 %v6732_v34 }
 0xaac   : > { %v5663_v30 = vsel %vm3350_vm5, %v5662_v7, %v5661_v52  ;;  %6936 = vperm.xlu0 %6654, %v6935_v48  }
 0xaad   : > { %v5665_v29 = vsel %vm3354_vm6, %v5664_v61, %v5663_v30  ;;  %v5676_v41 = vperm.slane %v6733_v60, %v9781_v63  ;;  %v5678_v5 = vperm.slane %v6734_v20, %v9796_v26 }
 0xaae   : > { %v5667_v39 = vsel %vm13405_vm14, %v5666_v59, %v5665_v29  ;;  %v6727_v12 = vpop.permute.xlu0 %6726  ;;  %vm13408_vm14 = vcmask 1042434  }
 0xaaf   : > { %v6729_v1 = vunpack.i.h.bf16 %v6727_v12  ;;  %v6728_v55 = vunpack.i.l.bf16 %v6727_v12  ;;  %v5669_v56 = vsel %vm3362_vm8, %v5668_v23, %v5667_v39  ;;  %v6797_v23 = vpop.permute.xlu2 %6796 }
 0xab0   : > { %v5671_v15 = vsel %vm3366_vm9, %v5670_v32, %v5669_v56 }
 0xab1   : > { %v5674_v51 = vperm.slane %v6729_v1, %v9763_v18  ;;  %v5672_v21 = vperm.slane %v6728_v55, %v9759_v25  ;;  %v6768_v55 = vunpack.i.l.bf16 %v11684_v58 }
 0xab2   : > { %v6747_v31 = vpop.permute.xlu1 %6746 }
 0xab3   : > { %v5673_v33 = vsel %vm3370_vm10, %v5672_v21, %v5671_v15  ;;  %v6749_v49 = vunpack.i.h.bf16 %v6747_v31  ;;  %v6748_v28 = vunpack.i.l.bf16 %v6747_v31  ;;  %v6769_v15 = vunpack.i.h.bf16 %v11684_v58 }
 0xab4   : > { %v5675_v14 = vsel %vm13406_vm11, %v5674_v51, %v5673_v33  ;;  %vm13409_vm11 = vcmask 392512   ;;  %v5703_v45 = vperm.slane %v6768_v55, %v9759_v25 }
 0xab5   : > { %v5677_v44 = vsel %vm3378_vm12, %v5676_v41, %v5675_v14  ;;  %v5689_v36 = vperm.slane %v6749_v49, %v9692_v38  ;;  %v5688_v40 = vperm.slane %v6748_v28, %v9689_v8  ;;  %v5705_v31 = vperm.slane %v6769_v15, %v9763_v18 }
 0xab6   : > { %v5679_v62 = vsel %vm3382_vm13, %v5678_v5, %v5677_v44  ;;  %v6742_v19 = vpop.permute.xlu0 %6741 }
 0xab7   : > { %v5690_v16 = vsel %vm3342_vm2, %v5689_v36, %v5688_v40  ;;  %v6744_v2 = vunpack.i.h.bf16 %v6742_v19  ;;  %v6743_v7 = vunpack.i.l.bf16 %v6742_v19  ;;  %v5681_v37 = vsel %vm13407_vm3, %v5680_v3, %v5679_v62  ;;  %v11745_v49 = vpop.permute.xlu2 %6811 }
 0xab8   : > { %v5692_v50 = vsel %vm3346_vm4, %v5691_v57, %v5690_v16  ;;  %v5683_v53 = vsel %vm3390_vm15, %v5682_v4, %v5681_v37  ;;  %vm13410_vm3 = vcmask 654912  }
 0xab9   : > { %v5686_v34 = vperm.slane %v6744_v2, %v13391_v22  ;;  %v5684_v48 = vperm.slane %v6743_v7, %v13389_v11  ;;  %v5694_v61 = vsel %vm3350_vm5, %v5693_v0, %v5692_v50 }
 0xaba   : > { %v6762_v52 = vpop.permute.xlu1 %6761 }
 0xabb   : > { %v5685_v59 = vsel %vm3394_vm0, %v5684_v48, %v5683_v53  ;;  %v6763_v39 = vunpack.i.l.bf16 %v6762_v52  ;;  %v6764_v1 = vunpack.i.h.bf16 %v6762_v52  ;;  %v6798_v48 = vunpack.i.l.bf16 %v6797_v23 }
 0xabc   : > { %v5687_v30 = vsel %vm3398_vm1, %v5686_v34, %v5685_v59 }
 0xabd   : > { %v11731_v29 = vsel %vm13408_vm14, %v5687_v30, %v11679_v35  ;;  %v5699_v51 = vperm.slane %v6763_v39, %v9732_v43  ;;  %v5701_v35 = vperm.slane %v6764_v1, %v9741_v42  ;;  %vm13411_vm14 = vcmask 851712  }
 0xabe   : > { %v6757_v32 = vpop.permute.xlu0 %6756  ;;  %v5726_v55 = vperm.slane %v6798_v48, %v9716_v17 }
 0xabf   : > { %v6759_v12 = vunpack.i.h.bf16 %v6757_v32  ;;  %v6758_v60 = vunpack.i.l.bf16 %v6757_v32 }
 0xac1   : > { %v5697_v56 = vperm.slane %v6759_v12, %v9726_v47  ;;  %v5695_v20 = vperm.slane %v6758_v60, %v9716_v17  ;;  %v6799_v60 = vunpack.i.h.bf16 %v6797_v23 }
 0xac2   : > { %v6777_v46 = vpop.permute.xlu1 %6776 }
 0xac3   : > { %v5696_v21 = vsel %vm3354_vm6, %v5695_v20, %v5694_v61  ;;  %v6778_v58 = vunpack.i.l.bf16 %v6777_v46  ;;  %v6779_v3 = vunpack.i.h.bf16 %v6777_v46  ;;  %v6827_v61 = vpop.permute.xlu2 %6826 }
 0xac4   : > { %v5698_v9 = vsel %vm13409_vm11, %v5697_v56, %v5696_v21  ;;  %v6828_v48 = vunpack.i.l.bf16 %v6827_v61 }
 0xac5   : > { %v5700_v54 = vsel %vm3362_vm8, %v5699_v51, %v5698_v9  ;;  %v5711_v0 = vperm.slane %v6778_v58, %v13386_v13  ;;  %v5713_v62 = vperm.slane %v6779_v3, %v13385_v6 }
 0xac6   : > { %v5702_v41 = vsel %vm3366_vm9, %v5701_v35, %v5700_v54  ;;  %v6772_v33 = vpop.permute.xlu0 %6771  ;;  %v5728_v35 = vperm.slane %v6799_v60, %v9726_v47 }
 0xac7   : > { %v6774_v28 = vunpack.i.h.bf16 %v6772_v33  ;;  %v6773_v5 = vunpack.i.l.bf16 %v6772_v33  ;;  %v5704_v14 = vsel %vm3370_vm10, %v5703_v45, %v5702_v41 }
 0xac8   : > { %v5706_v44 = vsel %vm13410_vm3, %v5705_v31, %v5704_v14 }
 0xac9   : > { %v5709_v36 = vperm.slane %v6774_v28, %v9796_v26  ;;  %v5707_v40 = vperm.slane %v6773_v5, %v9781_v63 }
 0xaca   : > { %v6792_v4 = vpop.permute.xlu1 %6791 }
 0xacb   : > { %v5708_v57 = vsel %vm3378_vm12, %v5707_v40, %v5706_v44  ;;  %v6793_v7 = vunpack.i.l.bf16 %v6792_v4  ;;  %v6794_v50 = vunpack.i.h.bf16 %v6792_v4  ;;  %v11774_v41 = vpop.permute.xlu2 %6841 }
 0xacc   : > { %v5710_v19 = vsel %vm3382_vm13, %v5709_v36, %v5708_v57  ;;  %v5082_v57 = vld [vmem:[%s7510_s24 + $0x78] sm:$0xff] }
 0xacd   : > { %v5712_v16 = vsel %vm13411_vm14, %v5711_v0, %v5710_v19  ;;  %v5722_v30 = vperm.slane %v6793_v7, %v13382_v10  ;;  %v5724_v39 = vperm.slane %v6794_v50, %v13381_v24  ;;  %5851 = vmatpush.msra.mxu2 %v5082_v57  ;;  %v6813_v50 = vunpack.i.l.bf16 %v11745_v49  ;;  %v5073_v57 = vld [vmem:[%s7510_s24 + $0x30] sm:$0xff] }
 0xace   : > { %v11757_v2 = vsel %vm3390_vm15, %v5713_v62, %v5712_v16  ;;  %v6787_v37 = vpop.permute.xlu0 %6786  ;;  %v5081_v62 = vld [vmem:[%s7510_s24 + $0x70] sm:$0xff]  ;;  %v5080_v16 = vld [vmem:[%s7510_s24 + $0x68] sm:$0xff] }
 0xacf   : > { %v6789_v53 = vunpack.i.h.bf16 %v6787_v37  ;;  %v6788_v34 = vunpack.i.l.bf16 %v6787_v37  ;;  %5852 = vmatpush.msra.mxu2 %v5081_v62  ;;  %v5079_v37 = vld [vmem:[%s7510_s24 + $0x60] sm:$0xff]  ;;  %v6783_v62 = vunpack.i.l.bf16 %v11706_v27 }
 0xad1   : > { %v5720_v52 = vperm.slane %v6789_v53, %v9692_v38  ;;  %v5719_v59 = vperm.slane %v6788_v34, %v9689_v8  ;;  %5853 = vmatpush.msra.mxu2 %v5080_v16  ;;  %v6829_v34 = vunpack.i.h.bf16 %v6827_v61 }
 0xad2   : > { %v6807_v32 = vpop.permute.xlu1 %6806 }
 0xad3   : > { %v5721_v12 = vsel %vm3342_vm2, %v5720_v52, %v5719_v59  ;;  %v6808_v15 = vunpack.i.l.bf16 %v6807_v32  ;;  %v6809_v9 = vunpack.i.h.bf16 %v6807_v32  ;;  %v11784_v40 = vpop.permute.xlu2 %6856  ;;  %5854 = vmatpush.msra.mxu2 %v5079_v37  ;;  %v5078_v59 = vld [vmem:[%s7510_s24 + $0x58] sm:$0xff]  ;;  %v6814_v32 = vunpack.i.h.bf16 %v11745_v49  ;;  %v5075_v49 = vld [vmem:[%s7510_s24 + $0x40] sm:$0xff] }
 0xad4   : > { %v5723_v1 = vsel %vm3346_vm4, %v5722_v30, %v5721_v12  ;;  %v5077_v30 = vld [vmem:[%s7510_s24 + $0x50] sm:$0xff]  ;;  %v5738_v12 = vperm.slane %v6813_v50, %v9781_v63 }
 0xad5   : > { %v5725_v56 = vsel %vm3350_vm5, %v5724_v39, %v5723_v1  ;;  %v5734_v33 = vperm.slane %v6808_v15, %v9759_v25  ;;  %v5736_v28 = vperm.slane %v6809_v9, %v9763_v18  ;;  %5855 = vmatpush.msra.mxu2 %v5078_v59  ;;  %v5076_v1 = vld [vmem:[%s7510_s24 + $0x48] sm:$0xff]  ;;  %v6784_v9 = vunpack.i.h.bf16 %v11706_v27 }
 0xad6   : > { %v6802_v20 = vpop.permute.xlu0 %6801  ;;  %v5727_v21 = vsel %vm3354_vm6, %v5726_v55, %v5725_v56  ;;  %v5751_v55 = vperm.slane %v6829_v34, %v9692_v38  ;;  %v6843_v34 = vunpack.i.l.bf16 %v11774_v41 }
 0xad7   : > { %v6804_v46 = vunpack.i.h.bf16 %v6802_v20  ;;  %v6803_v51 = vunpack.i.l.bf16 %v6802_v20  ;;  %v5729_v54 = vsel %vm13409_vm11, %v5728_v35, %v5727_v21  ;;  %5856 = vmatpush.msra.mxu2 %v5077_v30  ;;  %v5750_v20 = vperm.slane %v6828_v48, %v9689_v8  ;;  %v5072_v30 = vld [vmem:[%s7510_s24 + $0x28] sm:$0xff] }
 0xad8   : > { %v5717_v50 = vperm.slane %v6784_v9, %v13391_v22 }
 0xad9   : > { %v5732_v45 = vperm.slane %v6804_v46, %v9741_v42  ;;  %v5730_v23 = vperm.slane %v6803_v51, %v9732_v43  ;;  %v5740_v51 = vperm.slane %v6814_v32, %v9796_v26  ;;  %5857 = vmatpush.msra.mxu2 %v5076_v1 }
 0xada   : > { %v11772_v31 = vpop.permute.xlu1 %6821 }
 0xadb   : > { %v5731_v58 = vsel %vm3362_vm8, %v5730_v23, %v5729_v54  ;;  %v6872_v7 = vpop.permute.xlu2 %6871  ;;  %5858 = vmatpush.msra.mxu2 %v5075_v49  ;;  %v6824_v27 = vunpack.i.h.bf16 %v11772_v31 }
 0xadc   : > { %v5733_v5 = vsel %vm3366_vm9, %v5732_v45, %v5731_v58  ;;  %v6874_v45 = vunpack.i.h.bf16 %v6872_v7  ;;  %v6873_v23 = vunpack.i.l.bf16 %v6872_v7 }
 0xadd   : > { %v5735_v14 = vsel %vm3370_vm10, %v5734_v33, %v5733_v5  ;;  %v5074_v5 = vld [vmem:[%s7510_s24 + $0x38] sm:$0xff] }
 0xade   : > { %v5737_v3 = vsel %vm13410_vm3, %v5736_v28, %v5735_v14  ;;  %v6817_v44 = vpop.permute.xlu0 %6816  ;;  %v5752_v14 = vsel %vm3342_vm2, %v5751_v55, %v5750_v20  ;;  %5859 = vmatpush.msra.mxu2 %v5074_v5  ;;  %v5813_v48 = vperm.slane %v6874_v45, %v9692_v38  ;;  %v5748_v45 = vperm.slane %v6824_v27, %v13391_v22 }
 0xadf   : > { %v6818_v52 = vunpack.i.l.bf16 %v6817_v44  ;;  %v6819_v56 = vunpack.i.h.bf16 %v6817_v44  ;;  %v5739_v61 = vsel %vm3378_vm12, %v5738_v12, %v5737_v3  ;;  %v6823_v3 = vunpack.i.l.bf16 %v11772_v31 }
 0xae0   : > { %v5741_v58 = vsel %vm3382_vm13, %v5740_v51, %v5739_v61  ;;  %5860 = vmatpush.msra.mxu2 %v5073_v57  ;;  %v5071_v61 = vld [vmem:[%s7510_s24 + $0x20] sm:$0xff]  ;;  %v5761_v51 = vperm.slane %v6843_v34, %v9732_v43  ;;  %vm13414_vm3 = vcmask 1044484  }
 0xae1   : > { %v5742_v15 = vperm.slane %v6818_v52, %v13386_v13  ;;  %v5744_v33 = vperm.slane %v6819_v56, %v13385_v6  ;;  %v5812_v52 = vperm.slane %v6873_v23, %v9689_v8  ;;  %v5746_v1 = vperm.slane %v6823_v3, %v13389_v11 }
 0xae2   : > { %v11782_v36 = vpop.permute.xlu1 %6836  ;;  %5861 = vmatpush.msra.mxu2 %v5072_v30 }
 0xae3   : > { %v11810_v21 = vpop.permute.xlu2 %6886  ;;  %v5743_v44 = vsel %vm13411_vm14, %v5742_v15, %v5741_v58  ;;  %v6838_v16 = vunpack.i.l.bf16 %v11782_v36  ;;  %v6839_v55 = vunpack.i.h.bf16 %v11782_v36  ;;  %v5715_v15 = vperm.slane %v6783_v62, %v13389_v11 }
 0xae4   : > { %v5745_v32 = vsel %vm3390_vm15, %v5744_v33, %v5743_v44  ;;  %v5814_v36 = vsel %vm3342_vm2, %v5813_v48, %v5812_v52  ;;  %5862 = vmatpush.msra.mxu2 %v5071_v61  ;;  %v6889_v44 = vunpack.i.h.bf16 %v11810_v21  ;;  %v5068_v48 = vld [vmem:[%s7510_s24 + $0x8] sm:$0xff]  ;;  %v6888_v52 = vunpack.i.l.bf16 %v11810_v21 }
 0xae5   : > { %v5757_v31 = vperm.slane %v6838_v16, %v9716_v17  ;;  %v5759_v58 = vperm.slane %v6839_v55, %v9726_v47  ;;  %v5716_v3 = vsel %vm3394_vm0, %v5715_v15, %v11757_v2 }
 0xae6   : > { %v6832_v4 = vpop.permute.xlu0 %6831  ;;  %v5718_v2 = vsel %vm3398_vm1, %v5717_v50, %v5716_v3  ;;  %v5819_v61 = vperm.slane %v6889_v44, %v9716_v17  ;;  %v5790_v15 = vperm.slane %v6888_v52, %v9726_v47 }
 0xae7   : > { %v6833_v39 = vunpack.i.l.bf16 %v6832_v4  ;;  %v6834_v46 = vunpack.i.h.bf16 %v6832_v4 }
 0xae9   : > { %v5753_v35 = vperm.slane %v6833_v39, %v13382_v10  ;;  %v5755_v4 = vperm.slane %v6834_v46, %v13381_v24 }
 0xaea   : > { %v11786_v0 = vpop.permute.xlu1 %6851 }
 0xaeb   : > { %v5754_v7 = vsel %vm3346_vm4, %v5753_v35, %v5752_v14  ;;  %v5747_v35 = vsel %vm3394_vm0, %v5746_v1, %v5745_v32  ;;  %v11851_v9 = vpop.permute.xlu2 %6901  ;;  %v5069_v14 = vld [vmem:[%s7510_s24 + $0x10] sm:$0xff] }
 0xaec   : > { %v5756_v56 = vsel %vm3350_vm5, %v5755_v4, %v5754_v7  ;;  %v5749_v62 = vsel %vm3398_vm1, %v5748_v45, %v5747_v35 }
 0xaed   : > { %v5758_v23 = vsel %vm3354_vm6, %v5757_v31, %v5756_v56 }
 0xaee   : > { %v11790_v19 = vpop.permute.xlu0 %6846 }
 0xaef   : > { %v6848_v4 = vunpack.i.l.bf16 %v11790_v19  ;;  %v6849_v27 = vunpack.i.h.bf16 %v11790_v19 }
 0xaf1   : > { %v5765_v21 = vperm.slane %v6848_v4, %v9759_v25 }
 0xaf2   : > { %v11795_v53 = vpop.permute.xlu1 %6866 }
 0xaf3   : > { %v6868_v37 = vunpack.i.l.bf16 %v11795_v53  ;;  %v6869_v20 = vunpack.i.h.bf16 %v11795_v53 }
 0xaf5   : > { %v5782_v46 = vperm.slane %v6868_v37, %v9692_v38 }
 0xaf6   : > { %v11801_v60 = vpop.permute.xlu0 %6861 }
 0xaf7   : > { %v6864_v28 = vunpack.i.h.bf16 %v11801_v60 }
 0xaf9   : > { %v5781_v39 = vperm.slane %v6864_v28, %v9689_v8  ;;  %v6844_v8 = vunpack.i.h.bf16 %v11774_v41  ;;  %v5070_v41 = vld [vmem:[%s7510_s24 + $0x18] sm:$0xff]  ;;  %v5784_v28 = vperm.slane %v6869_v20, %v13382_v10 }
 0xafa   : > { %v11814_v54 = vpop.permute.xlu1 %6881  ;;  %5863 = vmatpush.msra.mxu2 %v5070_v41 }
 0xafb   : > { %v5783_v38 = vsel %vm3342_vm2, %v5782_v46, %v5781_v39  ;;  %v6883_v5 = vunpack.i.l.bf16 %v11814_v54  ;;  %vm13412_vm2 = vmmov %vm13409_vm11  ;;  %v6884_v7 = vunpack.i.h.bf16 %v11814_v54  ;;  %vm13413_vm11 = vcmask 1043459   ;;  %v5067_v39 = vld [vmem:[%s7510_s24] sm:$0xff] }
 0xafc   : > { %v5760_v16 = vsel %vm13412_vm2, %v5759_v58, %v5758_v23  ;;  %v5785_v37 = vsel %vm3346_vm4, %v5784_v28, %v5783_v38  ;;  %5864 = vmatpush.msra.mxu2 %v5069_v14  ;;  %v5763_v55 = vperm.slane %v6844_v8, %v9741_v42  ;;  %v5767_v46 = vperm.slane %v6849_v27, %v9763_v18  ;;  %vm13417_vm14 = vmmov %vm13412_vm2 }
 0xafd   : > { %v5788_v32 = vperm.slane %v6883_v5, %v9716_v17  ;;  %v5762_v50 = vsel %vm3362_vm8, %v5761_v51, %v5760_v16  ;;  %v6917_v51 = vpop.permute.xlu2 %6916  ;;  %v6904_v23 = vunpack.i.h.bf16 %v11851_v9  ;;  %v6903_v38 = vunpack.i.l.bf16 %v11851_v9 }
 0xafe   : > { %v6877_v59 = vpop.permute.xlu0 %6876  ;;  %5865 = vmatpush.msra.mxu2 %v5068_v48  ;;  %v6854_v14 = vunpack.i.h.bf16 %v11786_v0  ;;  %v6918_v52 = vunpack.i.l.bf16 %v6917_v51  ;;  %v6863_v27 = vunpack.i.l.bf16 %v11801_v60 }
 0xaff   : > { %v6878_v12 = vunpack.i.l.bf16 %v6877_v59  ;;  %v6879_v49 = vunpack.i.h.bf16 %v6877_v59  ;;  %v5796_v16 = vperm.slane %v6903_v38, %v9759_v25 }
 0xb00   : > { %5866 = vmatpush.msra.mxu2 %v5067_v39 }
 0xb01   : > { %v5786_v33 = vperm.slane %v6878_v12, %v13381_v24  ;;  %v5815_v57 = vperm.slane %v6879_v49, %v13382_v10  ;;  %v5845_v10 = vsel %vm13413_vm11, %v5718_v2, %v11731_v29  ;;  %v5817_v29 = vperm.slane %v6884_v7, %v13381_v24 }
 0xb02   : > { %v11849_v53 = vpop.permute.xlu1 %6896  ;;  %v11881_v12 = vsel %vm13414_vm3, %v5749_v62, %v5845_v10  ;;  %v5764_v49 = vsel %vm3366_vm9, %v5763_v55, %v5762_v50  ;;  %v6858_v62 = vunpack.i.l.bf16 %v11784_v40  ;;  %v6859_v10 = vunpack.i.h.bf16 %v11784_v40 }
 0xb03   : > { %v5787_v59 = vsel %vm3350_vm5, %v5786_v33, %v5785_v37  ;;  %v5816_v1 = vsel %vm3346_vm4, %v5815_v57, %v5814_v36  ;;  %v6898_v31 = vunpack.i.l.bf16 %v11849_v53  ;;  %v6853_v36 = vunpack.i.l.bf16 %v11786_v0  ;;  %vm13415_vm4 = vmmov %vm13412_vm2 }
 0xb04   : > { %v5789_v19 = vsel %vm3354_vm6, %v5788_v32, %v5787_v59  ;;  %v5818_v8 = vsel %vm3350_vm5, %v5817_v29, %v5816_v1  ;;  %v5766_v35 = vsel %vm3370_vm10, %v5765_v21, %v5764_v49  ;;  %v6899_v17 = vunpack.i.h.bf16 %v11849_v53 }
 0xb05   : > { %v5791_v45 = vsel %vm13415_vm4, %v5790_v15, %v5789_v19  ;;  %v5794_v58 = vperm.slane %v6898_v31, %v9741_v42  ;;  %vm13416_vm5 = vcmask 654912   ;;  %v5769_v44 = vperm.slane %v6853_v36, %v9781_v63  ;;  %v6932_v1 = vpop.permute.xlu2 %6931 }
 0xb06   : > { %v6892_v34 = vpop.permute.xlu0 %6891  ;;  %v5768_v3 = vsel %vm13416_vm5, %v5767_v46, %v5766_v35  ;;  %v5823_v4 = vperm.slane %v6899_v17, %v9732_v43  ;;  %v5825_v0 = vperm.slane %v6904_v23, %v9741_v42  ;;  %v5773_v42 = vperm.slane %v6858_v62, %v13386_v13 }
 0xb07   : > { %v6893_v30 = vunpack.i.l.bf16 %v6892_v34  ;;  %v6894_v54 = vunpack.i.h.bf16 %v6892_v34  ;;  %v5770_v34 = vsel %vm3378_vm12, %v5769_v44, %v5768_v3  ;;  %v6919_v21 = vunpack.i.h.bf16 %v6917_v51 }
 0xb08   : > { %v5802_v40 = vperm.slane %v6918_v52, %v9796_v26  ;;  %v5775_v46 = vperm.slane %v6859_v10, %v13385_v6  ;;  %v6933_v49 = vunpack.i.l.bf16 %v6932_v1  ;;  %v6934_v35 = vunpack.i.h.bf16 %v6932_v1  ;;  %v5060_v52 = vld [vmem:[#allocation6] sm:$0xff] }
 0xb09   : > { %v5792_v56 = vperm.slane %v6893_v30, %v9732_v43  ;;  %v5821_v24 = vperm.slane %v6894_v54, %v9726_v47  ;;  %v5820_v47 = vsel %vm3354_vm6, %v5819_v61, %v5818_v8  ;;  %v5771_v43 = vperm.slane %v6854_v14, %v9796_v26  ;;  %vm13418_vm6 = vmmov %vm13416_vm5 }
 0xb0a   : > { %v6912_v20 = vpop.permute.xlu1 %6911  ;;  %v5777_v61 = vperm.slane %v6863_v27, %v13389_v11  ;;  %v5831_v51 = vperm.slane %v6919_v21, %v9781_v63  ;;  %vm13424_vm2 = vcmask 1047559  }
 0xb0b   : > { %v5793_v33 = vsel %vm3362_vm8, %v5792_v56, %v5791_v45  ;;  %v5822_v53 = vsel %vm13417_vm14, %v5821_v24, %v5820_v47  ;;  %v6913_v7 = vunpack.i.l.bf16 %v6912_v20  ;;  %v6914_v59 = vunpack.i.h.bf16 %v6912_v20 }
 0xb0c   : > { %v5795_v9 = vsel %vm3366_vm9, %v5794_v58, %v5793_v33  ;;  %v5824_v48 = vsel %vm3362_vm8, %v5823_v4, %v5822_v53  ;;  %v5772_v54 = vsel %vm3382_vm13, %v5771_v43, %v5770_v34  ;;  %vm13419_vm8 = vcmask 851712   ;;  %v13425_v43 = vld [vmem:[#allocation163_spill] sm:$0xff] }
 0xb0d   : > { %v5797_v30 = vsel %vm3370_vm10, %v5796_v16, %v5795_v9  ;;  %v5800_v39 = vperm.slane %v6913_v7, %v9781_v63  ;;  %v5829_v60 = vperm.slane %v6914_v59, %v9763_v18  ;;  %v5774_v20 = vsel %vm13419_vm8, %v5773_v42, %v5772_v54  ;;  %v5886_v10 = vpop.permute.xlu2 %5885 }
 0xb0e   : > { %v6907_v41 = vpop.permute.xlu0 %6906  ;;  %v5776_v17 = vsel %vm3390_vm15, %v5775_v46, %v5774_v20  ;;  %v5779_v58 = vperm.slane %v6933_v49, %v13391_v22  ;;  %v5808_v53 = vperm.slane %v6934_v35, %v13389_v11  ;;  %v5066_v59 = vmul.f32 %v13425_v43, %v5060_v52 }
 0xb0f   : > { %v6909_v28 = vunpack.i.h.bf16 %v6907_v41  ;;  %v6908_v5 = vunpack.i.l.bf16 %v6907_v41  ;;  %v5778_v38 = vsel %vm3394_vm0, %v5777_v61, %v5776_v17 }
 0xb10   : > { %v5780_v4 = vsel %vm3398_vm1, %v5779_v58, %v5778_v38 }
 0xb11   : > { %v5798_v57 = vperm.slane %v6908_v5, %v9763_v18  ;;  %v5827_v2 = vperm.slane %v6909_v28, %v9759_v25  ;;  %v5826_v25 = vsel %vm3366_vm9, %v5825_v0, %v5824_v48  ;;  %vm13420_vm9 = vmmov %vm13416_vm5 }
 0xb12   : > { %v6927_v37 = vpop.permute.xlu1 %6926 }
 0xb13   : > { %v5799_v32 = vsel %vm13418_vm6, %v5798_v57, %v5797_v30  ;;  %v5828_v55 = vsel %vm3370_vm10, %v5827_v2, %v5826_v25  ;;  %v6928_v15 = vunpack.i.l.bf16 %v6927_v37  ;;  %v6929_v45 = vunpack.i.h.bf16 %v6927_v37  ;;  %vm13421_vm10 = vmmov %vm13419_vm8 }
 0xb14   : > { %v5801_v56 = vsel %vm3378_vm12, %v5800_v39, %v5799_v32  ;;  %v5830_v8 = vsel %vm13420_vm9, %v5829_v60, %v5828_v55  ;;  %v5889_v32 = vld [vmem:[#allocation2] sm:$0xff] }
 0xb15   : > { %v5803_v18 = vsel %vm3382_vm13, %v5802_v40, %v5801_v56  ;;  %v5806_v33 = vperm.slane %v6928_v15, %v13385_v6  ;;  %v5832_v41 = vsel %vm3378_vm12, %v5831_v51, %v5830_v8  ;;  %v5835_v44 = vperm.slane %v6929_v45, %v13386_v13  ;;  %vm13422_vm12 = vmmov %vm13419_vm8 }
 0xb16   : > { %v6922_v50 = vpop.permute.xlu0 %6921 }
 0xb17   : > { %v6924_v29 = vunpack.i.h.bf16 %v6922_v50  ;;  %v6923_v19 = vunpack.i.l.bf16 %v6922_v50 }
 0xb19   : > { %v5804_v31 = vperm.slane %v6923_v19, %v13386_v13  ;;  %v5833_v24 = vperm.slane %v6924_v29, %v9796_v26  ;;  %v5847_v13 = vsel %vm3625_vm7, %v5780_v4, %v11881_v12 }
 0xb1a   : > { %v6942_v36 = vpop.permute.xlu1 %6941 }
 0xb1b   : > { %v5805_v23 = vsel %vm13421_vm10, %v5804_v31, %v5803_v18  ;;  %v5834_v26 = vsel %vm3382_vm13, %v5833_v24, %v5832_v41  ;;  %v6943_v63 = vunpack.i.l.bf16 %v6942_v36  ;;  %v6944_v28 = vunpack.i.h.bf16 %v6942_v36 }
 0xb1c   : > { %v5807_v3 = vsel %vm3390_vm15, %v5806_v33, %v5805_v23  ;;  %v5836_v16 = vsel %vm13422_vm12, %v5835_v44, %v5834_v26  ;;  %vm13423_vm13 = vcmask 1046534  }
 0xb1d   : > { %v5839_v62 = vperm.slane %v6943_v63, %v13389_v11  ;;  %v5809_v7 = vsel %vm3394_vm0, %v5808_v53, %v5807_v3  ;;  %v5841_v37 = vperm.slane %v6944_v28, %v13391_v22 }
 0xb1e   : > { %v6937_v47 = vpop.permute.xlu0 %6936 }
 0xb1f   : > { %v6939_v5 = vunpack.i.h.bf16 %v6937_v47  ;;  %v6938_v14 = vunpack.i.l.bf16 %v6937_v47 }
 0xb21   : > { %v5810_v9 = vperm.slane %v6939_v5, %v13391_v22  ;;  %v5837_v57 = vperm.slane %v6938_v14, %v13385_v6 }
 0xb23   : > { %v5838_v0 = vsel %vm3390_vm15, %v5837_v57, %v5836_v16  ;;  %v5811_v34 = vsel %vm3398_vm1, %v5810_v9, %v5809_v7  ;;  %vm13426_vm15 = vcmask 261120  }
 0xb24   : > { %v5840_v48 = vsel %vm3394_vm0, %v5839_v62, %v5838_v0  ;;  %v5848_v2 = vsel %vm13423_vm13, %v5811_v34, %v5847_v13  ;;  %vm13427_vm7 = vmmov %vm13426_vm15 }
 0xb25   : > { %v5842_v6 = vsel %vm3398_vm1, %v5841_v37, %v5840_v48 }
 0xb26   : > { %v5849_v11 = vsel %vm13424_vm2, %v5842_v6, %v5848_v2 }
 0xb27   : > { %5867 = vmatmul.f32.vlgmr.msra.gmra.mxu2 %v5849_v11 }
 0xbaa   : > { %v5868_v22 = vpop.f32.mrf.mxu2 }
 0xbab   : > { %v5871_v30 = vadd.f32 %v5868_v22, %v5066_v59 }
 0xbad   : > { %5872 = vst.msk [vmem:[#allocation6] sm:$0xff] %vm13426_vm15, %v5871_v30 }
 0xbb4   : > { %v5882_v27 = vld [vmem:[#allocation6] sm:$0xff] }
 0xbb5   : > { %v5888_v12 = vmul.f32 %v5886_v10, %v5882_v27  ;;  %5894 = sbr.rel (%p6218_p4) target bundleno = 3133 (0xc3d), region = 80 }
 0xbb7   : > { %v5890_v42 = vadd.f32 %v5889_v32, %v5888_v12 }
 0xbb9   : > { %5891 = vst.msk [vmem:[#allocation2] sm:$0xff] %vm13427_vm7, %v5890_v42 }
 0xbba   : > { %v5897_v54 = vld [vmem:[#allocation4] sm:$0xff]  ;;  %vm13428_vm0 = vcmask 261120   ;;  %v7341_v39 = vmov 0   ;;  %v5896_v25 = vld [vmem:[%s7542_s26] sm:$0xff] }
 0xbbb   : > { %5895 = vst.msk [vmem:[%s7538_s2] sm:$0xff] %vm13428_vm0, %v5888_v12  ;;  %7206 = vset.pattern.permute.xlu0 %v7341_v39 }
 0xbbc   : > { %5900 = vperm.xlu0 %7206, %v5897_v54  }
 0xc2e   : > { %v5901_v50 = vpop.permute.xlu0 %5900 }
 0xc2f   : > { %v5903_v21 = vsub.f32 %v5896_v25, %v5901_v50 }
 0xc31   : > { %v5904_v1 = vmul.f32 1.442695, %v5903_v21 }
 0xc33   : > { %7207 = vpow2.f32 %v5904_v1 }
 0xc39   : > { %v7208_v55 = vpop.eup %7207 }
 0xc3a   : > { %v5906_v29 = vmul.f32 %v7208_v55, %v5886_v10 }
 0xc3c   : > { %5907 = vst [vmem:[%s7542_s26] sm:$0xff] %v5906_v29 }
 0xc3d PF: > { %s6222_s25 = sshll.u32 %s7323_s21, 3  ;;  %s13430_s14 = sld [smem:[#allocation230_spill]] }
 0xc3e   : > { %s5926_s12 = sshll.u32 %s7538_s2, 4  ;;  %s5909_s19 = scalar_lea.sflag [#allocation8], %s7472_s15  ;;  %s5927_s12 = int_to_ptr.vmem [resolvable:$true] %s5926_s12 }
 0xc43   : > { %s5924_s13 = scalar_lea.hbm %s13430_s14, %s6222_s25  ;;  %s7229_s21 = scalar_lea.hbm %s13430_s14, 16 }
 0xc44   : > { %s5928_s18 = sshll.u32 %s5924_s13, 4  ;;  %s5929_s18 = int_to_ptr.hbm [resolvable:$true] %s5928_s18 }
 0xc45   : > { %s7223_s30 = sshra.s32 %s5929_s18, 4  ;;  %s7224_s30 = int_to_ptr.hbm [resolvable:$true] %s7223_s30 }
 0xc46   : > { %s7225_s11 = scalar_lea.hbm %s7224_s30, 8  ;;  %p7230_p8 = scmp.lt.s32.totalorder %s7224_s30, %s13430_s14 }
 0xc47   : > { %p7226_p5 = scmp.ne.s32.totalorder %s7224_s30, %s7225_s11  ;;  %p7231_p10 = scmp.lt.s32.totalorder %s7229_s21, %s7225_s11 }
 0xc49   : > { %p7227_p6 = pnand %p7226_p5, %p7451_p3  ;;  %p7232_p11 = por %p7231_p10, %p7230_p8 }
 0xc4b   : > { %p7228_p7 = pneg %p7227_p6 }
 0xc4d   : > { %p7233_p12 = pnand %p7232_p11, %p7228_p7 }
 0xc4f   : > { %7236 = shalt.err (!%p7233_p12)
}
 0xc50   : > { %6238 = dma.vmem_to_hbm [thread:$0]  (%p7451_p3), %s5927_s12, 128, %s5929_s18, %s5909_s19  }
 0xc51   : > { %s13431_s29 = sld [smem:[#allocation231_spill]]  ;;  %s5940_s28 = sshll.u32 %s7542_s26, 4  ;;  %s5941_s28 = int_to_ptr.vmem [resolvable:$true] %s5940_s28 }
 0xc52   : > { %s5914_s24 = scalar_lea.sflag [#allocation10], %s7472_s15 }
 0xc57   : > { %s5938_s22 = scalar_lea.hbm %s13431_s29, %s6222_s25  ;;  %s7257_s12 = scalar_lea.hbm %s13431_s29, 16 }
 0xc58   : > { %s5942_s0 = sshll.u32 %s5938_s22, 4  ;;  %s5943_s0 = int_to_ptr.hbm [resolvable:$true] %s5942_s0 }
 0xc59   : > { %s7251_s27 = sshra.s32 %s5943_s0, 4  ;;  %s7252_s27 = int_to_ptr.hbm [resolvable:$true] %s7251_s27 }
 0xc5a   : > { %s7253_s13 = scalar_lea.hbm %s7252_s27, 8  ;;  %p7258_p2 = scmp.lt.s32.totalorder %s7252_s27, %s13431_s29 }
 0xc5b   : > { %p7254_p13 = scmp.ne.s32.totalorder %s7252_s27, %s7253_s13  ;;  %p7259_p4 = scmp.lt.s32.totalorder %s7257_s12, %s7253_s13 }
 0xc5d   : > { %p7255_p0 = pnand %p7254_p13, %p7451_p3  ;;  %p7260_p5 = por %p7259_p4, %p7258_p2 }
 0xc5f   : > { %p7256_p1 = pneg %p7255_p0 }
 0xc61   : > { %p7261_p6 = pnand %p7260_p5, %p7256_p1 }
 0xc63   : > { %7264 = shalt.err (!%p7261_p6)
}
 0xc64   : > { %6239 = dma.vmem_to_hbm [thread:$0]  (%p7451_p3), %s5941_s28, 128, %s5943_s0, %s5914_s24  }
 0xc65 PF: > { %s13432_s15 = sld [smem:[#allocation18_spill]] }
 0xc66   : > { %s13433_s26 = sld [smem:[#allocation13_spill]] }
 0xc6b   : > { %p6249_p7 = scmp.ge.s32.totalorder %s13432_s15, 2 }
 0xc6c   : > { %s5954_s16 = sand.u32 1, %s13433_s26  }
 0xc6d   : > { %p6243_p8 = pnand %p6249_p7, %p7461_p9  ;;  %s5955_s1 = scalar_lea.sflag [#allocation8], %s5954_s16 }
 0xc6f   : > { %p6244_p10 = pneg %p6243_p8 }
 0xc71   : > { %7298 = dma.done.wait (%p6244_p10), %s5955_s1, 128  }
 0xc72   : > { %7300 = vsyncadd (%p6244_p10), %s5955_s1, 4294967168  ;;  %s5965_s21 = scalar_lea.sflag [#allocation10], %s5954_s16 }
 0xc73   : > { %7302 = dma.done.wait (%p6244_p10), %s5965_s21, 128  }
 0xc74   : > { %7304 = vsyncadd (%p6244_p10), %s5965_s21, 4294967168  ;;  %s28_s24 = sadd.s32 1, %s13432_s15   ;;  %s13435_s17 = sld [smem:[#allocation14_spill]] }
 0xc75   : > { %p25_p11 = scmp.ge.s32.totalorder %s28_s24, 6   ;;  %s13436_s18 = sld [smem:[#allocation15_spill]] }
 0xc76   : > { %s13437_s19 = sld [smem:[#allocation23_spill]] }
 0xc77   : > { %s13438_s20 = sld [smem:[#allocation16_spill]]  ;;  %27 = sbr.rel (!%p25_p11) target bundleno = 13 (0xd), region = 160 }
 0xc78   : > { %s13439_s21 = sld [smem:[#allocation17_spill]] }
 0xc79   : > { %s13440_s22 = sld [smem:[#allocation19_spill]] }
 0xc7a   : > { %s13441_s23 = sld [smem:[#allocation21_spill]] }
 0xc7c   :  { %5971 = vsyncpa [#allocation8], 1 }
 0xc7d   :  { %5973 = vsyncpa [#allocation8 + $0x1], 1 }
 0xc7e   :  { %5974 = vsyncpa [#allocation10], 1 }
 0xc7f   :  { %5976 = vsyncpa [#allocation10 + $0x1], 1 }

</bundles_post_ra>
